<compile_context>
chip_gen: v7x
topology: tpu7x:2x2x1
jax: 0.10.0
libtpu: 0.0.40
codegen_flags: <defaults>
</compile_context>

<pallas_src>
import functools

import jax
import jax.numpy as jnp
import numpy as np
from jax.experimental import pallas as pl
from jax.experimental.pallas import tpu as pltpu

DILATIONS = (1, 2, 4, 8, 16)


# -----------------------------------------------------------------------------
# Fused Pallas kernel: one batch element of the full Dblock_more_dilate chain
# -----------------------------------------------------------------------------
def _dblock_fused_kernel(x_ref, w_ref, b_ref, o_ref, pad_ref, *, H, W, C, D):
    """x_ref   : (1, H, W, C)      f32   input tile (NHWC)
       w_ref   : (5, 3, 3, C, C)   bf16  packed conv weights (kh, kw, cin, cout)
       b_ref   : (5, 1, C)         f32   packed conv biases
       o_ref   : (1, H, W, C)      f32   output tile
       pad_ref : (H+2D, W+2D, C)   bf16  padded activation buffer (VMEM scratch)
    """
    HW = H * W
    Wp = W + 2 * D
    zdt = pad_ref.dtype

    # Zero only the halo strips; the interior is fully rewritten below (and
    # again before every conv), so the halo stays zero for every dilation
    # (D = max dilation covers all of them).  Done every grid step so each
    # step is self-contained (safe under megacore "parallel" sharding).
    pad_ref[0:D, :, :] = jnp.zeros((D, Wp, C), dtype=zdt)                 # top
    pad_ref[D + H:D + H + D, :, :] = jnp.zeros((D, Wp, C), dtype=zdt)     # bottom
    pad_ref[D:D + H, 0:D, :] = jnp.zeros((H, D, C), dtype=zdt)            # left
    pad_ref[D:D + H, D + W:D + W + D, :] = jnp.zeros((H, D, C), dtype=zdt)  # right

    x = x_ref[0]                                             # (H, W, C) f32
    pad_ref[D:D + H, D:D + W, :] = x.astype(zdt)             # conv-1 input (bf16)
    res = x.reshape(HW, C)                                   # residual acc (registers, f32)

    for i, d in enumerate(DILATIONS):
        base = D - d
        acc = None                                           # (HW, C) f32, register-resident
        # 9 taps -> 9 bf16 MXU matmuls, f32 accumulation in registers.
        # (H,W,C)->(HW,C) is a sublane-clean (layout-preserving) collapse
        # since W % 8 == 0 for the supported shapes.
        for kh in range(3):
            hs = base + kh * d
            for kw in range(3):
                ws = base + kw * d
                patch = pad_ref[hs:hs + H, ws:ws + W, :]     # (H, W, C) bf16
                t = jnp.dot(patch.reshape(HW, C), w_ref[i, kh, kw],
                            preferred_element_type=jnp.float32)
                acc = t if acc is None else acc + t
        y = jnp.maximum(acc + b_ref[i], 0.0)                 # bias + ReLU, (HW, C) f32
        res = res + y                                        # residual branch (f32)
        if i + 1 < len(DILATIONS):
            # Feed the next conv (bf16, interior only; halo stays zero).
            pad_ref[D:D + H, D:D + W, :] = y.reshape(H, W, C).astype(zdt)

    o_ref[0] = res.reshape(H, W, C).astype(o_ref.dtype)


# -----------------------------------------------------------------------------
# Wrapper (pallas_call plumbing)
# -----------------------------------------------------------------------------
def dblock_more_dilate_forward(x_nchw, params):
    """Pallas implementation of Dblock_more_dilate.forward. x: (B, C, H, W) f32."""
    x = jnp.transpose(x_nchw, (0, 2, 3, 1))                  # NCHW -> NHWC
    B, H, W, C = x.shape
    D = max(DILATIONS)
    Hp, Wp = H + 2 * D, W + 2 * D

    # Pack the 5 weights / biases into single grid-invariant inputs.
    w = jnp.stack([params[f"w{i + 1}"] for i in range(5)]).astype(jnp.bfloat16)
    bias = jnp.stack([params[f"b{i + 1}"] for i in range(5)]
                     ).reshape(5, 1, C).astype(jnp.float32)

    kernel = functools.partial(_dblock_fused_kernel, H=H, W=W, C=C, D=D)

    # VMEM budget derived from the actual footprint (generation-aware cap).
    footprint = (
        Hp * Wp * C * 2                        # padded activation scratch (bf16)
        + 2 * (H * W * C * 4) * 2              # double-buffered in + out blocks (f32)
        + 2 * (5 * 9 * C * C * 2 + 5 * C * 4)  # double-buffered weights + biases
        + 4 * (H * W * C * 4)                  # headroom for register spills (acc/res/taps)
    )
    try:
        vmem_cap = int(pltpu.get_tpu_info().vmem_capacity_bytes)
    except Exception:
        vmem_cap = 64 * 1024 * 1024            # conservative (v7x per-TC physical)
    vmem_limit = max(16 * 1024 * 1024,
                     min(int(footprint * 1.5), int(vmem_cap * 0.9)))

    out = pl.pallas_call(
        kernel,
        out_shape=jax.ShapeDtypeStruct((B, H, W, C), jnp.float32),
        grid=(B,),
        in_specs=[
            pl.BlockSpec((1, H, W, C), lambda i: (i, 0, 0, 0)),
            pl.BlockSpec((5, 3, 3, C, C), lambda i: (0, 0, 0, 0, 0)),
            pl.BlockSpec((5, 1, C), lambda i: (0, 0, 0)),
        ],
        out_specs=pl.BlockSpec((1, H, W, C), lambda i: (i, 0, 0, 0)),
        scratch_shapes=[
            pltpu.VMEM((Hp, Wp, C), jnp.bfloat16),           # padded activations
        ],
        compiler_params=pltpu.CompilerParams(
            dimension_semantics=("parallel",),
            vmem_limit_bytes=vmem_limit,
        ),
    )(x, w, bias)
    return jnp.transpose(out, (0, 3, 1, 2))                  # NHWC -> NCHW


# -----------------------------------------------------------------------------
# Parameter init (mirrors PyTorch Conv2d default weight init; biases zeroed as
# in Dblock_more_dilate.__init__).
# -----------------------------------------------------------------------------
def init_dblock_params(key, channel):
    params = {}
    fan_in = channel * 3 * 3
    bound = 1.0 / float(np.sqrt(fan_in))  # kaiming_uniform(a=sqrt(5)) bound
    keys = jax.random.split(key, 5)
    for i in range(5):
        # weight layout (kh, kw, cin, cout) == HWIO
        wgt = jax.random.uniform(
            keys[i], (3, 3, channel, channel),
            minval=-bound, maxval=bound, dtype=jnp.float32)
        params[f"w{i + 1}"] = wgt
        params[f"b{i + 1}"] = jnp.zeros((channel,), jnp.float32)
    return params


# -----------------------------------------------------------------------------
# Pure-JAX reference (same bf16 storage of weights / inter-layer activations as
# the kernel so the comparison stays tight; residual is accumulated in f32).
# -----------------------------------------------------------------------------
def _q_bf16(t):
    return t.astype(jnp.bfloat16).astype(jnp.float32)


def dblock_reference(x_nchw, params):
    x = jnp.transpose(x_nchw, (0, 2, 3, 1))
    acc = x
    cur = x
    for i, d in enumerate(DILATIONS):
        w = _q_bf16(params[f"w{i + 1}"])
        b = params[f"b{i + 1}"]
        y = jax.lax.conv_general_dilated(
            _q_bf16(cur), w,
            window_strides=(1, 1),
            padding=[(d, d), (d, d)],
            rhs_dilation=(d, d),
            dimension_numbers=("NHWC", "HWIO", "NHWC"),
            precision=jax.lax.Precision.HIGHEST,
        ) + b[None, None, None, :]
        y = jnp.maximum(y, 0.0)
        acc = acc + y
        cur = y
    return jnp.transpose(acc, (0, 3, 1, 2))


# -----------------------------------------------------------------------------
if __name__ == "__main__":
    B, C, H, W = 2, 4, 16, 16
    key = jax.random.PRNGKey(0)
    k_x, k_p = jax.random.split(key)
    x = jax.random.normal(k_x, (B, C, H, W), dtype=jnp.float32)
    params = init_dblock_params(k_p, C)

    out = jax.block_until_ready(dblock_more_dilate_forward(x, params))
    ref = jax.block_until_ready(dblock_reference(x, params))

    assert out.shape == (B, C, H, W), out.shape
    np.testing.assert_allclose(np.asarray(out), np.asarray(ref),
                               rtol=1e-3, atol=1e-3)
    print("KERNEL_OK")
</pallas_src>

<mosaic_0001>
module attributes {stable_mosaic.version = 11 : i64} {
  func.func @_dblock_fused_kernel(%arg0: i32, %arg1: memref<1x16x16x4xf32, #tpu.memory_space<vmem>>, %arg2: memref<5x3x3x4x4xbf16, #tpu.memory_space<vmem>>, %arg3: memref<5x1x4xf32, #tpu.memory_space<vmem>>, %arg4: memref<1x16x16x4xf32, #tpu.memory_space<vmem>>, %arg5: memref<48x48x4xbf16, #tpu.memory_space<vmem>>) attributes {dimension_semantics = [#tpu.dimension_semantics<parallel>], iteration_bounds = array<i64: 2>, scalar_prefetch = 0 : i64, scratch_operands = 1 : i64, tpu.core_type = #tpu.core_type<tc>, window_params = [{transform_indices = @transform_0, window_bounds = array<i64: 1, 16, 16, 4>}, {pipeline_mode = #tpu.pipeline_mode<synchronous>, transform_indices = @transform_1, window_bounds = array<i64: 5, 3, 3, 4, 4>}, {pipeline_mode = #tpu.pipeline_mode<synchronous>, transform_indices = @transform_2, window_bounds = array<i64: 5, 1, 4>}, {transform_indices = @transform_3, window_bounds = array<i64: 1, 16, 16, 4>}]} {
    %cst = arith.constant 0.000000e+00 : bf16
    %0 = vector.broadcast %cst : bf16 to vector<16x48x4xbf16>
    %c0 = arith.constant 0 : index
    %c0_0 = arith.constant 0 : index
    %c0_1 = arith.constant 0 : index
    %1 = vector.load %arg5[%c0, %c0_0, %c0_1] : memref<48x48x4xbf16, #tpu.memory_space<vmem>>, vector<16x48x4xbf16>
    tpu.vector_store %arg5[%c0, %c0_0, %c0_1], %0 {strides = array<i32>} : memref<48x48x4xbf16, #tpu.memory_space<vmem>>, vector<16x48x4xbf16>,
    %cst_2 = arith.constant 0.000000e+00 : bf16
    %2 = vector.broadcast %cst_2 : bf16 to vector<16x48x4xbf16>
    %c32 = arith.constant 32 : index
    %c0_3 = arith.constant 0 : index
    %c0_4 = arith.constant 0 : index
    %3 = vector.load %arg5[%c32, %c0_3, %c0_4] : memref<48x48x4xbf16, #tpu.memory_space<vmem>>, vector<16x48x4xbf16>
    tpu.vector_store %arg5[%c32, %c0_3, %c0_4], %2 {strides = array<i32>} : memref<48x48x4xbf16, #tpu.memory_space<vmem>>, vector<16x48x4xbf16>,
    %cst_5 = arith.constant 0.000000e+00 : bf16
    %4 = vector.broadcast %cst_5 : bf16 to vector<16x16x4xbf16>
    %c16 = arith.constant 16 : index
    %c0_6 = arith.constant 0 : index
    %c0_7 = arith.constant 0 : index
    %5 = vector.load %arg5[%c16, %c0_6, %c0_7] : memref<48x48x4xbf16, #tpu.memory_space<vmem>>, vector<16x16x4xbf16>
    tpu.vector_store %arg5[%c16, %c0_6, %c0_7], %4 {strides = array<i32>} : memref<48x48x4xbf16, #tpu.memory_space<vmem>>, vector<16x16x4xbf16>,
    %cst_8 = arith.constant 0.000000e+00 : bf16
    %6 = vector.broadcast %cst_8 : bf16 to vector<16x16x4xbf16>
    %c16_9 = arith.constant 16 : index
    %c32_10 = arith.constant 32 : index
    %c0_11 = arith.constant 0 : index
    %7 = vector.load %arg5[%c16_9, %c32_10, %c0_11] : memref<48x48x4xbf16, #tpu.memory_space<vmem>>, vector<16x16x4xbf16>
    tpu.vector_store %arg5[%c16_9, %c32_10, %c0_11], %6 {strides = array<i32>} : memref<48x48x4xbf16, #tpu.memory_space<vmem>>, vector<16x16x4xbf16>,
    %c0_12 = arith.constant 0 : index
    %c0_13 = arith.constant 0 : index
    %c0_14 = arith.constant 0 : index
    %c0_15 = arith.constant 0 : index
    %8 = vector.load %arg1[%c0_12, %c0_13, %c0_14, %c0_15] : memref<1x16x16x4xf32, #tpu.memory_space<vmem>>, vector<1x16x16x4xf32>
    %9 = vector.shape_cast %8 : vector<1x16x16x4xf32> to vector<16x16x4xf32>
    %10 = arith.truncf %9 : vector<16x16x4xf32> to vector<16x16x4xbf16>
    %c16_16 = arith.constant 16 : index
    %c16_17 = arith.constant 16 : index
    %c0_18 = arith.constant 0 : index
    %11 = vector.load %arg5[%c16_16, %c16_17, %c0_18] : memref<48x48x4xbf16, #tpu.memory_space<vmem>>, vector<16x16x4xbf16>
    tpu.vector_store %arg5[%c16_16, %c16_17, %c0_18], %10 {strides = array<i32>} : memref<48x48x4xbf16, #tpu.memory_space<vmem>>, vector<16x16x4xbf16>,
    %12 = vector.shape_cast %9 : vector<16x16x4xf32> to vector<256x4xf32>
    %c15 = arith.constant 15 : index
    %c15_19 = arith.constant 15 : index
    %c0_20 = arith.constant 0 : index
    %13 = vector.load %arg5[%c15, %c15_19, %c0_20] : memref<48x48x4xbf16, #tpu.memory_space<vmem>>, vector<16x16x4xbf16>
    %14 = vector.shape_cast %13 : vector<16x16x4xbf16> to vector<256x4xbf16>
    %c0_21 = arith.constant 0 : index
    %c0_22 = arith.constant 0 : index
    %c0_23 = arith.constant 0 : index
    %c0_24 = arith.constant 0 : index
    %c0_25 = arith.constant 0 : index
    %15 = vector.load %arg2[%c0_21, %c0_22, %c0_23, %c0_24, %c0_25] : memref<5x3x3x4x4xbf16, #tpu.memory_space<vmem>>, vector<1x1x1x4x4xbf16>
    %16 = vector.shape_cast %15 : vector<1x1x1x4x4xbf16> to vector<4x4xbf16>
    %cst_26 = arith.constant dense<0.000000e+00> : vector<256x4xf32>
    %17 = tpu.matmul %14, %16, %cst_26 {dimension_numbers = #tpu.dot_dimension_numbers<[1], [0], [0], [1], [0, 0, 1, 1], [], []>} : vector<256x4xbf16>, vector<4x4xbf16>, vector<256x4xf32> -> vector<256x4xf32>
    %c15_27 = arith.constant 15 : index
    %c16_28 = arith.constant 16 : index
    %c0_29 = arith.constant 0 : index
    %18 = vector.load %arg5[%c15_27, %c16_28, %c0_29] : memref<48x48x4xbf16, #tpu.memory_space<vmem>>, vector<16x16x4xbf16>
    %19 = vector.shape_cast %18 : vector<16x16x4xbf16> to vector<256x4xbf16>
    %c0_30 = arith.constant 0 : index
    %c0_31 = arith.constant 0 : index
    %c1 = arith.constant 1 : index
    %c0_32 = arith.constant 0 : index
    %c0_33 = arith.constant 0 : index
    %20 = vector.load %arg2[%c0_30, %c0_31, %c1, %c0_32, %c0_33] : memref<5x3x3x4x4xbf16, #tpu.memory_space<vmem>>, vector<1x1x1x4x4xbf16>
    %21 = vector.shape_cast %20 : vector<1x1x1x4x4xbf16> to vector<4x4xbf16>
    %cst_34 = arith.constant dense<0.000000e+00> : vector<256x4xf32>
    %22 = tpu.matmul %19, %21, %cst_34 {dimension_numbers = #tpu.dot_dimension_numbers<[1], [0], [0], [1], [0, 0, 1, 1], [], []>} : vector<256x4xbf16>, vector<4x4xbf16>, vector<256x4xf32> -> vector<256x4xf32>
    %23 = arith.addf %17, %22 : vector<256x4xf32>
    %c15_35 = arith.constant 15 : index
    %c17 = arith.constant 17 : index
    %c0_36 = arith.constant 0 : index
    %24 = vector.load %arg5[%c15_35, %c17, %c0_36] : memref<48x48x4xbf16, #tpu.memory_space<vmem>>, vector<16x16x4xbf16>
    %25 = vector.shape_cast %24 : vector<16x16x4xbf16> to vector<256x4xbf16>
    %c0_37 = arith.constant 0 : index
    %c0_38 = arith.constant 0 : index
    %c2 = arith.constant 2 : index
    %c0_39 = arith.constant 0 : index
    %c0_40 = arith.constant 0 : index
    %26 = vector.load %arg2[%c0_37, %c0_38, %c2, %c0_39, %c0_40] : memref<5x3x3x4x4xbf16, #tpu.memory_space<vmem>>, vector<1x1x1x4x4xbf16>
    %27 = vector.shape_cast %26 : vector<1x1x1x4x4xbf16> to vector<4x4xbf16>
    %cst_41 = arith.constant dense<0.000000e+00> : vector<256x4xf32>
    %28 = tpu.matmul %25, %27, %cst_41 {dimension_numbers = #tpu.dot_dimension_numbers<[1], [0], [0], [1], [0, 0, 1, 1], [], []>} : vector<256x4xbf16>, vector<4x4xbf16>, vector<256x4xf32> -> vector<256x4xf32>
    %29 = arith.addf %23, %28 : vector<256x4xf32>
    %c16_42 = arith.constant 16 : index
    %c15_43 = arith.constant 15 : index
    %c0_44 = arith.constant 0 : index
    %30 = vector.load %arg5[%c16_42, %c15_43, %c0_44] : memref<48x48x4xbf16, #tpu.memory_space<vmem>>, vector<16x16x4xbf16>
    %31 = vector.shape_cast %30 : vector<16x16x4xbf16> to vector<256x4xbf16>
    %c0_45 = arith.constant 0 : index
    %c1_46 = arith.constant 1 : index
    %c0_47 = arith.constant 0 : index
    %c0_48 = arith.constant 0 : index
    %c0_49 = arith.constant 0 : index
    %32 = vector.load %arg2[%c0_45, %c1_46, %c0_47, %c0_48, %c0_49] : memref<5x3x3x4x4xbf16, #tpu.memory_space<vmem>>, vector<1x1x1x4x4xbf16>
    %33 = vector.shape_cast %32 : vector<1x1x1x4x4xbf16> to vector<4x4xbf16>
    %cst_50 = arith.constant dense<0.000000e+00> : vector<256x4xf32>
    %34 = tpu.matmul %31, %33, %cst_50 {dimension_numbers = #tpu.dot_dimension_numbers<[1], [0], [0], [1], [0, 0, 1, 1], [], []>} : vector<256x4xbf16>, vector<4x4xbf16>, vector<256x4xf32> -> vector<256x4xf32>
    %35 = arith.addf %29, %34 : vector<256x4xf32>
    %c16_51 = arith.constant 16 : index
    %c16_52 = arith.constant 16 : index
    %c0_53 = arith.constant 0 : index
    %36 = vector.load %arg5[%c16_51, %c16_52, %c0_53] : memref<48x48x4xbf16, #tpu.memory_space<vmem>>, vector<16x16x4xbf16>
    %37 = vector.shape_cast %36 : vector<16x16x4xbf16> to vector<256x4xbf16>
    %c0_54 = arith.constant 0 : index
    %c1_55 = arith.constant 1 : index
    %c1_56 = arith.constant 1 : index
    %c0_57 = arith.constant 0 : index
    %c0_58 = arith.constant 0 : index
    %38 = vector.load %arg2[%c0_54, %c1_55, %c1_56, %c0_57, %c0_58] : memref<5x3x3x4x4xbf16, #tpu.memory_space<vmem>>, vector<1x1x1x4x4xbf16>
    %39 = vector.shape_cast %38 : vector<1x1x1x4x4xbf16> to vector<4x4xbf16>
    %cst_59 = arith.constant dense<0.000000e+00> : vector<256x4xf32>
    %40 = tpu.matmul %37, %39, %cst_59 {dimension_numbers = #tpu.dot_dimension_numbers<[1], [0], [0], [1], [0, 0, 1, 1], [], []>} : vector<256x4xbf16>, vector<4x4xbf16>, vector<256x4xf32> -> vector<256x4xf32>
    %41 = arith.addf %35, %40 : vector<256x4xf32>
    %c16_60 = arith.constant 16 : index
    %c17_61 = arith.constant 17 : index
    %c0_62 = arith.constant 0 : index
    %42 = vector.load %arg5[%c16_60, %c17_61, %c0_62] : memref<48x48x4xbf16, #tpu.memory_space<vmem>>, vector<16x16x4xbf16>
    %43 = vector.shape_cast %42 : vector<16x16x4xbf16> to vector<256x4xbf16>
    %c0_63 = arith.constant 0 : index
    %c1_64 = arith.constant 1 : index
    %c2_65 = arith.constant 2 : index
    %c0_66 = arith.constant 0 : index
    %c0_67 = arith.constant 0 : index
    %44 = vector.load %arg2[%c0_63, %c1_64, %c2_65, %c0_66, %c0_67] : memref<5x3x3x4x4xbf16, #tpu.memory_space<vmem>>, vector<1x1x1x4x4xbf16>
    %45 = vector.shape_cast %44 : vector<1x1x1x4x4xbf16> to vector<4x4xbf16>
    %cst_68 = arith.constant dense<0.000000e+00> : vector<256x4xf32>
    %46 = tpu.matmul %43, %45, %cst_68 {dimension_numbers = #tpu.dot_dimension_numbers<[1], [0], [0], [1], [0, 0, 1, 1], [], []>} : vector<256x4xbf16>, vector<4x4xbf16>, vector<256x4xf32> -> vector<256x4xf32>
    %47 = arith.addf %41, %46 : vector<256x4xf32>
    %c17_69 = arith.constant 17 : index
    %c15_70 = arith.constant 15 : index
    %c0_71 = arith.constant 0 : index
    %48 = vector.load %arg5[%c17_69, %c15_70, %c0_71] : memref<48x48x4xbf16, #tpu.memory_space<vmem>>, vector<16x16x4xbf16>
    %49 = vector.shape_cast %48 : vector<16x16x4xbf16> to vector<256x4xbf16>
    %c0_72 = arith.constant 0 : index
    %c2_73 = arith.constant 2 : index
    %c0_74 = arith.constant 0 : index
    %c0_75 = arith.constant 0 : index
    %c0_76 = arith.constant 0 : index
    %50 = vector.load %arg2[%c0_72, %c2_73, %c0_74, %c0_75, %c0_76] : memref<5x3x3x4x4xbf16, #tpu.memory_space<vmem>>, vector<1x1x1x4x4xbf16>
    %51 = vector.shape_cast %50 : vector<1x1x1x4x4xbf16> to vector<4x4xbf16>
    %cst_77 = arith.constant dense<0.000000e+00> : vector<256x4xf32>
    %52 = tpu.matmul %49, %51, %cst_77 {dimension_numbers = #tpu.dot_dimension_numbers<[1], [0], [0], [1], [0, 0, 1, 1], [], []>} : vector<256x4xbf16>, vector<4x4xbf16>, vector<256x4xf32> -> vector<256x4xf32>
    %53 = arith.addf %47, %52 : vector<256x4xf32>
    %c17_78 = arith.constant 17 : index
    %c16_79 = arith.constant 16 : index
    %c0_80 = arith.constant 0 : index
    %54 = vector.load %arg5[%c17_78, %c16_79, %c0_80] : memref<48x48x4xbf16, #tpu.memory_space<vmem>>, vector<16x16x4xbf16>
    %55 = vector.shape_cast %54 : vector<16x16x4xbf16> to vector<256x4xbf16>
    %c0_81 = arith.constant 0 : index
    %c2_82 = arith.constant 2 : index
    %c1_83 = arith.constant 1 : index
    %c0_84 = arith.constant 0 : index
    %c0_85 = arith.constant 0 : index
    %56 = vector.load %arg2[%c0_81, %c2_82, %c1_83, %c0_84, %c0_85] : memref<5x3x3x4x4xbf16, #tpu.memory_space<vmem>>, vector<1x1x1x4x4xbf16>
    %57 = vector.shape_cast %56 : vector<1x1x1x4x4xbf16> to vector<4x4xbf16>
    %cst_86 = arith.constant dense<0.000000e+00> : vector<256x4xf32>
    %58 = tpu.matmul %55, %57, %cst_86 {dimension_numbers = #tpu.dot_dimension_numbers<[1], [0], [0], [1], [0, 0, 1, 1], [], []>} : vector<256x4xbf16>, vector<4x4xbf16>, vector<256x4xf32> -> vector<256x4xf32>
    %59 = arith.addf %53, %58 : vector<256x4xf32>
    %c17_87 = arith.constant 17 : index
    %c17_88 = arith.constant 17 : index
    %c0_89 = arith.constant 0 : index
    %60 = vector.load %arg5[%c17_87, %c17_88, %c0_89] : memref<48x48x4xbf16, #tpu.memory_space<vmem>>, vector<16x16x4xbf16>
    %61 = vector.shape_cast %60 : vector<16x16x4xbf16> to vector<256x4xbf16>
    %c0_90 = arith.constant 0 : index
    %c2_91 = arith.constant 2 : index
    %c2_92 = arith.constant 2 : index
    %c0_93 = arith.constant 0 : index
    %c0_94 = arith.constant 0 : index
    %62 = vector.load %arg2[%c0_90, %c2_91, %c2_92, %c0_93, %c0_94] : memref<5x3x3x4x4xbf16, #tpu.memory_space<vmem>>, vector<1x1x1x4x4xbf16>
    %63 = vector.shape_cast %62 : vector<1x1x1x4x4xbf16> to vector<4x4xbf16>
    %cst_95 = arith.constant dense<0.000000e+00> : vector<256x4xf32>
    %64 = tpu.matmul %61, %63, %cst_95 {dimension_numbers = #tpu.dot_dimension_numbers<[1], [0], [0], [1], [0, 0, 1, 1], [], []>} : vector<256x4xbf16>, vector<4x4xbf16>, vector<256x4xf32> -> vector<256x4xf32>
    %65 = arith.addf %59, %64 : vector<256x4xf32>
    %c0_96 = arith.constant 0 : index
    %c0_97 = arith.constant 0 : index
    %c0_98 = arith.constant 0 : index
    %66 = vector.load %arg3[%c0_96, %c0_97, %c0_98] : memref<5x1x4xf32, #tpu.memory_space<vmem>>, vector<1x1x4xf32>
    %67 = vector.shape_cast %66 : vector<1x1x4xf32> to vector<1x4xf32>
    %68 = vector.broadcast %67 : vector<1x4xf32> to vector<256x4xf32>
    %69 = arith.addf %65, %68 : vector<256x4xf32>
    %cst_99 = arith.constant 0.000000e+00 : f32
    %70 = vector.broadcast %cst_99 : f32 to vector<256x4xf32>
    %71 = arith.maximumf %69, %70 : vector<256x4xf32>
    %72 = arith.addf %12, %71 : vector<256x4xf32>
    %73 = vector.shape_cast %71 : vector<256x4xf32> to vector<16x16x4xf32>
    %74 = arith.truncf %73 : vector<16x16x4xf32> to vector<16x16x4xbf16>
    %c16_100 = arith.constant 16 : index
    %c16_101 = arith.constant 16 : index
    %c0_102 = arith.constant 0 : index
    %75 = vector.load %arg5[%c16_100, %c16_101, %c0_102] : memref<48x48x4xbf16, #tpu.memory_space<vmem>>, vector<16x16x4xbf16>
    tpu.vector_store %arg5[%c16_100, %c16_101, %c0_102], %74 {strides = array<i32>} : memref<48x48x4xbf16, #tpu.memory_space<vmem>>, vector<16x16x4xbf16>,
    %c14 = arith.constant 14 : index
    %c14_103 = arith.constant 14 : index
    %c0_104 = arith.constant 0 : index
    %76 = vector.load %arg5[%c14, %c14_103, %c0_104] : memref<48x48x4xbf16, #tpu.memory_space<vmem>>, vector<16x16x4xbf16>
    %77 = vector.shape_cast %76 : vector<16x16x4xbf16> to vector<256x4xbf16>
    %c1_105 = arith.constant 1 : index
    %c0_106 = arith.constant 0 : index
    %c0_107 = arith.constant 0 : index
    %c0_108 = arith.constant 0 : index
    %c0_109 = arith.constant 0 : index
    %78 = vector.load %arg2[%c1_105, %c0_106, %c0_107, %c0_108, %c0_109] : memref<5x3x3x4x4xbf16, #tpu.memory_space<vmem>>, vector<1x1x1x4x4xbf16>
    %79 = vector.shape_cast %78 : vector<1x1x1x4x4xbf16> to vector<4x4xbf16>
    %cst_110 = arith.constant dense<0.000000e+00> : vector<256x4xf32>
    %80 = tpu.matmul %77, %79, %cst_110 {dimension_numbers = #tpu.dot_dimension_numbers<[1], [0], [0], [1], [0, 0, 1, 1], [], []>} : vector<256x4xbf16>, vector<4x4xbf16>, vector<256x4xf32> -> vector<256x4xf32>
    %c14_111 = arith.constant 14 : index
    %c16_112 = arith.constant 16 : index
    %c0_113 = arith.constant 0 : index
    %81 = vector.load %arg5[%c14_111, %c16_112, %c0_113] : memref<48x48x4xbf16, #tpu.memory_space<vmem>>, vector<16x16x4xbf16>
    %82 = vector.shape_cast %81 : vector<16x16x4xbf16> to vector<256x4xbf16>
    %c1_114 = arith.constant 1 : index
    %c0_115 = arith.constant 0 : index
    %c1_116 = arith.constant 1 : index
    %c0_117 = arith.constant 0 : index
    %c0_118 = arith.constant 0 : index
    %83 = vector.load %arg2[%c1_114, %c0_115, %c1_116, %c0_117, %c0_118] : memref<5x3x3x4x4xbf16, #tpu.memory_space<vmem>>, vector<1x1x1x4x4xbf16>
    %84 = vector.shape_cast %83 : vector<1x1x1x4x4xbf16> to vector<4x4xbf16>
    %cst_119 = arith.constant dense<0.000000e+00> : vector<256x4xf32>
    %85 = tpu.matmul %82, %84, %cst_119 {dimension_numbers = #tpu.dot_dimension_numbers<[1], [0], [0], [1], [0, 0, 1, 1], [], []>} : vector<256x4xbf16>, vector<4x4xbf16>, vector<256x4xf32> -> vector<256x4xf32>
    %86 = arith.addf %80, %85 : vector<256x4xf32>
    %c14_120 = arith.constant 14 : index
    %c18 = arith.constant 18 : index
    %c0_121 = arith.constant 0 : index
    %87 = vector.load %arg5[%c14_120, %c18, %c0_121] : memref<48x48x4xbf16, #tpu.memory_space<vmem>>, vector<16x16x4xbf16>
    %88 = vector.shape_cast %87 : vector<16x16x4xbf16> to vector<256x4xbf16>
    %c1_122 = arith.constant 1 : index
    %c0_123 = arith.constant 0 : index
    %c2_124 = arith.constant 2 : index
    %c0_125 = arith.constant 0 : index
    %c0_126 = arith.constant 0 : index
    %89 = vector.load %arg2[%c1_122, %c0_123, %c2_124, %c0_125, %c0_126] : memref<5x3x3x4x4xbf16, #tpu.memory_space<vmem>>, vector<1x1x1x4x4xbf16>
    %90 = vector.shape_cast %89 : vector<1x1x1x4x4xbf16> to vector<4x4xbf16>
    %cst_127 = arith.constant dense<0.000000e+00> : vector<256x4xf32>
    %91 = tpu.matmul %88, %90, %cst_127 {dimension_numbers = #tpu.dot_dimension_numbers<[1], [0], [0], [1], [0, 0, 1, 1], [], []>} : vector<256x4xbf16>, vector<4x4xbf16>, vector<256x4xf32> -> vector<256x4xf32>
    %92 = arith.addf %86, %91 : vector<256x4xf32>
    %c16_128 = arith.constant 16 : index
    %c14_129 = arith.constant 14 : index
    %c0_130 = arith.constant 0 : index
    %93 = vector.load %arg5[%c16_128, %c14_129, %c0_130] : memref<48x48x4xbf16, #tpu.memory_space<vmem>>, vector<16x16x4xbf16>
    %94 = vector.shape_cast %93 : vector<16x16x4xbf16> to vector<256x4xbf16>
    %c1_131 = arith.constant 1 : index
    %c1_132 = arith.constant 1 : index
    %c0_133 = arith.constant 0 : index
    %c0_134 = arith.constant 0 : index
    %c0_135 = arith.constant 0 : index
    %95 = vector.load %arg2[%c1_131, %c1_132, %c0_133, %c0_134, %c0_135] : memref<5x3x3x4x4xbf16, #tpu.memory_space<vmem>>, vector<1x1x1x4x4xbf16>
    %96 = vector.shape_cast %95 : vector<1x1x1x4x4xbf16> to vector<4x4xbf16>
    %cst_136 = arith.constant dense<0.000000e+00> : vector<256x4xf32>
    %97 = tpu.matmul %94, %96, %cst_136 {dimension_numbers = #tpu.dot_dimension_numbers<[1], [0], [0], [1], [0, 0, 1, 1], [], []>} : vector<256x4xbf16>, vector<4x4xbf16>, vector<256x4xf32> -> vector<256x4xf32>
    %98 = arith.addf %92, %97 : vector<256x4xf32>
    %c16_137 = arith.constant 16 : index
    %c16_138 = arith.constant 16 : index
    %c0_139 = arith.constant 0 : index
    %99 = vector.load %arg5[%c16_137, %c16_138, %c0_139] : memref<48x48x4xbf16, #tpu.memory_space<vmem>>, vector<16x16x4xbf16>
    %100 = vector.shape_cast %99 : vector<16x16x4xbf16> to vector<256x4xbf16>
    %c1_140 = arith.constant 1 : index
    %c1_141 = arith.constant 1 : index
    %c1_142 = arith.constant 1 : index
    %c0_143 = arith.constant 0 : index
    %c0_144 = arith.constant 0 : index
    %101 = vector.load %arg2[%c1_140, %c1_141, %c1_142, %c0_143, %c0_144] : memref<5x3x3x4x4xbf16, #tpu.memory_space<vmem>>, vector<1x1x1x4x4xbf16>
    %102 = vector.shape_cast %101 : vector<1x1x1x4x4xbf16> to vector<4x4xbf16>
    %cst_145 = arith.constant dense<0.000000e+00> : vector<256x4xf32>
    %103 = tpu.matmul %100, %102, %cst_145 {dimension_numbers = #tpu.dot_dimension_numbers<[1], [0], [0], [1], [0, 0, 1, 1], [], []>} : vector<256x4xbf16>, vector<4x4xbf16>, vector<256x4xf32> -> vector<256x4xf32>
    %104 = arith.addf %98, %103 : vector<256x4xf32>
    %c16_146 = arith.constant 16 : index
    %c18_147 = arith.constant 18 : index
    %c0_148 = arith.constant 0 : index
    %105 = vector.load %arg5[%c16_146, %c18_147, %c0_148] : memref<48x48x4xbf16, #tpu.memory_space<vmem>>, vector<16x16x4xbf16>
    %106 = vector.shape_cast %105 : vector<16x16x4xbf16> to vector<256x4xbf16>
    %c1_149 = arith.constant 1 : index
    %c1_150 = arith.constant 1 : index
    %c2_151 = arith.constant 2 : index
    %c0_152 = arith.constant 0 : index
    %c0_153 = arith.constant 0 : index
    %107 = vector.load %arg2[%c1_149, %c1_150, %c2_151, %c0_152, %c0_153] : memref<5x3x3x4x4xbf16, #tpu.memory_space<vmem>>, vector<1x1x1x4x4xbf16>
    %108 = vector.shape_cast %107 : vector<1x1x1x4x4xbf16> to vector<4x4xbf16>
    %cst_154 = arith.constant dense<0.000000e+00> : vector<256x4xf32>
    %109 = tpu.matmul %106, %108, %cst_154 {dimension_numbers = #tpu.dot_dimension_numbers<[1], [0], [0], [1], [0, 0, 1, 1], [], []>} : vector<256x4xbf16>, vector<4x4xbf16>, vector<256x4xf32> -> vector<256x4xf32>
    %110 = arith.addf %104, %109 : vector<256x4xf32>
    %c18_155 = arith.constant 18 : index
    %c14_156 = arith.constant 14 : index
    %c0_157 = arith.constant 0 : index
    %111 = vector.load %arg5[%c18_155, %c14_156, %c0_157] : memref<48x48x4xbf16, #tpu.memory_space<vmem>>, vector<16x16x4xbf16>
    %112 = vector.shape_cast %111 : vector<16x16x4xbf16> to vector<256x4xbf16>
    %c1_158 = arith.constant 1 : index
    %c2_159 = arith.constant 2 : index
    %c0_160 = arith.constant 0 : index
    %c0_161 = arith.constant 0 : index
    %c0_162 = arith.constant 0 : index
    %113 = vector.load %arg2[%c1_158, %c2_159, %c0_160, %c0_161, %c0_162] : memref<5x3x3x4x4xbf16, #tpu.memory_space<vmem>>, vector<1x1x1x4x4xbf16>
    %114 = vector.shape_cast %113 : vector<1x1x1x4x4xbf16> to vector<4x4xbf16>
    %cst_163 = arith.constant dense<0.000000e+00> : vector<256x4xf32>
    %115 = tpu.matmul %112, %114, %cst_163 {dimension_numbers = #tpu.dot_dimension_numbers<[1], [0], [0], [1], [0, 0, 1, 1], [], []>} : vector<256x4xbf16>, vector<4x4xbf16>, vector<256x4xf32> -> vector<256x4xf32>
    %116 = arith.addf %110, %115 : vector<256x4xf32>
    %c18_164 = arith.constant 18 : index
    %c16_165 = arith.constant 16 : index
    %c0_166 = arith.constant 0 : index
    %117 = vector.load %arg5[%c18_164, %c16_165, %c0_166] : memref<48x48x4xbf16, #tpu.memory_space<vmem>>, vector<16x16x4xbf16>
    %118 = vector.shape_cast %117 : vector<16x16x4xbf16> to vector<256x4xbf16>
    %c1_167 = arith.constant 1 : index
    %c2_168 = arith.constant 2 : index
    %c1_169 = arith.constant 1 : index
    %c0_170 = arith.constant 0 : index
    %c0_171 = arith.constant 0 : index
    %119 = vector.load %arg2[%c1_167, %c2_168, %c1_169, %c0_170, %c0_171] : memref<5x3x3x4x4xbf16, #tpu.memory_space<vmem>>, vector<1x1x1x4x4xbf16>
    %120 = vector.shape_cast %119 : vector<1x1x1x4x4xbf16> to vector<4x4xbf16>
    %cst_172 = arith.constant dense<0.000000e+00> : vector<256x4xf32>
    %121 = tpu.matmul %118, %120, %cst_172 {dimension_numbers = #tpu.dot_dimension_numbers<[1], [0], [0], [1], [0, 0, 1, 1], [], []>} : vector<256x4xbf16>, vector<4x4xbf16>, vector<256x4xf32> -> vector<256x4xf32>
    %122 = arith.addf %116, %121 : vector<256x4xf32>
    %c18_173 = arith.constant 18 : index
    %c18_174 = arith.constant 18 : index
    %c0_175 = arith.constant 0 : index
    %123 = vector.load %arg5[%c18_173, %c18_174, %c0_175] : memref<48x48x4xbf16, #tpu.memory_space<vmem>>, vector<16x16x4xbf16>
    %124 = vector.shape_cast %123 : vector<16x16x4xbf16> to vector<256x4xbf16>
    %c1_176 = arith.constant 1 : index
    %c2_177 = arith.constant 2 : index
    %c2_178 = arith.constant 2 : index
    %c0_179 = arith.constant 0 : index
    %c0_180 = arith.constant 0 : index
    %125 = vector.load %arg2[%c1_176, %c2_177, %c2_178, %c0_179, %c0_180] : memref<5x3x3x4x4xbf16, #tpu.memory_space<vmem>>, vector<1x1x1x4x4xbf16>
    %126 = vector.shape_cast %125 : vector<1x1x1x4x4xbf16> to vector<4x4xbf16>
    %cst_181 = arith.constant dense<0.000000e+00> : vector<256x4xf32>
    %127 = tpu.matmul %124, %126, %cst_181 {dimension_numbers = #tpu.dot_dimension_numbers<[1], [0], [0], [1], [0, 0, 1, 1], [], []>} : vector<256x4xbf16>, vector<4x4xbf16>, vector<256x4xf32> -> vector<256x4xf32>
    %128 = arith.addf %122, %127 : vector<256x4xf32>
    %c1_182 = arith.constant 1 : index
    %c0_183 = arith.constant 0 : index
    %c0_184 = arith.constant 0 : index
    %129 = vector.load %arg3[%c1_182, %c0_183, %c0_184] : memref<5x1x4xf32, #tpu.memory_space<vmem>>, vector<1x1x4xf32>
    %130 = vector.shape_cast %129 : vector<1x1x4xf32> to vector<1x4xf32>
    %131 = vector.broadcast %130 : vector<1x4xf32> to vector<256x4xf32>
    %132 = arith.addf %128, %131 : vector<256x4xf32>
    %cst_185 = arith.constant 0.000000e+00 : f32
    %133 = vector.broadcast %cst_185 : f32 to vector<256x4xf32>
    %134 = arith.maximumf %132, %133 : vector<256x4xf32>
    %135 = arith.addf %72, %134 : vector<256x4xf32>
    %136 = vector.shape_cast %134 : vector<256x4xf32> to vector<16x16x4xf32>
    %137 = arith.truncf %136 : vector<16x16x4xf32> to vector<16x16x4xbf16>
    %c16_186 = arith.constant 16 : index
    %c16_187 = arith.constant 16 : index
    %c0_188 = arith.constant 0 : index
    %138 = vector.load %arg5[%c16_186, %c16_187, %c0_188] : memref<48x48x4xbf16, #tpu.memory_space<vmem>>, vector<16x16x4xbf16>
    tpu.vector_store %arg5[%c16_186, %c16_187, %c0_188], %137 {strides = array<i32>} : memref<48x48x4xbf16, #tpu.memory_space<vmem>>, vector<16x16x4xbf16>,
    %c12 = arith.constant 12 : index
    %c12_189 = arith.constant 12 : index
    %c0_190 = arith.constant 0 : index
    %139 = vector.load %arg5[%c12, %c12_189, %c0_190] : memref<48x48x4xbf16, #tpu.memory_space<vmem>>, vector<16x16x4xbf16>
    %140 = vector.shape_cast %139 : vector<16x16x4xbf16> to vector<256x4xbf16>
    %c2_191 = arith.constant 2 : index
    %c0_192 = arith.constant 0 : index
    %c0_193 = arith.constant 0 : index
    %c0_194 = arith.constant 0 : index
    %c0_195 = arith.constant 0 : index
    %141 = vector.load %arg2[%c2_191, %c0_192, %c0_193, %c0_194, %c0_195] : memref<5x3x3x4x4xbf16, #tpu.memory_space<vmem>>, vector<1x1x1x4x4xbf16>
    %142 = vector.shape_cast %141 : vector<1x1x1x4x4xbf16> to vector<4x4xbf16>
    %cst_196 = arith.constant dense<0.000000e+00> : vector<256x4xf32>
    %143 = tpu.matmul %140, %142, %cst_196 {dimension_numbers = #tpu.dot_dimension_numbers<[1], [0], [0], [1], [0, 0, 1, 1], [], []>} : vector<256x4xbf16>, vector<4x4xbf16>, vector<256x4xf32> -> vector<256x4xf32>
    %c12_197 = arith.constant 12 : index
    %c16_198 = arith.constant 16 : index
    %c0_199 = arith.constant 0 : index
    %144 = vector.load %arg5[%c12_197, %c16_198, %c0_199] : memref<48x48x4xbf16, #tpu.memory_space<vmem>>, vector<16x16x4xbf16>
    %145 = vector.shape_cast %144 : vector<16x16x4xbf16> to vector<256x4xbf16>
    %c2_200 = arith.constant 2 : index
    %c0_201 = arith.constant 0 : index
    %c1_202 = arith.constant 1 : index
    %c0_203 = arith.constant 0 : index
    %c0_204 = arith.constant 0 : index
    %146 = vector.load %arg2[%c2_200, %c0_201, %c1_202, %c0_203, %c0_204] : memref<5x3x3x4x4xbf16, #tpu.memory_space<vmem>>, vector<1x1x1x4x4xbf16>
    %147 = vector.shape_cast %146 : vector<1x1x1x4x4xbf16> to vector<4x4xbf16>
    %cst_205 = arith.constant dense<0.000000e+00> : vector<256x4xf32>
    %148 = tpu.matmul %145, %147, %cst_205 {dimension_numbers = #tpu.dot_dimension_numbers<[1], [0], [0], [1], [0, 0, 1, 1], [], []>} : vector<256x4xbf16>, vector<4x4xbf16>, vector<256x4xf32> -> vector<256x4xf32>
    %149 = arith.addf %143, %148 : vector<256x4xf32>
    %c12_206 = arith.constant 12 : index
    %c20 = arith.constant 20 : index
    %c0_207 = arith.constant 0 : index
    %150 = vector.load %arg5[%c12_206, %c20, %c0_207] : memref<48x48x4xbf16, #tpu.memory_space<vmem>>, vector<16x16x4xbf16>
    %151 = vector.shape_cast %150 : vector<16x16x4xbf16> to vector<256x4xbf16>
    %c2_208 = arith.constant 2 : index
    %c0_209 = arith.constant 0 : index
    %c2_210 = arith.constant 2 : index
    %c0_211 = arith.constant 0 : index
    %c0_212 = arith.constant 0 : index
    %152 = vector.load %arg2[%c2_208, %c0_209, %c2_210, %c0_211, %c0_212] : memref<5x3x3x4x4xbf16, #tpu.memory_space<vmem>>, vector<1x1x1x4x4xbf16>
    %153 = vector.shape_cast %152 : vector<1x1x1x4x4xbf16> to vector<4x4xbf16>
    %cst_213 = arith.constant dense<0.000000e+00> : vector<256x4xf32>
    %154 = tpu.matmul %151, %153, %cst_213 {dimension_numbers = #tpu.dot_dimension_numbers<[1], [0], [0], [1], [0, 0, 1, 1], [], []>} : vector<256x4xbf16>, vector<4x4xbf16>, vector<256x4xf32> -> vector<256x4xf32>
    %155 = arith.addf %149, %154 : vector<256x4xf32>
    %c16_214 = arith.constant 16 : index
    %c12_215 = arith.constant 12 : index
    %c0_216 = arith.constant 0 : index
    %156 = vector.load %arg5[%c16_214, %c12_215, %c0_216] : memref<48x48x4xbf16, #tpu.memory_space<vmem>>, vector<16x16x4xbf16>
    %157 = vector.shape_cast %156 : vector<16x16x4xbf16> to vector<256x4xbf16>
    %c2_217 = arith.constant 2 : index
    %c1_218 = arith.constant 1 : index
    %c0_219 = arith.constant 0 : index
    %c0_220 = arith.constant 0 : index
    %c0_221 = arith.constant 0 : index
    %158 = vector.load %arg2[%c2_217, %c1_218, %c0_219, %c0_220, %c0_221] : memref<5x3x3x4x4xbf16, #tpu.memory_space<vmem>>, vector<1x1x1x4x4xbf16>
    %159 = vector.shape_cast %158 : vector<1x1x1x4x4xbf16> to vector<4x4xbf16>
    %cst_222 = arith.constant dense<0.000000e+00> : vector<256x4xf32>
    %160 = tpu.matmul %157, %159, %cst_222 {dimension_numbers = #tpu.dot_dimension_numbers<[1], [0], [0], [1], [0, 0, 1, 1], [], []>} : vector<256x4xbf16>, vector<4x4xbf16>, vector<256x4xf32> -> vector<256x4xf32>
    %161 = arith.addf %155, %160 : vector<256x4xf32>
    %c16_223 = arith.constant 16 : index
    %c16_224 = arith.constant 16 : index
    %c0_225 = arith.constant 0 : index
    %162 = vector.load %arg5[%c16_223, %c16_224, %c0_225] : memref<48x48x4xbf16, #tpu.memory_space<vmem>>, vector<16x16x4xbf16>
    %163 = vector.shape_cast %162 : vector<16x16x4xbf16> to vector<256x4xbf16>
    %c2_226 = arith.constant 2 : index
    %c1_227 = arith.constant 1 : index
    %c1_228 = arith.constant 1 : index
    %c0_229 = arith.constant 0 : index
    %c0_230 = arith.constant 0 : index
    %164 = vector.load %arg2[%c2_226, %c1_227, %c1_228, %c0_229, %c0_230] : memref<5x3x3x4x4xbf16, #tpu.memory_space<vmem>>, vector<1x1x1x4x4xbf16>
    %165 = vector.shape_cast %164 : vector<1x1x1x4x4xbf16> to vector<4x4xbf16>
    %cst_231 = arith.constant dense<0.000000e+00> : vector<256x4xf32>
    %166 = tpu.matmul %163, %165, %cst_231 {dimension_numbers = #tpu.dot_dimension_numbers<[1], [0], [0], [1], [0, 0, 1, 1], [], []>} : vector<256x4xbf16>, vector<4x4xbf16>, vector<256x4xf32> -> vector<256x4xf32>
    %167 = arith.addf %161, %166 : vector<256x4xf32>
    %c16_232 = arith.constant 16 : index
    %c20_233 = arith.constant 20 : index
    %c0_234 = arith.constant 0 : index
    %168 = vector.load %arg5[%c16_232, %c20_233, %c0_234] : memref<48x48x4xbf16, #tpu.memory_space<vmem>>, vector<16x16x4xbf16>
    %169 = vector.shape_cast %168 : vector<16x16x4xbf16> to vector<256x4xbf16>
    %c2_235 = arith.constant 2 : index
    %c1_236 = arith.constant 1 : index
    %c2_237 = arith.constant 2 : index
    %c0_238 = arith.constant 0 : index
    %c0_239 = arith.constant 0 : index
    %170 = vector.load %arg2[%c2_235, %c1_236, %c2_237, %c0_238, %c0_239] : memref<5x3x3x4x4xbf16, #tpu.memory_space<vmem>>, vector<1x1x1x4x4xbf16>
    %171 = vector.shape_cast %170 : vector<1x1x1x4x4xbf16> to vector<4x4xbf16>
    %cst_240 = arith.constant dense<0.000000e+00> : vector<256x4xf32>
    %172 = tpu.matmul %169, %171, %cst_240 {dimension_numbers = #tpu.dot_dimension_numbers<[1], [0], [0], [1], [0, 0, 1, 1], [], []>} : vector<256x4xbf16>, vector<4x4xbf16>, vector<256x4xf32> -> vector<256x4xf32>
    %173 = arith.addf %167, %172 : vector<256x4xf32>
    %c20_241 = arith.constant 20 : index
    %c12_242 = arith.constant 12 : index
    %c0_243 = arith.constant 0 : index
    %174 = vector.load %arg5[%c20_241, %c12_242, %c0_243] : memref<48x48x4xbf16, #tpu.memory_space<vmem>>, vector<16x16x4xbf16>
    %175 = vector.shape_cast %174 : vector<16x16x4xbf16> to vector<256x4xbf16>
    %c2_244 = arith.constant 2 : index
    %c2_245 = arith.constant 2 : index
    %c0_246 = arith.constant 0 : index
    %c0_247 = arith.constant 0 : index
    %c0_248 = arith.constant 0 : index
    %176 = vector.load %arg2[%c2_244, %c2_245, %c0_246, %c0_247, %c0_248] : memref<5x3x3x4x4xbf16, #tpu.memory_space<vmem>>, vector<1x1x1x4x4xbf16>
    %177 = vector.shape_cast %176 : vector<1x1x1x4x4xbf16> to vector<4x4xbf16>
    %cst_249 = arith.constant dense<0.000000e+00> : vector<256x4xf32>
    %178 = tpu.matmul %175, %177, %cst_249 {dimension_numbers = #tpu.dot_dimension_numbers<[1], [0], [0], [1], [0, 0, 1, 1], [], []>} : vector<256x4xbf16>, vector<4x4xbf16>, vector<256x4xf32> -> vector<256x4xf32>
    %179 = arith.addf %173, %178 : vector<256x4xf32>
    %c20_250 = arith.constant 20 : index
    %c16_251 = arith.constant 16 : index
    %c0_252 = arith.constant 0 : index
    %180 = vector.load %arg5[%c20_250, %c16_251, %c0_252] : memref<48x48x4xbf16, #tpu.memory_space<vmem>>, vector<16x16x4xbf16>
    %181 = vector.shape_cast %180 : vector<16x16x4xbf16> to vector<256x4xbf16>
    %c2_253 = arith.constant 2 : index
    %c2_254 = arith.constant 2 : index
    %c1_255 = arith.constant 1 : index
    %c0_256 = arith.constant 0 : index
    %c0_257 = arith.constant 0 : index
    %182 = vector.load %arg2[%c2_253, %c2_254, %c1_255, %c0_256, %c0_257] : memref<5x3x3x4x4xbf16, #tpu.memory_space<vmem>>, vector<1x1x1x4x4xbf16>
    %183 = vector.shape_cast %182 : vector<1x1x1x4x4xbf16> to vector<4x4xbf16>
    %cst_258 = arith.constant dense<0.000000e+00> : vector<256x4xf32>
    %184 = tpu.matmul %181, %183, %cst_258 {dimension_numbers = #tpu.dot_dimension_numbers<[1], [0], [0], [1], [0, 0, 1, 1], [], []>} : vector<256x4xbf16>, vector<4x4xbf16>, vector<256x4xf32> -> vector<256x4xf32>
    %185 = arith.addf %179, %184 : vector<256x4xf32>
    %c20_259 = arith.constant 20 : index
    %c20_260 = arith.constant 20 : index
    %c0_261 = arith.constant 0 : index
    %186 = vector.load %arg5[%c20_259, %c20_260, %c0_261] : memref<48x48x4xbf16, #tpu.memory_space<vmem>>, vector<16x16x4xbf16>
    %187 = vector.shape_cast %186 : vector<16x16x4xbf16> to vector<256x4xbf16>
    %c2_262 = arith.constant 2 : index
    %c2_263 = arith.constant 2 : index
    %c2_264 = arith.constant 2 : index
    %c0_265 = arith.constant 0 : index
    %c0_266 = arith.constant 0 : index
    %188 = vector.load %arg2[%c2_262, %c2_263, %c2_264, %c0_265, %c0_266] : memref<5x3x3x4x4xbf16, #tpu.memory_space<vmem>>, vector<1x1x1x4x4xbf16>
    %189 = vector.shape_cast %188 : vector<1x1x1x4x4xbf16> to vector<4x4xbf16>
    %cst_267 = arith.constant dense<0.000000e+00> : vector<256x4xf32>
    %190 = tpu.matmul %187, %189, %cst_267 {dimension_numbers = #tpu.dot_dimension_numbers<[1], [0], [0], [1], [0, 0, 1, 1], [], []>} : vector<256x4xbf16>, vector<4x4xbf16>, vector<256x4xf32> -> vector<256x4xf32>
    %191 = arith.addf %185, %190 : vector<256x4xf32>
    %c2_268 = arith.constant 2 : index
    %c0_269 = arith.constant 0 : index
    %c0_270 = arith.constant 0 : index
    %192 = vector.load %arg3[%c2_268, %c0_269, %c0_270] : memref<5x1x4xf32, #tpu.memory_space<vmem>>, vector<1x1x4xf32>
    %193 = vector.shape_cast %192 : vector<1x1x4xf32> to vector<1x4xf32>
    %194 = vector.broadcast %193 : vector<1x4xf32> to vector<256x4xf32>
    %195 = arith.addf %191, %194 : vector<256x4xf32>
    %cst_271 = arith.constant 0.000000e+00 : f32
    %196 = vector.broadcast %cst_271 : f32 to vector<256x4xf32>
    %197 = arith.maximumf %195, %196 : vector<256x4xf32>
    %198 = arith.addf %135, %197 : vector<256x4xf32>
    %199 = vector.shape_cast %197 : vector<256x4xf32> to vector<16x16x4xf32>
    %200 = arith.truncf %199 : vector<16x16x4xf32> to vector<16x16x4xbf16>
    %c16_272 = arith.constant 16 : index
    %c16_273 = arith.constant 16 : index
    %c0_274 = arith.constant 0 : index
    %201 = vector.load %arg5[%c16_272, %c16_273, %c0_274] : memref<48x48x4xbf16, #tpu.memory_space<vmem>>, vector<16x16x4xbf16>
    tpu.vector_store %arg5[%c16_272, %c16_273, %c0_274], %200 {strides = array<i32>} : memref<48x48x4xbf16, #tpu.memory_space<vmem>>, vector<16x16x4xbf16>,
    %c8 = arith.constant 8 : index
    %c8_275 = arith.constant 8 : index
    %c0_276 = arith.constant 0 : index
    %202 = vector.load %arg5[%c8, %c8_275, %c0_276] : memref<48x48x4xbf16, #tpu.memory_space<vmem>>, vector<16x16x4xbf16>
    %203 = vector.shape_cast %202 : vector<16x16x4xbf16> to vector<256x4xbf16>
    %c3 = arith.constant 3 : index
    %c0_277 = arith.constant 0 : index
    %c0_278 = arith.constant 0 : index
    %c0_279 = arith.constant 0 : index
    %c0_280 = arith.constant 0 : index
    %204 = vector.load %arg2[%c3, %c0_277, %c0_278, %c0_279, %c0_280] : memref<5x3x3x4x4xbf16, #tpu.memory_space<vmem>>, vector<1x1x1x4x4xbf16>
    %205 = vector.shape_cast %204 : vector<1x1x1x4x4xbf16> to vector<4x4xbf16>
    %cst_281 = arith.constant dense<0.000000e+00> : vector<256x4xf32>
    %206 = tpu.matmul %203, %205, %cst_281 {dimension_numbers = #tpu.dot_dimension_numbers<[1], [0], [0], [1], [0, 0, 1, 1], [], []>} : vector<256x4xbf16>, vector<4x4xbf16>, vector<256x4xf32> -> vector<256x4xf32>
    %c8_282 = arith.constant 8 : index
    %c16_283 = arith.constant 16 : index
    %c0_284 = arith.constant 0 : index
    %207 = vector.load %arg5[%c8_282, %c16_283, %c0_284] : memref<48x48x4xbf16, #tpu.memory_space<vmem>>, vector<16x16x4xbf16>
    %208 = vector.shape_cast %207 : vector<16x16x4xbf16> to vector<256x4xbf16>
    %c3_285 = arith.constant 3 : index
    %c0_286 = arith.constant 0 : index
    %c1_287 = arith.constant 1 : index
    %c0_288 = arith.constant 0 : index
    %c0_289 = arith.constant 0 : index
    %209 = vector.load %arg2[%c3_285, %c0_286, %c1_287, %c0_288, %c0_289] : memref<5x3x3x4x4xbf16, #tpu.memory_space<vmem>>, vector<1x1x1x4x4xbf16>
    %210 = vector.shape_cast %209 : vector<1x1x1x4x4xbf16> to vector<4x4xbf16>
    %cst_290 = arith.constant dense<0.000000e+00> : vector<256x4xf32>
    %211 = tpu.matmul %208, %210, %cst_290 {dimension_numbers = #tpu.dot_dimension_numbers<[1], [0], [0], [1], [0, 0, 1, 1], [], []>} : vector<256x4xbf16>, vector<4x4xbf16>, vector<256x4xf32> -> vector<256x4xf32>
    %212 = arith.addf %206, %211 : vector<256x4xf32>
    %c8_291 = arith.constant 8 : index
    %c24 = arith.constant 24 : index
    %c0_292 = arith.constant 0 : index
    %213 = vector.load %arg5[%c8_291, %c24, %c0_292] : memref<48x48x4xbf16, #tpu.memory_space<vmem>>, vector<16x16x4xbf16>
    %214 = vector.shape_cast %213 : vector<16x16x4xbf16> to vector<256x4xbf16>
    %c3_293 = arith.constant 3 : index
    %c0_294 = arith.constant 0 : index
    %c2_295 = arith.constant 2 : index
    %c0_296 = arith.constant 0 : index
    %c0_297 = arith.constant 0 : index
    %215 = vector.load %arg2[%c3_293, %c0_294, %c2_295, %c0_296, %c0_297] : memref<5x3x3x4x4xbf16, #tpu.memory_space<vmem>>, vector<1x1x1x4x4xbf16>
    %216 = vector.shape_cast %215 : vector<1x1x1x4x4xbf16> to vector<4x4xbf16>
    %cst_298 = arith.constant dense<0.000000e+00> : vector<256x4xf32>
    %217 = tpu.matmul %214, %216, %cst_298 {dimension_numbers = #tpu.dot_dimension_numbers<[1], [0], [0], [1], [0, 0, 1, 1], [], []>} : vector<256x4xbf16>, vector<4x4xbf16>, vector<256x4xf32> -> vector<256x4xf32>
    %218 = arith.addf %212, %217 : vector<256x4xf32>
    %c16_299 = arith.constant 16 : index
    %c8_300 = arith.constant 8 : index
    %c0_301 = arith.constant 0 : index
    %219 = vector.load %arg5[%c16_299, %c8_300, %c0_301] : memref<48x48x4xbf16, #tpu.memory_space<vmem>>, vector<16x16x4xbf16>
    %220 = vector.shape_cast %219 : vector<16x16x4xbf16> to vector<256x4xbf16>
    %c3_302 = arith.constant 3 : index
    %c1_303 = arith.constant 1 : index
    %c0_304 = arith.constant 0 : index
    %c0_305 = arith.constant 0 : index
    %c0_306 = arith.constant 0 : index
    %221 = vector.load %arg2[%c3_302, %c1_303, %c0_304, %c0_305, %c0_306] : memref<5x3x3x4x4xbf16, #tpu.memory_space<vmem>>, vector<1x1x1x4x4xbf16>
    %222 = vector.shape_cast %221 : vector<1x1x1x4x4xbf16> to vector<4x4xbf16>
    %cst_307 = arith.constant dense<0.000000e+00> : vector<256x4xf32>
    %223 = tpu.matmul %220, %222, %cst_307 {dimension_numbers = #tpu.dot_dimension_numbers<[1], [0], [0], [1], [0, 0, 1, 1], [], []>} : vector<256x4xbf16>, vector<4x4xbf16>, vector<256x4xf32> -> vector<256x4xf32>
    %224 = arith.addf %218, %223 : vector<256x4xf32>
    %c16_308 = arith.constant 16 : index
    %c16_309 = arith.constant 16 : index
    %c0_310 = arith.constant 0 : index
    %225 = vector.load %arg5[%c16_308, %c16_309, %c0_310] : memref<48x48x4xbf16, #tpu.memory_space<vmem>>, vector<16x16x4xbf16>
    %226 = vector.shape_cast %225 : vector<16x16x4xbf16> to vector<256x4xbf16>
    %c3_311 = arith.constant 3 : index
    %c1_312 = arith.constant 1 : index
    %c1_313 = arith.constant 1 : index
    %c0_314 = arith.constant 0 : index
    %c0_315 = arith.constant 0 : index
    %227 = vector.load %arg2[%c3_311, %c1_312, %c1_313, %c0_314, %c0_315] : memref<5x3x3x4x4xbf16, #tpu.memory_space<vmem>>, vector<1x1x1x4x4xbf16>
    %228 = vector.shape_cast %227 : vector<1x1x1x4x4xbf16> to vector<4x4xbf16>
    %cst_316 = arith.constant dense<0.000000e+00> : vector<256x4xf32>
    %229 = tpu.matmul %226, %228, %cst_316 {dimension_numbers = #tpu.dot_dimension_numbers<[1], [0], [0], [1], [0, 0, 1, 1], [], []>} : vector<256x4xbf16>, vector<4x4xbf16>, vector<256x4xf32> -> vector<256x4xf32>
    %230 = arith.addf %224, %229 : vector<256x4xf32>
    %c16_317 = arith.constant 16 : index
    %c24_318 = arith.constant 24 : index
    %c0_319 = arith.constant 0 : index
    %231 = vector.load %arg5[%c16_317, %c24_318, %c0_319] : memref<48x48x4xbf16, #tpu.memory_space<vmem>>, vector<16x16x4xbf16>
    %232 = vector.shape_cast %231 : vector<16x16x4xbf16> to vector<256x4xbf16>
    %c3_320 = arith.constant 3 : index
    %c1_321 = arith.constant 1 : index
    %c2_322 = arith.constant 2 : index
    %c0_323 = arith.constant 0 : index
    %c0_324 = arith.constant 0 : index
    %233 = vector.load %arg2[%c3_320, %c1_321, %c2_322, %c0_323, %c0_324] : memref<5x3x3x4x4xbf16, #tpu.memory_space<vmem>>, vector<1x1x1x4x4xbf16>
    %234 = vector.shape_cast %233 : vector<1x1x1x4x4xbf16> to vector<4x4xbf16>
    %cst_325 = arith.constant dense<0.000000e+00> : vector<256x4xf32>
    %235 = tpu.matmul %232, %234, %cst_325 {dimension_numbers = #tpu.dot_dimension_numbers<[1], [0], [0], [1], [0, 0, 1, 1], [], []>} : vector<256x4xbf16>, vector<4x4xbf16>, vector<256x4xf32> -> vector<256x4xf32>
    %236 = arith.addf %230, %235 : vector<256x4xf32>
    %c24_326 = arith.constant 24 : index
    %c8_327 = arith.constant 8 : index
    %c0_328 = arith.constant 0 : index
    %237 = vector.load %arg5[%c24_326, %c8_327, %c0_328] : memref<48x48x4xbf16, #tpu.memory_space<vmem>>, vector<16x16x4xbf16>
    %238 = vector.shape_cast %237 : vector<16x16x4xbf16> to vector<256x4xbf16>
    %c3_329 = arith.constant 3 : index
    %c2_330 = arith.constant 2 : index
    %c0_331 = arith.constant 0 : index
    %c0_332 = arith.constant 0 : index
    %c0_333 = arith.constant 0 : index
    %239 = vector.load %arg2[%c3_329, %c2_330, %c0_331, %c0_332, %c0_333] : memref<5x3x3x4x4xbf16, #tpu.memory_space<vmem>>, vector<1x1x1x4x4xbf16>
    %240 = vector.shape_cast %239 : vector<1x1x1x4x4xbf16> to vector<4x4xbf16>
    %cst_334 = arith.constant dense<0.000000e+00> : vector<256x4xf32>
    %241 = tpu.matmul %238, %240, %cst_334 {dimension_numbers = #tpu.dot_dimension_numbers<[1], [0], [0], [1], [0, 0, 1, 1], [], []>} : vector<256x4xbf16>, vector<4x4xbf16>, vector<256x4xf32> -> vector<256x4xf32>
    %242 = arith.addf %236, %241 : vector<256x4xf32>
    %c24_335 = arith.constant 24 : index
    %c16_336 = arith.constant 16 : index
    %c0_337 = arith.constant 0 : index
    %243 = vector.load %arg5[%c24_335, %c16_336, %c0_337] : memref<48x48x4xbf16, #tpu.memory_space<vmem>>, vector<16x16x4xbf16>
    %244 = vector.shape_cast %243 : vector<16x16x4xbf16> to vector<256x4xbf16>
    %c3_338 = arith.constant 3 : index
    %c2_339 = arith.constant 2 : index
    %c1_340 = arith.constant 1 : index
    %c0_341 = arith.constant 0 : index
    %c0_342 = arith.constant 0 : index
    %245 = vector.load %arg2[%c3_338, %c2_339, %c1_340, %c0_341, %c0_342] : memref<5x3x3x4x4xbf16, #tpu.memory_space<vmem>>, vector<1x1x1x4x4xbf16>
    %246 = vector.shape_cast %245 : vector<1x1x1x4x4xbf16> to vector<4x4xbf16>
    %cst_343 = arith.constant dense<0.000000e+00> : vector<256x4xf32>
    %247 = tpu.matmul %244, %246, %cst_343 {dimension_numbers = #tpu.dot_dimension_numbers<[1], [0], [0], [1], [0, 0, 1, 1], [], []>} : vector<256x4xbf16>, vector<4x4xbf16>, vector<256x4xf32> -> vector<256x4xf32>
    %248 = arith.addf %242, %247 : vector<256x4xf32>
    %c24_344 = arith.constant 24 : index
    %c24_345 = arith.constant 24 : index
    %c0_346 = arith.constant 0 : index
    %249 = vector.load %arg5[%c24_344, %c24_345, %c0_346] : memref<48x48x4xbf16, #tpu.memory_space<vmem>>, vector<16x16x4xbf16>
    %250 = vector.shape_cast %249 : vector<16x16x4xbf16> to vector<256x4xbf16>
    %c3_347 = arith.constant 3 : index
    %c2_348 = arith.constant 2 : index
    %c2_349 = arith.constant 2 : index
    %c0_350 = arith.constant 0 : index
    %c0_351 = arith.constant 0 : index
    %251 = vector.load %arg2[%c3_347, %c2_348, %c2_349, %c0_350, %c0_351] : memref<5x3x3x4x4xbf16, #tpu.memory_space<vmem>>, vector<1x1x1x4x4xbf16>
    %252 = vector.shape_cast %251 : vector<1x1x1x4x4xbf16> to vector<4x4xbf16>
    %cst_352 = arith.constant dense<0.000000e+00> : vector<256x4xf32>
    %253 = tpu.matmul %250, %252, %cst_352 {dimension_numbers = #tpu.dot_dimension_numbers<[1], [0], [0], [1], [0, 0, 1, 1], [], []>} : vector<256x4xbf16>, vector<4x4xbf16>, vector<256x4xf32> -> vector<256x4xf32>
    %254 = arith.addf %248, %253 : vector<256x4xf32>
    %c3_353 = arith.constant 3 : index
    %c0_354 = arith.constant 0 : index
    %c0_355 = arith.constant 0 : index
    %255 = vector.load %arg3[%c3_353, %c0_354, %c0_355] : memref<5x1x4xf32, #tpu.memory_space<vmem>>, vector<1x1x4xf32>
    %256 = vector.shape_cast %255 : vector<1x1x4xf32> to vector<1x4xf32>
    %257 = vector.broadcast %256 : vector<1x4xf32> to vector<256x4xf32>
    %258 = arith.addf %254, %257 : vector<256x4xf32>
    %cst_356 = arith.constant 0.000000e+00 : f32
    %259 = vector.broadcast %cst_356 : f32 to vector<256x4xf32>
    %260 = arith.maximumf %258, %259 : vector<256x4xf32>
    %261 = arith.addf %198, %260 : vector<256x4xf32>
    %262 = vector.shape_cast %260 : vector<256x4xf32> to vector<16x16x4xf32>
    %263 = arith.truncf %262 : vector<16x16x4xf32> to vector<16x16x4xbf16>
    %c16_357 = arith.constant 16 : index
    %c16_358 = arith.constant 16 : index
    %c0_359 = arith.constant 0 : index
    %264 = vector.load %arg5[%c16_357, %c16_358, %c0_359] : memref<48x48x4xbf16, #tpu.memory_space<vmem>>, vector<16x16x4xbf16>
    tpu.vector_store %arg5[%c16_357, %c16_358, %c0_359], %263 {strides = array<i32>} : memref<48x48x4xbf16, #tpu.memory_space<vmem>>, vector<16x16x4xbf16>,
    %c0_360 = arith.constant 0 : index
    %c0_361 = arith.constant 0 : index
    %c0_362 = arith.constant 0 : index
    %265 = vector.load %arg5[%c0_360, %c0_361, %c0_362] : memref<48x48x4xbf16, #tpu.memory_space<vmem>>, vector<16x16x4xbf16>
    %266 = vector.shape_cast %265 : vector<16x16x4xbf16> to vector<256x4xbf16>
    %c4 = arith.constant 4 : index
    %c0_363 = arith.constant 0 : index
    %c0_364 = arith.constant 0 : index
    %c0_365 = arith.constant 0 : index
    %c0_366 = arith.constant 0 : index
    %267 = vector.load %arg2[%c4, %c0_363, %c0_364, %c0_365, %c0_366] : memref<5x3x3x4x4xbf16, #tpu.memory_space<vmem>>, vector<1x1x1x4x4xbf16>
    %268 = vector.shape_cast %267 : vector<1x1x1x4x4xbf16> to vector<4x4xbf16>
    %cst_367 = arith.constant dense<0.000000e+00> : vector<256x4xf32>
    %269 = tpu.matmul %266, %268, %cst_367 {dimension_numbers = #tpu.dot_dimension_numbers<[1], [0], [0], [1], [0, 0, 1, 1], [], []>} : vector<256x4xbf16>, vector<4x4xbf16>, vector<256x4xf32> -> vector<256x4xf32>
    %c0_368 = arith.constant 0 : index
    %c16_369 = arith.constant 16 : index
    %c0_370 = arith.constant 0 : index
    %270 = vector.load %arg5[%c0_368, %c16_369, %c0_370] : memref<48x48x4xbf16, #tpu.memory_space<vmem>>, vector<16x16x4xbf16>
    %271 = vector.shape_cast %270 : vector<16x16x4xbf16> to vector<256x4xbf16>
    %c4_371 = arith.constant 4 : index
    %c0_372 = arith.constant 0 : index
    %c1_373 = arith.constant 1 : index
    %c0_374 = arith.constant 0 : index
    %c0_375 = arith.constant 0 : index
    %272 = vector.load %arg2[%c4_371, %c0_372, %c1_373, %c0_374, %c0_375] : memref<5x3x3x4x4xbf16, #tpu.memory_space<vmem>>, vector<1x1x1x4x4xbf16>
    %273 = vector.shape_cast %272 : vector<1x1x1x4x4xbf16> to vector<4x4xbf16>
    %cst_376 = arith.constant dense<0.000000e+00> : vector<256x4xf32>
    %274 = tpu.matmul %271, %273, %cst_376 {dimension_numbers = #tpu.dot_dimension_numbers<[1], [0], [0], [1], [0, 0, 1, 1], [], []>} : vector<256x4xbf16>, vector<4x4xbf16>, vector<256x4xf32> -> vector<256x4xf32>
    %275 = arith.addf %269, %274 : vector<256x4xf32>
    %c0_377 = arith.constant 0 : index
    %c32_378 = arith.constant 32 : index
    %c0_379 = arith.constant 0 : index
    %276 = vector.load %arg5[%c0_377, %c32_378, %c0_379] : memref<48x48x4xbf16, #tpu.memory_space<vmem>>, vector<16x16x4xbf16>
    %277 = vector.shape_cast %276 : vector<16x16x4xbf16> to vector<256x4xbf16>
    %c4_380 = arith.constant 4 : index
    %c0_381 = arith.constant 0 : index
    %c2_382 = arith.constant 2 : index
    %c0_383 = arith.constant 0 : index
    %c0_384 = arith.constant 0 : index
    %278 = vector.load %arg2[%c4_380, %c0_381, %c2_382, %c0_383, %c0_384] : memref<5x3x3x4x4xbf16, #tpu.memory_space<vmem>>, vector<1x1x1x4x4xbf16>
    %279 = vector.shape_cast %278 : vector<1x1x1x4x4xbf16> to vector<4x4xbf16>
    %cst_385 = arith.constant dense<0.000000e+00> : vector<256x4xf32>
    %280 = tpu.matmul %277, %279, %cst_385 {dimension_numbers = #tpu.dot_dimension_numbers<[1], [0], [0], [1], [0, 0, 1, 1], [], []>} : vector<256x4xbf16>, vector<4x4xbf16>, vector<256x4xf32> -> vector<256x4xf32>
    %281 = arith.addf %275, %280 : vector<256x4xf32>
    %c16_386 = arith.constant 16 : index
    %c0_387 = arith.constant 0 : index
    %c0_388 = arith.constant 0 : index
    %282 = vector.load %arg5[%c16_386, %c0_387, %c0_388] : memref<48x48x4xbf16, #tpu.memory_space<vmem>>, vector<16x16x4xbf16>
    %283 = vector.shape_cast %282 : vector<16x16x4xbf16> to vector<256x4xbf16>
    %c4_389 = arith.constant 4 : index
    %c1_390 = arith.constant 1 : index
    %c0_391 = arith.constant 0 : index
    %c0_392 = arith.constant 0 : index
    %c0_393 = arith.constant 0 : index
    %284 = vector.load %arg2[%c4_389, %c1_390, %c0_391, %c0_392, %c0_393] : memref<5x3x3x4x4xbf16, #tpu.memory_space<vmem>>, vector<1x1x1x4x4xbf16>
    %285 = vector.shape_cast %284 : vector<1x1x1x4x4xbf16> to vector<4x4xbf16>
    %cst_394 = arith.constant dense<0.000000e+00> : vector<256x4xf32>
    %286 = tpu.matmul %283, %285, %cst_394 {dimension_numbers = #tpu.dot_dimension_numbers<[1], [0], [0], [1], [0, 0, 1, 1], [], []>} : vector<256x4xbf16>, vector<4x4xbf16>, vector<256x4xf32> -> vector<256x4xf32>
    %287 = arith.addf %281, %286 : vector<256x4xf32>
    %c16_395 = arith.constant 16 : index
    %c16_396 = arith.constant 16 : index
    %c0_397 = arith.constant 0 : index
    %288 = vector.load %arg5[%c16_395, %c16_396, %c0_397] : memref<48x48x4xbf16, #tpu.memory_space<vmem>>, vector<16x16x4xbf16>
    %289 = vector.shape_cast %288 : vector<16x16x4xbf16> to vector<256x4xbf16>
    %c4_398 = arith.constant 4 : index
    %c1_399 = arith.constant 1 : index
    %c1_400 = arith.constant 1 : index
    %c0_401 = arith.constant 0 : index
    %c0_402 = arith.constant 0 : index
    %290 = vector.load %arg2[%c4_398, %c1_399, %c1_400, %c0_401, %c0_402] : memref<5x3x3x4x4xbf16, #tpu.memory_space<vmem>>, vector<1x1x1x4x4xbf16>
    %291 = vector.shape_cast %290 : vector<1x1x1x4x4xbf16> to vector<4x4xbf16>
    %cst_403 = arith.constant dense<0.000000e+00> : vector<256x4xf32>
    %292 = tpu.matmul %289, %291, %cst_403 {dimension_numbers = #tpu.dot_dimension_numbers<[1], [0], [0], [1], [0, 0, 1, 1], [], []>} : vector<256x4xbf16>, vector<4x4xbf16>, vector<256x4xf32> -> vector<256x4xf32>
    %293 = arith.addf %287, %292 : vector<256x4xf32>
    %c16_404 = arith.constant 16 : index
    %c32_405 = arith.constant 32 : index
    %c0_406 = arith.constant 0 : index
    %294 = vector.load %arg5[%c16_404, %c32_405, %c0_406] : memref<48x48x4xbf16, #tpu.memory_space<vmem>>, vector<16x16x4xbf16>
    %295 = vector.shape_cast %294 : vector<16x16x4xbf16> to vector<256x4xbf16>
    %c4_407 = arith.constant 4 : index
    %c1_408 = arith.constant 1 : index
    %c2_409 = arith.constant 2 : index
    %c0_410 = arith.constant 0 : index
    %c0_411 = arith.constant 0 : index
    %296 = vector.load %arg2[%c4_407, %c1_408, %c2_409, %c0_410, %c0_411] : memref<5x3x3x4x4xbf16, #tpu.memory_space<vmem>>, vector<1x1x1x4x4xbf16>
    %297 = vector.shape_cast %296 : vector<1x1x1x4x4xbf16> to vector<4x4xbf16>
    %cst_412 = arith.constant dense<0.000000e+00> : vector<256x4xf32>
    %298 = tpu.matmul %295, %297, %cst_412 {dimension_numbers = #tpu.dot_dimension_numbers<[1], [0], [0], [1], [0, 0, 1, 1], [], []>} : vector<256x4xbf16>, vector<4x4xbf16>, vector<256x4xf32> -> vector<256x4xf32>
    %299 = arith.addf %293, %298 : vector<256x4xf32>
    %c32_413 = arith.constant 32 : index
    %c0_414 = arith.constant 0 : index
    %c0_415 = arith.constant 0 : index
    %300 = vector.load %arg5[%c32_413, %c0_414, %c0_415] : memref<48x48x4xbf16, #tpu.memory_space<vmem>>, vector<16x16x4xbf16>
    %301 = vector.shape_cast %300 : vector<16x16x4xbf16> to vector<256x4xbf16>
    %c4_416 = arith.constant 4 : index
    %c2_417 = arith.constant 2 : index
    %c0_418 = arith.constant 0 : index
    %c0_419 = arith.constant 0 : index
    %c0_420 = arith.constant 0 : index
    %302 = vector.load %arg2[%c4_416, %c2_417, %c0_418, %c0_419, %c0_420] : memref<5x3x3x4x4xbf16, #tpu.memory_space<vmem>>, vector<1x1x1x4x4xbf16>
    %303 = vector.shape_cast %302 : vector<1x1x1x4x4xbf16> to vector<4x4xbf16>
    %cst_421 = arith.constant dense<0.000000e+00> : vector<256x4xf32>
    %304 = tpu.matmul %301, %303, %cst_421 {dimension_numbers = #tpu.dot_dimension_numbers<[1], [0], [0], [1], [0, 0, 1, 1], [], []>} : vector<256x4xbf16>, vector<4x4xbf16>, vector<256x4xf32> -> vector<256x4xf32>
    %305 = arith.addf %299, %304 : vector<256x4xf32>
    %c32_422 = arith.constant 32 : index
    %c16_423 = arith.constant 16 : index
    %c0_424 = arith.constant 0 : index
    %306 = vector.load %arg5[%c32_422, %c16_423, %c0_424] : memref<48x48x4xbf16, #tpu.memory_space<vmem>>, vector<16x16x4xbf16>
    %307 = vector.shape_cast %306 : vector<16x16x4xbf16> to vector<256x4xbf16>
    %c4_425 = arith.constant 4 : index
    %c2_426 = arith.constant 2 : index
    %c1_427 = arith.constant 1 : index
    %c0_428 = arith.constant 0 : index
    %c0_429 = arith.constant 0 : index
    %308 = vector.load %arg2[%c4_425, %c2_426, %c1_427, %c0_428, %c0_429] : memref<5x3x3x4x4xbf16, #tpu.memory_space<vmem>>, vector<1x1x1x4x4xbf16>
    %309 = vector.shape_cast %308 : vector<1x1x1x4x4xbf16> to vector<4x4xbf16>
    %cst_430 = arith.constant dense<0.000000e+00> : vector<256x4xf32>
    %310 = tpu.matmul %307, %309, %cst_430 {dimension_numbers = #tpu.dot_dimension_numbers<[1], [0], [0], [1], [0, 0, 1, 1], [], []>} : vector<256x4xbf16>, vector<4x4xbf16>, vector<256x4xf32> -> vector<256x4xf32>
    %311 = arith.addf %305, %310 : vector<256x4xf32>
    %c32_431 = arith.constant 32 : index
    %c32_432 = arith.constant 32 : index
    %c0_433 = arith.constant 0 : index
    %312 = vector.load %arg5[%c32_431, %c32_432, %c0_433] : memref<48x48x4xbf16, #tpu.memory_space<vmem>>, vector<16x16x4xbf16>
    %313 = vector.shape_cast %312 : vector<16x16x4xbf16> to vector<256x4xbf16>
    %c4_434 = arith.constant 4 : index
    %c2_435 = arith.constant 2 : index
    %c2_436 = arith.constant 2 : index
    %c0_437 = arith.constant 0 : index
    %c0_438 = arith.constant 0 : index
    %314 = vector.load %arg2[%c4_434, %c2_435, %c2_436, %c0_437, %c0_438] : memref<5x3x3x4x4xbf16, #tpu.memory_space<vmem>>, vector<1x1x1x4x4xbf16>
    %315 = vector.shape_cast %314 : vector<1x1x1x4x4xbf16> to vector<4x4xbf16>
    %cst_439 = arith.constant dense<0.000000e+00> : vector<256x4xf32>
    %316 = tpu.matmul %313, %315, %cst_439 {dimension_numbers = #tpu.dot_dimension_numbers<[1], [0], [0], [1], [0, 0, 1, 1], [], []>} : vector<256x4xbf16>, vector<4x4xbf16>, vector<256x4xf32> -> vector<256x4xf32>
    %317 = arith.addf %311, %316 : vector<256x4xf32>
    %c4_440 = arith.constant 4 : index
    %c0_441 = arith.constant 0 : index
    %c0_442 = arith.constant 0 : index
    %318 = vector.load %arg3[%c4_440, %c0_441, %c0_442] : memref<5x1x4xf32, #tpu.memory_space<vmem>>, vector<1x1x4xf32>
    %319 = vector.shape_cast %318 : vector<1x1x4xf32> to vector<1x4xf32>
    %320 = vector.broadcast %319 : vector<1x4xf32> to vector<256x4xf32>
    %321 = arith.addf %317, %320 : vector<256x4xf32>
    %cst_443 = arith.constant 0.000000e+00 : f32
    %322 = vector.broadcast %cst_443 : f32 to vector<256x4xf32>
    %323 = arith.maximumf %321, %322 : vector<256x4xf32>
    %324 = arith.addf %261, %323 : vector<256x4xf32>
    %325 = vector.shape_cast %324 : vector<256x4xf32> to vector<16x16x4xf32>
    %c0_444 = arith.constant 0 : index
    %c0_445 = arith.constant 0 : index
    %c0_446 = arith.constant 0 : index
    %c0_447 = arith.constant 0 : index
    %326 = vector.load %arg4[%c0_444, %c0_445, %c0_446, %c0_447] : memref<1x16x16x4xf32, #tpu.memory_space<vmem>>, vector<1x16x16x4xf32>
    %327 = vector.shape_cast %326 : vector<1x16x16x4xf32> to vector<16x16x4xf32>
    %328 = vector.shape_cast %325 : vector<16x16x4xf32> to vector<1x16x16x4xf32>
    tpu.vector_store %arg4[%c0_444, %c0_445, %c0_446, %c0_447], %328 {strides = array<i32>} : memref<1x16x16x4xf32, #tpu.memory_space<vmem>>, vector<1x16x16x4xf32>,
    return
  }
  func.func @transform_0(%arg0: i32) -> (i32, i32, i32, i32) {
    %c0_i32 = arith.constant 0 : i32
    %c0_i32_0 = arith.constant 0 : i32
    %c0_i32_1 = arith.constant 0 : i32
    %c0_i32_2 = arith.constant 0 : i32
    return %arg0, %c0_i32, %c0_i32_0, %c0_i32_1 : i32, i32, i32, i32
  }
  func.func @transform_1(%arg0: i32) -> (i32, i32, i32, i32, i32) {
    %c0_i32 = arith.constant 0 : i32
    %c0_i32_0 = arith.constant 0 : i32
    %c0_i32_1 = arith.constant 0 : i32
    %c0_i32_2 = arith.constant 0 : i32
    %c0_i32_3 = arith.constant 0 : i32
    %c0_i32_4 = arith.constant 0 : i32
    return %c0_i32, %c0_i32_0, %c0_i32_1, %c0_i32_2, %c0_i32_3 : i32, i32, i32, i32, i32
  }
  func.func @transform_2(%arg0: i32) -> (i32, i32, i32) {
    %c0_i32 = arith.constant 0 : i32
    %c0_i32_0 = arith.constant 0 : i32
    %c0_i32_1 = arith.constant 0 : i32
    %c0_i32_2 = arith.constant 0 : i32
    return %c0_i32, %c0_i32_0, %c0_i32_1 : i32, i32, i32
  }
  func.func @transform_3(%arg0: i32) -> (i32, i32, i32, i32) {
    %c0_i32 = arith.constant 0 : i32
    %c0_i32_0 = arith.constant 0 : i32
    %c0_i32_1 = arith.constant 0 : i32
    %c0_i32_2 = arith.constant 0 : i32
    return %arg0, %c0_i32, %c0_i32_0, %c0_i32_1 : i32, i32, i32, i32
  }
}

</mosaic_0001>

<bundles_post_ra>
// kernel: tpu_custom_call.1
= control target key start
LH: loop header
LB: loop body
LE: loop exit
PB: predicated region body
PF: predicated region fallthrough
CT: control target
= control target key end

     0   :  { %s19957_s12 = smov 0   ;;  %s23261_s0 = inlined_call_operand.vmem [shape: f32[2,16,16,4], index: 0, kind: input, shape index: {}]   ;;  %s23262_s1 = inlined_call_operand.vmem [shape: bf16[5,3,3,4,4], index: 1, kind: input, shape index: {}]   ;;  %s23263_s2 = inlined_call_operand.vmem [shape: f32[5,1,4], index: 2, kind: input, shape index: {}]   ;;  %s23264_s3 = inlined_call_operand.vmem [shape: f32[2,16,16,4], index: 3, kind: output, shape index: {}]  }
   0x1 LB: > { %s15466_s13 = sadd.s32 4294967295, %s19934_s12   ;;  %p15470_p0 = scmp.ge.s32.totalorder %s19934_s12, 1  ;;  %s19934_s12 = sphi %s19957_s12, %s13_s12  }
   0x2   : > { %p137_p1 = scmp.lt.s32.totalorder %s19934_s12, 3 }
   0x4   : > { %p138_p2 = pnand %p15470_p0, %p137_p1 }
   0x6   : > { %141 = sbr.rel (%p138_p2) target bundleno = 3248 (0xcb0), region = 32 }
   0xd   : > { %v15475_v0 = vld [vmem:[%s23262_s1 + $0x2] sm:$0x3]  ;;  %vm628_vm0 = vcmask 1041408   ;;  %v15542_v1 = vld [vmem:[%s23262_s1 + $0x8] sm:$0x3]  ;;  %vm172_vm1 = vcmask 31744  }
   0xe   : > { %19829 = vmatprep.subr.msk.bf16.mxu1 %vm628_vm0, %v15475_v0  ;;  %19833 = vmatprep.subr.msk.bf16.mxu0 %vm628_vm0, %v15542_v1  ;;  %v630_v2 = vsel %vm628_vm0, %v15475_v0, 0  ;;  %v19975_v3 = vsel %vm628_vm0, %v15542_v1, 0  ;;  %p19979_p3 = scmp.lt.s32.totalorder %s15466_s13, 1  ;;  %v19986_v4 = vld [vmem:[%s23262_s1] sm:$0x3]  ;;  %v19936_v5 = vmov 0  }
   0xf   : > { %17018 = vmatpush3.bf16.msra.mxu1 %v630_v2  ;;  %17154 = vmatpush3.bf16.msra.mxu0 %v19975_v3  ;;  %219 = vst.msk [vmem:[#allocation2 + $0x170] sm:$0xff] %vm172_vm1, %v19936_v5  ;;  %173 = vst.msk [vmem:[#allocation2] sm:$0xff] %vm172_vm1, %v19936_v5  ;;  %v15559_v6 = vld [vmem:[%s23262_s1 + $0xa] sm:$0x3]  ;;  %v842_v40 = vsel %vm628_vm0, %v19986_v4, 0  ;;  %vm4017_vm4 = vcmask 1040384  }
  0x10   : > { %174 = vst.msk [vmem:[#allocation2 + $0x8] sm:$0xff] %vm172_vm1, %v19936_v5  ;;  %175 = vst.msk [vmem:[#allocation2 + $0x10] sm:$0xff] %vm172_vm1, %v19936_v5  ;;  %s23346_s13 = smov (!%p19979_p3, %s15466_s13), 1  ;;  %19830 = vmatprep.subr.msk.bf16.mxu1 %vm628_vm0, %v19986_v4  ;;  %19835 = vmatprep.subr.msk.bf16.mxu0 %vm628_vm0, %v15559_v6  ;;  %v2451_v46 = vsel %vm628_vm0, %v15559_v6, 0  ;;  %v20321_v51 = vld [vmem:[%s23262_s1 + $0xc] sm:$0x3] }
  0x11   : > { %176 = vst.msk [vmem:[#allocation2 + $0x18] sm:$0xff] %vm172_vm1, %v19936_v5  ;;  %177 = vst.msk [vmem:[#allocation2 + $0x20] sm:$0xff] %vm172_vm1, %v19936_v5  ;;  %s16250_s23 = sshll.u32 %s23346_s13, 8  ;;  %v20330_v53 = vld [vmem:[%s23262_s1 + $0x4] sm:$0x3]  ;;  %vm4574_vm5 = vcmask 1046528  }
  0x12   : > { %178 = vst.msk [vmem:[#allocation2 + $0x28] sm:$0xff] %vm172_vm1, %v19936_v5  ;;  %179 = vst.msk [vmem:[#allocation2 + $0x30] sm:$0xff] %vm172_vm1, %v19936_v5  ;;  %s20263_s26 = scalar_lea.vmem %s23261_s0, %s16250_s23  ;;  %vm1037_vm2 = vsmask.f32 7424  ;;  %vm400_vm3 = vsmask.f32 256  ;;  %s23131_s28 = scalar_lea.vmem %s23264_s3, %s16250_s23 }
  0x13   : > { %180 = vst.msk [vmem:[#allocation2 + $0x38] sm:$0xff] %vm172_vm1, %v19936_v5  ;;  %181 = vst.msk [vmem:[#allocation2 + $0x40] sm:$0xff] %vm172_vm1, %v19936_v5  ;;  %v303_v7 = vld [vmem:[%s20263_s26] sm:$0xff]  ;;  %v304_v8 = vld [vmem:[%s20263_s26 + $0x8] sm:$0xff]  ;;  %vm7584_vm6 = vcmask 1045504   ;;  %vm10037_vm7 = vcmask 1043456  }
  0x14   : > { %182 = vst.msk [vmem:[#allocation2 + $0x48] sm:$0xff] %vm172_vm1, %v19936_v5  ;;  %183 = vst.msk [vmem:[#allocation2 + $0x50] sm:$0xff] %vm172_vm1, %v19936_v5  ;;  %v305_v9 = vld [vmem:[%s20263_s26 + $0x10] sm:$0xff]  ;;  %v335_v10 = vpack.c.bf16 %v304_v8, %v303_v7  ;;  %v306_v11 = vld [vmem:[%s20263_s26 + $0x18] sm:$0xff] }
  0x15   : > { %184 = vst.msk [vmem:[#allocation2 + $0x58] sm:$0xff] %vm172_vm1, %v19936_v5  ;;  %185 = vst.msk [vmem:[#allocation2 + $0x60] sm:$0xff] %vm172_vm1, %v19936_v5  ;;  %v307_v12 = vld [vmem:[%s20263_s26 + $0x20] sm:$0xff]  ;;  %v308_v13 = vld [vmem:[%s20263_s26 + $0x28] sm:$0xff]  ;;  %v336_v15 = vpack.c.bf16 %v306_v11, %v305_v9 }
  0x16   : > { %186 = vst.msk [vmem:[#allocation2 + $0x68] sm:$0xff] %vm172_vm1, %v19936_v5  ;;  %187 = vst.msk [vmem:[#allocation2 + $0x70] sm:$0xff] %vm172_vm1, %v19936_v5  ;;  %v20271_v14 = vld [vmem:[#allocation2 + $0x170] sm:$0xff]  ;;  %v337_v16 = vpack.c.bf16 %v308_v13, %v307_v12  ;;  %v310_v18 = vld [vmem:[%s20263_s26 + $0x38] sm:$0xff] }
  0x17   : > { %188 = vst.msk [vmem:[#allocation2 + $0x78] sm:$0xff] %vm172_vm1, %v19936_v5  ;;  %189 = vst.msk [vmem:[#allocation2 + $0x80] sm:$0xff] %vm172_vm1, %v19936_v5  ;;  %v309_v17 = vld [vmem:[%s20263_s26 + $0x30] sm:$0xff]  ;;  %17019 = vmatprep.mubr.msk.bf16.mxu1 %vm172_vm1, %v20271_v14  ;;  %v311_v20 = vld [vmem:[%s20263_s26 + $0x40] sm:$0xff] }
  0x18   : > { %190 = vst.msk [vmem:[#allocation2 + $0x88] sm:$0xff] %vm172_vm1, %v19936_v5  ;;  %191 = vst.msk [vmem:[#allocation2 + $0x90] sm:$0xff] %vm172_vm1, %v19936_v5  ;;  %v338_v19 = vpack.c.bf16 %v310_v18, %v309_v17  ;;  %v312_v21 = vld [vmem:[%s20263_s26 + $0x48] sm:$0xff]  ;;  %v313_v22 = vld [vmem:[%s20263_s26 + $0x50] sm:$0xff] }
  0x19   : > { %192 = vst.msk [vmem:[#allocation2 + $0x98] sm:$0xff] %vm172_vm1, %v19936_v5  ;;  %193 = vst.msk [vmem:[#allocation2 + $0xa0] sm:$0xff] %vm172_vm1, %v19936_v5  ;;  %v339_v23 = vpack.c.bf16 %v312_v21, %v311_v20  ;;  %v314_v24 = vld [vmem:[%s20263_s26 + $0x58] sm:$0xff]  ;;  %v315_v25 = vld [vmem:[%s20263_s26 + $0x60] sm:$0xff] }
  0x1a   : > { %194 = vst.msk [vmem:[#allocation2 + $0xa8] sm:$0xff] %vm172_vm1, %v19936_v5  ;;  %195 = vst.msk [vmem:[#allocation2 + $0xb0] sm:$0xff] %vm172_vm1, %v19936_v5  ;;  %v316_v26 = vld [vmem:[%s20263_s26 + $0x68] sm:$0xff]  ;;  %v340_v27 = vpack.c.bf16 %v314_v24, %v313_v22  ;;  %v317_v29 = vld [vmem:[%s20263_s26 + $0x70] sm:$0xff] }
  0x1b   : > { %196 = vst.msk [vmem:[#allocation2 + $0xb8] sm:$0xff] %vm172_vm1, %v19936_v5  ;;  %197 = vst.msk [vmem:[#allocation2 + $0xc0] sm:$0xff] %vm172_vm1, %v19936_v5  ;;  %v341_v28 = vpack.c.bf16 %v316_v26, %v315_v25  ;;  %v318_v30 = vld [vmem:[%s20263_s26 + $0x78] sm:$0xff]  ;;  %v319_v31 = vld [vmem:[%s20263_s26 + $0x80] sm:$0xff] }
  0x1c   : > { %198 = vst.msk [vmem:[#allocation2 + $0xc8] sm:$0xff] %vm172_vm1, %v19936_v5  ;;  %199 = vst.msk [vmem:[#allocation2 + $0xd0] sm:$0xff] %vm172_vm1, %v19936_v5  ;;  %v342_v32 = vpack.c.bf16 %v318_v30, %v317_v29  ;;  %v320_v33 = vld [vmem:[%s20263_s26 + $0x88] sm:$0xff]  ;;  %v321_v35 = vld [vmem:[%s20263_s26 + $0x90] sm:$0xff]  ;;  %v2922_v30 = vsel %vm628_vm0, %v20321_v51, 0 }
  0x1d   : > { %200 = vst.msk [vmem:[#allocation2 + $0xd8] sm:$0xff] %vm172_vm1, %v19936_v5  ;;  %201 = vst.msk [vmem:[#allocation2 + $0xe0] sm:$0xff] %vm172_vm1, %v19936_v5  ;;  %v343_v34 = vpack.c.bf16 %v320_v33, %v319_v31  ;;  %v322_v36 = vld [vmem:[%s20263_s26 + $0x98] sm:$0xff]  ;;  %v323_v37 = vld [vmem:[%s20263_s26 + $0xa0] sm:$0xff] }
  0x1e   : > { %202 = vst.msk [vmem:[#allocation2 + $0xe8] sm:$0xff] %vm172_vm1, %v19936_v5  ;;  %203 = vst.msk [vmem:[#allocation2 + $0xf0] sm:$0xff] %vm172_vm1, %v19936_v5  ;;  %v344_v38 = vpack.c.bf16 %v322_v36, %v321_v35  ;;  %v324_v39 = vld [vmem:[%s20263_s26 + $0xa8] sm:$0xff]  ;;  %v325_v42 = vld [vmem:[%s20263_s26 + $0xb0] sm:$0xff] }
  0x1f   : > { %204 = vst.msk [vmem:[#allocation2 + $0xf8] sm:$0xff] %vm172_vm1, %v19936_v5  ;;  %205 = vst.msk [vmem:[#allocation2 + $0x100] sm:$0xff] %vm172_vm1, %v19936_v5  ;;  %v345_v41 = vpack.c.bf16 %v324_v39, %v323_v37  ;;  %v326_v43 = vld [vmem:[%s20263_s26 + $0xb8] sm:$0xff]  ;;  %v327_v44 = vld [vmem:[%s20263_s26 + $0xc0] sm:$0xff] }
  0x20   : > { %206 = vst.msk [vmem:[#allocation2 + $0x108] sm:$0xff] %vm172_vm1, %v19936_v5  ;;  %207 = vst.msk [vmem:[#allocation2 + $0x110] sm:$0xff] %vm172_vm1, %v19936_v5  ;;  %v346_v47 = vpack.c.bf16 %v326_v43, %v325_v42  ;;  %v328_v48 = vld [vmem:[%s20263_s26 + $0xc8] sm:$0xff]  ;;  %v329_v58 = vld [vmem:[%s20263_s26 + $0xd0] sm:$0xff] }
  0x21   : > { %208 = vst.msk [vmem:[#allocation2 + $0x118] sm:$0xff] %vm172_vm1, %v19936_v5  ;;  %209 = vst.msk [vmem:[#allocation2 + $0x120] sm:$0xff] %vm172_vm1, %v19936_v5  ;;  %v347_v52 = vpack.c.bf16 %v328_v48, %v327_v44  ;;  %v330_v59 = vld [vmem:[%s20263_s26 + $0xd8] sm:$0xff]  ;;  %v331_v60 = vld [vmem:[%s20263_s26 + $0xe0] sm:$0xff] }
  0x22   : > { %210 = vst.msk [vmem:[#allocation2 + $0x128] sm:$0xff] %vm172_vm1, %v19936_v5  ;;  %211 = vst.msk [vmem:[#allocation2 + $0x130] sm:$0xff] %vm172_vm1, %v19936_v5  ;;  %v332_v61 = vld [vmem:[%s20263_s26 + $0xe8] sm:$0xff]  ;;  %v348_v4 = vpack.c.bf16 %v330_v59, %v329_v58 }
  0x23   : > { %212 = vst.msk [vmem:[#allocation2 + $0x138] sm:$0xff] %vm172_vm1, %v19936_v5  ;;  %213 = vst.msk [vmem:[#allocation2 + $0x140] sm:$0xff] %vm172_vm1, %v19936_v5  ;;  %v20422_v42 = vld [vmem:[%s23262_s1 + $0xe] sm:$0x3] }
  0x24   : > { %214 = vst.msk [vmem:[#allocation2 + $0x148] sm:$0xff] %vm172_vm1, %v19936_v5  ;;  %215 = vst.msk [vmem:[#allocation2 + $0x150] sm:$0xff] %vm172_vm1, %v19936_v5 }
  0x25   : > { %216 = vst.msk [vmem:[#allocation2 + $0x158] sm:$0xff] %vm172_vm1, %v19936_v5  ;;  %217 = vst.msk [vmem:[#allocation2 + $0x160] sm:$0xff] %vm172_vm1, %v19936_v5 }
  0x26   : > { %218 = vst.msk [vmem:[#allocation2 + $0x168] sm:$0xff] %vm172_vm1, %v19936_v5  ;;  %220 = vst.msk [vmem:[#allocation2 + $0x178] sm:$0xff] %vm172_vm1, %v19936_v5 }
  0x27   : > { %222 = vst.msk [vmem:[#allocation2 + $0x300] sm:$0xff] %vm172_vm1, %v19936_v5  ;;  %223 = vst.msk [vmem:[#allocation2 + $0x308] sm:$0xff] %vm172_vm1, %v19936_v5 }
  0x28   : > { %224 = vst.msk [vmem:[#allocation2 + $0x310] sm:$0xff] %vm172_vm1, %v19936_v5  ;;  %225 = vst.msk [vmem:[#allocation2 + $0x318] sm:$0xff] %vm172_vm1, %v19936_v5 }
  0x29   : > { %226 = vst.msk [vmem:[#allocation2 + $0x320] sm:$0xff] %vm172_vm1, %v19936_v5  ;;  %227 = vst.msk [vmem:[#allocation2 + $0x328] sm:$0xff] %vm172_vm1, %v19936_v5 }
  0x2a   : > { %228 = vst.msk [vmem:[#allocation2 + $0x330] sm:$0xff] %vm172_vm1, %v19936_v5  ;;  %229 = vst.msk [vmem:[#allocation2 + $0x338] sm:$0xff] %vm172_vm1, %v19936_v5 }
  0x2b   : > { %230 = vst.msk [vmem:[#allocation2 + $0x340] sm:$0xff] %vm172_vm1, %v19936_v5  ;;  %231 = vst.msk [vmem:[#allocation2 + $0x348] sm:$0xff] %vm172_vm1, %v19936_v5 }
  0x2c   : > { %232 = vst.msk [vmem:[#allocation2 + $0x350] sm:$0xff] %vm172_vm1, %v19936_v5  ;;  %233 = vst.msk [vmem:[#allocation2 + $0x358] sm:$0xff] %vm172_vm1, %v19936_v5 }
  0x2d   : > { %234 = vst.msk [vmem:[#allocation2 + $0x360] sm:$0xff] %vm172_vm1, %v19936_v5  ;;  %235 = vst.msk [vmem:[#allocation2 + $0x368] sm:$0xff] %vm172_vm1, %v19936_v5 }
  0x2e   : > { %236 = vst.msk [vmem:[#allocation2 + $0x370] sm:$0xff] %vm172_vm1, %v19936_v5  ;;  %237 = vst.msk [vmem:[#allocation2 + $0x378] sm:$0xff] %vm172_vm1, %v19936_v5 }
  0x2f   : > { %238 = vst.msk [vmem:[#allocation2 + $0x380] sm:$0xff] %vm172_vm1, %v19936_v5  ;;  %239 = vst.msk [vmem:[#allocation2 + $0x388] sm:$0xff] %vm172_vm1, %v19936_v5 }
  0x30   : > { %240 = vst.msk [vmem:[#allocation2 + $0x390] sm:$0xff] %vm172_vm1, %v19936_v5  ;;  %241 = vst.msk [vmem:[#allocation2 + $0x398] sm:$0xff] %vm172_vm1, %v19936_v5 }
  0x31   : > { %242 = vst.msk [vmem:[#allocation2 + $0x3a0] sm:$0xff] %vm172_vm1, %v19936_v5  ;;  %243 = vst.msk [vmem:[#allocation2 + $0x3a8] sm:$0xff] %vm172_vm1, %v19936_v5 }
  0x32   : > { %244 = vst.msk [vmem:[#allocation2 + $0x3b0] sm:$0xff] %vm172_vm1, %v19936_v5  ;;  %245 = vst.msk [vmem:[#allocation2 + $0x3b8] sm:$0xff] %vm172_vm1, %v19936_v5 }
  0x33   : > { %246 = vst.msk [vmem:[#allocation2 + $0x3c0] sm:$0xff] %vm172_vm1, %v19936_v5  ;;  %247 = vst.msk [vmem:[#allocation2 + $0x3c8] sm:$0xff] %vm172_vm1, %v19936_v5 }
  0x34   : > { %248 = vst.msk [vmem:[#allocation2 + $0x3d0] sm:$0xff] %vm172_vm1, %v19936_v5  ;;  %249 = vst.msk [vmem:[#allocation2 + $0x3d8] sm:$0xff] %vm172_vm1, %v19936_v5 }
  0x35   : > { %250 = vst.msk [vmem:[#allocation2 + $0x3e0] sm:$0xff] %vm172_vm1, %v19936_v5  ;;  %251 = vst.msk [vmem:[#allocation2 + $0x3e8] sm:$0xff] %vm172_vm1, %v19936_v5 }
  0x36   : > { %252 = vst.msk [vmem:[#allocation2 + $0x3f0] sm:$0xff] %vm172_vm1, %v19936_v5  ;;  %253 = vst.msk [vmem:[#allocation2 + $0x3f8] sm:$0xff] %vm172_vm1, %v19936_v5 }
  0x37   : > { %254 = vst.msk [vmem:[#allocation2 + $0x400] sm:$0xff] %vm172_vm1, %v19936_v5  ;;  %255 = vst.msk [vmem:[#allocation2 + $0x408] sm:$0xff] %vm172_vm1, %v19936_v5 }
  0x38   : > { %256 = vst.msk [vmem:[#allocation2 + $0x410] sm:$0xff] %vm172_vm1, %v19936_v5  ;;  %257 = vst.msk [vmem:[#allocation2 + $0x418] sm:$0xff] %vm172_vm1, %v19936_v5 }
  0x39   : > { %258 = vst.msk [vmem:[#allocation2 + $0x420] sm:$0xff] %vm172_vm1, %v19936_v5  ;;  %259 = vst.msk [vmem:[#allocation2 + $0x428] sm:$0xff] %vm172_vm1, %v19936_v5 }
  0x3a   : > { %260 = vst.msk [vmem:[#allocation2 + $0x430] sm:$0xff] %vm172_vm1, %v19936_v5  ;;  %261 = vst.msk [vmem:[#allocation2 + $0x438] sm:$0xff] %vm172_vm1, %v19936_v5 }
  0x3b   : > { %262 = vst.msk [vmem:[#allocation2 + $0x440] sm:$0xff] %vm172_vm1, %v19936_v5  ;;  %263 = vst.msk [vmem:[#allocation2 + $0x448] sm:$0xff] %vm172_vm1, %v19936_v5 }
  0x3c   : > { %264 = vst.msk [vmem:[#allocation2 + $0x450] sm:$0xff] %vm172_vm1, %v19936_v5  ;;  %265 = vst.msk [vmem:[#allocation2 + $0x458] sm:$0xff] %vm172_vm1, %v19936_v5 }
  0x3d   : > { %266 = vst.msk [vmem:[#allocation2 + $0x460] sm:$0xff] %vm172_vm1, %v19936_v5  ;;  %267 = vst.msk [vmem:[#allocation2 + $0x468] sm:$0xff] %vm172_vm1, %v19936_v5 }
  0x3e   : > { %268 = vst.msk [vmem:[#allocation2 + $0x470] sm:$0xff] %vm172_vm1, %v19936_v5  ;;  %269 = vst.msk [vmem:[#allocation2 + $0x478] sm:$0xff] %vm172_vm1, %v19936_v5 }
  0x3f   : > { %271 = vst.msk [vmem:[#allocation2 + $0x180] sm:$0xff] %vm172_vm1, %v19936_v5  ;;  %272 = vst.msk [vmem:[#allocation2 + $0x198] sm:$0xff] %vm172_vm1, %v19936_v5 }
  0x40   : > { %273 = vst.msk [vmem:[#allocation2 + $0x1b0] sm:$0xff] %vm172_vm1, %v19936_v5  ;;  %274 = vst.msk [vmem:[#allocation2 + $0x1c8] sm:$0xff] %vm172_vm1, %v19936_v5 }
  0x41   : > { %275 = vst.msk [vmem:[#allocation2 + $0x1e0] sm:$0xff] %vm172_vm1, %v19936_v5  ;;  %276 = vst.msk [vmem:[#allocation2 + $0x1f8] sm:$0xff] %vm172_vm1, %v19936_v5 }
  0x42   : > { %277 = vst.msk [vmem:[#allocation2 + $0x210] sm:$0xff] %vm172_vm1, %v19936_v5  ;;  %278 = vst.msk [vmem:[#allocation2 + $0x228] sm:$0xff] %vm172_vm1, %v19936_v5 }
  0x43   : > { %279 = vst.msk [vmem:[#allocation2 + $0x240] sm:$0xff] %vm172_vm1, %v19936_v5  ;;  %280 = vst.msk [vmem:[#allocation2 + $0x258] sm:$0xff] %vm172_vm1, %v19936_v5 }
  0x44   : > { %281 = vst.msk [vmem:[#allocation2 + $0x270] sm:$0xff] %vm172_vm1, %v19936_v5  ;;  %282 = vst.msk [vmem:[#allocation2 + $0x288] sm:$0xff] %vm172_vm1, %v19936_v5 }
  0x45   : > { %283 = vst.msk [vmem:[#allocation2 + $0x2a0] sm:$0xff] %vm172_vm1, %v19936_v5  ;;  %284 = vst.msk [vmem:[#allocation2 + $0x2b8] sm:$0xff] %vm172_vm1, %v19936_v5 }
  0x46   : > { %285 = vst.msk [vmem:[#allocation2 + $0x2d0] sm:$0xff] %vm172_vm1, %v19936_v5  ;;  %286 = vst.msk [vmem:[#allocation2 + $0x2e8] sm:$0xff] %vm172_vm1, %v19936_v5 }
  0x47   : > { %287 = vst.msk [vmem:[#allocation2 + $0x190] sm:$0xff] %vm172_vm1, %v19936_v5  ;;  %288 = vst.msk [vmem:[#allocation2 + $0x1a8] sm:$0xff] %vm172_vm1, %v19936_v5 }
  0x48   : > { %289 = vst.msk [vmem:[#allocation2 + $0x1c0] sm:$0xff] %vm172_vm1, %v19936_v5  ;;  %290 = vst.msk [vmem:[#allocation2 + $0x1d8] sm:$0xff] %vm172_vm1, %v19936_v5 }
  0x49   : > { %291 = vst.msk [vmem:[#allocation2 + $0x1f0] sm:$0xff] %vm172_vm1, %v19936_v5  ;;  %292 = vst.msk [vmem:[#allocation2 + $0x208] sm:$0xff] %vm172_vm1, %v19936_v5 }
  0x4a   : > { %293 = vst.msk [vmem:[#allocation2 + $0x220] sm:$0xff] %vm172_vm1, %v19936_v5  ;;  %294 = vst.msk [vmem:[#allocation2 + $0x238] sm:$0xff] %vm172_vm1, %v19936_v5 }
  0x4b   : > { %295 = vst.msk [vmem:[#allocation2 + $0x250] sm:$0xff] %vm172_vm1, %v19936_v5  ;;  %296 = vst.msk [vmem:[#allocation2 + $0x268] sm:$0xff] %vm172_vm1, %v19936_v5 }
  0x4c   : > { %297 = vst.msk [vmem:[#allocation2 + $0x280] sm:$0xff] %vm172_vm1, %v19936_v5  ;;  %298 = vst.msk [vmem:[#allocation2 + $0x298] sm:$0xff] %vm172_vm1, %v19936_v5 }
  0x4d   : > { %299 = vst.msk [vmem:[#allocation2 + $0x2b0] sm:$0xff] %vm172_vm1, %v19936_v5  ;;  %300 = vst.msk [vmem:[#allocation2 + $0x2c8] sm:$0xff] %vm172_vm1, %v19936_v5 }
  0x4e   : > { %301 = vst.msk [vmem:[#allocation2 + $0x2e0] sm:$0xff] %vm172_vm1, %v19936_v5  ;;  %302 = vst.msk [vmem:[#allocation2 + $0x2f8] sm:$0xff] %vm172_vm1, %v19936_v5  ;;  %v2177_v57 = vld [vmem:[#allocation2 + $0x190] sm:$0x1]  ;;  %v349_v5 = vpack.c.bf16 %v332_v61, %v331_v60 }
  0x4f   : > { %351 = vst.msk [vmem:[#allocation2 + $0x188] sm:$0xff] %vm172_vm1, %v335_v10  ;;  %352 = vst.msk [vmem:[#allocation2 + $0x1a0] sm:$0xff] %vm172_vm1, %v336_v15  ;;  %v2216_v2 = vshll.u32 %v2177_v57, 16  ;;  %v2179_v10 = vld [vmem:[#allocation2 + $0x1a8] sm:$0x1] }
  0x50   : > { %353 = vst.msk [vmem:[#allocation2 + $0x1b8] sm:$0xff] %vm172_vm1, %v337_v16  ;;  %354 = vst.msk [vmem:[#allocation2 + $0x1d0] sm:$0xff] %vm172_vm1, %v338_v19  ;;  %v2181_v11 = vld [vmem:[#allocation2 + $0x1c0] sm:$0x1]  ;;  %v2228_v16 = vshll.u32 %v2179_v10, 16 }
  0x51   : > { %355 = vst.msk [vmem:[#allocation2 + $0x1e8] sm:$0xff] %vm172_vm1, %v339_v23  ;;  %356 = vst.msk [vmem:[#allocation2 + $0x200] sm:$0xff] %vm172_vm1, %v340_v27  ;;  %v2218_v9 = vrot.slane %v2216_v2, 1  ;;  %v2240_v20 = vshll.u32 %v2181_v11, 16  ;;  %v2183_v27 = vld [vmem:[#allocation2 + $0x1d8] sm:$0x1] }
  0x52   : > { %357 = vst.msk [vmem:[#allocation2 + $0x218] sm:$0xff] %vm172_vm1, %v341_v28  ;;  %358 = vst.msk [vmem:[#allocation2 + $0x230] sm:$0xff] %vm172_vm1, %v342_v32  ;;  %v2230_v23 = vrot.slane %v2228_v16, 1  ;;  %v2185_v28 = vld [vmem:[#allocation2 + $0x1f0] sm:$0x1]  ;;  %v2252_v35 = vshll.u32 %v2183_v27, 16 }
  0x53   : > { %359 = vst.msk [vmem:[#allocation2 + $0x248] sm:$0xff] %vm172_vm1, %v343_v34  ;;  %360 = vst.msk [vmem:[#allocation2 + $0x260] sm:$0xff] %vm172_vm1, %v344_v38  ;;  %v2242_v26 = vrot.slane %v2240_v20, 1  ;;  %v2264_v39 = vshll.u32 %v2185_v28, 16  ;;  %v2189_v58 = vld [vmem:[#allocation2 + $0x220] sm:$0x1] }
  0x54   : > { %361 = vst.msk [vmem:[#allocation2 + $0x278] sm:$0xff] %vm172_vm1, %v345_v41  ;;  %362 = vst.msk [vmem:[#allocation2 + $0x290] sm:$0xff] %vm172_vm1, %v346_v47  ;;  %v334_v41 = vld [vmem:[%s20263_s26 + $0xf8] sm:$0xff]  ;;  %v2288_v10 = vshll.u32 %v2189_v58, 16  ;;  %v406_v11 = vshrl.u32 %v20271_v14, 16  ;;  %v409_v28 = vshll.u32 %v20271_v14, 16 }
  0x55   : > { %363 = vst.msk [vmem:[#allocation2 + $0x2a8] sm:$0xff] %vm172_vm1, %v347_v52  ;;  %364 = vst.msk [vmem:[#allocation2 + $0x2c0] sm:$0xff] %vm172_vm1, %v348_v4  ;;  %v2187_v52 = vld [vmem:[#allocation2 + $0x208] sm:$0x1]  ;;  %v370_v58 = vld [vmem:[#allocation2 + $0x180] sm:$0x80] }
  0x56   : > { %v20305_v45 = vld [vmem:[#allocation2 + $0x188] sm:$0xff]  ;;  %v20314_v49 = vld [vmem:[#allocation2 + $0x1a0] sm:$0xff]  ;;  %365 = vst.msk [vmem:[#allocation2 + $0x2d8] sm:$0xff] %vm172_vm1, %v349_v5  ;;  %v2276_v4 = vshll.u32 %v2187_v52, 16  ;;  %v408_v27 = vrot.slane %v406_v11, 7 }
  0x57   : > { %17020 = vmatmul.mubr.msk.bf16.vlgmr.msra.gmra.mrb[0].mxu1 %vm172_vm1, %v20305_v45  ;;  %17155 = vmatprep.mubr.msk.bf16.mxu0 %vm172_vm1, %v20305_v45  ;;  %v20316_v50 = vld [vmem:[#allocation2 + $0x1b8] sm:$0xff]  ;;  %v20341_v54 = vld [vmem:[#allocation2 + $0x1d0] sm:$0xff]  ;;  %v421_v56 = vshll.u32 %v20305_v45, 16  ;;  %v418_v63 = vshrl.u32 %v20305_v45, 16  ;;  %v1528_v6 = vshll.u32 %v20314_v49, 16  ;;  %v1525_v12 = vshrl.u32 %v20314_v49, 16 }
  0x58   : > { %17052 = vmatpush3.bf16.msra.mxu1 %v842_v40  ;;  %17156 = vmatmul.mubr.msk.bf16.vlgmr.msra.gmra.mrb[0].mxu0 %vm172_vm1, %v20314_v49  ;;  %v20343_v55 = vld [vmem:[#allocation2 + $0x1e8] sm:$0xff]  ;;  %v20358_v62 = vld [vmem:[#allocation2 + $0x200] sm:$0xff]  ;;  %v445_v7 = vshll.u32 %v20316_v50, 16  ;;  %v442_v17 = vshrl.u32 %v20316_v50, 16  ;;  %v1552_v21 = vshll.u32 %v20341_v54, 16  ;;  %v1549_v31 = vshrl.u32 %v20341_v54, 16 }
  0x59   : > { %17188 = vmatpush3.bf16.msra.mxu0 %v2451_v46  ;;  %17023 = vmatprep.mubr.msk.bf16.mxu1 %vm172_vm1, %v20314_v49  ;;  %v20361_v0 = vld [vmem:[#allocation2 + $0x218] sm:$0xff]  ;;  %v2213_v1 = vrot.slane %v421_v56, 1  ;;  %v20380_v13 = vld [vmem:[#allocation2 + $0x230] sm:$0xff]  ;;  %v2225_v15 = vrot.slane %v1528_v6, 1  ;;  %v469_v24 = vshll.u32 %v20343_v55, 16  ;;  %v466_v36 = vshrl.u32 %v20343_v55, 16 }
  0x5a   : > { %17159 = vmatprep.mubr.msk.bf16.mxu0 %vm172_vm1, %v20316_v50  ;;  %19836 = vmatprep.subr.msk.bf16.mxu0 %vm628_vm0, %v20321_v51  ;;  %v2237_v19 = vrot.slane %v445_v7, 1  ;;  %v20401_v29 = vld [vmem:[#allocation2 + $0x248] sm:$0xff]  ;;  %v20407_v33 = vld [vmem:[#allocation2 + $0x260] sm:$0xff]  ;;  %v2249_v34 = vrot.slane %v1552_v21, 1  ;;  %v333_v40 = vld [vmem:[%s20263_s26 + $0xf0] sm:$0xff]  ;;  %v1576_v43 = vshll.u32 %v20358_v62, 16 }
  0x5b   : > { %19831 = vmatprep.subr.msk.bf16.mxu1 %vm628_vm0, %v20330_v53  ;;  %v2214_v8 = vor.u32 %v2213_v1, %v418_v63  ;;  %v2226_v22 = vor.u32 %v2225_v15, %v1525_v12  ;;  %v2261_v38 = vrot.slane %v469_v24, 1  ;;  %v2254_v46 = vrot.slane %v2252_v35, 1  ;;  %v20436_v59 = vld [vmem:[#allocation2 + $0x278] sm:$0xff]  ;;  %v20441_v1 = vld [vmem:[#allocation2 + $0x290] sm:$0xff]  ;;  %v2197_v11 = vld [vmem:[#allocation2 + $0x280] sm:$0x1] }
  0x5c   : > { %v2238_v25 = vor.u32 %v2237_v19, %v442_v17  ;;  %v2250_v44 = vor.u32 %v2249_v34, %v1549_v31  ;;  %v493_v47 = vshll.u32 %v20361_v0, 16  ;;  %v2266_v51 = vrot.slane %v2264_v39, 1  ;;  %v20467_v35 = vld [vmem:[#allocation2 + $0x2c0] sm:$0xff] }
  0x5d   : > { %v2219_v18 = vsel %vm1037_vm2, %v2214_v8, %v2218_v9  ;;  %v2231_v32 = vsel %vm1037_vm2, %v2226_v22, %v2230_v23  ;;  %v2262_v48 = vor.u32 %v2261_v38, %v466_v36  ;;  %v350_v57 = vpack.c.bf16 %v334_v41, %v333_v40  ;;  %v2191_v23 = vld [vmem:[#allocation2 + $0x238] sm:$0x1] }
  0x5e   : > { %v2243_v37 = vsel %vm1037_vm2, %v2238_v25, %v2242_v26  ;;  %v1573_v60 = vshrl.u32 %v20358_v62, 16  ;;  %v2255_v61 = vsel %vm1037_vm2, %v2250_v44, %v2254_v46  ;;  %v2273_v2 = vrot.slane %v1576_v43, 1  ;;  %v368_v25 = vld [vmem:[#allocation2 + $0x168] sm:$0x80]  ;;  %v2193_v26 = vld [vmem:[#allocation2 + $0x250] sm:$0x1] }
  0x5f   : > { %17024 = vmatmul.mubr.msk.bf16.gmra.mrb[4].mxu1 %vm172_vm1, %v20316_v50  ;;  %366 = vst.msk [vmem:[#allocation2 + $0x2f0] sm:$0xff] %vm172_vm1, %v350_v57  ;;  %v490_v5 = vshrl.u32 %v20361_v0, 16  ;;  %v2267_v8 = vsel %vm1037_vm2, %v2262_v48, %v2266_v51  ;;  %v2285_v9 = vrot.slane %v493_v47, 1  ;;  %v1600_v15 = vshll.u32 %v20380_v13, 16 }
  0x60   : > { %17160 = vmatmul.mubr.msk.bf16.gmra.mrb[4].mxu0 %vm172_vm1, %v20341_v54  ;;  %17027 = vmatprep.mubr.msk.bf16.mxu1 %vm172_vm1, %v20341_v54  ;;  %v2274_v16 = vor.u32 %v2273_v2, %v1573_v60  ;;  %v517_v19 = vshll.u32 %v20401_v29, 16  ;;  %v2290_v22 = vrot.slane %v2288_v10, 1  ;;  %v2300_v38 = vshll.u32 %v2191_v23, 16  ;;  %v372_v10 = vld [vmem:[#allocation2 + $0x198] sm:$0x80] }
  0x61   : > { %17163 = vmatprep.mubr.msk.bf16.mxu0 %vm172_vm1, %v20343_v55  ;;  %v2286_v20 = vor.u32 %v2285_v9, %v490_v5  ;;  %v402_v39 = vshrl.u32 %v368_v25, 16  ;;  %v514_v40 = vshrl.u32 %v20401_v29, 16  ;;  %v2312_v44 = vshll.u32 %v2193_v26, 16 }
  0x62   : > { %v2309_v14 = vrot.slane %v517_v19, 1  ;;  %v411_v46 = vor.u32 %v409_v28, %v408_v27  ;;  %v529_v48 = vshll.u32 %v20407_v33, 16  ;;  %v2302_v52 = vrot.slane %v2300_v38, 1 }
  0x63   : > { %v2291_v41 = vsel %vm1037_vm2, %v2286_v20, %v2290_v22  ;;  %v404_v57 = vrot.slane %v402_v39, 7  ;;  %v420_v9 = vrot.slane %v418_v63, 7  ;;  %v538_v20 = vshrl.u32 %v20436_v59, 16  ;;  %v20493_v22 = vld [vmem:[#allocation2 + $0x2d8] sm:$0xff] }
  0x64   : > { %v2310_v2 = vor.u32 %v2309_v14, %v514_v40  ;;  %v414_v23 = vshrl.u32 %v370_v58, 16  ;;  %v2321_v27 = vrot.slane %v529_v48, 1  ;;  %v2199_v58 = vld [vmem:[#allocation2 + $0x298] sm:$0x1]  ;;  %v550_v49 = vshrl.u32 %v20441_v1, 16 }
  0x65   : > { %v412_v26 = vsel %vm400_vm3, %v404_v57, %v411_v46  ;;  %v20506_v38 = vor.u32 %v421_v56, %v420_v9  ;;  %v1281_v9 = vsel %vm628_vm0, %v20330_v53, 0  ;;  %v589_v50 = vshll.u32 %v20493_v22, 16 }
  0x66   : > { %v416_v39 = vrot.slane %v414_v23, 7  ;;  %v574_v54 = vshrl.u32 %v20467_v35, 16 }
  0x67   : > { %17028 = vmatmul.mubr.msk.bf16.gmra.mrb[8].mxu1 %vm172_vm1, %v20343_v55 }
  0x68   : > { %17164 = vmatmul.mubr.msk.bf16.gmra.mrb[8].mxu0 %vm172_vm1, %v20358_v62  ;;  %17031 = vmatprep.mubr.msk.bf16.mxu1 %vm172_vm1, %v20358_v62  ;;  %v2647_v62 = vld [vmem:[#allocation2 + $0x198] sm:$0x80] }
  0x69   : > { %17167 = vmatprep.mubr.msk.bf16.mxu0 %vm172_vm1, %v20361_v0 }
  0x6f   : > { %17032 = vmatmul.mubr.msk.bf16.gmra.mrb[12].mxu1 %vm172_vm1, %v20361_v0  ;;  %v516_v0 = vrot.slane %v514_v40, 7 }
  0x70   : > { %17168 = vmatmul.mubr.msk.bf16.gmra.mrb[12].mxu0 %vm172_vm1, %v20380_v13  ;;  %17035 = vmatprep.mubr.msk.bf16.mxu1 %vm172_vm1, %v20380_v13 }
  0x71   : > { %17189 = vmatprep.mubr.msk.bf16.mxu0 %vm172_vm1, %v2219_v18  ;;  %v2278_v18 = vrot.slane %v2276_v4, 1  ;;  %v2314_v4 = vrot.slane %v2312_v44, 1 }
  0x73   : > { %v2279_v34 = vsel %vm1037_vm2, %v2274_v16, %v2278_v18  ;;  %v1527_v16 = vrot.slane %v1525_v12, 7  ;;  %v526_v18 = vshrl.u32 %v20407_v33, 16  ;;  %v2315_v28 = vsel %vm1037_vm2, %v2310_v2, %v2314_v4  ;;  %v376_v2 = vld [vmem:[#allocation2 + $0x1c8] sm:$0x80] }
  0x74   : > { %v444_v4 = vrot.slane %v442_v17, 7 }
  0x75   : > { %v2322_v44 = vor.u32 %v2321_v27, %v526_v18  ;;  %v20517_v45 = vor.u32 %v1528_v6, %v1527_v16 }
  0x77   : > { %17036 = vmatmul.mubr.msk.bf16.gmra.mrb[16].mxu1 %vm172_vm1, %v20401_v29  ;;  %v552_v29 = vrot.slane %v550_v49, 7 }
  0x78   : > { %17190 = vmatmul.mubr.msk.bf16.vlgmr.msra.gmra.mrb[0].mxu0 %vm172_vm1, %v2231_v32  ;;  %17039 = vmatprep.mubr.msk.bf16.mxu1 %vm172_vm1, %v20407_v33  ;;  %v20464_v32 = vld [vmem:[#allocation2 + $0x2a8] sm:$0xff] }
  0x79   : > { %17222 = vmatpush3.bf16.msra.mxu0 %v2922_v30  ;;  %17193 = vmatprep.mubr.msk.bf16.mxu0 %vm172_vm1, %v2243_v37  ;;  %v1597_v30 = vshrl.u32 %v20380_v13, 16  ;;  %v2297_v37 = vrot.slane %v1600_v15, 1  ;;  %v565_v14 = vshll.u32 %v20464_v32, 16  ;;  %v562_v6 = vshrl.u32 %v20464_v32, 16 }
  0x7a   : > { %19837 = vmatprep.subr.msk.bf16.mxu0 %vm628_vm0, %v20422_v42 }
  0x7b   : > { %v2298_v51 = vor.u32 %v2297_v37, %v1597_v30  ;;  %v2336_v37 = vshll.u32 %v2197_v11, 16  ;;  %v424_v11 = vsel %vm400_vm3, %v416_v39, %v20506_v38  ;;  %v2357_v27 = vrot.slane %v565_v14, 1  ;;  %v378_v39 = vld [vmem:[#allocation2 + $0x1e0] sm:$0x80] }
  0x7d   : > { %v2303_v25 = vsel %vm1037_vm2, %v2298_v51, %v2302_v52  ;;  %v374_v51 = vld [vmem:[#allocation2 + $0x1b0] sm:$0x80]  ;;  %v2338_v57 = vrot.slane %v2336_v37, 1  ;;  %v20549_v37 = vor.u32 %v445_v7, %v444_v4  ;;  %v2358_v7 = vor.u32 %v2357_v27, %v562_v6 }
  0x7e   : > { %v438_v16 = vshrl.u32 %v374_v51, 16  ;;  %v1575_v4 = vrot.slane %v1573_v60, 7 }
  0x7f   : > { %17040 = vmatmul.mubr.msk.bf16.gmra.mrb[20].mxu1 %vm172_vm1, %v20436_v59 }
  0x80   : > { %17194 = vmatmul.mubr.msk.bf16.gmra.mrb[4].mxu0 %vm172_vm1, %v2255_v61  ;;  %17043 = vmatprep.mubr.msk.bf16.mxu1 %vm172_vm1, %v20441_v1  ;;  %v541_v61 = vshll.u32 %v20436_v59, 16  ;;  %v564_v59 = vrot.slane %v562_v6, 7  ;;  %v1005_v6 = vld [vmem:[#allocation2 + $0x170] sm:$0xff] }
  0x81   : > { %17197 = vmatprep.mubr.msk.bf16.mxu0 %vm172_vm1, %v2267_v8  ;;  %v2195_v8 = vld [vmem:[#allocation2 + $0x268] sm:$0x1] }
  0x82   : > { %v2324_v63 = vshll.u32 %v2195_v8, 16  ;;  %v2333_v12 = vrot.slane %v541_v61, 1  ;;  %v1551_v8 = vrot.slane %v1549_v31, 7 }
  0x84   : > { %v2326_v46 = vrot.slane %v2324_v63, 1  ;;  %v2334_v52 = vor.u32 %v2333_v12, %v538_v20  ;;  %v440_v12 = vrot.slane %v438_v16, 7 }
  0x86   : > { %v2327_v23 = vsel %vm1037_vm2, %v2322_v44, %v2326_v46  ;;  %v2339_v53 = vsel %vm1037_vm2, %v2334_v52, %v2338_v57  ;;  %v2203_v52 = vld [vmem:[#allocation2 + $0x2c8] sm:$0x1]  ;;  %v380_v57 = vld [vmem:[#allocation2 + $0x1f8] sm:$0x80] }
  0x87   : > { %17044 = vmatmul.mubr.msk.bf16.gmra.mrb[24].mxu1 %vm172_vm1, %v20464_v32  ;;  %v474_v16 = vshrl.u32 %v380_v57, 16  ;;  %v384_v57 = vld [vmem:[#allocation2 + $0x228] sm:$0x80] }
  0x88   : > { %17198 = vmatmul.mubr.msk.bf16.gmra.mrb[8].mxu0 %vm172_vm1, %v2279_v34  ;;  %17047 = vmatprep.mubr.msk.bf16.mxu1 %vm172_vm1, %v20467_v35  ;;  %v426_v34 = vshrl.u32 %v372_v10, 16  ;;  %v2201_v10 = vld [vmem:[#allocation2 + $0x2b0] sm:$0x1] }
  0x89   : > { %17201 = vmatprep.mubr.msk.bf16.mxu0 %vm172_vm1, %v2291_v41  ;;  %v553_v41 = vshll.u32 %v20441_v1, 16  ;;  %v2360_v63 = vshll.u32 %v2201_v10, 16  ;;  %v576_v1 = vrot.slane %v574_v54, 7 }
  0x8a   : > { %v428_v56 = vrot.slane %v426_v34, 7  ;;  %v577_v34 = vshll.u32 %v20467_v35, 16 }
  0x8b   : > { %v2345_v17 = vrot.slane %v553_v41, 1 }
  0x8c   : > { %v436_v31 = vsel %vm400_vm3, %v428_v56, %v20517_v45  ;;  %v20557_v56 = vor.u32 %v1552_v21, %v1551_v8  ;;  %v462_v21 = vshrl.u32 %v378_v39, 16  ;;  %v2205_v8 = vld [vmem:[#allocation2 + $0x2e0] sm:$0x1]  ;;  %v2369_v10 = vrot.slane %v577_v34, 1 }
  0x8d   : > { %v2346_v44 = vor.u32 %v2345_v17, %v550_v49  ;;  %v586_v17 = vshrl.u32 %v20493_v22, 16  ;;  %v476_v39 = vrot.slane %v474_v16, 7  ;;  %v20667_v49 = vld [vmem:[%s23262_s1 + $0x10] sm:$0x3] }
  0x8f   : > { %17048 = vmatmul.mubr.msk.bf16.gmra.mrb[28].mxu1 %vm172_vm1, %v20493_v22 }
  0x90   : > { %17202 = vmatmul.mubr.msk.bf16.gmra.mrb[12].mxu0 %vm172_vm1, %v2303_v25  ;;  %17053 = vmatprep.mubr.msk.bf16.mxu1 %vm172_vm1, %v412_v26  ;;  %v2348_v25 = vshll.u32 %v2199_v58, 16  ;;  %v450_v26 = vshrl.u32 %v376_v2, 16  ;;  %v2362_v58 = vrot.slane %v2360_v63, 1  ;;  %v468_v2 = vrot.slane %v466_v36, 7 }
  0x91   : > { %17205 = vmatprep.mubr.msk.bf16.mxu0 %vm172_vm1, %v2315_v28  ;;  %v20543_v28 = vld [vmem:[%s23262_s1 + $0x6] sm:$0x3]  ;;  %v2370_v63 = vor.u32 %v2369_v10, %v574_v54  ;;  %v20699_v54 = vor.u32 %v565_v14, %v564_v59  ;;  %v2665_v59 = vld [vmem:[#allocation2 + $0x270] sm:$0x80] }
  0x92   : > { %v2350_v46 = vrot.slane %v2348_v25, 1  ;;  %v452_v51 = vrot.slane %v450_v26, 7  ;;  %v2363_v60 = vsel %vm1037_vm2, %v2358_v7, %v2362_v58  ;;  %v2381_v25 = vrot.slane %v589_v50, 1 }
  0x93   : > { %v2384_v26 = vshll.u32 %v2205_v8, 16  ;;  %v20585_v27 = vor.u32 %v469_v24, %v468_v2  ;;  %v492_v7 = vrot.slane %v490_v5, 7  ;;  %v1599_v58 = vrot.slane %v1597_v30, 7 }
  0x94   : > { %v460_v36 = vsel %vm400_vm3, %v452_v51, %v20557_v56  ;;  %v2382_v24 = vor.u32 %v2381_v25, %v586_v17  ;;  %v498_v5 = vshrl.u32 %v384_v57, 16  ;;  %v2680_v30 = vshrl.u32 %v2647_v62, 16 }
  0x95   : > { %v2386_v51 = vrot.slane %v2384_v26, 1  ;;  %v20624_v26 = vor.u32 %v1600_v15, %v1599_v58 }
  0x96   : > { %v500_v25 = vrot.slane %v498_v5, 7  ;;  %v2655_v5 = vld [vmem:[#allocation2 + $0x1f8] sm:$0x80] }
  0x97   : > { %17054 = vmatmul.mubr.msk.bf16.vlgmr.msra.gmra.mrb[0].mxu1 %vm172_vm1, %v424_v11  ;;  %v2372_v11 = vshll.u32 %v2203_v52, 16  ;;  %v2207_v52 = vld [vmem:[#allocation2 + $0x2f8] sm:$0x1] }
  0x98   : > { %17086 = vmatpush3.bf16.msra.mxu1 %v1281_v9  ;;  %17206 = vmatmul.mubr.msk.bf16.gmra.mrb[16].mxu0 %vm172_vm1, %v2327_v23  ;;  %v448_v9 = vsel %vm400_vm3, %v440_v12, %v20549_v37  ;;  %v2351_v23 = vsel %vm1037_vm2, %v2346_v44, %v2350_v46  ;;  %v20593_v44 = vor.u32 %v1576_v43, %v1575_v4  ;;  %v382_v46 = vld [vmem:[#allocation2 + $0x210] sm:$0x80]  ;;  %v2396_v10 = vshll.u32 %v2207_v52, 16 }
  0x99   : > { %17057 = vmatprep.mubr.msk.bf16.mxu1 %vm172_vm1, %v436_v31  ;;  %17209 = vmatprep.mubr.msk.bf16.mxu0 %vm172_vm1, %v2339_v53  ;;  %v20580_v31 = vld [vmem:[#allocation2 + $0x2f0] sm:$0xff]  ;;  %v464_v53 = vrot.slane %v462_v21, 7  ;;  %v2374_v12 = vrot.slane %v2372_v11, 1  ;;  %v486_v21 = vshrl.u32 %v382_v46, 16  ;;  %v2387_v11 = vsel %vm1037_vm2, %v2382_v24, %v2386_v51  ;;  %v2651_v46 = vld [vmem:[#allocation2 + $0x1c8] sm:$0x80] }
  0x9a   : > { %19832 = vmatprep.subr.msk.bf16.mxu1 %vm628_vm0, %v20543_v28  ;;  %v2391_v55 = vshll.u32 %v20580_v31, 16  ;;  %v484_v4 = vsel %vm400_vm3, %v476_v39, %v20593_v44  ;;  %v2389_v8 = vshrl.u32 %v20580_v31, 16  ;;  %v388_v39 = vld [vmem:[#allocation2 + $0x258] sm:$0x80]  ;;  %v508_v13 = vsel %vm400_vm3, %v500_v25, %v20624_v26 }
  0x9b   : > { %v472_v43 = vsel %vm400_vm3, %v464_v53, %v20585_v27  ;;  %v2375_v2 = vsel %vm1037_vm2, %v2370_v63, %v2374_v12  ;;  %v488_v16 = vrot.slane %v486_v21, 7  ;;  %v386_v53 = vld [vmem:[#allocation2 + $0x240] sm:$0x80]  ;;  %v2682_v63 = vrot.slane %v2680_v30, 7  ;;  %v2649_v12 = vld [vmem:[#allocation2 + $0x1b0] sm:$0x80] }
  0x9c   : > { %v510_v51 = vshrl.u32 %v386_v53, 16  ;;  %v2692_v15 = vshrl.u32 %v2649_v12, 16  ;;  %v522_v57 = vshrl.u32 %v388_v39, 16  ;;  %v2704_v58 = vshrl.u32 %v2651_v46, 16  ;;  %v394_v46 = vld [vmem:[#allocation2 + $0x2a0] sm:$0x80] }
  0x9d   : > { %v2728_v25 = vshrl.u32 %v2655_v5, 16  ;;  %v20678_v39 = vor.u32 %v553_v41, %v552_v29  ;;  %v588_v29 = vrot.slane %v586_v17, 7 }
  0x9e   : > { %v512_v40 = vrot.slane %v510_v51, 7  ;;  %v2694_v62 = vrot.slane %v2692_v15, 7  ;;  %v2706_v21 = vrot.slane %v2704_v58, 7  ;;  %v2659_v51 = vld [vmem:[#allocation2 + $0x228] sm:$0x80] }
  0x9f   : > { %17058 = vmatmul.mubr.msk.bf16.gmra.mrb[4].mxu1 %vm172_vm1, %v448_v9  ;;  %v2393_v9 = vrot.slane %v2391_v55, 1  ;;  %v2752_v58 = vshrl.u32 %v2659_v51, 16  ;;  %v1008_v51 = vld [vmem:[#allocation2 + $0x190] sm:$0x1] }
  0xa0   : > { %17210 = vmatmul.mubr.msk.bf16.gmra.mrb[20].mxu0 %vm172_vm1, %v2351_v23  ;;  %17061 = vmatprep.mubr.msk.bf16.mxu1 %vm172_vm1, %v460_v36  ;;  %v20617_v23 = vor.u32 %v493_v47, %v492_v7  ;;  %v528_v47 = vrot.slane %v526_v18, 7  ;;  %v2690_v7 = vsel %vm400_vm3, %v2682_v63, %v20517_v45  ;;  %v20642_v18 = vor.u32 %v517_v19, %v516_v0  ;;  %v2657_v0 = vld [vmem:[#allocation2 + $0x210] sm:$0x80] }
  0xa1   : > { %17213 = vmatprep.mubr.msk.bf16.mxu0 %vm172_vm1, %v2363_v60  ;;  %v2394_v36 = vor.u32 %v2393_v9, %v2389_v8  ;;  %v2398_v60 = vrot.slane %v2396_v10, 1  ;;  %v2653_v9 = vld [vmem:[#allocation2 + $0x1e0] sm:$0x80]  ;;  %v392_v10 = vld [vmem:[#allocation2 + $0x288] sm:$0x80]  ;;  %v2702_v33 = vsel %vm400_vm3, %v2694_v62, %v20549_v37  ;;  %v2754_v5 = vrot.slane %v2752_v58, 7 }
  0xa2   : > { %v496_v24 = vsel %vm400_vm3, %v488_v16, %v20617_v23  ;;  %v520_v19 = vsel %vm400_vm3, %v512_v40, %v20642_v18  ;;  %v2716_v16 = vshrl.u32 %v2653_v9, 16  ;;  %v2661_v9 = vld [vmem:[#allocation2 + $0x240] sm:$0x80]  ;;  %v1011_v58 = vld [vmem:[#allocation2 + $0x1b8] sm:$0xff] }
  0xa3   : > { %v2399_v52 = vsel %vm1037_vm2, %v2394_v36, %v2398_v60  ;;  %v546_v36 = vshrl.u32 %v392_v10, 16  ;;  %v3152_v60 = vsel %vm628_vm0, %v20422_v42, 0  ;;  %v1041_v10 = vshll.u32 %v1005_v6, 16 }
  0xa4   : > { %v2718_v42 = vrot.slane %v2716_v16, 7  ;;  %v1039_v16 = vshrl.u32 %v1005_v6, 16 }
  0xa5   : > { %v548_v12 = vrot.slane %v546_v36, 7  ;;  %v1043_v36 = vrot.slane %v1041_v10, 1 }
  0xa6   : > { %v2726_v41 = vsel %vm400_vm3, %v2718_v42, %v20585_v27  ;;  %v20719_v42 = vor.u32 %v589_v50, %v588_v29  ;;  %v1010_v50 = vld [vmem:[#allocation2 + $0x1a8] sm:$0x1] }
  0xa7   : > { %17062 = vmatmul.mubr.msk.bf16.gmra.mrb[8].mxu1 %vm172_vm1, %v472_v43  ;;  %v524_v43 = vrot.slane %v522_v57, 7  ;;  %v556_v15 = vsel %vm400_vm3, %v548_v12, %v20678_v39  ;;  %v1009_v12 = vld [vmem:[#allocation2 + $0x1a0] sm:$0xff] }
  0xa8   : > { %17214 = vmatmul.mubr.msk.bf16.gmra.mrb[24].mxu0 %vm172_vm1, %v2375_v2  ;;  %17065 = vmatprep.mubr.msk.bf16.mxu1 %vm172_vm1, %v484_v4  ;;  %v20647_v2 = vor.u32 %v529_v48, %v528_v47  ;;  %v390_v4 = vld [vmem:[#allocation2 + $0x270] sm:$0x80]  ;;  %v2730_v47 = vrot.slane %v2728_v25, 7  ;;  %v2762_v25 = vsel %vm400_vm3, %v2754_v5, %v20624_v26 }
  0xa9   : > { %17217 = vmatprep.mubr.msk.bf16.mxu0 %vm172_vm1, %v2387_v11  ;;  %v540_v11 = vrot.slane %v538_v20, 7  ;;  %v534_v30 = vshrl.u32 %v390_v4, 16  ;;  %v2714_v20 = vsel %vm400_vm3, %v2706_v21, %v20557_v56  ;;  %v20704_v21 = vor.u32 %v577_v34, %v576_v1  ;;  %v2667_v1 = vld [vmem:[#allocation2 + $0x288] sm:$0x80]  ;;  %v1013_v5 = vld [vmem:[#allocation2 + $0x1d0] sm:$0xff] }
  0xaa   : > { %v532_v48 = vsel %vm400_vm3, %v524_v43, %v20647_v2  ;;  %v398_v43 = vld [vmem:[#allocation2 + $0x2d0] sm:$0x80]  ;;  %v2800_v10 = vshrl.u32 %v2667_v1, 16 }
  0xab   : > { %v536_v53 = vrot.slane %v534_v30, 7  ;;  %v20673_v63 = vor.u32 %v541_v61, %v540_v11  ;;  %v1006_v11 = vld [vmem:[#allocation2 + $0x178] sm:$0x1]  ;;  %v2663_v30 = vld [vmem:[#allocation2 + $0x258] sm:$0x80] }
  0xac   : > { %v2776_v17 = vshrl.u32 %v2663_v30, 16  ;;  %v1012_v30 = vld [vmem:[#allocation2 + $0x1c0] sm:$0x1] }
  0xad   : > { %v544_v61 = vsel %vm400_vm3, %v536_v53, %v20673_v63 }
  0xaf   : > { %17066 = vmatmul.mubr.msk.bf16.gmra.mrb[12].mxu1 %vm172_vm1, %v496_v24  ;;  %v396_v24 = vld [vmem:[#allocation2 + $0x2b8] sm:$0x80] }
  0xb0   : > { %17218 = vmatmul.mubr.msk.bf16.gmra.mrb[28].mxu0 %vm172_vm1, %v2399_v52  ;;  %17069 = vmatprep.mubr.msk.bf16.mxu1 %vm172_vm1, %v508_v13  ;;  %v558_v52 = vshrl.u32 %v394_v46, 16  ;;  %v2740_v13 = vshrl.u32 %v2657_v0, 16  ;;  %v570_v57 = vshrl.u32 %v396_v24, 16 }
  0xb1   : > { %17223 = vmatprep.mubr.msk.bf16.mxu0 %vm172_vm1, %v2690_v7  ;;  %v2738_v7 = vsel %vm400_vm3, %v2730_v47, %v20593_v44  ;;  %v1044_v47 = vor.u32 %v1043_v36, %v1039_v16  ;;  %v1014_v16 = vld [vmem:[#allocation2 + $0x1d8] sm:$0x1]  ;;  %v1075_v36 = vshrl.u32 %v1011_v58, 16 }
  0xb2   : > { %v560_v40 = vrot.slane %v558_v52, 7  ;;  %v2742_v62 = vrot.slane %v2740_v13, 7  ;;  %v572_v4 = vrot.slane %v570_v57, 7  ;;  %v1065_v52 = vshll.u32 %v1009_v12, 16 }
  0xb3   : > { %v1058_v57 = vshll.u32 %v1008_v51, 16  ;;  %v1094_v51 = vshll.u32 %v1014_v16, 16  ;;  %v20768_v16 = vld [vmem:[#allocation2 + $0x308] sm:$0xff] }
  0xb4   : > { %v568_v14 = vsel %vm400_vm3, %v560_v40, %v20699_v54  ;;  %v580_v34 = vsel %vm400_vm3, %v572_v4, %v20704_v21  ;;  %v1067_v4 = vrot.slane %v1065_v52, 1 }
  0xb7   : > { %17070 = vmatmul.mubr.msk.bf16.gmra.mrb[16].mxu1 %vm172_vm1, %v520_v19  ;;  %v582_v19 = vshrl.u32 %v398_v43, 16 }
  0xb8   : > { %17224 = vmatmul.mubr.msk.bf16.vlgmr.msra.gmra.mrb[0].mxu0 %vm172_vm1, %v2702_v33  ;;  %17073 = vmatprep.mubr.msk.bf16.mxu1 %vm172_vm1, %v532_v48  ;;  %v2750_v33 = vsel %vm400_vm3, %v2742_v62, %v20617_v23  ;;  %v2764_v48 = vshrl.u32 %v2661_v9, 16  ;;  %v1063_v62 = vshrl.u32 %v1009_v12, 16  ;;  %v1070_v9 = vshll.u32 %v1010_v50, 16 }
  0xb9   : > { %17256 = vmatpush3.bf16.msra.mxu0 %v3152_v60  ;;  %17227 = vmatprep.mubr.msk.bf16.mxu0 %vm172_vm1, %v2714_v20  ;;  %v1046_v60 = vshll.u32 %v1006_v11, 16  ;;  %v1007_v20 = vld [vmem:[#allocation2 + $0x188] sm:$0xff]  ;;  %v584_v53 = vrot.slane %v582_v19, 7  ;;  %v1077_v11 = vshll.u32 %v1011_v58, 16  ;;  %v1060_v19 = vrot.slane %v1058_v57, 1 }
  0xba   : > { %19838 = vmatprep.subr.msk.bf16.mxu0 %vm628_vm0, %v20667_v49  ;;  %v1053_v46 = vshll.u32 %v1007_v20, 16  ;;  %v2766_v0 = vrot.slane %v2764_v48, 7  ;;  %v2802_v48 = vrot.slane %v2800_v10, 7  ;;  %v1018_v58 = vld [vmem:[#allocation2 + $0x208] sm:$0x1] }
  0xbb   : > { %v1048_v24 = vrot.slane %v1046_v60, 1  ;;  %v592_v13 = vsel %vm400_vm3, %v584_v53, %v20719_v42  ;;  %v1079_v60 = vrot.slane %v1077_v11, 1  ;;  %v1751_v53 = vsel %vm628_vm0, %v20543_v28, 0  ;;  %v2675_v10 = vld [vmem:[#allocation2 + $0x2e8] sm:$0x80] }
  0xbc   : > { %v2774_v6 = vsel %vm400_vm3, %v2766_v0, %v20642_v18  ;;  %v2810_v52 = vsel %vm400_vm3, %v2802_v48, %v20678_v39  ;;  %v1096_v39 = vrot.slane %v1094_v51, 1  ;;  %v2848_v48 = vshrl.u32 %v2675_v10, 16 }
  0xbd   : > { %v1049_v40 = vsel %vm1037_vm2, %v1044_v47, %v1048_v24  ;;  %v1087_v47 = vshrl.u32 %v1013_v5, 16  ;;  %v20747_v50 = vor.u32 %v1079_v60, %v1075_v36  ;;  %v1021_v36 = vld [vmem:[#allocation2 + $0x230] sm:$0xff] }
  0xbf   : > { %17074 = vmatmul.mubr.msk.bf16.gmra.mrb[20].mxu1 %vm172_vm1, %v544_v61  ;;  %v2778_v61 = vrot.slane %v2776_v17, 7 }
  0xc0   : > { %17228 = vmatmul.mubr.msk.bf16.gmra.mrb[4].mxu0 %vm172_vm1, %v2726_v41  ;;  %17077 = vmatprep.mubr.msk.bf16.mxu1 %vm172_vm1, %v556_v15  ;;  %v1051_v41 = vshrl.u32 %v1007_v20, 16  ;;  %v1055_v15 = vrot.slane %v1053_v46, 1  ;;  %v1082_v20 = vshll.u32 %v1012_v30, 16  ;;  %v1015_v46 = vld [vmem:[#allocation2 + $0x1e8] sm:$0xff] }
  0xc1   : > { %17231 = vmatprep.mubr.msk.bf16.mxu0 %vm172_vm1, %v2738_v7  ;;  %v2788_v7 = vshrl.u32 %v2665_v59, 16  ;;  %v2786_v43 = vsel %vm400_vm3, %v2778_v61, %v20647_v2  ;;  %v1072_v2 = vrot.slane %v1070_v9, 1  ;;  %v1017_v59 = vld [vmem:[#allocation2 + $0x200] sm:$0xff]  ;;  %v1101_v1 = vshll.u32 %v1015_v46, 16 }
  0xc2   : > { %v1056_v29 = vor.u32 %v1055_v15, %v1051_v41  ;;  %v1084_v28 = vrot.slane %v1082_v20, 1  ;;  %v1113_v41 = vshll.u32 %v1017_v59, 16  ;;  %v1111_v11 = vshrl.u32 %v1017_v59, 16 }
  0xc3   : > { %v2790_v18 = vrot.slane %v2788_v7, 7  ;;  %v2673_v7 = vld [vmem:[#allocation2 + $0x2d0] sm:$0x80] }
  0xc4   : > { %v1061_v17 = vsel %vm1037_vm2, %v1056_v29, %v1060_v19  ;;  %v1115_v29 = vrot.slane %v1113_v41, 1  ;;  %v1118_v19 = vshll.u32 %v1018_v58, 16 }
  0xc5   : > { %v2798_v12 = vsel %vm400_vm3, %v2790_v18, %v20673_v63  ;;  %v1016_v63 = vld [vmem:[#allocation2 + $0x1f0] sm:$0x1]  ;;  %v1019_v18 = vld [vmem:[#allocation2 + $0x218] sm:$0xff] }
  0xc6   : > { %v1106_v9 = vshll.u32 %v1016_v63, 16  ;;  %v1123_v59 = vshrl.u32 %v1019_v18, 16  ;;  %v2867_v63 = vshll.u32 %v20768_v16, 16 }
  0xc7   : > { %17078 = vmatmul.mubr.msk.bf16.gmra.mrb[24].mxu1 %vm172_vm1, %v568_v14  ;;  %v1089_v14 = vshll.u32 %v1013_v5, 16  ;;  %v2836_v5 = vshrl.u32 %v2673_v7, 16  ;;  %v20790_v7 = vld [vmem:[#allocation2 + $0x248] sm:$0xff] }
  0xc8   : > { %17232 = vmatmul.mubr.msk.bf16.gmra.mrb[8].mxu0 %vm172_vm1, %v2750_v33  ;;  %17081 = vmatprep.mubr.msk.bf16.mxu1 %vm172_vm1, %v580_v34  ;;  %v20735_v33 = vor.u32 %v1067_v4, %v1063_v62  ;;  %v2669_v34 = vld [vmem:[#allocation2 + $0x2a0] sm:$0x80]  ;;  %v1085_v62 = vsel %vm1037_vm2, %v20747_v50, %v1084_v28  ;;  %v1103_v4 = vrot.slane %v1101_v1, 1  ;;  %v1108_v20 = vrot.slane %v1106_v9, 1 }
  0xc9   : > { %17235 = vmatprep.mubr.msk.bf16.mxu0 %vm172_vm1, %v2762_v25  ;;  %v2671_v25 = vld [vmem:[#allocation2 + $0x2b8] sm:$0x80]  ;;  %v2812_v0 = vshrl.u32 %v2669_v34, 16  ;;  %v1091_v24 = vrot.slane %v1089_v14, 1  ;;  %v2854_v34 = vrot.slane %v2389_v8, 7 }
  0xca   : > { %v1073_v61 = vsel %vm1037_vm2, %v20735_v33, %v1072_v2  ;;  %v2677_v8 = vld [vmem:[#allocation2 + $0x300] sm:$0x80] }
  0xcb   : > { %v2814_v15 = vrot.slane %v2812_v0, 7  ;;  %v20752_v57 = vor.u32 %v1091_v24, %v1087_v47  ;;  %v2850_v0 = vrot.slane %v2848_v48, 7  ;;  %v2857_v47 = vor.u32 %v2854_v34, %v2391_v55  ;;  %v1022_v24 = vld [vmem:[#allocation2 + $0x238] sm:$0x1] }
  0xcc   : > { %v2860_v1 = vshrl.u32 %v2677_v8, 16  ;;  %v1135_v55 = vshrl.u32 %v1021_v36, 16 }
  0xcd   : > { %v2822_v30 = vsel %vm400_vm3, %v2814_v15, %v20699_v54  ;;  %v1097_v14 = vsel %vm1037_vm2, %v20752_v57, %v1096_v39  ;;  %v2838_v54 = vrot.slane %v2836_v5, 7  ;;  %v1142_v39 = vshll.u32 %v1022_v24, 16  ;;  %v1024_v5 = vld [vmem:[#allocation2 + $0x250] sm:$0x1]  ;;  %v1028_v24 = vld [vmem:[#allocation2 + $0x280] sm:$0x1] }
  0xce   : > { %v2858_v58 = vsel %vm400_vm3, %v2850_v0, %v2857_v47 }
  0xcf   : > { %17082 = vmatmul.mubr.msk.bf16.gmra.mrb[28].mxu1 %vm172_vm1, %v592_v13  ;;  %v2824_v13 = vshrl.u32 %v2671_v25, 16  ;;  %v1125_v25 = vshll.u32 %v1019_v18, 16  ;;  %v1144_v10 = vrot.slane %v1142_v39, 1  ;;  %v1147_v18 = vshrl.u32 %v20790_v7, 16  ;;  %v20846_v39 = vld [vmem:[#allocation2 + $0x2a8] sm:$0xff] }
  0xd0   : > { %17236 = vmatmul.mubr.msk.bf16.gmra.mrb[12].mxu0 %vm172_vm1, %v2774_v6  ;;  %17087 = vmatprep.mubr.msk.bf16.mxu1 %vm172_vm1, %v1049_v40  ;;  %v19884_v40 = vld [vmem:[%s23262_s1 + $0x8] sm:$0x3] }
  0xd1   : > { %17239 = vmatprep.mubr.msk.bf16.mxu0 %vm172_vm1, %v2786_v43  ;;  %v2826_v6 = vrot.slane %v2824_v13, 7  ;;  %v1099_v43 = vshrl.u32 %v1015_v46, 16  ;;  %v1137_v46 = vshll.u32 %v1021_v36, 16  ;;  %v2846_v13 = vsel %vm400_vm3, %v2838_v54, %v20719_v42  ;;  %v20820_v54 = vld [vmem:[#allocation2 + $0x290] sm:$0xff] }
  0xd3   : > { %v2834_v2 = vsel %vm400_vm3, %v2826_v6, %v20704_v21  ;;  %v20771_v60 = vor.u32 %v1103_v4, %v1099_v43  ;;  %v1120_v21 = vrot.slane %v1118_v19, 1  ;;  %v1139_v15 = vrot.slane %v1137_v46, 1  ;;  %v20793_v6 = vld [vmem:[#allocation2 + $0x260] sm:$0xff] }
  0xd4   : > { %v1149_v43 = vshll.u32 %v20790_v7, 16  ;;  %v19885_v46 = vld [vmem:[#allocation2 + $0x1a0] sm:$0xff] }
  0xd5   : > { %v1109_v51 = vsel %vm1037_vm2, %v20771_v60, %v1108_v20  ;;  %v20804_v9 = vor.u32 %v1139_v15, %v1135_v55 }
  0xd7   : > { %17088 = vmatmul.mubr.msk.bf16.vlgmr.msra.gmra.mrb[0].mxu1 %vm172_vm1, %v1061_v17  ;;  %v20775_v17 = vor.u32 %v1115_v29, %v1111_v11  ;;  %v1161_v11 = vshll.u32 %v20793_v6, 16  ;;  %v1026_v29 = vld [vmem:[#allocation2 + $0x268] sm:$0x1]  ;;  %v1145_v34 = vsel %vm1037_vm2, %v20804_v9, %v1144_v10 }
  0xd8   : > { %17120 = vmatpush3.bf16.msra.mxu1 %v1751_v53  ;;  %17240 = vmatmul.mubr.msk.bf16.gmra.mrb[16].mxu0 %vm172_vm1, %v2798_v12  ;;  %v1020_v53 = vld [vmem:[#allocation2 + $0x220] sm:$0x1]  ;;  %v23265_v12 = vshrl.u32 %v20768_v16, 16  ;;  %v1166_v20 = vshll.u32 %v1026_v29, 16  ;;  %v19887_v29 = vld [vmem:[#allocation2 + $0x1d0] sm:$0xff] }
  0xd9   : > { %17091 = vmatprep.mubr.msk.bf16.mxu1 %vm172_vm1, %v1073_v61  ;;  %17243 = vmatprep.mubr.msk.bf16.mxu0 %vm172_vm1, %v2810_v52  ;;  %v1127_v61 = vrot.slane %v1125_v25, 1  ;;  %v1130_v52 = vshll.u32 %v1020_v53, 16  ;;  %v1121_v28 = vsel %vm1037_vm2, %v20775_v17, %v1120_v21  ;;  %v1163_v36 = vrot.slane %v1161_v11, 1  ;;  %v20818_v25 = vld [vmem:[#allocation2 + $0x278] sm:$0xff] }
  0xda   : > { %19834 = vmatprep.subr.msk.bf16.mxu1 %vm628_vm0, %v19884_v40  ;;  %v2866_v41 = vrot.slane %v23265_v12, 7  ;;  %v1173_v8 = vshll.u32 %v20818_v25, 16  ;;  %v1168_v47 = vrot.slane %v1166_v20, 1  ;;  %v1484_v12 = vld [vmem:[#allocation2 + $0x1e0] sm:$0x80] }
  0xdb   : > { %v20796_v42 = vor.u32 %v1127_v61, %v1123_v59  ;;  %v1132_v40 = vrot.slane %v1130_v52, 1  ;;  %v1030_v59 = vld [vmem:[#allocation2 + $0x298] sm:$0x1]  ;;  %v1171_v52 = vshrl.u32 %v20818_v25, 16 }
  0xdc   : > { %v2869_v4 = vor.u32 %v2867_v63, %v2866_v41  ;;  %v1183_v41 = vshrl.u32 %v20820_v54, 16  ;;  %v1190_v15 = vshll.u32 %v1030_v59, 16 }
  0xdd   : > { %v1133_v19 = vsel %vm1037_vm2, %v20796_v42, %v1132_v40  ;;  %v20850_v40 = vld [vmem:[#allocation2 + $0x2c0] sm:$0xff] }
  0xdf   : > { %17092 = vmatmul.mubr.msk.bf16.gmra.mrb[4].mxu1 %vm172_vm1, %v1085_v62  ;;  %v2862_v62 = vrot.slane %v2860_v1, 7 }
  0xe0   : > { %17244 = vmatmul.mubr.msk.bf16.gmra.mrb[20].mxu0 %vm172_vm1, %v2822_v30  ;;  %17095 = vmatprep.mubr.msk.bf16.mxu1 %vm172_vm1, %v1097_v14  ;;  %v1151_v30 = vrot.slane %v1149_v43, 1  ;;  %v1154_v14 = vshll.u32 %v1024_v5, 16  ;;  %v1197_v5 = vshll.u32 %v20846_v39, 16 }
  0xe1   : > { %17247 = vmatprep.mubr.msk.bf16.mxu0 %vm172_vm1, %v2834_v2  ;;  %v1159_v2 = vshrl.u32 %v20793_v6, 16  ;;  %v2870_v48 = vsel %vm400_vm3, %v2862_v62, %v2869_v4  ;;  %v19886_v62 = vld [vmem:[#allocation2 + $0x1b8] sm:$0xff] }
  0xe2   : > { %v20827_v21 = vor.u32 %v1151_v30, %v1147_v18  ;;  %v1156_v53 = vrot.slane %v1154_v14, 1  ;;  %v1032_v30 = vld [vmem:[#allocation2 + $0x2b0] sm:$0x1]  ;;  %v1209_v14 = vshll.u32 %v20850_v40, 16  ;;  %v1199_v20 = vrot.slane %v1197_v5, 1 }
  0xe3   : > { %v20833_v0 = vor.u32 %v1163_v36, %v1159_v2  ;;  %v1195_v36 = vshrl.u32 %v20846_v39, 16 }
  0xe4   : > { %v1157_v61 = vsel %vm1037_vm2, %v20827_v21, %v1156_v53  ;;  %v1202_v53 = vshll.u32 %v1032_v30, 16 }
  0xe5   : > { %v1169_v1 = vsel %vm1037_vm2, %v20833_v0, %v1168_v47  ;;  %v1207_v47 = vshrl.u32 %v20850_v40, 16 }
  0xe7   : > { %17096 = vmatmul.mubr.msk.bf16.gmra.mrb[8].mxu1 %vm172_vm1, %v1109_v51  ;;  %v1185_v51 = vshll.u32 %v20820_v54, 16 }
  0xe8   : > { %17248 = vmatmul.mubr.msk.bf16.gmra.mrb[24].mxu0 %vm172_vm1, %v2846_v13  ;;  %17099 = vmatprep.mubr.msk.bf16.mxu1 %vm172_vm1, %v1121_v28  ;;  %v1175_v13 = vrot.slane %v1173_v8, 1  ;;  %v1178_v28 = vshll.u32 %v1028_v24, 16  ;;  %v1211_v24 = vrot.slane %v1209_v14, 1 }
  0xe9   : > { %17251 = vmatprep.mubr.msk.bf16.mxu0 %vm172_vm1, %v2858_v58  ;;  %v1187_v55 = vrot.slane %v1185_v51, 1  ;;  %v3622_v58 = vsel %vm628_vm0, %v20667_v49, 0 }
  0xea   : > { %v20857_v4 = vor.u32 %v1175_v13, %v1171_v52  ;;  %v1180_v10 = vrot.slane %v1178_v28, 1  ;;  %v19888_v13 = vld [vmem:[#allocation2 + $0x1e8] sm:$0xff]  ;;  %v20883_v28 = vor.u32 %v1199_v20, %v1195_v36 }
  0xeb   : > { %v20863_v49 = vor.u32 %v1187_v55, %v1183_v41 }
  0xef   : > { %17100 = vmatmul.mubr.msk.bf16.gmra.mrb[12].mxu1 %vm172_vm1, %v1133_v19  ;;  %v1192_v19 = vrot.slane %v1190_v15, 1  ;;  %v19889_v15 = vld [vmem:[#allocation2 + $0x200] sm:$0xff] }
  0xf0   : > { %17252 = vmatmul.mubr.msk.bf16.gmra.mrb[28].mxu0 %vm172_vm1, %v2870_v48  ;;  %17103 = vmatprep.mubr.msk.bf16.mxu1 %vm172_vm1, %v1145_v34  ;;  %v1034_v48 = vld [vmem:[#allocation2 + $0x2c8] sm:$0x1]  ;;  %v1181_v34 = vsel %vm1037_vm2, %v20857_v4, %v1180_v10  ;;  %v1036_v10 = vld [vmem:[#allocation2 + $0x2e0] sm:$0x1] }
  0xf1   : > { %17257 = vmatprep.mubr.msk.bf16.mxu0 %vm172_vm1, %v19885_v46  ;;  %v1193_v46 = vsel %vm1037_vm2, %v20863_v49, %v1192_v19  ;;  %v1214_v59 = vshll.u32 %v1034_v48, 16 }
  0xf7   : > { %17104 = vmatmul.mubr.msk.bf16.gmra.mrb[16].mxu1 %vm172_vm1, %v1157_v61  ;;  %v20876_v61 = vld [vmem:[#allocation2 + $0x2d8] sm:$0xff] }
  0xf8   : > { %17258 = vmatmul.mubr.msk.bf16.vlgmr.msra.gmra.mrb[0].mxu0 %vm172_vm1, %v19886_v62  ;;  %17107 = vmatprep.mubr.msk.bf16.mxu1 %vm172_vm1, %v1169_v1  ;;  %v1204_v1 = vrot.slane %v1202_v53, 1  ;;  %v1221_v55 = vshll.u32 %v20876_v61, 16  ;;  %v1216_v62 = vrot.slane %v1214_v59, 1  ;;  %v1219_v30 = vshrl.u32 %v20876_v61, 16 }
  0xf9   : > { %17290 = vmatpush3.bf16.msra.mxu0 %v3622_v58  ;;  %17261 = vmatprep.mubr.msk.bf16.mxu0 %vm172_vm1, %v19887_v29  ;;  %v20889_v58 = vor.u32 %v1211_v24, %v1207_v47  ;;  %v1476_v29 = vld [vmem:[#allocation2 + $0x180] sm:$0x80] }
  0xfa   : > { %v1205_v19 = vsel %vm1037_vm2, %v20883_v28, %v1204_v1  ;;  %v1223_v48 = vrot.slane %v1221_v55, 1  ;;  %v1509_v53 = vshrl.u32 %v1476_v29, 16 }
  0xfb   : > { %v1217_v20 = vsel %vm1037_vm2, %v20889_v58, %v1216_v62 }
  0xfc   : > { %v20903_v24 = vor.u32 %v1223_v48, %v1219_v30  ;;  %v1511_v1 = vrot.slane %v1509_v53, 7  ;;  %v1482_v53 = vld [vmem:[#allocation2 + $0x1c8] sm:$0x80] }
  0xff   : > { %17108 = vmatmul.mubr.msk.bf16.gmra.mrb[20].mxu1 %vm172_vm1, %v1181_v34  ;;  %v1226_v34 = vshll.u32 %v1036_v10, 16  ;;  %v1480_v10 = vld [vmem:[#allocation2 + $0x1b0] sm:$0x80] }
 0x100   : > { %17262 = vmatmul.mubr.msk.bf16.gmra.mrb[4].mxu0 %vm172_vm1, %v19888_v13  ;;  %17111 = vmatprep.mubr.msk.bf16.mxu1 %vm172_vm1, %v1193_v46  ;;  %v19890_v46 = vld [vmem:[#allocation2 + $0x218] sm:$0xff]  ;;  %v19891_v13 = vld [vmem:[#allocation2 + $0x230] sm:$0xff] }
 0x101   : > { %17265 = vmatprep.mubr.msk.bf16.mxu0 %vm172_vm1, %v19889_v15  ;;  %v1228_v59 = vrot.slane %v1226_v34, 1  ;;  %v1478_v15 = vld [vmem:[#allocation2 + $0x198] sm:$0x80]  ;;  %v19893_v34 = vld [vmem:[#allocation2 + $0x260] sm:$0xff] }
 0x102   : > { %v1521_v29 = vshrl.u32 %v1478_v15, 16  ;;  %v1545_v15 = vshrl.u32 %v1482_v53, 16  ;;  %v1490_v53 = vld [vmem:[#allocation2 + $0x228] sm:$0x80] }
 0x103   : > { %v1229_v62 = vsel %vm1037_vm2, %v20903_v24, %v1228_v59 }
 0x104   : > { %v1523_v48 = vrot.slane %v1521_v29, 7  ;;  %v19895_v29 = vld [vmem:[#allocation2 + $0x290] sm:$0xff] }
 0x106   : > { %v1531_v59 = vsel %vm400_vm3, %v1523_v48, %v20517_v45  ;;  %v1486_v45 = vld [vmem:[#allocation2 + $0x1f8] sm:$0x80] }
 0x107   : > { %17112 = vmatmul.mubr.msk.bf16.gmra.mrb[24].mxu1 %vm172_vm1, %v1205_v19  ;;  %v1519_v19 = vsel %vm400_vm3, %v1511_v1, %v20506_v38  ;;  %v1557_v38 = vshrl.u32 %v1484_v12, 16 }
 0x108   : > { %17266 = vmatmul.mubr.msk.bf16.gmra.mrb[8].mxu0 %vm172_vm1, %v19890_v46  ;;  %17115 = vmatprep.mubr.msk.bf16.mxu1 %vm172_vm1, %v1217_v20  ;;  %v1533_v46 = vshrl.u32 %v1480_v10, 16  ;;  %v19892_v20 = vld [vmem:[#allocation2 + $0x248] sm:$0xff]  ;;  %v19894_v10 = vld [vmem:[#allocation2 + $0x278] sm:$0xff] }
 0x109   : > { %17269 = vmatprep.mubr.msk.bf16.mxu0 %vm172_vm1, %v19891_v13 }
 0x10a   : > { %v1535_v13 = vrot.slane %v1533_v46, 7  ;;  %v1488_v46 = vld [vmem:[#allocation2 + $0x210] sm:$0x80] }
 0x10c   : > { %v1543_v1 = vsel %vm400_vm3, %v1535_v13, %v20549_v37  ;;  %v1569_v37 = vshrl.u32 %v1486_v45, 16  ;;  %v1492_v13 = vld [vmem:[#allocation2 + $0x240] sm:$0x80] }
 0x10e   : > { %v1571_v48 = vrot.slane %v1569_v37, 7 }
 0x10f   : > { %17116 = vmatmul.mubr.msk.bf16.gmra.mrb[28].mxu1 %vm172_vm1, %v1229_v62  ;;  %v1547_v62 = vrot.slane %v1545_v15, 7 }
 0x110   : > { %17270 = vmatmul.mubr.msk.bf16.gmra.mrb[12].mxu0 %vm172_vm1, %v19892_v20  ;;  %17121 = vmatprep.mubr.msk.bf16.mxu1 %vm172_vm1, %v1519_v19  ;;  %v1559_v19 = vrot.slane %v1557_v38, 7  ;;  %v1605_v38 = vshrl.u32 %v1492_v13, 16 }
 0x111   : > { %17273 = vmatprep.mubr.msk.bf16.mxu0 %vm172_vm1, %v19893_v34  ;;  %v1555_v12 = vsel %vm400_vm3, %v1547_v62, %v20557_v56  ;;  %v3348_v56 = vld [vmem:[#allocation2 + $0x1a8] sm:$0x1] }
 0x112   : > { %v1567_v20 = vsel %vm400_vm3, %v1559_v19, %v20585_v27  ;;  %v1593_v27 = vshrl.u32 %v1490_v53, 16  ;;  %v3352_v19 = vld [vmem:[#allocation2 + $0x1d8] sm:$0x1]  ;;  %v3354_v53 = vld [vmem:[#allocation2 + $0x1f0] sm:$0x1] }
 0x117   : > { %17122 = vmatmul.mubr.msk.bf16.vlgmr.msra.gmra.mrb[0].mxu1 %vm172_vm1, %v1531_v59  ;;  %v1579_v59 = vsel %vm400_vm3, %v1571_v48, %v20593_v44  ;;  %v1607_v44 = vrot.slane %v1605_v38, 7  ;;  %v1647_v38 = vrot.slane %v1183_v41, 7 }
 0x118   : > { %18548 = vmatpush3.bf16.msra.mxu1 %v19975_v3  ;;  %17274 = vmatmul.mubr.msk.bf16.gmra.mrb[16].mxu0 %vm172_vm1, %v19894_v10  ;;  %v1581_v3 = vshrl.u32 %v1488_v46, 16  ;;  %v1494_v10 = vld [vmem:[#allocation2 + $0x258] sm:$0x80] }
 0x119   : > { %17125 = vmatprep.mubr.msk.bf16.mxu1 %vm172_vm1, %v1543_v1  ;;  %17277 = vmatprep.mubr.msk.bf16.mxu0 %vm172_vm1, %v19895_v29  ;;  %v3387_v1 = vshll.u32 %v3348_v56, 16  ;;  %v3350_v29 = vld [vmem:[#allocation2 + $0x1c0] sm:$0x1]  ;;  %v1617_v46 = vshrl.u32 %v1494_v10, 16  ;;  %v1500_v56 = vld [vmem:[#allocation2 + $0x2a0] sm:$0x80] }
 0x11a   : > { %v1583_v34 = vrot.slane %v1581_v3, 7  ;;  %v3399_v37 = vshll.u32 %v3350_v29, 16  ;;  %v3411_v3 = vshll.u32 %v3352_v19, 16  ;;  %v1502_v29 = vld [vmem:[#allocation2 + $0x2b8] sm:$0x80] }
 0x11b   : > { %v3389_v62 = vrot.slane %v3387_v1, 1  ;;  %v1504_v19 = vld [vmem:[#allocation2 + $0x2d0] sm:$0x80] }
 0x11c   : > { %v1591_v15 = vsel %vm400_vm3, %v1583_v34, %v20617_v23  ;;  %v3401_v48 = vrot.slane %v3399_v37, 1  ;;  %v3413_v13 = vrot.slane %v3411_v3, 1 }
 0x11f   : > { %17126 = vmatmul.mubr.msk.bf16.gmra.mrb[4].mxu1 %vm172_vm1, %v1555_v12 }
 0x120   : > { %17278 = vmatmul.mubr.msk.bf16.gmra.mrb[20].mxu0 %vm172_vm1, %v20464_v32  ;;  %17129 = vmatprep.mubr.msk.bf16.mxu1 %vm172_vm1, %v1567_v20  ;;  %v1611_v32 = vrot.slane %v1147_v18, 7  ;;  %v1496_v18 = vld [vmem:[#allocation2 + $0x270] sm:$0x80]  ;;  %v1635_v20 = vrot.slane %v1171_v52, 7 }
 0x121   : > { %17281 = vmatprep.mubr.msk.bf16.mxu0 %vm172_vm1, %v20467_v35  ;;  %v1595_v35 = vrot.slane %v1593_v27, 7 }
 0x122   : > { %v1614_v23 = vor.u32 %v1611_v32, %v1149_v43  ;;  %v3390_v43 = vsel %vm1037_vm2, %v20735_v33, %v3389_v62  ;;  %v1638_v52 = vor.u32 %v1635_v20, %v1173_v8  ;;  %v1498_v33 = vld [vmem:[#allocation2 + $0x288] sm:$0x80]  ;;  %v3423_v32 = vshll.u32 %v3354_v53, 16  ;;  %v3364_v53 = vld [vmem:[#allocation2 + $0x268] sm:$0x1] }
 0x123   : > { %v1603_v45 = vsel %vm400_vm3, %v1595_v35, %v20624_v26  ;;  %v1619_v26 = vrot.slane %v1617_v46, 7  ;;  %v1653_v35 = vshrl.u32 %v1500_v56, 16  ;;  %v1659_v8 = vrot.slane %v1195_v36, 7 }
 0x124   : > { %v1615_v12 = vsel %vm400_vm3, %v1607_v44, %v1614_v23  ;;  %v3414_v44 = vsel %vm1037_vm2, %v20752_v57, %v3413_v13  ;;  %v3425_v10 = vrot.slane %v3423_v32, 1  ;;  %v1677_v20 = vshrl.u32 %v1504_v19, 16 }
 0x125   : > { %v1655_v62 = vrot.slane %v1653_v35, 7  ;;  %v1662_v36 = vor.u32 %v1659_v8, %v1197_v5  ;;  %v1683_v5 = vrot.slane %v1219_v30, 7  ;;  %v3483_v32 = vshll.u32 %v3364_v53, 16 }
 0x127   : > { %17130 = vmatmul.mubr.msk.bf16.gmra.mrb[8].mxu1 %vm172_vm1, %v1579_v59  ;;  %v3356_v59 = vld [vmem:[#allocation2 + $0x208] sm:$0x1]  ;;  %v1663_v37 = vsel %vm400_vm3, %v1655_v62, %v1662_v36  ;;  %v3485_v8 = vrot.slane %v3483_v32, 1 }
 0x128   : > { %17282 = vmatmul.mubr.msk.bf16.gmra.mrb[24].mxu0 %vm172_vm1, %v20493_v22  ;;  %17133 = vmatprep.mubr.msk.bf16.mxu1 %vm172_vm1, %v1591_v15  ;;  %v1623_v22 = vrot.slane %v1159_v2, 7  ;;  %v1641_v15 = vshrl.u32 %v1498_v33, 16  ;;  %v3435_v23 = vshll.u32 %v3356_v59, 16  ;;  %v3362_v33 = vld [vmem:[#allocation2 + $0x250] sm:$0x1] }
 0x129   : > { %17285 = vmatprep.mubr.msk.bf16.mxu0 %vm172_vm1, %v20580_v31  ;;  %v1629_v31 = vshrl.u32 %v1496_v18, 16  ;;  %v3358_v18 = vld [vmem:[#allocation2 + $0x220] sm:$0x1] }
 0x12a   : > { %v1626_v2 = vor.u32 %v1623_v22, %v1161_v11  ;;  %v3402_v11 = vsel %vm1037_vm2, %v20747_v50, %v3401_v48  ;;  %v1643_v41 = vrot.slane %v1641_v15, 7  ;;  %v1650_v50 = vor.u32 %v1647_v38, %v1185_v51 }
 0x12b   : > { %v1631_v34 = vrot.slane %v1629_v31, 7  ;;  %v3437_v57 = vrot.slane %v3435_v23, 1  ;;  %v3426_v22 = vsel %vm1037_vm2, %v20771_v60, %v3425_v10  ;;  %v1671_v51 = vrot.slane %v1207_v47, 7 }
 0x12c   : > { %v1627_v27 = vsel %vm400_vm3, %v1619_v26, %v1626_v2  ;;  %v1651_v46 = vsel %vm400_vm3, %v1643_v41, %v1650_v50  ;;  %v3447_v31 = vshll.u32 %v3358_v18, 16  ;;  %v1679_v48 = vrot.slane %v1677_v20, 7 }
 0x12d   : > { %v1639_v1 = vsel %vm400_vm3, %v1631_v34, %v1638_v52  ;;  %v3438_v3 = vsel %vm1037_vm2, %v20775_v17, %v3437_v57  ;;  %v1674_v47 = vor.u32 %v1671_v51, %v1209_v14  ;;  %v1686_v17 = vor.u32 %v1683_v5, %v1221_v55  ;;  %v1506_v34 = vld [vmem:[#allocation2 + $0x2e8] sm:$0x80]  ;;  %v3372_v57 = vld [vmem:[#allocation2 + $0x2c8] sm:$0x1] }
 0x12e   : > { %v3449_v30 = vrot.slane %v3447_v31, 1  ;;  %v1689_v56 = vshrl.u32 %v1506_v34, 16  ;;  %v3471_v38 = vshll.u32 %v3362_v33, 16  ;;  %v3486_v50 = vsel %vm1037_vm2, %v20833_v0, %v3485_v8  ;;  %v3378_v31 = vld [vmem:[#allocation2 + $0x310] sm:$0x1] }
 0x12f   : > { %17134 = vmatmul.mubr.msk.bf16.gmra.mrb[12].mxu1 %vm172_vm1, %v1603_v45  ;;  %v3360_v45 = vld [vmem:[#allocation2 + $0x238] sm:$0x1]  ;;  %v1687_v15 = vsel %vm400_vm3, %v1679_v48, %v1686_v17  ;;  %v3531_v19 = vshll.u32 %v3372_v57, 16  ;;  %v3564_v20 = vrot.slane %v2867_v63, 1  ;;  %v15629_v63 = vld [vmem:[%s23262_s1 + $0x14] sm:$0x3] }
 0x130   : > { %17286 = vmatmul.mubr.msk.bf16.gmra.mrb[28].mxu0 %vm172_vm1, %v20768_v16  ;;  %17137 = vmatprep.mubr.msk.bf16.mxu1 %vm172_vm1, %v1615_v12  ;;  %v1665_v12 = vshrl.u32 %v1502_v29, 16  ;;  %v3459_v26 = vshll.u32 %v3360_v45, 16  ;;  %v3473_v35 = vrot.slane %v3471_v38, 1  ;;  %v3370_v29 = vld [vmem:[#allocation2 + $0x2b0] sm:$0x1] }
 0x131   : > { %17291 = vmatprep.mubr.msk.bf16.mxu0 %vm172_vm1, %v3390_v43  ;;  %v20991_v43 = vld [vmem:[#allocation2 + $0x2f0] sm:$0xff]  ;;  %v3519_v18 = vshll.u32 %v3370_v29, 16  ;;  %v3533_v45 = vrot.slane %v3531_v19, 1  ;;  %19839 = vmatprep.subr.msk.bf16.mxu1 %vm628_vm0, %v15629_v63 }
 0x132   : > { %v1667_v60 = vrot.slane %v1665_v12, 7  ;;  %v1693_v2 = vshrl.u32 %v20991_v43, 16  ;;  %v3461_v52 = vrot.slane %v3459_v26, 1  ;;  %v1696_v14 = vshll.u32 %v20991_v43, 16 }
 0x134   : > { %v1675_v13 = vsel %vm400_vm3, %v1667_v60, %v1674_v47  ;;  %v1695_v59 = vrot.slane %v1693_v2, 7  ;;  %v3462_v55 = vsel %vm1037_vm2, %v20804_v9, %v3461_v52  ;;  %v3474_v9 = vsel %vm1037_vm2, %v20827_v21, %v3473_v35  ;;  %v21081_v47 = vld [vmem:[%s23262_s1 + $0x16] sm:$0x3] }
 0x135   : > { %v3552_v51 = vrot.slane %v1696_v14, 1 }
 0x137   : > { %17138 = vmatmul.mubr.msk.bf16.gmra.mrb[16].mxu1 %vm172_vm1, %v1627_v27  ;;  %v3450_v27 = vsel %vm1037_vm2, %v20796_v42, %v3449_v30  ;;  %v3366_v42 = vld [vmem:[#allocation2 + $0x280] sm:$0x1] }
 0x138   : > { %17292 = vmatmul.mubr.msk.bf16.vlgmr.msra.gmra.mrb[0].mxu0 %vm172_vm1, %v3402_v11  ;;  %17141 = vmatprep.mubr.msk.bf16.mxu1 %vm172_vm1, %v1639_v1  ;;  %v1691_v11 = vrot.slane %v1689_v56, 7  ;;  %v1698_v1 = vor.u32 %v1696_v14, %v1695_v59  ;;  %v3495_v41 = vshll.u32 %v3366_v42, 16 }
 0x139   : > { %17295 = vmatprep.mubr.msk.bf16.mxu0 %vm172_vm1, %v3414_v44  ;;  %v3368_v44 = vld [vmem:[#allocation2 + $0x298] sm:$0x1] }
 0x13a   : > { %v1699_v23 = vsel %vm400_vm3, %v1691_v11, %v1698_v1  ;;  %v3507_v10 = vshll.u32 %v3368_v44, 16  ;;  %v3497_v62 = vrot.slane %v3495_v41, 1  ;;  %v21096_v11 = vld [vmem:[%s23263_s2] ss:$0 sm:$0xff] }
 0x13c   : > { %v3509_v36 = vrot.slane %v3507_v10, 1  ;;  %v3498_v21 = vsel %vm1037_vm2, %v20857_v4, %v3497_v62 }
 0x13e   : > { %v3510_v0 = vsel %vm1037_vm2, %v20863_v49, %v3509_v36  ;;  %v3534_v49 = vsel %vm1037_vm2, %v20889_v58, %v3533_v45 }
 0x13f   : > { %17142 = vmatmul.mubr.msk.bf16.gmra.mrb[20].mxu1 %vm172_vm1, %v1651_v46  ;;  %v3374_v46 = vld [vmem:[#allocation2 + $0x2e0] sm:$0x1] }
 0x140   : > { %17296 = vmatmul.mubr.msk.bf16.gmra.mrb[4].mxu0 %vm172_vm1, %v3426_v22  ;;  %17145 = vmatprep.mubr.msk.bf16.mxu1 %vm172_vm1, %v1663_v37  ;;  %v3376_v22 = vld [vmem:[#allocation2 + $0x2f8] sm:$0x1]  ;;  %v3543_v12 = vshll.u32 %v3374_v46, 16 }
 0x141   : > { %17299 = vmatprep.mubr.msk.bf16.mxu0 %vm172_vm1, %v3438_v3 }
 0x147   : > { %17146 = vmatmul.mubr.msk.bf16.gmra.mrb[24].mxu1 %vm172_vm1, %v1675_v13 }
 0x148   : > { %17300 = vmatmul.mubr.msk.bf16.gmra.mrb[8].mxu0 %vm172_vm1, %v3450_v27  ;;  %17149 = vmatprep.mubr.msk.bf16.mxu1 %vm172_vm1, %v1687_v15 }
 0x149   : > { %17303 = vmatprep.mubr.msk.bf16.mxu0 %vm172_vm1, %v3462_v55 }
 0x14f   : > { %17150 = vmatmul.mubr.msk.bf16.gmra.mrb[28].mxu1 %vm172_vm1, %v1699_v23 }
 0x150   : > { %17304 = vmatmul.mubr.msk.bf16.gmra.mrb[12].mxu0 %vm172_vm1, %v3474_v9  ;;  %17171 = vmatprep.mubr.msk.bf16.mxu1 %vm172_vm1, %v20790_v7  ;;  %v3521_v7 = vrot.slane %v3519_v18, 1 }
 0x151   : > { %17307 = vmatprep.mubr.msk.bf16.mxu0 %vm172_vm1, %v3486_v50 }
 0x152   : > { %v3522_v4 = vsel %vm1037_vm2, %v20883_v28, %v3521_v7  ;;  %v3553_v28 = vor.u32 %v3552_v51, %v1693_v2 }
 0x157   : > { %17172 = vmatmul.mubr.msk.bf16.vlgmr.msra.gmra.mrb[16].mxu1 %vm172_vm1, %v20793_v6  ;;  %v3555_v6 = vshll.u32 %v3376_v22, 16 }
 0x158   : > { %17308 = vmatmul.mubr.msk.bf16.gmra.mrb[16].mxu0 %vm172_vm1, %v3498_v21  ;;  %17175 = vmatprep.mubr.msk.bf16.mxu1 %vm172_vm1, %v20818_v25  ;;  %v3545_v25 = vrot.slane %v3543_v12, 1 }
 0x159   : > { %17311 = vmatprep.mubr.msk.bf16.mxu0 %vm172_vm1, %v3510_v0  ;;  %v3557_v37 = vrot.slane %v3555_v6, 1 }
 0x15a   : > { %v3546_v58 = vsel %vm1037_vm2, %v20903_v24, %v3545_v25 }
 0x15b   : > { %v3558_v5 = vsel %vm1037_vm2, %v3553_v28, %v3557_v37 }
 0x15f   : > { %17176 = vmatmul.mubr.msk.bf16.gmra.mrb[20].mxu1 %vm172_vm1, %v20820_v54  ;;  %v3567_v54 = vshll.u32 %v3378_v31, 16 }
 0x160   : > { %17312 = vmatmul.mubr.msk.bf16.gmra.mrb[20].mxu0 %vm172_vm1, %v3522_v4  ;;  %17179 = vmatprep.mubr.msk.bf16.mxu1 %vm172_vm1, %v20846_v39  ;;  %v23300_v39 = vshrl.u32 %v20768_v16, 16  ;;  %v4069_v16 = vld [vmem:[#allocation2 + $0x170] sm:$0xff] }
 0x161   : > { %17315 = vmatprep.mubr.msk.bf16.mxu0 %vm172_vm1, %v3534_v49  ;;  %v3569_v24 = vrot.slane %v3567_v54, 1 }
 0x162   : > { %v3565_v3 = vor.u32 %v3564_v20, %v23300_v39 }
 0x164   : > { %v3570_v26 = vsel %vm1037_vm2, %v3565_v3, %v3569_v24 }
 0x167   : > { %17180 = vmatmul.mubr.msk.bf16.gmra.mrb[24].mxu1 %vm172_vm1, %v20850_v40  ;;  %v4135_v40 = vsel %vm628_vm0, %v15629_v63, 0 }
 0x168   : > { %17316 = vmatmul.mubr.msk.bf16.gmra.mrb[24].mxu0 %vm172_vm1, %v3546_v58  ;;  %17183 = vmatprep.mubr.msk.bf16.mxu1 %vm172_vm1, %v20876_v61  ;;  %v4068_v61 = vld [vmem:[#allocation2 + $0x158] sm:$0xff] }
 0x169   : > { %17319 = vmatprep.mubr.msk.bf16.mxu0 %vm172_vm1, %v3558_v5  ;;  %17324 = vmatpush3.bf16.msra.mxu1 %v4135_v40 }
 0x16f   : > { %17184 = vmatmul.mubr.msk.bf16.gmra.mrb[28].mxu1 %vm172_vm1, %v20991_v43  ;;  %v15628_v43 = vld [vmem:[%s23262_s1 + $0x12] sm:$0x3] }
 0x170   : > { %17320 = vmatmul.mubr.msk.bf16.gmra.mrb[28].mxu0 %vm172_vm1, %v3570_v26  ;;  %17325 = vmatprep.mubr.msk.bf16.mxu1 %vm172_vm1, %v4068_v61  ;;  %v4347_v60 = vsel %vm628_vm0, %v15628_v43, 0 }
 0x171   : > { %19840 = vmatprep.subr.msk.bf16.mxu1 %vm628_vm0, %v15628_v43 }
 0x177   : > { %17326 = vmatmul.mubr.msk.bf16.vlgmr.msra.gmra.mrb[32].mxu1 %vm172_vm1, %v4069_v16 }
 0x178   : > { %17358 = vmatpush3.bf16.msra.mxu1 %v4347_v60 }
 0x179   : > { %19841 = vmatprep.subr.msk.bf16.mxu1 %vm628_vm0, %v21081_v47 }
 0x1ea   : > { %v17123_v2 = vpop.f32.mrb[0].mxu1 }
 0x1eb   : > { %v1787_v30 = vpop.f32.mrb[1].mxu1 }
 0x1ec   : > { %v17124_v48 = vpop.f32.mrb[2].mxu1 }
 0x1ed   : > { %v1790_v17 = vpop.f32.mrb[3].mxu1 }
 0x1f2   : > { %v17127_v34 = vpop.f32.mrb[4].mxu1 }
 0x1f3   : > { %v1803_v52 = vpop.f32.mrb[5].mxu1 }
 0x1f4   : > { %v17128_v33 = vpop.f32.mrb[6].mxu1 }
 0x1f5   : > { %v1806_v53 = vpop.f32.mrb[7].mxu1 }
 0x1fa   : > { %v17131_v13 = vpop.f32.mrb[8].mxu1 }
 0x1fb   : > { %v1819_v56 = vpop.f32.mrb[9].mxu1 }
 0x1fc   : > { %v17132_v59 = vpop.f32.mrb[10].mxu1 }
 0x1fd   : > { %v1822_v14 = vpop.f32.mrb[11].mxu1 }
 0x202   : > { %v21085_v27 = vpop.f32.mrb[12].mxu1 }
 0x203   : > { %v21087_v15 = vpop.f32.mrb[13].mxu1 }
 0x204   : > { %v21089_v38 = vpop.f32.mrb[14].mxu1 }
 0x205   : > { %v21091_v55 = vpop.f32.mrb[15].mxu1 }
 0x20b   : > { %v17293_v32 = vpop.f32.mrb[0].mxu0 }
 0x20c   : > { %v18549_v1 = vadd.f32 %v17293_v32, %v17123_v2  ;;  %v3658_v35 = vpop.f32.mrb[1].mxu0 }
 0x20d   : > { %v18550_v8 = vadd.f32 %v3658_v35, %v1787_v30  ;;  %v17294_v42 = vpop.f32.mrb[2].mxu0 }
 0x20e   : > { %v21099_v44 = vadd.f32 %v18549_v1, %v21096_v11  ;;  %v18551_v23 = vadd.f32 %v17294_v42, %v17124_v48  ;;  %v3661_v9 = vpop.f32.mrb[3].mxu0 }
 0x20f   : > { %v21102_v41 = vadd.f32 %v18550_v8, %v21096_v11  ;;  %v18552_v50 = vadd.f32 %v3661_v9, %v1790_v17 }
 0x210   : > { %v21105_v10 = vadd.f32 %v18551_v23, %v21096_v11  ;;  %v23297_v36 = vmax.f32 %v21099_v44, 0.0 }
 0x211   : > { %v21108_v62 = vadd.f32 %v18552_v50, %v21096_v11  ;;  %v23296_v57 = vmax.f32 %v21102_v41, 0.0 }
 0x212   : > { %v23295_v29 = vmax.f32 %v21105_v10, 0.0 }
 0x213   : > { %v23294_v21 = vmax.f32 %v21108_v62, 0.0  ;;  %v17297_v18 = vpop.f32.mrb[4].mxu0 }
 0x214   : > { %v3921_v0 = vpack.c.bf16 %v23295_v29, %v23297_v36  ;;  %v18553_v19 = vadd.f32 %v17297_v18, %v17127_v34  ;;  %v3674_v7 = vpop.f32.mrb[5].mxu0 }
 0x215   : > { %v3920_v45 = vpack.c.bf16 %v23294_v21, %v23296_v57  ;;  %v18554_v46 = vadd.f32 %v3674_v7, %v1803_v52  ;;  %v17298_v22 = vpop.f32.mrb[6].mxu0 }
 0x216   : > { %3937 = vst.msk [vmem:[#allocation2 + $0x1a0] sm:$0xff] %vm172_vm1, %v3921_v0  ;;  %v21124_v4 = vadd.f32 %v18553_v19, %v21096_v11  ;;  %v18555_v12 = vadd.f32 %v17298_v22, %v17128_v33  ;;  %v3677_v49 = vpop.f32.mrb[7].mxu0 }
 0x217   : > { %3936 = vst.msk [vmem:[#allocation2 + $0x188] sm:$0xff] %vm172_vm1, %v3920_v45  ;;  %v21128_v51 = vadd.f32 %v18554_v46, %v21096_v11  ;;  %v18556_v6 = vadd.f32 %v3677_v49, %v1806_v53 }
 0x218   : > { %v21131_v25 = vadd.f32 %v18555_v12, %v21096_v11  ;;  %v23293_v37 = vmax.f32 %v21124_v4, 0.0 }
 0x219   : > { %v21134_v28 = vadd.f32 %v18556_v6, %v21096_v11  ;;  %v23284_v58 = vmax.f32 %v21128_v51, 0.0 }
 0x21a   : > { %v23283_v31 = vmax.f32 %v21131_v25, 0.0 }
 0x21b   : > { %v23282_v20 = vmax.f32 %v21134_v28, 0.0  ;;  %v17301_v54 = vpop.f32.mrb[8].mxu0 }
 0x21c   : > { %v3923_v5 = vpack.c.bf16 %v23283_v31, %v23293_v37  ;;  %v18557_v39 = vadd.f32 %v17301_v54, %v17131_v13  ;;  %v3690_v3 = vpop.f32.mrb[9].mxu0 }
 0x21d   : > { %v3922_v24 = vpack.c.bf16 %v23282_v20, %v23284_v58  ;;  %v18558_v26 = vadd.f32 %v3690_v3, %v1819_v56  ;;  %v17302_v63 = vpop.f32.mrb[10].mxu0  ;;  %v21160_v30 = vld [vmem:[#allocation2 + $0x1a0] sm:$0xff] }
 0x21e   : > { %3939 = vst.msk [vmem:[#allocation2 + $0x1d0] sm:$0xff] %vm172_vm1, %v3923_v5  ;;  %v21150_v40 = vadd.f32 %v18557_v39, %v21096_v11  ;;  %v18559_v61 = vadd.f32 %v17302_v63, %v17132_v59  ;;  %v3693_v16 = vpop.f32.mrb[11].mxu0  ;;  %v21152_v43 = vld [vmem:[#allocation2 + $0x188] sm:$0xff] }
 0x21f   : > { %3938 = vst.msk [vmem:[#allocation2 + $0x1b8] sm:$0xff] %vm172_vm1, %v3922_v24  ;;  %v21156_v60 = vadd.f32 %v18558_v26, %v21096_v11  ;;  %v18560_v2 = vadd.f32 %v3693_v16, %v1822_v14  ;;  %17329 = vmatprep.mubr.msk.bf16.mxu1 %vm172_vm1, %v21152_v43 }
 0x220   : > { %v21163_v48 = vadd.f32 %v18559_v61, %v21096_v11  ;;  %17330 = vmatmul.mubr.msk.bf16.gmra.mrb[36].mxu1 %vm172_vm1, %v21160_v30  ;;  %v23281_v34 = vmax.f32 %v21150_v40, 0.0 }
 0x221   : > { %v21168_v17 = vadd.f32 %v18560_v2, %v21096_v11  ;;  %v23280_v33 = vmax.f32 %v21156_v60, 0.0 }
 0x222   : > { %v23279_v52 = vmax.f32 %v21163_v48, 0.0 }
 0x223   : > { %v23274_v53 = vmax.f32 %v21168_v17, 0.0  ;;  %v17305_v13 = vpop.f32.mrb[12].mxu0 }
 0x224   : > { %v3925_v56 = vpack.c.bf16 %v23279_v52, %v23281_v34  ;;  %v18561_v59 = vadd.f32 %v17305_v13, %v21085_v27  ;;  %v3706_v14 = vpop.f32.mrb[13].mxu0 }
 0x225   : > { %v3924_v32 = vpack.c.bf16 %v23274_v53, %v23280_v33  ;;  %v18562_v1 = vadd.f32 %v3706_v14, %v21087_v15  ;;  %v17306_v35 = vpop.f32.mrb[14].mxu0  ;;  %v21198_v15 = vld [vmem:[#allocation2 + $0x1d0] sm:$0xff] }
 0x226   : > { %3941 = vst.msk [vmem:[#allocation2 + $0x200] sm:$0xff] %vm172_vm1, %v3925_v56  ;;  %v21186_v8 = vadd.f32 %v18561_v59, %v21096_v11  ;;  %v18563_v42 = vadd.f32 %v17306_v35, %v21089_v38  ;;  %v3709_v23 = vpop.f32.mrb[15].mxu0  ;;  %v21189_v9 = vld [vmem:[#allocation2 + $0x1b8] sm:$0xff] }
 0x227   : > { %3940 = vst.msk [vmem:[#allocation2 + $0x1e8] sm:$0xff] %vm172_vm1, %v3924_v32  ;;  %v21193_v27 = vadd.f32 %v18562_v1, %v21096_v11  ;;  %v18564_v50 = vadd.f32 %v3709_v23, %v21091_v55  ;;  %17333 = vmatprep.mubr.msk.bf16.mxu1 %vm172_vm1, %v21189_v9 }
 0x228   : > { %v21201_v18 = vadd.f32 %v18563_v42, %v21096_v11  ;;  %17334 = vmatmul.mubr.msk.bf16.gmra.mrb[40].mxu1 %vm172_vm1, %v21198_v15  ;;  %v23273_v0 = vmax.f32 %v21186_v8, 0.0 }
 0x229   : > { %v21206_v38 = vadd.f32 %v18564_v50, %v21096_v11  ;;  %v23272_v55 = vmax.f32 %v21193_v27, 0.0 }
 0x22a   : > { %v23271_v19 = vmax.f32 %v21201_v18, 0.0  ;;  %v17173_v7 = vpop.f32.mrb[16].mxu1 }
 0x22b   : > { %v23270_v45 = vmax.f32 %v21206_v38, 0.0  ;;  %v2081_v46 = vpop.f32.mrb[17].mxu1  ;;  %v17309_v22 = vpop.f32.mrb[16].mxu0 }
 0x22c   : > { %v3927_v12 = vpack.c.bf16 %v23271_v19, %v23273_v0  ;;  %v18565_v49 = vadd.f32 %v17309_v22, %v17173_v7  ;;  %v17174_v6 = vpop.f32.mrb[18].mxu1  ;;  %v3722_v54 = vpop.f32.mrb[17].mxu0 }
 0x22d   : > { %v3926_v5 = vpack.c.bf16 %v23270_v45, %v23272_v55  ;;  %v18566_v39 = vadd.f32 %v3722_v54, %v2081_v46  ;;  %v2084_v3 = vpop.f32.mrb[19].mxu1  ;;  %v17310_v24 = vpop.f32.mrb[18].mxu0  ;;  %v21232_v56 = vld [vmem:[#allocation2 + $0x200] sm:$0xff] }
 0x22e   : > { %3943 = vst.msk [vmem:[#allocation2 + $0x230] sm:$0xff] %vm172_vm1, %v3927_v12  ;;  %v21222_v26 = vadd.f32 %v18565_v49, %v21096_v11  ;;  %v18567_v63 = vadd.f32 %v17310_v24, %v17174_v6  ;;  %v3725_v61 = vpop.f32.mrb[19].mxu0  ;;  %v21224_v16 = vld [vmem:[#allocation2 + $0x1e8] sm:$0xff] }
 0x22f   : > { %3942 = vst.msk [vmem:[#allocation2 + $0x218] sm:$0xff] %vm172_vm1, %v3926_v5  ;;  %v21228_v2 = vadd.f32 %v18566_v39, %v21096_v11  ;;  %v18568_v13 = vadd.f32 %v3725_v61, %v2084_v3  ;;  %17337 = vmatprep.mubr.msk.bf16.mxu1 %vm172_vm1, %v21224_v16 }
 0x230   : > { %v21235_v59 = vadd.f32 %v18567_v63, %v21096_v11  ;;  %17338 = vmatmul.mubr.msk.bf16.gmra.mrb[44].mxu1 %vm172_vm1, %v21232_v56  ;;  %v23269_v32 = vmax.f32 %v21222_v26, 0.0 }
 0x231   : > { %v21240_v14 = vadd.f32 %v18568_v13, %v21096_v11  ;;  %v23268_v42 = vmax.f32 %v21228_v2, 0.0 }
 0x232   : > { %v23267_v1 = vmax.f32 %v21235_v59, 0.0  ;;  %v17177_v35 = vpop.f32.mrb[20].mxu1 }
 0x233   : > { %v23266_v23 = vmax.f32 %v21240_v14, 0.0  ;;  %v2097_v50 = vpop.f32.mrb[21].mxu1  ;;  %v17313_v7 = vpop.f32.mrb[20].mxu0 }
 0x234   : > { %v3929_v46 = vpack.c.bf16 %v23267_v1, %v23269_v32  ;;  %v18569_v22 = vadd.f32 %v17313_v7, %v17177_v35  ;;  %v17178_v12 = vpop.f32.mrb[22].mxu1  ;;  %v3738_v49 = vpop.f32.mrb[21].mxu0 }
 0x235   : > { %v3928_v6 = vpack.c.bf16 %v23266_v23, %v23268_v42  ;;  %v18570_v54 = vadd.f32 %v3738_v49, %v2097_v50  ;;  %v2100_v5 = vpop.f32.mrb[23].mxu1  ;;  %v17314_v39 = vpop.f32.mrb[22].mxu0  ;;  %v21266_v50 = vld [vmem:[#allocation2 + $0x230] sm:$0xff] }
 0x236   : > { %3945 = vst.msk [vmem:[#allocation2 + $0x260] sm:$0xff] %vm172_vm1, %v3929_v46  ;;  %v21256_v3 = vadd.f32 %v18569_v22, %v21096_v11  ;;  %v18571_v24 = vadd.f32 %v17314_v39, %v17178_v12  ;;  %v3741_v63 = vpop.f32.mrb[23].mxu0  ;;  %v21258_v61 = vld [vmem:[#allocation2 + $0x218] sm:$0xff] }
 0x237   : > { %3944 = vst.msk [vmem:[#allocation2 + $0x248] sm:$0xff] %vm172_vm1, %v3928_v6  ;;  %v21262_v13 = vadd.f32 %v18570_v54, %v21096_v11  ;;  %v18572_v35 = vadd.f32 %v3741_v63, %v2100_v5  ;;  %17341 = vmatprep.mubr.msk.bf16.mxu1 %vm172_vm1, %v21258_v61 }
 0x238   : > { %v21269_v7 = vadd.f32 %v18571_v24, %v21096_v11  ;;  %17342 = vmatmul.mubr.msk.bf16.gmra.mrb[48].mxu1 %vm172_vm1, %v21266_v50  ;;  %v23278_v22 = vmax.f32 %v21256_v3, 0.0 }
 0x239   : > { %v21274_v46 = vadd.f32 %v18572_v35, %v21096_v11  ;;  %v23277_v6 = vmax.f32 %v21262_v13, 0.0 }
 0x23a   : > { %v23276_v12 = vmax.f32 %v21269_v7, 0.0  ;;  %v17181_v49 = vpop.f32.mrb[24].mxu1 }
 0x23b   : > { %v23275_v54 = vmax.f32 %v21274_v46, 0.0  ;;  %v2113_v5 = vpop.f32.mrb[25].mxu1  ;;  %v17317_v39 = vpop.f32.mrb[24].mxu0 }
 0x23c   : > { %v3931_v24 = vpack.c.bf16 %v23276_v12, %v23278_v22  ;;  %v18573_v63 = vadd.f32 %v17317_v39, %v17181_v49  ;;  %v17182_v23 = vpop.f32.mrb[26].mxu1  ;;  %v3754_v35 = vpop.f32.mrb[25].mxu0 }
 0x23d   : > { %v3930_v1 = vpack.c.bf16 %v23275_v54, %v23277_v6  ;;  %v18574_v42 = vadd.f32 %v3754_v35, %v2113_v5  ;;  %v2116_v32 = vpop.f32.mrb[27].mxu1  ;;  %v17318_v45 = vpop.f32.mrb[26].mxu0  ;;  %v21300_v5 = vld [vmem:[#allocation2 + $0x260] sm:$0xff] }
 0x23e   : > { %3947 = vst.msk [vmem:[#allocation2 + $0x290] sm:$0xff] %vm172_vm1, %v3931_v24  ;;  %v21290_v19 = vadd.f32 %v18573_v63, %v21096_v11  ;;  %v18575_v55 = vadd.f32 %v17318_v45, %v17182_v23  ;;  %v3757_v0 = vpop.f32.mrb[27].mxu0  ;;  %v21292_v53 = vld [vmem:[#allocation2 + $0x248] sm:$0xff] }
 0x23f   : > { %3946 = vst.msk [vmem:[#allocation2 + $0x278] sm:$0xff] %vm172_vm1, %v3930_v1  ;;  %v21296_v49 = vadd.f32 %v18574_v42, %v21096_v11  ;;  %v18576_v39 = vadd.f32 %v3757_v0, %v2116_v32  ;;  %17345 = vmatprep.mubr.msk.bf16.mxu1 %vm172_vm1, %v21292_v53 }
 0x240   : > { %v21303_v24 = vadd.f32 %v18575_v55, %v21096_v11  ;;  %17346 = vmatmul.mubr.msk.bf16.gmra.mrb[52].mxu1 %vm172_vm1, %v21300_v5  ;;  %v23292_v1 = vmax.f32 %v21290_v19, 0.0 }
 0x241   : > { %v21308_v45 = vadd.f32 %v18576_v39, %v21096_v11  ;;  %v23291_v0 = vmax.f32 %v21296_v49, 0.0 }
 0x242   : > { %v23286_v42 = vmax.f32 %v21303_v24, 0.0  ;;  %v17185_v23 = vpop.f32.mrb[28].mxu1 }
 0x243   : > { %v23285_v32 = vmax.f32 %v21308_v45, 0.0  ;;  %v2129_v63 = vpop.f32.mrb[29].mxu1  ;;  %v17321_v35 = vpop.f32.mrb[28].mxu0 }
 0x244   : > { %v3933_v55 = vpack.c.bf16 %v23286_v42, %v23292_v1  ;;  %v18577_v54 = vadd.f32 %v17321_v35, %v17185_v23  ;;  %v17186_v12 = vpop.f32.mrb[30].mxu1  ;;  %v3770_v39 = vpop.f32.mrb[29].mxu0  ;;  %v3956_v42 = vld [vmem:[#allocation2 + $0x170] sm:$0x7f]  ;;  %v21374_v1 = vld [vmem:[%s23262_s1 + $0x18] sm:$0x3] }
 0x245   : > { %v3932_v6 = vpack.c.bf16 %v23285_v32, %v23291_v0  ;;  %v18578_v22 = vadd.f32 %v3770_v39, %v2129_v63  ;;  %v2132_v52 = vpop.f32.mrb[31].mxu1  ;;  %v17322_v33 = vpop.f32.mrb[30].mxu0  ;;  %v21334_v63 = vld [vmem:[#allocation2 + $0x290] sm:$0xff] }
 0x246   : > { %3949 = vst.msk [vmem:[#allocation2 + $0x2c0] sm:$0xff] %vm172_vm1, %v3933_v55  ;;  %v21324_v34 = vadd.f32 %v18577_v54, %v21096_v11  ;;  %v18579_v20 = vadd.f32 %v17322_v33, %v17186_v12  ;;  %v3773_v31 = vpop.f32.mrb[31].mxu0  ;;  %v21326_v58 = vld [vmem:[#allocation2 + $0x278] sm:$0xff]  ;;  %v3953_v39 = vld [vmem:[#allocation2 + $0x150] sm:$0x80] }
 0x247   : > { %3948 = vst.msk [vmem:[#allocation2 + $0x2a8] sm:$0xff] %vm172_vm1, %v3932_v6  ;;  %v21330_v23 = vadd.f32 %v18578_v22, %v21096_v11  ;;  %v18580_v35 = vadd.f32 %v3773_v31, %v2132_v52  ;;  %17349 = vmatprep.mubr.msk.bf16.mxu1 %vm172_vm1, %v21326_v58  ;;  %v3954_v55 = vld [vmem:[#allocation2 + $0x158] sm:$0x7f]  ;;  %v4018_v52 = vrot.slane %v3953_v39, 7 }
 0x248   : > { %v21337_v54 = vadd.f32 %v18579_v20, %v21096_v11  ;;  %17350 = vmatmul.mubr.msk.bf16.gmra.mrb[56].mxu1 %vm172_vm1, %v21334_v63  ;;  %v23290_v22 = vmax.f32 %v21324_v34, 0.0  ;;  %v4019_v12 = vrot.slane %v3954_v55, 7  ;;  %v3955_v55 = vld [vmem:[#allocation2 + $0x168] sm:$0x80] }
 0x249   : > { %v21342_v33 = vadd.f32 %v18580_v35, %v21096_v11  ;;  %v23289_v6 = vmax.f32 %v21330_v23, 0.0 }
 0x24a   : > { %v23287_v31 = vmax.f32 %v21337_v54, 0.0  ;;  %v4020_v39 = vsel %vm4017_vm4, %v4018_v52, %v4019_v12 }
 0x24b   : > { %23301 = vst [vmem:[#allocation3_spill] sm:$0xff] %v21342_v33  ;;  %v23288_v32 = vmax.f32 %v21342_v33, 0.0 }
 0x24c   : > { %v3935_v20 = vpack.c.bf16 %v23287_v31, %v23290_v22  ;;  %v3958_v22 = vld [vmem:[#allocation2 + $0x188] sm:$0x7f] }
 0x24d   : > { %v3934_v11 = vpack.c.bf16 %v23288_v32, %v23289_v6  ;;  %v21363_v31 = vld [vmem:[#allocation2 + $0x2c0] sm:$0xff]  ;;  %v4021_v32 = vrot.slane %v3955_v55, 7  ;;  %v4025_v52 = vrot.slane %v3958_v22, 7  ;;  %v3959_v55 = vld [vmem:[#allocation2 + $0x198] sm:$0x80] }
 0x24e   : > { %3951 = vst.msk [vmem:[#allocation2 + $0x2f0] sm:$0xff] %vm172_vm1, %v3935_v20  ;;  %v21357_v35 = vld [vmem:[#allocation2 + $0x2a8] sm:$0xff]  ;;  %v4022_v20 = vrot.slane %v3956_v42, 7  ;;  %v3957_v6 = vld [vmem:[#allocation2 + $0x180] sm:$0x80] }
 0x24f   : > { %3950 = vst.msk [vmem:[#allocation2 + $0x2d8] sm:$0xff] %vm172_vm1, %v3934_v11  ;;  %17353 = vmatprep.mubr.msk.bf16.mxu1 %vm172_vm1, %v21357_v35  ;;  %v4024_v0 = vrot.slane %v3957_v6, 7  ;;  %v4674_v11 = vsel %vm628_vm0, %v21081_v47, 0  ;;  %v3960_v42 = vld [vmem:[#allocation2 + $0x1a0] sm:$0x7f]  ;;  %v4027_v47 = vrot.slane %v3959_v55, 7 }
 0x250   : > { %17354 = vmatmul.mubr.msk.bf16.gmra.mrb[60].mxu1 %vm172_vm1, %v21363_v31  ;;  %v4023_v12 = vsel %vm4017_vm4, %v4021_v32, %v4022_v20  ;;  %v3961_v22 = vld [vmem:[#allocation2 + $0x1b0] sm:$0x80]  ;;  %v3962_v6 = vld [vmem:[#allocation2 + $0x1b8] sm:$0x7f]  ;;  %v4028_v32 = vrot.slane %v3960_v42, 7 }
 0x251   : > { %17359 = vmatprep.mubr.msk.bf16.mxu1 %vm172_vm1, %v4020_v39  ;;  %v4026_v39 = vsel %vm4017_vm4, %v4024_v0, %v4025_v52  ;;  %v4030_v20 = vrot.slane %v3961_v22, 7  ;;  %v4031_v37 = vrot.slane %v3962_v6, 7  ;;  %v3963_v52 = vld [vmem:[#allocation2 + $0x1c8] sm:$0x80]  ;;  %v3967_v22 = vld [vmem:[#allocation2 + $0x1f8] sm:$0x80] }
 0x252   : > { %v4029_v21 = vsel %vm4017_vm4, %v4027_v47, %v4028_v32  ;;  %v4033_v29 = vrot.slane %v3963_v52, 7  ;;  %v3970_v6 = vld [vmem:[#allocation2 + $0x218] sm:$0x7f]  ;;  %v4039_v47 = vrot.slane %v3967_v22, 7 }
 0x253   : > { %v4032_v0 = vsel %vm4017_vm4, %v4030_v20, %v4031_v37  ;;  %v3969_v37 = vld [vmem:[#allocation2 + $0x210] sm:$0x80] }
 0x254   : > { %v4042_v20 = vrot.slane %v3969_v37, 7  ;;  %v3975_v37 = vld [vmem:[#allocation2 + $0x258] sm:$0x80] }
 0x258   : > { %17360 = vmatmul.mubr.msk.bf16.vlgmr.msra.gmra.mrb[32].mxu1 %vm172_vm1, %v4023_v12  ;;  %v3964_v12 = vld [vmem:[#allocation2 + $0x1d0] sm:$0x7f] }
 0x259   : > { %17392 = vmatpush3.bf16.msra.mxu1 %v4674_v11  ;;  %17363 = vmatprep.mubr.msk.bf16.mxu1 %vm172_vm1, %v4026_v39  ;;  %v3965_v11 = vld [vmem:[#allocation2 + $0x1e0] sm:$0x80]  ;;  %v3966_v39 = vld [vmem:[#allocation2 + $0x1e8] sm:$0x7f]  ;;  %v4034_v57 = vrot.slane %v3964_v12, 7 }
 0x25a   : > { %19842 = vmatprep.subr.msk.bf16.mxu1 %vm628_vm0, %v21374_v1  ;;  %v4036_v36 = vrot.slane %v3965_v11, 7  ;;  %v4037_v33 = vrot.slane %v3966_v39, 7  ;;  %v3972_v12 = vld [vmem:[#allocation2 + $0x230] sm:$0x7f] }
 0x25b   : > { %v4035_v55 = vsel %vm4017_vm4, %v4033_v29, %v4034_v57  ;;  %v3971_v57 = vld [vmem:[#allocation2 + $0x228] sm:$0x80]  ;;  %v4046_v39 = vrot.slane %v3972_v12, 7 }
 0x25c   : > { %v4038_v42 = vsel %vm4017_vm4, %v4036_v36, %v4037_v33  ;;  %v3973_v36 = vld [vmem:[#allocation2 + $0x240] sm:$0x80]  ;;  %v3974_v33 = vld [vmem:[#allocation2 + $0x248] sm:$0x7f]  ;;  %v4045_v11 = vrot.slane %v3971_v57, 7 }
 0x25e   : > { %v4047_v22 = vsel %vm4017_vm4, %v4045_v11, %v4046_v39  ;;  %v3981_v11 = vld [vmem:[#allocation2 + $0x2a0] sm:$0x80]  ;;  %v3982_v39 = vld [vmem:[#allocation2 + $0x2a8] sm:$0x7f] }
 0x260   : > { %17364 = vmatmul.mubr.msk.bf16.gmra.mrb[36].mxu1 %vm172_vm1, %v4029_v21  ;;  %v3968_v21 = vld [vmem:[#allocation2 + $0x200] sm:$0x7f] }
 0x261   : > { %17367 = vmatprep.mubr.msk.bf16.mxu1 %vm172_vm1, %v4032_v0  ;;  %v4040_v32 = vrot.slane %v3968_v21, 7  ;;  %v4043_v0 = vrot.slane %v3970_v6, 7  ;;  %v3976_v6 = vld [vmem:[#allocation2 + $0x260] sm:$0x7f] }
 0x263   : > { %v4041_v52 = vsel %vm4017_vm4, %v4039_v47, %v4040_v32  ;;  %v4044_v29 = vsel %vm4017_vm4, %v4042_v20, %v4043_v0  ;;  %v3977_v47 = vld [vmem:[#allocation2 + $0x270] sm:$0x80]  ;;  %v3978_v32 = vld [vmem:[#allocation2 + $0x278] sm:$0x7f]  ;;  %v4051_v20 = vrot.slane %v3975_v37, 7  ;;  %v4052_v0 = vrot.slane %v3976_v6, 7 }
 0x264   : > { %v4510_v6 = vld [vmem:[#allocation2 + $0x158] sm:$0xfe] }
 0x265   : > { %v4053_v57 = vsel %vm4017_vm4, %v4051_v20, %v4052_v0  ;;  %v3983_v20 = vld [vmem:[#allocation2 + $0x2b8] sm:$0x80]  ;;  %v3984_v0 = vld [vmem:[#allocation2 + $0x2c0] sm:$0x7f] }
 0x268   : > { %17368 = vmatmul.mubr.msk.bf16.gmra.mrb[40].mxu1 %vm172_vm1, %v4035_v55  ;;  %v4048_v55 = vrot.slane %v3973_v36, 7  ;;  %v3979_v36 = vld [vmem:[#allocation2 + $0x288] sm:$0x80] }
 0x269   : > { %17371 = vmatprep.mubr.msk.bf16.mxu1 %vm172_vm1, %v4038_v42  ;;  %v4049_v42 = vrot.slane %v3974_v33, 7  ;;  %v3980_v33 = vld [vmem:[#allocation2 + $0x290] sm:$0x7f] }
 0x26b   : > { %v4050_v21 = vsel %vm4017_vm4, %v4048_v55, %v4049_v42  ;;  %v4057_v55 = vrot.slane %v3979_v36, 7  ;;  %v4058_v42 = vrot.slane %v3980_v33, 7  ;;  %v4512_v33 = vld [vmem:[#allocation2 + $0x170] sm:$0xfe] }
 0x26d   : > { %v4059_v37 = vsel %vm4017_vm4, %v4057_v55, %v4058_v42  ;;  %v4578_v55 = vrot.slane %v4512_v33, 1 }
 0x270   : > { %17372 = vmatmul.mubr.msk.bf16.gmra.mrb[44].mxu1 %vm172_vm1, %v4041_v52  ;;  %v4054_v52 = vrot.slane %v3977_v47, 7  ;;  %v4511_v47 = vld [vmem:[#allocation2 + $0x160] sm:$0x1] }
 0x271   : > { %17375 = vmatprep.mubr.msk.bf16.mxu1 %vm172_vm1, %v4044_v29  ;;  %v4055_v29 = vrot.slane %v3978_v32, 7 }
 0x273   : > { %v4056_v12 = vsel %vm4017_vm4, %v4054_v52, %v4055_v29  ;;  %v4575_v52 = vrot.slane %v4510_v6, 1  ;;  %v4576_v29 = vrot.slane %v4511_v47, 1 }
 0x275   : > { %v4577_v36 = vsel %vm4574_vm5, %v4575_v52, %v4576_v29  ;;  %v4516_v52 = vld [vmem:[#allocation2 + $0x1a0] sm:$0xfe]  ;;  %v4517_v29 = vld [vmem:[#allocation2 + $0x1a8] sm:$0x1] }
 0x278   : > { %17376 = vmatmul.mubr.msk.bf16.gmra.mrb[48].mxu1 %vm172_vm1, %v4047_v22  ;;  %v4060_v22 = vrot.slane %v3981_v11, 7  ;;  %v4513_v11 = vld [vmem:[#allocation2 + $0x178] sm:$0x1] }
 0x279   : > { %17379 = vmatprep.mubr.msk.bf16.mxu1 %vm172_vm1, %v4050_v21  ;;  %v4061_v21 = vrot.slane %v3982_v39, 7  ;;  %v4579_v42 = vrot.slane %v4513_v11, 1 }
 0x27b   : > { %v4062_v32 = vsel %vm4017_vm4, %v4060_v22, %v4061_v21  ;;  %v4514_v22 = vld [vmem:[#allocation2 + $0x188] sm:$0xfe]  ;;  %v4515_v21 = vld [vmem:[#allocation2 + $0x190] sm:$0x1]  ;;  %v4580_v47 = vsel %vm4574_vm5, %v4578_v55, %v4579_v42  ;;  %v4520_v42 = vld [vmem:[#allocation2 + $0x1d0] sm:$0xfe] }
 0x27c   : > { %v4582_v6 = vrot.slane %v4515_v21, 1  ;;  %v4522_v21 = vld [vmem:[#allocation2 + $0x1e8] sm:$0xfe] }
 0x280   : > { %17380 = vmatmul.mubr.msk.bf16.gmra.mrb[52].mxu1 %vm172_vm1, %v4053_v57  ;;  %v4063_v57 = vrot.slane %v3983_v20, 7  ;;  %v21415_v20 = vld [vmem:[%s23262_s1 + $0x1a] sm:$0x3] }
 0x281   : > { %17383 = vmatprep.mubr.msk.bf16.mxu1 %vm172_vm1, %v4056_v12  ;;  %v4064_v12 = vrot.slane %v3984_v0, 7 }
 0x283   : > { %v4065_v39 = vsel %vm4017_vm4, %v4063_v57, %v4064_v12  ;;  %v4518_v57 = vld [vmem:[#allocation2 + $0x1b8] sm:$0xfe]  ;;  %v4519_v12 = vld [vmem:[#allocation2 + $0x1c0] sm:$0x1] }
 0x284   : > { %v4587_v33 = vrot.slane %v4518_v57, 1  ;;  %v4588_v11 = vrot.slane %v4519_v12, 1  ;;  %v4524_v57 = vld [vmem:[#allocation2 + $0x200] sm:$0xfe]  ;;  %v4525_v12 = vld [vmem:[#allocation2 + $0x208] sm:$0x1] }
 0x286   : > { %v4589_v55 = vsel %vm4574_vm5, %v4587_v33, %v4588_v11  ;;  %v4596_v33 = vrot.slane %v4524_v57, 1  ;;  %v4597_v11 = vrot.slane %v4525_v12, 1 }
 0x288   : > { %17384 = vmatmul.mubr.msk.bf16.gmra.mrb[56].mxu1 %vm172_vm1, %v4059_v37  ;;  %v4581_v37 = vrot.slane %v4514_v22, 1  ;;  %v4521_v22 = vld [vmem:[#allocation2 + $0x1d8] sm:$0x1] }
 0x289   : > { %17387 = vmatprep.mubr.msk.bf16.mxu1 %vm172_vm1, %v4062_v32  ;;  %v5032_v32 = vsel %vm628_vm0, %v21374_v1, 0  ;;  %v4584_v1 = vrot.slane %v4516_v52, 1 }
 0x28a   : > { %v4583_v0 = vsel %vm4574_vm5, %v4581_v37, %v4582_v6  ;;  %v4523_v37 = vld [vmem:[#allocation2 + $0x1f0] sm:$0x1]  ;;  %v4590_v6 = vrot.slane %v4520_v42, 1  ;;  %v4598_v42 = vsel %vm4574_vm5, %v4596_v33, %v4597_v11  ;;  %v4534_v33 = vld [vmem:[#allocation2 + $0x278] sm:$0xfe] }
 0x28b   : > { %v4535_v11 = vld [vmem:[#allocation2 + $0x280] sm:$0x1] }
 0x290   : > { %17388 = vmatmul.mubr.msk.bf16.gmra.mrb[60].mxu1 %vm172_vm1, %v4065_v39 }
 0x291   : > { %17393 = vmatprep.mubr.msk.bf16.mxu1 %vm172_vm1, %v4577_v36  ;;  %v4585_v36 = vrot.slane %v4517_v29, 1 }
 0x293   : > { %v4586_v39 = vsel %vm4574_vm5, %v4584_v1, %v4585_v36  ;;  %v4526_v1 = vld [vmem:[#allocation2 + $0x218] sm:$0xfe]  ;;  %v4527_v36 = vld [vmem:[#allocation2 + $0x220] sm:$0x1] }
 0x298   : > { %17394 = vmatmul.mubr.msk.bf16.vlgmr.msra.gmra.mrb[32].mxu1 %vm172_vm1, %v4580_v47  ;;  %v4591_v47 = vrot.slane %v4521_v22, 1 }
 0x299   : > { %17426 = vmatpush3.bf16.msra.mxu1 %v5032_v32  ;;  %17397 = vmatprep.mubr.msk.bf16.mxu1 %vm172_vm1, %v4583_v0  ;;  %v4593_v32 = vrot.slane %v4522_v21, 1  ;;  %v4594_v0 = vrot.slane %v4523_v37, 1  ;;  %v4528_v21 = vld [vmem:[#allocation2 + $0x230] sm:$0xfe]  ;;  %v4529_v37 = vld [vmem:[#allocation2 + $0x238] sm:$0x1] }
 0x29a   : > { %19843 = vmatprep.subr.msk.bf16.mxu1 %vm628_vm0, %v21415_v20  ;;  %v4592_v52 = vsel %vm4574_vm5, %v4590_v6, %v4591_v47  ;;  %v4530_v6 = vld [vmem:[#allocation2 + $0x248] sm:$0xfe]  ;;  %v4531_v47 = vld [vmem:[#allocation2 + $0x250] sm:$0x1] }
 0x29b   : > { %v4595_v29 = vsel %vm4574_vm5, %v4593_v32, %v4594_v0  ;;  %v4602_v32 = vrot.slane %v4528_v21, 1  ;;  %v4603_v0 = vrot.slane %v4529_v37, 1 }
 0x29d   : > { %v4604_v57 = vsel %vm4574_vm5, %v4602_v32, %v4603_v0  ;;  %v4538_v32 = vld [vmem:[#allocation2 + $0x2a8] sm:$0xfe]  ;;  %v4539_v0 = vld [vmem:[#allocation2 + $0x2b0] sm:$0x1] }
 0x2a0   : > { %17398 = vmatmul.mubr.msk.bf16.gmra.mrb[36].mxu1 %vm172_vm1, %v4586_v39  ;;  %v4599_v39 = vrot.slane %v4526_v1, 1  ;;  %v4532_v1 = vld [vmem:[#allocation2 + $0x260] sm:$0xfe] }
 0x2a1   : > { %17401 = vmatprep.mubr.msk.bf16.mxu1 %vm172_vm1, %v4589_v55  ;;  %v4600_v55 = vrot.slane %v4527_v36, 1  ;;  %v4533_v36 = vld [vmem:[#allocation2 + $0x268] sm:$0x1] }
 0x2a3   : > { %v4601_v22 = vsel %vm4574_vm5, %v4599_v39, %v4600_v55  ;;  %v4608_v39 = vrot.slane %v4532_v1, 1  ;;  %v4609_v55 = vrot.slane %v4533_v36, 1 }
 0x2a5   : > { %v4610_v21 = vsel %vm4574_vm5, %v4608_v39, %v4609_v55  ;;  %v4869_v39 = vld [vmem:[#allocation2 + $0x180] sm:$0x80]  ;;  %v4870_v55 = vld [vmem:[#allocation2 + $0x188] sm:$0x7f] }
 0x2a8   : > { %17402 = vmatmul.mubr.msk.bf16.gmra.mrb[40].mxu1 %vm172_vm1, %v4592_v52  ;;  %v4605_v52 = vrot.slane %v4530_v6, 1  ;;  %v4536_v6 = vld [vmem:[#allocation2 + $0x290] sm:$0xfe] }
 0x2a9   : > { %17405 = vmatprep.mubr.msk.bf16.mxu1 %vm172_vm1, %v4595_v29  ;;  %v4606_v29 = vrot.slane %v4531_v47, 1  ;;  %v4537_v47 = vld [vmem:[#allocation2 + $0x298] sm:$0x1] }
 0x2ab   : > { %v4607_v12 = vsel %vm4574_vm5, %v4605_v52, %v4606_v29  ;;  %v4614_v52 = vrot.slane %v4536_v6, 1  ;;  %v4615_v29 = vrot.slane %v4537_v47, 1 }
 0x2ad   : > { %v4616_v1 = vsel %vm4574_vm5, %v4614_v52, %v4615_v29  ;;  %v4873_v52 = vld [vmem:[#allocation2 + $0x1b0] sm:$0x80]  ;;  %v4874_v29 = vld [vmem:[#allocation2 + $0x1b8] sm:$0x7f] }
 0x2b0   : > { %17406 = vmatmul.mubr.msk.bf16.gmra.mrb[44].mxu1 %vm172_vm1, %v4598_v42  ;;  %v4611_v42 = vrot.slane %v4534_v33, 1  ;;  %v4540_v33 = vld [vmem:[#allocation2 + $0x2c0] sm:$0xfe] }
 0x2b1   : > { %17409 = vmatprep.mubr.msk.bf16.mxu1 %vm172_vm1, %v4601_v22  ;;  %v4612_v22 = vrot.slane %v4535_v11, 1  ;;  %v4541_v11 = vld [vmem:[#allocation2 + $0x2c8] sm:$0x1] }
 0x2b3   : > { %v4613_v37 = vsel %vm4574_vm5, %v4611_v42, %v4612_v22  ;;  %v4620_v42 = vrot.slane %v4540_v33, 1  ;;  %v4621_v22 = vrot.slane %v4541_v11, 1  ;;  %v5294_v33 = vsel %vm628_vm0, %v21415_v20, 0 }
 0x2b5   : > { %v4622_v6 = vsel %vm4574_vm5, %v4620_v42, %v4621_v22  ;;  %v4875_v42 = vld [vmem:[#allocation2 + $0x1c8] sm:$0x80]  ;;  %v4876_v22 = vld [vmem:[#allocation2 + $0x1d0] sm:$0x7f] }
 0x2b6   : > { %v4942_v20 = vrot.slane %v4875_v42, 7 }
 0x2b8   : > { %17410 = vmatmul.mubr.msk.bf16.gmra.mrb[48].mxu1 %vm172_vm1, %v4604_v57  ;;  %v4617_v57 = vrot.slane %v4538_v32, 1  ;;  %v4871_v32 = vld [vmem:[#allocation2 + $0x198] sm:$0x80] }
 0x2b9   : > { %17413 = vmatprep.mubr.msk.bf16.mxu1 %vm172_vm1, %v4607_v12  ;;  %v4618_v12 = vrot.slane %v4539_v0, 1  ;;  %v4872_v0 = vld [vmem:[#allocation2 + $0x1a0] sm:$0x7f] }
 0x2bb   : > { %v4619_v36 = vsel %vm4574_vm5, %v4617_v57, %v4618_v12  ;;  %v4936_v57 = vrot.slane %v4871_v32, 7  ;;  %v4937_v12 = vrot.slane %v4872_v0, 7 }
 0x2bd   : > { %v4938_v11 = vsel %vm4017_vm4, %v4936_v57, %v4937_v12  ;;  %v4880_v57 = vld [vmem:[#allocation2 + $0x200] sm:$0x7f]  ;;  %v4881_v12 = vld [vmem:[#allocation2 + $0x210] sm:$0x80] }
 0x2c0   : > { %17414 = vmatmul.mubr.msk.bf16.gmra.mrb[52].mxu1 %vm172_vm1, %v4610_v21  ;;  %v4933_v21 = vrot.slane %v4869_v39, 7  ;;  %v21456_v39 = vld [vmem:[%s23262_s1 + $0x1c] sm:$0x3] }
 0x2c1   : > { %17417 = vmatprep.mubr.msk.bf16.mxu1 %vm172_vm1, %v4613_v37  ;;  %v4934_v37 = vrot.slane %v4870_v55, 7 }
 0x2c3   : > { %v4935_v47 = vsel %vm4017_vm4, %v4933_v21, %v4934_v37  ;;  %v4877_v21 = vld [vmem:[#allocation2 + $0x1e0] sm:$0x80]  ;;  %v4878_v37 = vld [vmem:[#allocation2 + $0x1e8] sm:$0x7f] }
 0x2c4   : > { %v4946_v32 = vrot.slane %v4878_v37, 7  ;;  %v4884_v37 = vld [vmem:[#allocation2 + $0x230] sm:$0x7f] }
 0x2c8   : > { %17418 = vmatmul.mubr.msk.bf16.gmra.mrb[56].mxu1 %vm172_vm1, %v4616_v1  ;;  %v4939_v1 = vrot.slane %v4873_v52, 7 }
 0x2c9   : > { %17421 = vmatprep.mubr.msk.bf16.mxu1 %vm172_vm1, %v4619_v36  ;;  %v4940_v36 = vrot.slane %v4874_v29, 7  ;;  %v4879_v29 = vld [vmem:[#allocation2 + $0x1f8] sm:$0x80] }
 0x2cb   : > { %v4941_v55 = vsel %vm4017_vm4, %v4939_v1, %v4940_v36  ;;  %v4882_v1 = vld [vmem:[#allocation2 + $0x218] sm:$0x7f]  ;;  %v4948_v36 = vrot.slane %v4879_v29, 7 }
 0x2d0   : > { %17422 = vmatmul.mubr.msk.bf16.gmra.mrb[60].mxu1 %vm172_vm1, %v4622_v6  ;;  %v4943_v6 = vrot.slane %v4876_v22, 7 }
 0x2d1   : > { %17427 = vmatprep.mubr.msk.bf16.mxu1 %vm172_vm1, %v4935_v47  ;;  %v4945_v47 = vrot.slane %v4877_v21, 7  ;;  %v4883_v21 = vld [vmem:[#allocation2 + $0x228] sm:$0x80] }
 0x2d2   : > { %v4944_v0 = vsel %vm4017_vm4, %v4942_v20, %v4943_v6  ;;  %v4885_v20 = vld [vmem:[#allocation2 + $0x240] sm:$0x80]  ;;  %v4886_v6 = vld [vmem:[#allocation2 + $0x248] sm:$0x7f] }
 0x2d3   : > { %v4947_v52 = vsel %vm4017_vm4, %v4945_v47, %v4946_v32  ;;  %v4954_v47 = vrot.slane %v4883_v21, 7  ;;  %v4955_v32 = vrot.slane %v4884_v37, 7 }
 0x2d5   : > { %v4956_v29 = vsel %vm4017_vm4, %v4954_v47, %v4955_v32  ;;  %v4893_v47 = vld [vmem:[#allocation2 + $0x2a0] sm:$0x80]  ;;  %v4894_v32 = vld [vmem:[#allocation2 + $0x2a8] sm:$0x7f] }
 0x2d8   : > { %17428 = vmatmul.mubr.msk.bf16.vlgmr.msra.gmra.mrb[32].mxu1 %vm172_vm1, %v4938_v11  ;;  %v4951_v11 = vrot.slane %v4881_v12, 7  ;;  %v4887_v12 = vld [vmem:[#allocation2 + $0x258] sm:$0x80] }
 0x2d9   : > { %17460 = vmatpush3.bf16.msra.mxu1 %v5294_v33  ;;  %17431 = vmatprep.mubr.msk.bf16.mxu1 %vm172_vm1, %v4941_v55  ;;  %v4949_v33 = vrot.slane %v4880_v57, 7  ;;  %v4952_v55 = vrot.slane %v4882_v1, 7  ;;  %v4888_v1 = vld [vmem:[#allocation2 + $0x260] sm:$0x7f] }
 0x2da   : > { %19844 = vmatprep.subr.msk.bf16.mxu1 %vm628_vm0, %v21456_v39 }
 0x2db   : > { %v4950_v42 = vsel %vm4017_vm4, %v4948_v36, %v4949_v33  ;;  %v4953_v22 = vsel %vm4017_vm4, %v4951_v11, %v4952_v55  ;;  %v4889_v36 = vld [vmem:[#allocation2 + $0x270] sm:$0x80]  ;;  %v4890_v33 = vld [vmem:[#allocation2 + $0x278] sm:$0x7f]  ;;  %v4960_v11 = vrot.slane %v4887_v12, 7  ;;  %v4961_v55 = vrot.slane %v4888_v1, 7 }
 0x2dd   : > { %v4962_v21 = vsel %vm4017_vm4, %v4960_v11, %v4961_v55  ;;  %v4897_v11 = vld [vmem:[#allocation2 + $0x2d0] sm:$0x80]  ;;  %v4898_v55 = vld [vmem:[#allocation2 + $0x2d8] sm:$0x7f] }
 0x2e0   : > { %17432 = vmatmul.mubr.msk.bf16.gmra.mrb[36].mxu1 %vm172_vm1, %v4944_v0  ;;  %v4957_v0 = vrot.slane %v4885_v20, 7  ;;  %v4891_v20 = vld [vmem:[#allocation2 + $0x288] sm:$0x80] }
 0x2e1   : > { %17435 = vmatprep.mubr.msk.bf16.mxu1 %vm172_vm1, %v4947_v52  ;;  %v4958_v52 = vrot.slane %v4886_v6, 7  ;;  %v4892_v6 = vld [vmem:[#allocation2 + $0x290] sm:$0x7f] }
 0x2e3   : > { %v4959_v57 = vsel %vm4017_vm4, %v4957_v0, %v4958_v52  ;;  %v4966_v0 = vrot.slane %v4891_v20, 7  ;;  %v4967_v52 = vrot.slane %v4892_v6, 7 }
 0x2e5   : > { %v4968_v12 = vsel %vm4017_vm4, %v4966_v0, %v4967_v52 }
 0x2e8   : > { %17436 = vmatmul.mubr.msk.bf16.gmra.mrb[40].mxu1 %vm172_vm1, %v4950_v42  ;;  %v4963_v42 = vrot.slane %v4889_v36, 7  ;;  %v4895_v36 = vld [vmem:[#allocation2 + $0x2b8] sm:$0x80] }
 0x2e9   : > { %17439 = vmatprep.mubr.msk.bf16.mxu1 %vm172_vm1, %v4953_v22  ;;  %v4964_v22 = vrot.slane %v4890_v33, 7  ;;  %v4896_v33 = vld [vmem:[#allocation2 + $0x2c0] sm:$0x7f] }
 0x2eb   : > { %v4965_v37 = vsel %vm4017_vm4, %v4963_v42, %v4964_v22  ;;  %v4972_v42 = vrot.slane %v4895_v36, 7  ;;  %v4973_v22 = vrot.slane %v4896_v33, 7  ;;  %v21538_v33 = vld [vmem:[%s23262_s1 + $0x20] sm:$0x3] }
 0x2ed   : > { %v4974_v20 = vsel %vm4017_vm4, %v4972_v42, %v4973_v22  ;;  %v5496_v42 = vld [vmem:[#allocation2 + $0x1d8] sm:$0x1]  ;;  %v5497_v22 = vld [vmem:[#allocation2 + $0x1e8] sm:$0xfe] }
 0x2f0   : > { %17440 = vmatmul.mubr.msk.bf16.gmra.mrb[44].mxu1 %vm172_vm1, %v4956_v29  ;;  %v4969_v29 = vrot.slane %v4893_v47, 7  ;;  %v4899_v47 = vld [vmem:[#allocation2 + $0x2e8] sm:$0x80] }
 0x2f1   : > { %17443 = vmatprep.mubr.msk.bf16.mxu1 %vm172_vm1, %v4959_v57  ;;  %v4970_v57 = vrot.slane %v4894_v32, 7  ;;  %v4900_v32 = vld [vmem:[#allocation2 + $0x2f0] sm:$0x7f]  ;;  %v4978_v0 = vrot.slane %v4899_v47, 7 }
 0x2f2   : > { %v4979_v52 = vrot.slane %v4900_v32, 7 }
 0x2f3   : > { %v4971_v1 = vsel %vm4017_vm4, %v4969_v29, %v4970_v57  ;;  %v5652_v57 = vsel %vm628_vm0, %v21456_v39, 0 }
 0x2f4   : > { %v4980_v29 = vsel %vm4017_vm4, %v4978_v0, %v4979_v52  ;;  %v5499_v52 = vld [vmem:[#allocation2 + $0x200] sm:$0xfe] }
 0x2f8   : > { %17444 = vmatmul.mubr.msk.bf16.gmra.mrb[48].mxu1 %vm172_vm1, %v4962_v21  ;;  %v4975_v21 = vrot.slane %v4897_v11, 7 }
 0x2f9   : > { %17447 = vmatprep.mubr.msk.bf16.mxu1 %vm172_vm1, %v4965_v37  ;;  %v4976_v37 = vrot.slane %v4898_v55, 7  ;;  %v5495_v55 = vld [vmem:[#allocation2 + $0x1d0] sm:$0xfe] }
 0x2fb   : > { %v4977_v6 = vsel %vm4017_vm4, %v4975_v21, %v4976_v37  ;;  %v5498_v21 = vld [vmem:[#allocation2 + $0x1f0] sm:$0x1]  ;;  %v5562_v37 = vrot.slane %v5495_v55, 1  ;;  %v5507_v55 = vld [vmem:[#allocation2 + $0x260] sm:$0xfe] }
 0x2fc   : > { %v5566_v47 = vrot.slane %v5498_v21, 1  ;;  %v5510_v21 = vld [vmem:[#allocation2 + $0x280] sm:$0x1] }
 0x300   : > { %17448 = vmatmul.mubr.msk.bf16.gmra.mrb[52].mxu1 %vm172_vm1, %v4968_v12  ;;  %v15730_v12 = vld [vmem:[%s23262_s1 + $0x1e] sm:$0x3] }
 0x301   : > { %17451 = vmatprep.mubr.msk.bf16.mxu1 %vm172_vm1, %v4971_v1  ;;  %v6011_v1 = vsel %vm628_vm0, %v15730_v12, 0 }
 0x308   : > { %17452 = vmatmul.mubr.msk.bf16.gmra.mrb[56].mxu1 %vm172_vm1, %v4974_v20  ;;  %v5563_v20 = vrot.slane %v5496_v42, 1  ;;  %v5508_v42 = vld [vmem:[#allocation2 + $0x268] sm:$0x1] }
 0x309   : > { %17455 = vmatprep.mubr.msk.bf16.mxu1 %vm172_vm1, %v4977_v6  ;;  %v5565_v6 = vrot.slane %v5497_v22, 1  ;;  %v5509_v22 = vld [vmem:[#allocation2 + $0x278] sm:$0xfe] }
 0x30a   : > { %v5564_v32 = vsel %vm4574_vm5, %v5562_v37, %v5563_v20  ;;  %v5580_v37 = vrot.slane %v5507_v55, 1  ;;  %v5581_v20 = vrot.slane %v5508_v42, 1  ;;  %v5519_v55 = vld [vmem:[#allocation2 + $0x2f0] sm:$0xfe]  ;;  %v5520_v42 = vld [vmem:[#allocation2 + $0x2f8] sm:$0x1] }
 0x30b   : > { %v5567_v0 = vsel %vm4574_vm5, %v5565_v6, %v5566_v47  ;;  %v5583_v6 = vrot.slane %v5509_v22, 1  ;;  %v5584_v47 = vrot.slane %v5510_v21, 1  ;;  %v5848_v22 = vld [vmem:[#allocation2 + $0x1b0] sm:$0x80]  ;;  %v5849_v21 = vld [vmem:[#allocation2 + $0x1b8] sm:$0x7f] }
 0x310   : > { %17456 = vmatmul.mubr.msk.bf16.gmra.mrb[60].mxu1 %vm172_vm1, %v4980_v29  ;;  %v5500_v29 = vld [vmem:[#allocation2 + $0x208] sm:$0x1] }
 0x311   : > { %17461 = vmatprep.mubr.msk.bf16.mxu1 %vm172_vm1, %v21152_v43  ;;  %v21523_v43 = vld [vmem:[#allocation2 + $0x2d8] sm:$0xff] }
 0x318   : > { %17462 = vmatmul.mubr.msk.bf16.vlgmr.msra.gmra.mrb[32].mxu1 %vm172_vm1, %v21160_v30  ;;  %v5489_v30 = vld [vmem:[#allocation2 + $0x188] sm:$0xfe] }
 0x319   : > { %17494 = vmatpush3.bf16.msra.mxu1 %v5652_v57  ;;  %17465 = vmatprep.mubr.msk.bf16.mxu1 %vm172_vm1, %v21189_v9  ;;  %v5553_v9 = vrot.slane %v5489_v30, 1  ;;  %v5501_v57 = vld [vmem:[#allocation2 + $0x218] sm:$0xfe]  ;;  %v5568_v30 = vrot.slane %v5499_v52, 1  ;;  %v5511_v52 = vld [vmem:[#allocation2 + $0x290] sm:$0xfe] }
 0x31a   : > { %19845 = vmatprep.subr.msk.bf16.mxu1 %vm628_vm0, %v15730_v12  ;;  %v5502_v12 = vld [vmem:[#allocation2 + $0x220] sm:$0x1] }
 0x320   : > { %17466 = vmatmul.mubr.msk.bf16.gmra.mrb[36].mxu1 %vm172_vm1, %v21198_v15 }
 0x321   : > { %17469 = vmatprep.mubr.msk.bf16.mxu1 %vm172_vm1, %v21224_v16  ;;  %v21527_v16 = vld [vmem:[#allocation2 + $0x2f0] sm:$0xff] }
 0x328   : > { %17470 = vmatmul.mubr.msk.bf16.gmra.mrb[40].mxu1 %vm172_vm1, %v21232_v56  ;;  %v5491_v56 = vld [vmem:[#allocation2 + $0x1a0] sm:$0xfe] }
 0x329   : > { %17473 = vmatprep.mubr.msk.bf16.mxu1 %vm172_vm1, %v21258_v61  ;;  %v5492_v61 = vld [vmem:[#allocation2 + $0x1a8] sm:$0x1] }
 0x330   : > { %17474 = vmatmul.mubr.msk.bf16.gmra.mrb[44].mxu1 %vm172_vm1, %v21266_v50  ;;  %v5493_v50 = vld [vmem:[#allocation2 + $0x1b8] sm:$0xfe] }
 0x331   : > { %17477 = vmatprep.mubr.msk.bf16.mxu1 %vm172_vm1, %v21292_v53  ;;  %v5490_v53 = vld [vmem:[#allocation2 + $0x190] sm:$0x1] }
 0x332   : > { %v5554_v15 = vrot.slane %v5490_v53, 1  ;;  %v5569_v53 = vrot.slane %v5500_v29, 1  ;;  %v5512_v29 = vld [vmem:[#allocation2 + $0x298] sm:$0x1] }
 0x338   : > { %17478 = vmatmul.mubr.msk.bf16.gmra.mrb[48].mxu1 %vm172_vm1, %v21300_v5  ;;  %v5494_v5 = vld [vmem:[#allocation2 + $0x1c0] sm:$0x1] }
 0x339   : > { %17481 = vmatprep.mubr.msk.bf16.mxu1 %vm172_vm1, %v21326_v58  ;;  %v5555_v58 = vsel %vm4574_vm5, %v5553_v9, %v5554_v15  ;;  %v5560_v39 = vrot.slane %v5494_v5, 1  ;;  %v5571_v9 = vrot.slane %v5501_v57, 1  ;;  %v5572_v15 = vrot.slane %v5502_v12, 1  ;;  %v5505_v5 = vld [vmem:[#allocation2 + $0x248] sm:$0xfe] }
 0x33a   : > { %v5513_v57 = vld [vmem:[#allocation2 + $0x2a8] sm:$0xfe]  ;;  %v5514_v12 = vld [vmem:[#allocation2 + $0x2b0] sm:$0x1] }
 0x340   : > { %17482 = vmatmul.mubr.msk.bf16.gmra.mrb[52].mxu1 %vm172_vm1, %v21334_v63  ;;  %v5556_v63 = vrot.slane %v5491_v56, 1  ;;  %v5573_v56 = vsel %vm4574_vm5, %v5571_v9, %v5572_v15  ;;  %v5589_v9 = vrot.slane %v5513_v57, 1  ;;  %v5590_v15 = vrot.slane %v5514_v12, 1  ;;  %v5852_v57 = vld [vmem:[#allocation2 + $0x1e0] sm:$0x80] }
 0x341   : > { %17485 = vmatprep.mubr.msk.bf16.mxu1 %vm172_vm1, %v21357_v35  ;;  %v5559_v35 = vrot.slane %v5493_v50, 1  ;;  %v5504_v50 = vld [vmem:[#allocation2 + $0x238] sm:$0x1]  ;;  %v5853_v12 = vld [vmem:[#allocation2 + $0x1e8] sm:$0x7f] }
 0x343   : > { %v5561_v11 = vsel %vm4574_vm5, %v5559_v35, %v5560_v39  ;;  %v5575_v35 = vrot.slane %v5504_v50, 1  ;;  %v5577_v39 = vrot.slane %v5505_v5, 1  ;;  %v5516_v50 = vld [vmem:[#allocation2 + $0x2c8] sm:$0x1]  ;;  %v5517_v5 = vld [vmem:[#allocation2 + $0x2d8] sm:$0xfe] }
 0x348   : > { %17486 = vmatmul.mubr.msk.bf16.gmra.mrb[56].mxu1 %vm172_vm1, %v21363_v31  ;;  %v5557_v31 = vrot.slane %v5492_v61, 1  ;;  %v5503_v61 = vld [vmem:[#allocation2 + $0x230] sm:$0xfe] }
 0x349   : > { %17489 = vmatprep.mubr.msk.bf16.mxu1 %vm172_vm1, %v21523_v43 }
 0x34a   : > { %v5558_v36 = vsel %vm4574_vm5, %v5556_v63, %v5557_v31  ;;  %v5506_v63 = vld [vmem:[#allocation2 + $0x250] sm:$0x1]  ;;  %v5574_v31 = vrot.slane %v5503_v61, 1  ;;  %v5515_v61 = vld [vmem:[#allocation2 + $0x2c0] sm:$0xfe] }
 0x350   : > { %17490 = vmatmul.mubr.msk.bf16.gmra.mrb[60].mxu1 %vm172_vm1, %v21527_v16 }
 0x351   : > { %17495 = vmatprep.mubr.msk.bf16.mxu1 %vm172_vm1, %v5555_v58  ;;  %v5570_v58 = vsel %vm4574_vm5, %v5568_v30, %v5569_v53  ;;  %v5586_v30 = vrot.slane %v5511_v52, 1  ;;  %v5587_v53 = vrot.slane %v5512_v29, 1  ;;  %v5850_v52 = vld [vmem:[#allocation2 + $0x1c8] sm:$0x80]  ;;  %v5851_v29 = vld [vmem:[#allocation2 + $0x1d0] sm:$0x7f] }
 0x358   : > { %17496 = vmatmul.mubr.msk.bf16.vlgmr.msra.gmra.mrb[32].mxu1 %vm172_vm1, %v5558_v36  ;;  %v5576_v36 = vsel %vm4574_vm5, %v5574_v31, %v5575_v35  ;;  %v5592_v31 = vrot.slane %v5515_v61, 1  ;;  %v5593_v35 = vrot.slane %v5516_v50, 1  ;;  %v21579_v61 = vld [vmem:[%s23262_s1 + $0x22] sm:$0x3] }
 0x359   : > { %17528 = vmatpush3.bf16.msra.mxu1 %v6011_v1  ;;  %17499 = vmatprep.mubr.msk.bf16.mxu1 %vm172_vm1, %v5561_v11  ;;  %v5578_v1 = vrot.slane %v5506_v63, 1  ;;  %v5518_v63 = vld [vmem:[#allocation2 + $0x2e0] sm:$0x1] }
 0x35a   : > { %19846 = vmatprep.subr.msk.bf16.mxu1 %vm628_vm0, %v21538_v33 }
 0x35b   : > { %v5579_v11 = vsel %vm4574_vm5, %v5577_v39, %v5578_v1  ;;  %v5595_v39 = vrot.slane %v5517_v5, 1  ;;  %v5596_v1 = vrot.slane %v5518_v63, 1  ;;  %v5854_v5 = vld [vmem:[#allocation2 + $0x1f8] sm:$0x80]  ;;  %v5855_v63 = vld [vmem:[#allocation2 + $0x200] sm:$0x7f] }
 0x360   : > { %17500 = vmatmul.mubr.msk.bf16.gmra.mrb[36].mxu1 %vm172_vm1, %v5564_v32  ;;  %v5582_v32 = vsel %vm4574_vm5, %v5580_v37, %v5581_v20  ;;  %v5598_v37 = vrot.slane %v5519_v55, 1  ;;  %v5599_v20 = vrot.slane %v5520_v42, 1  ;;  %v5858_v42 = vld [vmem:[#allocation2 + $0x228] sm:$0x80] }
 0x361   : > { %17503 = vmatprep.mubr.msk.bf16.mxu1 %vm172_vm1, %v5567_v0  ;;  %v5585_v0 = vsel %vm4574_vm5, %v5583_v6, %v5584_v47  ;;  %v5912_v6 = vrot.slane %v5848_v22, 7  ;;  %v5913_v47 = vrot.slane %v5849_v21, 7  ;;  %v5859_v22 = vld [vmem:[#allocation2 + $0x230] sm:$0x7f]  ;;  %v5860_v21 = vld [vmem:[#allocation2 + $0x240] sm:$0x80] }
 0x368   : > { %17504 = vmatmul.mubr.msk.bf16.gmra.mrb[40].mxu1 %vm172_vm1, %v5570_v58  ;;  %v5588_v58 = vsel %vm4574_vm5, %v5586_v30, %v5587_v53  ;;  %v5915_v30 = vrot.slane %v5850_v52, 7  ;;  %v5916_v53 = vrot.slane %v5851_v29, 7  ;;  %v5862_v29 = vld [vmem:[#allocation2 + $0x258] sm:$0x80] }
 0x369   : > { %17507 = vmatprep.mubr.msk.bf16.mxu1 %vm172_vm1, %v5573_v56  ;;  %v5591_v56 = vsel %vm4574_vm5, %v5589_v9, %v5590_v15  ;;  %v5918_v9 = vrot.slane %v5852_v57, 7  ;;  %v5919_v15 = vrot.slane %v5853_v12, 7  ;;  %v5863_v57 = vld [vmem:[#allocation2 + $0x260] sm:$0x7f]  ;;  %v5864_v12 = vld [vmem:[#allocation2 + $0x270] sm:$0x80] }
 0x36b   : > { %v5920_v50 = vsel %vm4017_vm4, %v5918_v9, %v5919_v15  ;;  %v5934_v9 = vrot.slane %v5863_v57, 7  ;;  %v5936_v15 = vrot.slane %v5864_v12, 7  ;;  %v5874_v12 = vld [vmem:[#allocation2 + $0x2e8] sm:$0x80] }
 0x370   : > { %17508 = vmatmul.mubr.msk.bf16.gmra.mrb[44].mxu1 %vm172_vm1, %v5576_v36  ;;  %v5594_v36 = vsel %vm4574_vm5, %v5592_v31, %v5593_v35  ;;  %v5856_v31 = vld [vmem:[#allocation2 + $0x210] sm:$0x80]  ;;  %v5857_v35 = vld [vmem:[#allocation2 + $0x218] sm:$0x7f] }
 0x371   : > { %17511 = vmatprep.mubr.msk.bf16.mxu1 %vm172_vm1, %v5579_v11  ;;  %v5597_v11 = vsel %vm4574_vm5, %v5595_v39, %v5596_v1  ;;  %v5922_v39 = vrot.slane %v5855_v63, 7  ;;  %v5924_v1 = vrot.slane %v5856_v31, 7  ;;  %v5867_v63 = vld [vmem:[#allocation2 + $0x290] sm:$0x7f]  ;;  %v5868_v31 = vld [vmem:[#allocation2 + $0x2a0] sm:$0x80] }
 0x378   : > { %17512 = vmatmul.mubr.msk.bf16.gmra.mrb[48].mxu1 %vm172_vm1, %v5582_v32  ;;  %v5600_v32 = vsel %vm4574_vm5, %v5598_v37, %v5599_v20  ;;  %v5861_v37 = vld [vmem:[#allocation2 + $0x248] sm:$0x7f]  ;;  %v5927_v20 = vrot.slane %v5858_v42, 7  ;;  %v5870_v42 = vld [vmem:[#allocation2 + $0x2b8] sm:$0x80] }
 0x379   : > { %17515 = vmatprep.mubr.msk.bf16.mxu1 %vm172_vm1, %v5585_v0  ;;  %v5914_v0 = vsel %vm4017_vm4, %v5912_v6, %v5913_v47  ;;  %v5928_v6 = vrot.slane %v5859_v22, 7  ;;  %v5930_v47 = vrot.slane %v5860_v21, 7  ;;  %v5871_v22 = vld [vmem:[#allocation2 + $0x2c0] sm:$0x7f]  ;;  %v5872_v21 = vld [vmem:[#allocation2 + $0x2d0] sm:$0x80] }
 0x380   : > { %17516 = vmatmul.mubr.msk.bf16.gmra.mrb[52].mxu1 %vm172_vm1, %v5588_v58  ;;  %v6273_v58 = vsel %vm628_vm0, %v21538_v33, 0  ;;  %v5921_v33 = vrot.slane %v5854_v5, 7  ;;  %v5866_v5 = vld [vmem:[#allocation2 + $0x288] sm:$0x80] }
 0x381   : > { %17519 = vmatprep.mubr.msk.bf16.mxu1 %vm172_vm1, %v5591_v56  ;;  %v5917_v56 = vsel %vm4017_vm4, %v5915_v30, %v5916_v53  ;;  %v5865_v30 = vld [vmem:[#allocation2 + $0x278] sm:$0x7f]  ;;  %v5933_v53 = vrot.slane %v5862_v29, 7  ;;  %v5877_v29 = vld [vmem:[#allocation2 + $0x308] sm:$0x7f] }
 0x388   : > { %17520 = vmatmul.mubr.msk.bf16.gmra.mrb[56].mxu1 %vm172_vm1, %v5594_v36  ;;  %v5925_v36 = vrot.slane %v5857_v35, 7  ;;  %v5869_v35 = vld [vmem:[#allocation2 + $0x2a8] sm:$0x7f] }
 0x389   : > { %17523 = vmatprep.mubr.msk.bf16.mxu1 %vm172_vm1, %v5597_v11  ;;  %v5923_v11 = vsel %vm4017_vm4, %v5921_v33, %v5922_v39  ;;  %v5939_v33 = vrot.slane %v5866_v5, 7  ;;  %v5940_v39 = vrot.slane %v5867_v63, 7  ;;  %v5879_v5 = vld [vmem:[#allocation2 + $0x320] sm:$0x7f] }
 0x38a   : > { %v5926_v55 = vsel %vm4017_vm4, %v5924_v1, %v5925_v36  ;;  %v5942_v1 = vrot.slane %v5868_v31, 7  ;;  %v5943_v36 = vrot.slane %v5869_v35, 7  ;;  %v5958_v35 = vrot.slane %v5879_v5, 7 }
 0x390   : > { %17524 = vmatmul.mubr.msk.bf16.gmra.mrb[60].mxu1 %vm172_vm1, %v5600_v32  ;;  %v5931_v32 = vrot.slane %v5861_v37, 7  ;;  %v5873_v37 = vld [vmem:[#allocation2 + $0x2d8] sm:$0x7f] }
 0x391   : > { %17529 = vmatprep.mubr.msk.bf16.mxu1 %vm172_vm1, %v5914_v0  ;;  %v5929_v0 = vsel %vm4017_vm4, %v5927_v20, %v5928_v6  ;;  %v5945_v20 = vrot.slane %v5870_v42, 7  ;;  %v5946_v6 = vrot.slane %v5871_v22, 7  ;;  %v6208_v42 = vld [vmem:[#allocation2 + $0x1e8] sm:$0xff]  ;;  %v6209_v22 = vld [vmem:[#allocation2 + $0x200] sm:$0xff] }
 0x392   : > { %v5932_v52 = vsel %vm4017_vm4, %v5930_v47, %v5931_v32  ;;  %v5948_v47 = vrot.slane %v5872_v21, 7  ;;  %v5949_v32 = vrot.slane %v5873_v37, 7  ;;  %v6210_v21 = vld [vmem:[#allocation2 + $0x218] sm:$0xff]  ;;  %v6211_v37 = vld [vmem:[#allocation2 + $0x230] sm:$0xff] }
 0x394   : > { %v5950_v57 = vsel %vm4017_vm4, %v5948_v47, %v5949_v32  ;;  %v6215_v47 = vld [vmem:[#allocation2 + $0x290] sm:$0xff]  ;;  %v6216_v32 = vld [vmem:[#allocation2 + $0x2a8] sm:$0xff] }
 0x398   : > { %17530 = vmatmul.mubr.msk.bf16.vlgmr.msra.gmra.mrb[32].mxu1 %vm172_vm1, %v5917_v56  ;;  %v5935_v56 = vsel %vm4017_vm4, %v5933_v53, %v5934_v9  ;;  %v5955_v9 = vrot.slane %v5877_v29, 7  ;;  %v6468_v29 = vld [vmem:[#allocation2 + $0x1b8] sm:$0xfe] }
 0x399   : > { %17562 = vmatpush3.bf16.msra.mxu1 %v6273_v58  ;;  %17533 = vmatprep.mubr.msk.bf16.mxu1 %vm172_vm1, %v5920_v50  ;;  %v5937_v58 = vrot.slane %v5865_v30, 7  ;;  %v5875_v30 = vld [vmem:[#allocation2 + $0x2f0] sm:$0x7f] }
 0x39a   : > { %19847 = vmatprep.subr.msk.bf16.mxu1 %vm628_vm0, %v21579_v61 }
 0x39b   : > { %v5938_v50 = vsel %vm4017_vm4, %v5936_v15, %v5937_v58  ;;  %v5951_v15 = vrot.slane %v5874_v12, 7  ;;  %v5952_v58 = vrot.slane %v5875_v30, 7  ;;  %v6532_v12 = vrot.slane %v6468_v29, 1 }
 0x39d   : > { %v5953_v63 = vsel %vm4017_vm4, %v5951_v15, %v5952_v58  ;;  %v6470_v15 = vld [vmem:[#allocation2 + $0x1d0] sm:$0xfe]  ;;  %v6471_v58 = vld [vmem:[#allocation2 + $0x1d8] sm:$0x1] }
 0x39e   : > { %v6536_v5 = vrot.slane %v6471_v58, 1 }
 0x3a0   : > { %17534 = vmatmul.mubr.msk.bf16.gmra.mrb[36].mxu1 %vm172_vm1, %v5923_v11  ;;  %v5941_v11 = vsel %vm4017_vm4, %v5939_v33, %v5940_v39  ;;  %v6206_v39 = vld [vmem:[#allocation2 + $0x1b8] sm:$0xff] }
 0x3a1   : > { %17537 = vmatprep.mubr.msk.bf16.mxu1 %vm172_vm1, %v5926_v55  ;;  %v5944_v55 = vsel %vm4017_vm4, %v5942_v1, %v5943_v36  ;;  %v15784_v1 = vld [vmem:[%s23262_s1 + $0x26] sm:$0x3] }
 0x3a2   : > { %19848 = vmatprep.subr.msk.bf16.mxu0 %vm628_vm0, %v15784_v1  ;;  %v7145_v36 = vsel %vm628_vm0, %v15784_v1, 0  ;;  %v6476_v1 = vld [vmem:[#allocation2 + $0x218] sm:$0xfe] }
 0x3a3   : > { %17630 = vmatpush3.bf16.msra.mxu0 %v7145_v36  ;;  %v6477_v36 = vld [vmem:[#allocation2 + $0x220] sm:$0x1] }
 0x3a8   : > { %17538 = vmatmul.mubr.msk.bf16.gmra.mrb[40].mxu1 %vm172_vm1, %v5929_v0  ;;  %v5947_v0 = vsel %vm4017_vm4, %v5945_v20, %v5946_v6  ;;  %v6212_v20 = vld [vmem:[#allocation2 + $0x248] sm:$0xff]  ;;  %v6214_v6 = vld [vmem:[#allocation2 + $0x278] sm:$0xff] }
 0x3a9   : > { %17541 = vmatprep.mubr.msk.bf16.mxu1 %vm172_vm1, %v5932_v52  ;;  %v5876_v52 = vld [vmem:[#allocation2 + $0x300] sm:$0x80] }
 0x3aa   : > { %v5954_v53 = vrot.slane %v5876_v52, 7  ;;  %v6220_v52 = vld [vmem:[#allocation2 + $0x308] sm:$0xff] }
 0x3b0   : > { %17542 = vmatmul.mubr.msk.bf16.gmra.mrb[44].mxu1 %vm172_vm1, %v5935_v56  ;;  %v5956_v56 = vsel %vm4017_vm4, %v5954_v53, %v5955_v9  ;;  %v6221_v53 = vld [vmem:[#allocation2 + $0x320] sm:$0xff] }
 0x3b1   : > { %17545 = vmatprep.mubr.msk.bf16.mxu1 %vm172_vm1, %v5938_v50  ;;  %v5878_v50 = vld [vmem:[#allocation2 + $0x318] sm:$0x80] }
 0x3b2   : > { %v5957_v31 = vrot.slane %v5878_v50, 7  ;;  %v6535_v50 = vrot.slane %v6470_v15, 1  ;;  %v6485_v15 = vld [vmem:[#allocation2 + $0x280] sm:$0x1] }
 0x3b4   : > { %v5959_v33 = vsel %vm4017_vm4, %v5957_v31, %v5958_v35  ;;  %v6537_v31 = vsel %vm4574_vm5, %v6535_v50, %v6536_v5  ;;  %v6557_v50 = vrot.slane %v6485_v15, 1 }
 0x3b8   : > { %17546 = vmatmul.mubr.msk.bf16.gmra.mrb[48].mxu1 %vm172_vm1, %v5941_v11  ;;  %v6631_v11 = vsel %vm628_vm0, %v21579_v61, 0  ;;  %v6213_v61 = vld [vmem:[#allocation2 + $0x260] sm:$0xff] }
 0x3b9   : > { %17549 = vmatprep.mubr.msk.bf16.mxu1 %vm172_vm1, %v5944_v55  ;;  %v6207_v55 = vld [vmem:[#allocation2 + $0x1d0] sm:$0xff] }
 0x3c0   : > { %17550 = vmatmul.mubr.msk.bf16.gmra.mrb[52].mxu1 %vm172_vm1, %v5947_v0  ;;  %v6217_v0 = vld [vmem:[#allocation2 + $0x2c0] sm:$0xff] }
 0x3c1   : > { %17553 = vmatprep.mubr.msk.bf16.mxu1 %vm172_vm1, %v5950_v57  ;;  %v6469_v57 = vld [vmem:[#allocation2 + $0x1c0] sm:$0x1] }
 0x3c2   : > { %v6533_v30 = vrot.slane %v6469_v57, 1 }
 0x3c4   : > { %v6534_v9 = vsel %vm4574_vm5, %v6532_v12, %v6533_v30  ;;  %v6482_v30 = vld [vmem:[#allocation2 + $0x260] sm:$0xfe] }
 0x3c5   : > { %v6553_v58 = vrot.slane %v6482_v30, 1  ;;  %v6495_v30 = vld [vmem:[#allocation2 + $0x2f8] sm:$0x1] }
 0x3c8   : > { %17554 = vmatmul.mubr.msk.bf16.gmra.mrb[56].mxu1 %vm172_vm1, %v5953_v63 }
 0x3c9   : > { %17557 = vmatprep.mubr.msk.bf16.mxu1 %vm172_vm1, %v5956_v56  ;;  %v6473_v56 = vld [vmem:[#allocation2 + $0x1f0] sm:$0x1] }
 0x3ca   : > { %v6539_v63 = vrot.slane %v6473_v56, 1 }
 0x3d0   : > { %17558 = vmatmul.mubr.msk.bf16.gmra.mrb[60].mxu1 %vm172_vm1, %v5959_v33  ;;  %v6474_v33 = vld [vmem:[#allocation2 + $0x200] sm:$0xfe] }
 0x3d1   : > { %17563 = vmatprep.mubr.msk.bf16.mxu1 %vm172_vm1, %v6206_v39  ;;  %v6475_v39 = vld [vmem:[#allocation2 + $0x208] sm:$0x1] }
 0x3d8   : > { %17564 = vmatmul.mubr.msk.bf16.vlgmr.msra.gmra.mrb[32].mxu1 %vm172_vm1, %v6207_v55  ;;  %v6542_v55 = vrot.slane %v6475_v39, 1 }
 0x3d9   : > { %17596 = vmatpush3.bf16.msra.mxu1 %v6631_v11  ;;  %17567 = vmatprep.mubr.msk.bf16.mxu1 %vm172_vm1, %v6208_v42  ;;  %v6541_v11 = vrot.slane %v6474_v33, 1  ;;  %v6544_v42 = vrot.slane %v6476_v1, 1  ;;  %v6489_v33 = vld [vmem:[#allocation2 + $0x2b0] sm:$0x1] }
 0x3e0   : > { %17568 = vmatmul.mubr.msk.bf16.gmra.mrb[36].mxu1 %vm172_vm1, %v6209_v22  ;;  %v6545_v22 = vrot.slane %v6477_v36, 1 }
 0x3e1   : > { %17571 = vmatprep.mubr.msk.bf16.mxu1 %vm172_vm1, %v6210_v21  ;;  %v6543_v21 = vsel %vm4574_vm5, %v6541_v11, %v6542_v55  ;;  %v6563_v11 = vrot.slane %v6489_v33, 1  ;;  %v15783_v33 = vld [vmem:[%s23262_s1 + $0x24] sm:$0x3] }
 0x3e2   : > { %19849 = vmatprep.subr.msk.bf16.mxu0 %vm628_vm0, %v15783_v33 }
 0x3e8   : > { %17572 = vmatmul.mubr.msk.bf16.gmra.mrb[40].mxu1 %vm172_vm1, %v6211_v37  ;;  %v6546_v37 = vsel %vm4574_vm5, %v6544_v42, %v6545_v22  ;;  %v6490_v22 = vld [vmem:[#allocation2 + $0x2c0] sm:$0xfe] }
 0x3e9   : > { %17575 = vmatprep.mubr.msk.bf16.mxu1 %vm172_vm1, %v6212_v20  ;;  %v6478_v20 = vld [vmem:[#allocation2 + $0x230] sm:$0xfe] }
 0x3f0   : > { %17576 = vmatmul.mubr.msk.bf16.gmra.mrb[44].mxu1 %vm172_vm1, %v6213_v61  ;;  %v6479_v61 = vld [vmem:[#allocation2 + $0x238] sm:$0x1] }
 0x3f1   : > { %17579 = vmatprep.mubr.msk.bf16.mxu1 %vm172_vm1, %v6214_v6  ;;  %v6480_v6 = vld [vmem:[#allocation2 + $0x248] sm:$0xfe] }
 0x3f8   : > { %17580 = vmatmul.mubr.msk.bf16.gmra.mrb[48].mxu1 %vm172_vm1, %v6215_v47  ;;  %v6481_v47 = vld [vmem:[#allocation2 + $0x250] sm:$0x1] }
 0x3f9   : > { %17583 = vmatprep.mubr.msk.bf16.mxu1 %vm172_vm1, %v6216_v32  ;;  %v6547_v32 = vrot.slane %v6478_v20, 1  ;;  %v6551_v29 = vrot.slane %v6481_v47, 1  ;;  %v6493_v20 = vld [vmem:[#allocation2 + $0x2e0] sm:$0x1] }
 0x400   : > { %17584 = vmatmul.mubr.msk.bf16.gmra.mrb[52].mxu1 %vm172_vm1, %v6217_v0  ;;  %v6548_v0 = vrot.slane %v6479_v61, 1  ;;  %v6565_v61 = vrot.slane %v6490_v22, 1 }
 0x401   : > { %17587 = vmatprep.mubr.msk.bf16.mxu1 %vm172_vm1, %v21523_v43  ;;  %v6472_v43 = vld [vmem:[#allocation2 + $0x1e8] sm:$0xfe] }
 0x402   : > { %v6549_v57 = vsel %vm4574_vm5, %v6547_v32, %v6548_v0  ;;  %v6569_v32 = vrot.slane %v6493_v20, 1 }
 0x408   : > { %17588 = vmatmul.mubr.msk.bf16.gmra.mrb[56].mxu1 %vm172_vm1, %v21527_v16  ;;  %v6538_v16 = vrot.slane %v6472_v43, 1 }
 0x409   : > { %17591 = vmatprep.mubr.msk.bf16.mxu1 %vm172_vm1, %v6220_v52  ;;  %v6550_v52 = vrot.slane %v6480_v6, 1 }
 0x40a   : > { %v6540_v35 = vsel %vm4574_vm5, %v6538_v16, %v6539_v63  ;;  %v6486_v63 = vld [vmem:[#allocation2 + $0x290] sm:$0xfe] }
 0x40b   : > { %v6552_v12 = vsel %vm4574_vm5, %v6550_v52, %v6551_v29  ;;  %v6559_v39 = vrot.slane %v6486_v63, 1  ;;  %v6496_v52 = vld [vmem:[#allocation2 + $0x308] sm:$0xfe]  ;;  %v6497_v29 = vld [vmem:[#allocation2 + $0x310] sm:$0x1] }
 0x410   : > { %17592 = vmatmul.mubr.msk.bf16.gmra.mrb[60].mxu1 %vm172_vm1, %v6221_v53  ;;  %v6483_v53 = vld [vmem:[#allocation2 + $0x268] sm:$0x1] }
 0x411   : > { %17597 = vmatprep.mubr.msk.bf16.mxu1 %vm172_vm1, %v6534_v9  ;;  %v6484_v9 = vld [vmem:[#allocation2 + $0x278] sm:$0xfe]  ;;  %v6554_v43 = vrot.slane %v6483_v53, 1  ;;  %v6574_v53 = vrot.slane %v6496_v52, 1 }
 0x412   : > { %v6556_v56 = vrot.slane %v6484_v9, 1  ;;  %v6575_v9 = vrot.slane %v6497_v29, 1 }
 0x413   : > { %v6555_v5 = vsel %vm4574_vm5, %v6553_v58, %v6554_v43  ;;  %v6572_v58 = vrot.slane %v6495_v30, 1 }
 0x414   : > { %v6558_v16 = vsel %vm4574_vm5, %v6556_v56, %v6557_v50  ;;  %v6576_v43 = vsel %vm4574_vm5, %v6574_v53, %v6575_v9  ;;  %v6498_v56 = vld [vmem:[#allocation2 + $0x320] sm:$0xfe]  ;;  %v6499_v50 = vld [vmem:[#allocation2 + $0x328] sm:$0x1] }
 0x415   : > { %v6578_v63 = vrot.slane %v6499_v50, 1 }
 0x418   : > { %17598 = vmatmul.mubr.msk.bf16.vlgmr.msra.gmra.mrb[32].mxu1 %vm172_vm1, %v6537_v31  ;;  %v6487_v31 = vld [vmem:[#allocation2 + $0x298] sm:$0x1] }
 0x419   : > { %17601 = vmatprep.mubr.msk.bf16.mxu1 %vm172_vm1, %v6540_v35  ;;  %v6488_v35 = vld [vmem:[#allocation2 + $0x2a8] sm:$0xfe]  ;;  %v6560_v1 = vrot.slane %v6487_v31, 1 }
 0x41a   : > { %v6562_v36 = vrot.slane %v6488_v35, 1  ;;  %v7078_v35 = vld [vmem:[#allocation2 + $0x128] sm:$0xff] }
 0x41b   : > { %v6561_v55 = vsel %vm4574_vm5, %v6559_v39, %v6560_v1  ;;  %17631 = vmatprep.mubr.msk.bf16.mxu0 %vm172_vm1, %v7078_v35  ;;  %v7079_v39 = vld [vmem:[#allocation2 + $0x140] sm:$0xff]  ;;  %v7357_v1 = vsel %vm628_vm0, %v15783_v33, 0 }
 0x41c   : > { %v6564_v42 = vsel %vm4574_vm5, %v6562_v36, %v6563_v11  ;;  %17632 = vmatmul.mubr.msk.bf16.vlgmr.msra.gmra.mrb[32].mxu0 %vm172_vm1, %v7079_v39  ;;  %v7080_v36 = vld [vmem:[#allocation2 + $0x158] sm:$0xff]  ;;  %v7081_v11 = vld [vmem:[#allocation2 + $0x170] sm:$0xff] }
 0x41d   : > { %17664 = vmatpush3.bf16.msra.mxu0 %v7357_v1  ;;  %17635 = vmatprep.mubr.msk.bf16.mxu0 %vm172_vm1, %v7080_v36 }
 0x420   : > { %17602 = vmatmul.mubr.msk.bf16.gmra.mrb[36].mxu1 %vm172_vm1, %v6543_v21  ;;  %v6491_v21 = vld [vmem:[#allocation2 + $0x2c8] sm:$0x1] }
 0x421   : > { %17605 = vmatprep.mubr.msk.bf16.mxu1 %vm172_vm1, %v6546_v37  ;;  %v6492_v37 = vld [vmem:[#allocation2 + $0x2d8] sm:$0xfe]  ;;  %v6566_v6 = vrot.slane %v6491_v21, 1 }
 0x422   : > { %v6568_v47 = vrot.slane %v6492_v37, 1 }
 0x423   : > { %v6567_v0 = vsel %vm4574_vm5, %v6565_v61, %v6566_v6  ;;  %v19896_v6 = vld [vmem:[%s20263_s26 + $0x10] sm:$0xff] }
 0x424   : > { %17636 = vmatmul.mubr.msk.bf16.gmra.mrb[36].mxu0 %vm172_vm1, %v7081_v11 }
 0x428   : > { %17606 = vmatmul.mubr.msk.bf16.gmra.mrb[40].mxu1 %vm172_vm1, %v6549_v57  ;;  %v6570_v57 = vsel %vm4574_vm5, %v6568_v47, %v6569_v32  ;;  %v23302_v47 = vmax.f32 %v21099_v44, 0.0 }
 0x429   : > { %17609 = vmatprep.mubr.msk.bf16.mxu1 %vm172_vm1, %v6552_v12  ;;  %v6494_v12 = vld [vmem:[#allocation2 + $0x2f0] sm:$0xfe] }
 0x42a   : > { %v6571_v15 = vrot.slane %v6494_v12, 1  ;;  %v3890_v32 = vadd.f32 %v19896_v6, %v23302_v47  ;;  %v23303_v12 = vmax.f32 %v21102_v41, 0.0  ;;  %v19901_v47 = vld [vmem:[%s20263_s26 + $0x20] sm:$0xff] }
 0x430   : > { %17610 = vmatmul.mubr.msk.bf16.gmra.mrb[44].mxu1 %vm172_vm1, %v6555_v5  ;;  %v6573_v5 = vsel %vm4574_vm5, %v6571_v15, %v6572_v58  ;;  %v19898_v58 = vld [vmem:[%s20263_s26 + $0x18] sm:$0xff] }
 0x431   : > { %17613 = vmatprep.mubr.msk.bf16.mxu1 %vm172_vm1, %v6558_v16  ;;  %v6577_v16 = vrot.slane %v6498_v56, 1 }
 0x433   : > { %v6579_v31 = vsel %vm4574_vm5, %v6577_v16, %v6578_v63  ;;  %v23305_v16 = vmax.f32 %v21108_v62, 0.0 }
 0x438   : > { %17614 = vmatmul.mubr.msk.bf16.gmra.mrb[48].mxu1 %vm172_vm1, %v6561_v55  ;;  %v21681_v55 = vld [vmem:[%s23262_s1 + $0x28] sm:$0x3] }
 0x439   : > { %17617 = vmatprep.mubr.msk.bf16.mxu1 %vm172_vm1, %v6564_v42  ;;  %19850 = vmatprep.subr.msk.bf16.mxu0 %vm628_vm0, %v21681_v55  ;;  %v21688_v42 = vld [vmem:[%s23263_s2 + $0x1] ss:$0 sm:$0xff] }
 0x440   : > { %17618 = vmatmul.mubr.msk.bf16.gmra.mrb[52].mxu1 %vm172_vm1, %v6567_v0 }
 0x441   : > { %17621 = vmatprep.mubr.msk.bf16.mxu1 %vm172_vm1, %v6570_v57  ;;  %v19897_v57 = vld [vmem:[%s20263_s26] sm:$0xff] }
 0x442   : > { %v3888_v30 = vadd.f32 %v19897_v57, %v23303_v12  ;;  %v19902_v12 = vld [vmem:[%s20263_s26 + $0x38] sm:$0xff] }
 0x448   : > { %17622 = vmatmul.mubr.msk.bf16.gmra.mrb[56].mxu1 %vm172_vm1, %v6573_v5  ;;  %v19899_v5 = vld [vmem:[%s20263_s26 + $0x8] sm:$0xff] }
 0x449   : > { %17625 = vmatprep.mubr.msk.bf16.mxu1 %vm172_vm1, %v6576_v43  ;;  %v23304_v43 = vmax.f32 %v21105_v10, 0.0  ;;  %v3889_v63 = vadd.f32 %v19899_v5, %v23305_v16 }
 0x44b   : > { %v3891_v56 = vadd.f32 %v19898_v58, %v23304_v43  ;;  %v19903_v58 = vld [vmem:[%s20263_s26 + $0x28] sm:$0xff]  ;;  %v23309_v43 = vmax.f32 %v21134_v28, 0.0 }
 0x450   : > { %17626 = vmatmul.mubr.msk.bf16.gmra.mrb[60].mxu1 %vm172_vm1, %v6579_v31 }
 0x4eb   : > { %v17599_v22 = vpop.f32.mrb[32].mxu1 }
 0x4ec   : > { %v6836_v21 = vadd.f32 %v17599_v22, %v21688_v42  ;;  %v6667_v37 = vpop.f32.mrb[33].mxu1  ;;  %v19900_v22 = vld [vmem:[%s20263_s26 + $0x30] sm:$0xff] }
 0x4ed   : > { %v6834_v20 = vadd.f32 %v21688_v42, %v6667_v37  ;;  %v17600_v61 = vpop.f32.mrb[34].mxu1 }
 0x4ee   : > { %v6868_v0 = vmax.f32 %v6836_v21, 0.0  ;;  %v6837_v52 = vadd.f32 %v17600_v61, %v21688_v42  ;;  %v6670_v29 = vpop.f32.mrb[35].mxu1  ;;  %v23306_v21 = vmax.f32 %v21124_v4, 0.0 }
 0x4ef   : > { %v6866_v53 = vmax.f32 %v6834_v20, 0.0  ;;  %v6835_v9 = vadd.f32 %v21688_v42, %v6670_v29 }
 0x4f0   : > { %v21700_v15 = vadd.f32 %v6868_v0, %v3890_v32  ;;  %v6869_v50 = vmax.f32 %v6837_v52, 0.0  ;;  %v3894_v37 = vadd.f32 %v19900_v22, %v23306_v21  ;;  %v23307_v32 = vmax.f32 %v21128_v51, 0.0 }
 0x4f1   : > { %v21705_v44 = vadd.f32 %v6866_v53, %v3888_v30  ;;  %v6867_v31 = vmax.f32 %v6835_v9, 0.0  ;;  %v23308_v30 = vmax.f32 %v21131_v25, 0.0 }
 0x4f2   : > { %v21710_v41 = vadd.f32 %v6869_v50, %v3891_v56  ;;  %v6931_v35 = vpack.c.bf16 %v6869_v50, %v6868_v0  ;;  %v3892_v0 = vadd.f32 %v19901_v47, %v23307_v32  ;;  %v3893_v56 = vadd.f32 %v19903_v58, %v23309_v43 }
 0x4f3   : > { %v21712_v33 = vadd.f32 %v6867_v31, %v3889_v63  ;;  %v6930_v39 = vpack.c.bf16 %v6867_v31, %v6866_v53  ;;  %v17603_v1 = vpop.f32.mrb[36].mxu1  ;;  %v3895_v53 = vadd.f32 %v19902_v12, %v23308_v30 }
 0x4f4   : > { %6947 = vst.msk [vmem:[#allocation2 + $0x1a0] sm:$0xff] %vm172_vm1, %v6931_v35  ;;  %v6840_v10 = vadd.f32 %v17603_v1, %v21688_v42  ;;  %v6683_v36 = vpop.f32.mrb[37].mxu1 }
 0x4f5   : > { %6946 = vst.msk [vmem:[#allocation2 + $0x188] sm:$0xff] %vm172_vm1, %v6930_v39  ;;  %v6838_v62 = vadd.f32 %v21688_v42, %v6683_v36  ;;  %v17604_v11 = vpop.f32.mrb[38].mxu1  ;;  %v19904_v36 = vld [vmem:[%s20263_s26 + $0x50] sm:$0xff] }
 0x4f6   : > { %v6872_v20 = vmax.f32 %v6840_v10, 0.0  ;;  %v6841_v61 = vadd.f32 %v17604_v11, %v21688_v42  ;;  %v6686_v6 = vpop.f32.mrb[39].mxu1 }
 0x4f7   : > { %v6870_v52 = vmax.f32 %v6838_v62, 0.0  ;;  %v6839_v29 = vadd.f32 %v21688_v42, %v6686_v6  ;;  %v23310_v62 = vmax.f32 %v21150_v40, 0.0  ;;  %v23312_v40 = vmax.f32 %v21163_v48, 0.0 }
 0x4f8   : > { %v21726_v57 = vadd.f32 %v6872_v20, %v3894_v37  ;;  %v6873_v9 = vmax.f32 %v6841_v61, 0.0  ;;  %v23311_v61 = vmax.f32 %v21156_v60, 0.0 }
 0x4f9   : > { %v21731_v4 = vadd.f32 %v6870_v52, %v3892_v0  ;;  %v6871_v50 = vmax.f32 %v6839_v29, 0.0  ;;  %v3898_v11 = vadd.f32 %v19904_v36, %v23310_v62  ;;  %v23314_v36 = vmax.f32 %v21186_v8, 0.0 }
 0x4fa   : > { %v21736_v51 = vadd.f32 %v6873_v9, %v3895_v53  ;;  %v6933_v5 = vpack.c.bf16 %v6873_v9, %v6872_v20  ;;  %v19905_v20 = vld [vmem:[%s20263_s26 + $0x40] sm:$0xff]  ;;  %v19907_v53 = vld [vmem:[%s20263_s26 + $0x48] sm:$0xff]  ;;  %v23313_v9 = vmax.f32 %v21168_v17, 0.0  ;;  %v23316_v8 = vmax.f32 %v21201_v18, 0.0 }
 0x4fb   : > { %v21738_v16 = vadd.f32 %v6871_v50, %v3893_v56  ;;  %v6932_v63 = vpack.c.bf16 %v6871_v50, %v6870_v52  ;;  %v17607_v31 = vpop.f32.mrb[40].mxu1  ;;  %v21748_v10 = vld [vmem:[#allocation2 + $0x1a0] sm:$0xff]  ;;  %v3896_v6 = vadd.f32 %v19905_v20, %v23311_v61  ;;  %v19906_v52 = vld [vmem:[%s20263_s26 + $0x58] sm:$0xff]  ;;  %v23315_v20 = vmax.f32 %v21193_v27, 0.0 }
 0x4fc   : > { %6949 = vst.msk [vmem:[#allocation2 + $0x1d0] sm:$0xff] %vm172_vm1, %v6933_v5  ;;  %v6844_v25 = vadd.f32 %v17607_v31, %v21688_v42  ;;  %v6699_v35 = vpop.f32.mrb[41].mxu1  ;;  %v21742_v39 = vld [vmem:[#allocation2 + $0x188] sm:$0xff]  ;;  %v3899_v29 = vadd.f32 %v19906_v52, %v23312_v40  ;;  %v3897_v58 = vadd.f32 %v19907_v53, %v23313_v9  ;;  %v19910_v52 = vld [vmem:[%s20263_s26 + $0x78] sm:$0xff]  ;;  %v23317_v9 = vmax.f32 %v21206_v38, 0.0 }
 0x4fd   : > { %6948 = vst.msk [vmem:[#allocation2 + $0x1b8] sm:$0xff] %vm172_vm1, %v6932_v63  ;;  %v6842_v28 = vadd.f32 %v21688_v42, %v6699_v35  ;;  %v17608_v1 = vpop.f32.mrb[42].mxu1  ;;  %17639 = vmatprep.mubr.msk.bf16.mxu0 %vm172_vm1, %v21742_v39  ;;  %v3903_v40 = vadd.f32 %v19910_v52, %v23316_v8  ;;  %v19911_v53 = vld [vmem:[%s20263_s26 + $0x68] sm:$0xff] }
 0x4fe   : > { %v6876_v22 = vmax.f32 %v6844_v25, 0.0  ;;  %v6845_v21 = vadd.f32 %v17608_v1, %v21688_v42  ;;  %v6702_v37 = vpop.f32.mrb[43].mxu1  ;;  %17640 = vmatmul.mubr.msk.bf16.gmra.mrb[40].mxu0 %vm172_vm1, %v21748_v10  ;;  %v19908_v1 = vld [vmem:[%s20263_s26 + $0x70] sm:$0xff] }
 0x4ff   : > { %v6874_v47 = vmax.f32 %v6842_v28, 0.0  ;;  %v6843_v32 = vadd.f32 %v21688_v42, %v6702_v37  ;;  %v3902_v62 = vadd.f32 %v19908_v1, %v23314_v36  ;;  %v19909_v37 = vld [vmem:[%s20263_s26 + $0x60] sm:$0xff]  ;;  %v19912_v36 = vld [vmem:[%s20263_s26 + $0x90] sm:$0xff] }
 0x500   : > { %v21760_v0 = vadd.f32 %v6876_v22, %v3898_v11  ;;  %v6877_v12 = vmax.f32 %v6845_v21, 0.0  ;;  %v3900_v61 = vadd.f32 %v19909_v37, %v23315_v20  ;;  %v19913_v20 = vld [vmem:[%s20263_s26 + $0x80] sm:$0xff] }
 0x501   : > { %v21765_v30 = vadd.f32 %v6874_v47, %v3896_v6  ;;  %v6875_v43 = vmax.f32 %v6843_v32, 0.0 }
 0x502   : > { %v21770_v60 = vadd.f32 %v6877_v12, %v3899_v29  ;;  %v6935_v56 = vpack.c.bf16 %v6877_v12, %v6876_v22 }
 0x503   : > { %v21772_v50 = vadd.f32 %v6875_v43, %v3897_v58  ;;  %v6934_v5 = vpack.c.bf16 %v6875_v43, %v6874_v47  ;;  %v17611_v63 = vpop.f32.mrb[44].mxu1  ;;  %v21782_v28 = vld [vmem:[#allocation2 + $0x1d0] sm:$0xff]  ;;  %v3901_v58 = vadd.f32 %v19911_v53, %v23317_v9 }
 0x504   : > { %6951 = vst.msk [vmem:[#allocation2 + $0x200] sm:$0xff] %vm172_vm1, %v6935_v56  ;;  %v6848_v48 = vadd.f32 %v17611_v63, %v21688_v42  ;;  %v6715_v31 = vpop.f32.mrb[45].mxu1  ;;  %v21776_v25 = vld [vmem:[#allocation2 + $0x1b8] sm:$0xff] }
 0x505   : > { %6950 = vst.msk [vmem:[#allocation2 + $0x1e8] sm:$0xff] %vm172_vm1, %v6934_v5  ;;  %v6846_v17 = vadd.f32 %v21688_v42, %v6715_v31  ;;  %v17612_v35 = vpop.f32.mrb[46].mxu1  ;;  %17643 = vmatprep.mubr.msk.bf16.mxu0 %vm172_vm1, %v21776_v25 }
 0x506   : > { %v6880_v11 = vmax.f32 %v6848_v48, 0.0  ;;  %v6849_v22 = vadd.f32 %v17612_v35, %v21688_v42  ;;  %v6718_v21 = vpop.f32.mrb[47].mxu1  ;;  %17644 = vmatmul.mubr.msk.bf16.gmra.mrb[44].mxu0 %vm172_vm1, %v21782_v28 }
 0x507   : > { %v6878_v6 = vmax.f32 %v6846_v17, 0.0  ;;  %v6847_v47 = vadd.f32 %v21688_v42, %v6718_v21 }
 0x508   : > { %v21794_v32 = vadd.f32 %v6880_v11, %v3902_v62  ;;  %v6881_v29 = vmax.f32 %v6849_v22, 0.0  ;;  %v23318_v62 = vmax.f32 %v21222_v26, 0.0  ;;  %v23320_v26 = vmax.f32 %v21235_v59, 0.0 }
 0x509   : > { %v21799_v12 = vadd.f32 %v6878_v6, %v3900_v61  ;;  %v6879_v43 = vmax.f32 %v6847_v47, 0.0  ;;  %v23319_v61 = vmax.f32 %v21228_v2, 0.0 }
 0x50a   : > { %v21804_v27 = vadd.f32 %v6881_v29, %v3903_v40  ;;  %v6937_v56 = vpack.c.bf16 %v6881_v29, %v6880_v11  ;;  %v3906_v11 = vadd.f32 %v19912_v36, %v23318_v62  ;;  %v19914_v40 = vld [vmem:[%s20263_s26 + $0x98] sm:$0xff] }
 0x50b   : > { %v21806_v5 = vadd.f32 %v6879_v43, %v3901_v58  ;;  %v6936_v63 = vpack.c.bf16 %v6879_v43, %v6878_v6  ;;  %v17615_v48 = vpop.f32.mrb[48].mxu1  ;;  %v21816_v1 = vld [vmem:[#allocation2 + $0x200] sm:$0xff]  ;;  %v3904_v6 = vadd.f32 %v19913_v20, %v23319_v61  ;;  %v3907_v29 = vadd.f32 %v19914_v40, %v23320_v26  ;;  %v19915_v58 = vld [vmem:[%s20263_s26 + $0x88] sm:$0xff] }
 0x50c   : > { %6953 = vst.msk [vmem:[#allocation2 + $0x230] sm:$0xff] %vm172_vm1, %v6937_v56  ;;  %v6852_v18 = vadd.f32 %v17615_v48, %v21688_v42  ;;  %v6731_v31 = vpop.f32.mrb[49].mxu1  ;;  %v21810_v17 = vld [vmem:[#allocation2 + $0x1e8] sm:$0xff]  ;;  %v23321_v43 = vmax.f32 %v21240_v14, 0.0 }
 0x50d   : > { %6952 = vst.msk [vmem:[#allocation2 + $0x218] sm:$0xff] %vm172_vm1, %v6936_v63  ;;  %v6850_v38 = vadd.f32 %v21688_v42, %v6731_v31  ;;  %v17616_v35 = vpop.f32.mrb[50].mxu1  ;;  %17647 = vmatprep.mubr.msk.bf16.mxu0 %vm172_vm1, %v21810_v17 }
 0x50e   : > { %v6884_v22 = vmax.f32 %v6852_v18, 0.0  ;;  %v6853_v21 = vadd.f32 %v17616_v35, %v21688_v42  ;;  %v6734_v37 = vpop.f32.mrb[51].mxu1  ;;  %17648 = vmatmul.mubr.msk.bf16.gmra.mrb[48].mxu0 %vm172_vm1, %v21816_v1  ;;  %v3905_v56 = vadd.f32 %v19915_v58, %v23321_v43  ;;  %v19918_v58 = vld [vmem:[%s20263_s26 + $0xb8] sm:$0xff] }
 0x50f   : > { %v6882_v47 = vmax.f32 %v6850_v38, 0.0  ;;  %v6851_v52 = vadd.f32 %v21688_v42, %v6734_v37 }
 0x510   : > { %v21828_v8 = vadd.f32 %v6884_v22, %v3906_v11  ;;  %v6885_v53 = vmax.f32 %v6853_v21, 0.0  ;;  %v23322_v21 = vmax.f32 %v21256_v3, 0.0  ;;  %v23324_v3 = vmax.f32 %v21269_v7, 0.0 }
 0x511   : > { %v21833_v9 = vadd.f32 %v6882_v47, %v3904_v6  ;;  %v6883_v63 = vmax.f32 %v6851_v52, 0.0  ;;  %v23323_v52 = vmax.f32 %v21262_v13, 0.0 }
 0x512   : > { %v21838_v2 = vadd.f32 %v6885_v53, %v3907_v29  ;;  %v6939_v48 = vpack.c.bf16 %v6885_v53, %v6884_v22  ;;  %v19916_v22 = vld [vmem:[%s20263_s26 + $0xb0] sm:$0xff]  ;;  %v3911_v43 = vadd.f32 %v19918_v58, %v23324_v3 }
 0x513   : > { %v21840_v18 = vadd.f32 %v6883_v63, %v3905_v56  ;;  %v6938_v31 = vpack.c.bf16 %v6883_v63, %v6882_v47  ;;  %v17619_v38 = vpop.f32.mrb[52].mxu1  ;;  %v21850_v11 = vld [vmem:[#allocation2 + $0x230] sm:$0xff]  ;;  %v3910_v37 = vadd.f32 %v19916_v22, %v23322_v21  ;;  %v19917_v47 = vld [vmem:[%s20263_s26 + $0xa0] sm:$0xff] }
 0x514   : > { %6955 = vst.msk [vmem:[#allocation2 + $0x260] sm:$0xff] %vm172_vm1, %v6939_v48  ;;  %v6856_v59 = vadd.f32 %v17619_v38, %v21688_v42  ;;  %v6747_v35 = vpop.f32.mrb[53].mxu1  ;;  %v21844_v36 = vld [vmem:[#allocation2 + $0x218] sm:$0xff]  ;;  %v3908_v40 = vadd.f32 %v19917_v47, %v23323_v52  ;;  %v19919_v48 = vld [vmem:[%s20263_s26 + $0xa8] sm:$0xff]  ;;  %v19920_v52 = vld [vmem:[%s20263_s26 + $0xd0] sm:$0xff] }
 0x515   : > { %6954 = vst.msk [vmem:[#allocation2 + $0x248] sm:$0xff] %vm172_vm1, %v6938_v31  ;;  %v6854_v14 = vadd.f32 %v21688_v42, %v6747_v35  ;;  %v17620_v62 = vpop.f32.mrb[54].mxu1  ;;  %17651 = vmatprep.mubr.msk.bf16.mxu0 %vm172_vm1, %v21844_v36  ;;  %v23325_v31 = vmax.f32 %v21274_v46, 0.0  ;;  %v6964_v47 = vld [vmem:[#allocation2 + $0x128] sm:$0x3f] }
 0x516   : > { %v6888_v20 = vmax.f32 %v6856_v59, 0.0  ;;  %v6857_v61 = vadd.f32 %v17620_v62, %v21688_v42  ;;  %v6750_v6 = vpop.f32.mrb[55].mxu1  ;;  %17652 = vmatmul.mubr.msk.bf16.gmra.mrb[52].mxu0 %vm172_vm1, %v21850_v11 }
 0x517   : > { %v6886_v26 = vmax.f32 %v6854_v14, 0.0  ;;  %v6855_v29 = vadd.f32 %v21688_v42, %v6750_v6  ;;  %v3909_v38 = vadd.f32 %v19919_v48, %v23325_v31  ;;  %v6963_v6 = vld [vmem:[#allocation2 + $0x120] sm:$0xc0] }
 0x518   : > { %v21862_v53 = vadd.f32 %v6888_v20, %v3910_v37  ;;  %v6889_v56 = vmax.f32 %v6857_v61, 0.0 }
 0x519   : > { %v21867_v63 = vadd.f32 %v6886_v26, %v3908_v40  ;;  %v6887_v59 = vmax.f32 %v6855_v29, 0.0  ;;  %v23327_v40 = vmax.f32 %v21290_v19, 0.0 }
 0x51a   : > { %v21872_v35 = vadd.f32 %v6889_v56, %v3911_v43  ;;  %v6941_v13 = vpack.c.bf16 %v6889_v56, %v6888_v20  ;;  %v19921_v43 = vld [vmem:[%s20263_s26 + $0xc0] sm:$0xff]  ;;  %v23328_v56 = vmax.f32 %v21296_v49, 0.0 }
 0x51b   : > { %v21874_v14 = vadd.f32 %v6887_v59, %v3909_v38  ;;  %v6940_v62 = vpack.c.bf16 %v6887_v59, %v6886_v26  ;;  %v17623_v22 = vpop.f32.mrb[56].mxu1  ;;  %v21884_v20 = vld [vmem:[#allocation2 + $0x260] sm:$0xff]  ;;  %v3914_v26 = vadd.f32 %v19920_v52, %v23327_v40  ;;  %v19922_v38 = vld [vmem:[%s20263_s26 + $0xd8] sm:$0xff]  ;;  %v23329_v59 = vmax.f32 %v21303_v24, 0.0  ;;  %v19923_v52 = vld [vmem:[%s20263_s26 + $0xc8] sm:$0xff] }
 0x51c   : > { %6957 = vst.msk [vmem:[#allocation2 + $0x290] sm:$0xff] %vm172_vm1, %v6941_v13  ;;  %v6860_v7 = vadd.f32 %v17623_v22, %v21688_v42  ;;  %v6763_v21 = vpop.f32.mrb[57].mxu1  ;;  %v21878_v37 = vld [vmem:[#allocation2 + $0x248] sm:$0xff]  ;;  %v3912_v48 = vadd.f32 %v19921_v43, %v23328_v56  ;;  %v23332_v40 = vmax.f32 %v21308_v45, 0.0 }
 0x51d   : > { %23326 = vst [vmem:[#allocation4_spill] sm:$0xff] %v21874_v14  ;;  %6956 = vst.msk [vmem:[#allocation2 + $0x278] sm:$0xff] %vm172_vm1, %v6940_v62  ;;  %v6858_v46 = vadd.f32 %v21688_v42, %v6763_v21  ;;  %v17624_v61 = vpop.f32.mrb[58].mxu1  ;;  %17655 = vmatprep.mubr.msk.bf16.mxu0 %vm172_vm1, %v21878_v37  ;;  %v3915_v13 = vadd.f32 %v19922_v38, %v23329_v59  ;;  %v7029_v21 = vrot.slane %v6964_v47, 6  ;;  %v23335_v59 = vmax.f32 %v21324_v34, 0.0 }
 0x51e   : > { %v6892_v29 = vmax.f32 %v6860_v7, 0.0  ;;  %v6861_v58 = vadd.f32 %v17624_v61, %v21688_v42  ;;  %v6766_v3 = vpop.f32.mrb[59].mxu1  ;;  %17656 = vmatmul.mubr.msk.bf16.gmra.mrb[56].mxu0 %vm172_vm1, %v21884_v20  ;;  %v7028_v7 = vrot.slane %v6963_v6, 6  ;;  %v3913_v49 = vadd.f32 %v19923_v52, %v23332_v40  ;;  %v6967_v52 = vld [vmem:[#allocation2 + $0x150] sm:$0xc0] }
 0x51f   : > { %v6890_v31 = vmax.f32 %v6858_v46, 0.0  ;;  %v6859_v19 = vadd.f32 %v21688_v42, %v6766_v3  ;;  %v6968_v40 = vld [vmem:[#allocation2 + $0x158] sm:$0x3f]  ;;  %v23337_v34 = vmax.f32 %v21337_v54, 0.0 }
 0x520   : > { %v21899_v62 = vadd.f32 %v6892_v29, %v3914_v26  ;;  %v6893_v22 = vmax.f32 %v6861_v58, 0.0  ;;  %v7030_v45 = vsel %vm628_vm0, %v7028_v7, %v7029_v21  ;;  %v6965_v58 = vld [vmem:[#allocation2 + $0x138] sm:$0xc0]  ;;  %v19925_v7 = vld [vmem:[%s20263_s26 + $0xe0] sm:$0xff]  ;;  %v23336_v21 = vmax.f32 %v21330_v23, 0.0 }
 0x521   : > { %v21901_v61 = vadd.f32 %v6890_v31, %v3912_v48  ;;  %v6891_v43 = vmax.f32 %v6859_v19, 0.0  ;;  %v6966_v48 = vld [vmem:[#allocation2 + $0x140] sm:$0x3f] }
 0x522   : > { %23330 = vst [vmem:[#allocation5_spill] sm:$0xff] %v21899_v62  ;;  %v21906_v46 = vadd.f32 %v6893_v22, %v3915_v13  ;;  %v6943_v56 = vpack.c.bf16 %v6893_v22, %v6892_v29  ;;  %v19924_v29 = vld [vmem:[%s20263_s26 + $0xf0] sm:$0xff] }
 0x523   : > { %23331 = vst [vmem:[#allocation6_spill] sm:$0xff] %v21901_v61  ;;  %v21908_v24 = vadd.f32 %v6891_v43, %v3913_v49  ;;  %v6942_v38 = vpack.c.bf16 %v6891_v43, %v6890_v31  ;;  %v17627_v3 = vpop.f32.mrb[60].mxu1  ;;  %v3918_v31 = vadd.f32 %v19924_v29, %v23335_v59  ;;  %v21922_v22 = vld [vmem:[#allocation2 + $0x290] sm:$0xff]  ;;  %v3916_v43 = vadd.f32 %v19925_v7, %v23336_v21 }
 0x524   : > { %23333 = vst [vmem:[#allocation7_spill] sm:$0xff] %v21906_v46  ;;  %6959 = vst.msk [vmem:[#allocation2 + $0x2c0] sm:$0xff] %vm172_vm1, %v6943_v56  ;;  %v6864_v6 = vadd.f32 %v17627_v3, %v21688_v42  ;;  %v6779_v47 = vpop.f32.mrb[61].mxu1  ;;  %v21912_v26 = vld [vmem:[#allocation2 + $0x278] sm:$0xff]  ;;  %v7034_v21 = vrot.slane %v6967_v52, 6  ;;  %v7035_v46 = vrot.slane %v6968_v40, 6 }
 0x525   : > { %23334 = vst [vmem:[#allocation8_spill] sm:$0xff] %v21908_v24  ;;  %6958 = vst.msk [vmem:[#allocation2 + $0x2a8] sm:$0xff] %vm172_vm1, %v6942_v38  ;;  %v6862_v13 = vadd.f32 %v21688_v42, %v6779_v47  ;;  %v17628_v19 = vpop.f32.mrb[62].mxu1  ;;  %17659 = vmatprep.mubr.msk.bf16.mxu0 %vm172_vm1, %v21912_v26  ;;  %v19926_v56 = vld [vmem:[%s20263_s26 + $0xf8] sm:$0xff]  ;;  %v7032_v24 = vrot.slane %v6966_v48, 6  ;;  %v7684_v48 = vsel %vm628_vm0, %v21681_v55, 0 }
 0x526   : > { %v6896_v49 = vmax.f32 %v6864_v6, 0.0  ;;  %v3919_v38 = vadd.f32 %v19926_v56, %v23337_v34  ;;  %v6865_v3 = vadd.f32 %v17628_v19, %v21688_v42  ;;  %v6782_v47 = vpop.f32.mrb[63].mxu1  ;;  %17660 = vmatmul.mubr.msk.bf16.gmra.mrb[60].mxu0 %vm172_vm1, %v21922_v22  ;;  %v7031_v6 = vrot.slane %v6965_v58, 6  ;;  %v19927_v56 = vld [vmem:[%s20263_s26 + $0xe8] sm:$0xff]  ;;  %v23338_v19 = vld [vmem:[#allocation3_spill] sm:$0xff] }
 0x527   : > { %v6894_v29 = vmax.f32 %v6862_v13, 0.0  ;;  %v6863_v59 = vadd.f32 %v21688_v42, %v6782_v47  ;;  %17665 = vmatprep.mubr.msk.bf16.mxu0 %vm172_vm1, %v7030_v45  ;;  %v23339_v34 = vmax.f32 %v23338_v19, 0.0  ;;  %v6969_v52 = vld [vmem:[#allocation2 + $0x168] sm:$0xc0]  ;;  %v6970_v40 = vld [vmem:[#allocation2 + $0x170] sm:$0x3f] }
 0x528   : > { %v21935_v23 = vadd.f32 %v6896_v49, %v3918_v31  ;;  %v6897_v7 = vmax.f32 %v6865_v3, 0.0  ;;  %v7033_v58 = vsel %vm628_vm0, %v7031_v6, %v7032_v24  ;;  %v7036_v31 = vsel %vm628_vm0, %v7034_v21, %v7035_v46  ;;  %v6971_v24 = vld [vmem:[#allocation2 + $0x180] sm:$0xc0]  ;;  %v6972_v55 = vld [vmem:[#allocation2 + $0x188] sm:$0x3f] }
 0x529   : > { %v21937_v54 = vadd.f32 %v6894_v29, %v3916_v43  ;;  %v3917_v61 = vadd.f32 %v19927_v56, %v23339_v34  ;;  %v6895_v62 = vmax.f32 %v6863_v59, 0.0  ;;  %v7040_v46 = vrot.slane %v6971_v24, 6  ;;  %v6973_v47 = vld [vmem:[#allocation2 + $0x198] sm:$0xc0]  ;;  %v6975_v59 = vld [vmem:[#allocation2 + $0x1b0] sm:$0xc0] }
 0x52a   : > { %v21942_v14 = vadd.f32 %v6897_v7, %v3919_v38  ;;  %v6945_v13 = vpack.c.bf16 %v6897_v7, %v6896_v49  ;;  %v21955_v49 = vld [vmem:[%s23262_s1 + $0x2a] sm:$0x3]  ;;  %v7041_v43 = vrot.slane %v6972_v55, 6  ;;  %v6976_v6 = vld [vmem:[#allocation2 + $0x1b8] sm:$0x3f]  ;;  %v7043_v7 = vrot.slane %v6973_v47, 6 }
 0x52b   : > { %v21944_v42 = vadd.f32 %v6895_v62, %v3917_v61  ;;  %v6944_v45 = vpack.c.bf16 %v6895_v62, %v6894_v29  ;;  %v7037_v62 = vrot.slane %v6969_v52, 6  ;;  %v7038_v61 = vrot.slane %v6970_v40, 6  ;;  %v6974_v29 = vld [vmem:[#allocation2 + $0x1a0] sm:$0x3f] }
 0x52c   : > { %6961 = vst.msk [vmem:[#allocation2 + $0x2f0] sm:$0xff] %vm172_vm1, %v6945_v13  ;;  %v7042_v3 = vsel %vm628_vm0, %v7040_v46, %v7041_v43  ;;  %v7044_v21 = vrot.slane %v6974_v29, 6  ;;  %v7046_v56 = vrot.slane %v6975_v59, 6  ;;  %v7047_v19 = vrot.slane %v6976_v6, 6  ;;  %v6981_v46 = vld [vmem:[#allocation2 + $0x1f8] sm:$0xc0] }
 0x52d   : > { %6960 = vst.msk [vmem:[#allocation2 + $0x2d8] sm:$0xff] %vm172_vm1, %v6944_v45  ;;  %v7039_v38 = vsel %vm628_vm0, %v7037_v62, %v7038_v61  ;;  %v6977_v45 = vld [vmem:[#allocation2 + $0x1c8] sm:$0xc0]  ;;  %v6982_v43 = vld [vmem:[#allocation2 + $0x200] sm:$0x3f]  ;;  %v7055_v47 = vrot.slane %v6981_v46, 6 }
 0x52e   : > { %17666 = vmatmul.mubr.msk.bf16.vlgmr.msra.gmra.mrb[32].mxu0 %vm172_vm1, %v7033_v58  ;;  %v7045_v34 = vsel %vm628_vm0, %v7043_v7, %v7044_v21  ;;  %v7048_v13 = vsel %vm628_vm0, %v7046_v56, %v7047_v19  ;;  %v6978_v58 = vld [vmem:[#allocation2 + $0x1d0] sm:$0x3f]  ;;  %v7049_v52 = vrot.slane %v6977_v45, 6  ;;  %v7056_v29 = vrot.slane %v6982_v43, 6  ;;  %v6985_v56 = vld [vmem:[#allocation2 + $0x228] sm:$0xc0] }
 0x52f   : > { %17698 = vmatpush3.bf16.msra.mxu0 %v7684_v48  ;;  %17669 = vmatprep.mubr.msk.bf16.mxu0 %vm172_vm1, %v7036_v31  ;;  %v6979_v48 = vld [vmem:[#allocation2 + $0x1e0] sm:$0xc0]  ;;  %v6980_v31 = vld [vmem:[#allocation2 + $0x1e8] sm:$0x3f]  ;;  %v7050_v40 = vrot.slane %v6978_v58, 6  ;;  %v7061_v45 = vrot.slane %v6985_v56, 6 }
 0x530   : > { %19851 = vmatprep.subr.msk.bf16.mxu0 %vm628_vm0, %v21955_v49  ;;  %v7052_v62 = vrot.slane %v6979_v48, 6  ;;  %v7053_v61 = vrot.slane %v6980_v31, 6  ;;  %v7057_v7 = vsel %vm628_vm0, %v7055_v47, %v7056_v29  ;;  %v6986_v19 = vld [vmem:[#allocation2 + $0x230] sm:$0x3f]  ;;  %v7520_v29 = vld [vmem:[#allocation2 + $0x128] sm:$0xfc] }
 0x531   : > { %v7051_v24 = vsel %vm628_vm0, %v7049_v52, %v7050_v40  ;;  %v7062_v58 = vrot.slane %v6986_v19, 6  ;;  %v7585_v56 = vrot.slane %v7520_v29, 2  ;;  %v21996_v29 = vld [vmem:[%s23262_s1 + $0x2c] sm:$0x3] }
 0x532   : > { %v7054_v55 = vsel %vm628_vm0, %v7052_v62, %v7053_v61  ;;  %v6989_v62 = vld [vmem:[#allocation2 + $0x258] sm:$0xc0]  ;;  %v6990_v61 = vld [vmem:[#allocation2 + $0x260] sm:$0x3f] }
 0x533   : > { %v7063_v52 = vsel %vm628_vm0, %v7061_v45, %v7062_v58  ;;  %v7067_v46 = vrot.slane %v6989_v62, 6  ;;  %v7068_v43 = vrot.slane %v6990_v61, 6  ;;  %v7522_v58 = vld [vmem:[#allocation2 + $0x140] sm:$0xfc] }
 0x534   : > { %v7588_v62 = vrot.slane %v7522_v58, 2  ;;  %v7532_v58 = vld [vmem:[#allocation2 + $0x1b8] sm:$0xfc] }
 0x535   : > { %v7069_v47 = vsel %vm628_vm0, %v7067_v46, %v7068_v43  ;;  %v8042_v43 = vsel %vm628_vm0, %v21955_v49, 0 }
 0x536   : > { %17670 = vmatmul.mubr.msk.bf16.gmra.mrb[36].mxu0 %vm172_vm1, %v7039_v38  ;;  %v6983_v38 = vld [vmem:[#allocation2 + $0x210] sm:$0xc0] }
 0x537   : > { %17673 = vmatprep.mubr.msk.bf16.mxu0 %vm172_vm1, %v7042_v3  ;;  %v6984_v3 = vld [vmem:[#allocation2 + $0x218] sm:$0x3f]  ;;  %v7058_v59 = vrot.slane %v6983_v38, 6 }
 0x538   : > { %v7059_v6 = vrot.slane %v6984_v3, 6 }
 0x53a   : > { %v7060_v21 = vsel %vm628_vm0, %v7058_v59, %v7059_v6  ;;  %v7521_v59 = vld [vmem:[#allocation2 + $0x130] sm:$0x3] }
 0x53b   : > { %v7586_v19 = vrot.slane %v7521_v59, 2 }
 0x53d   : > { %v7587_v45 = vsel %vm7584_vm6, %v7585_v56, %v7586_v19 }
 0x53e   : > { %17674 = vmatmul.mubr.msk.bf16.gmra.mrb[40].mxu0 %vm172_vm1, %v7045_v34  ;;  %v6987_v34 = vld [vmem:[#allocation2 + $0x240] sm:$0xc0] }
 0x53f   : > { %17677 = vmatprep.mubr.msk.bf16.mxu0 %vm172_vm1, %v7048_v13  ;;  %v6988_v13 = vld [vmem:[#allocation2 + $0x248] sm:$0x3f]  ;;  %v7064_v48 = vrot.slane %v6987_v34, 6 }
 0x540   : > { %v7065_v31 = vrot.slane %v6988_v13, 6 }
 0x542   : > { %v7066_v40 = vsel %vm628_vm0, %v7064_v48, %v7065_v31  ;;  %v7523_v48 = vld [vmem:[#allocation2 + $0x148] sm:$0x3] }
 0x543   : > { %v7589_v61 = vrot.slane %v7523_v48, 2  ;;  %v7533_v48 = vld [vmem:[#allocation2 + $0x1c0] sm:$0x3] }
 0x545   : > { %v7590_v46 = vsel %vm7584_vm6, %v7588_v62, %v7589_v61  ;;  %v7604_v62 = vrot.slane %v7533_v48, 2 }
 0x546   : > { %17678 = vmatmul.mubr.msk.bf16.gmra.mrb[44].mxu0 %vm172_vm1, %v7051_v24  ;;  %v6991_v24 = vld [vmem:[#allocation2 + $0x270] sm:$0xc0] }
 0x547   : > { %17681 = vmatprep.mubr.msk.bf16.mxu0 %vm172_vm1, %v7054_v55  ;;  %v6992_v55 = vld [vmem:[#allocation2 + $0x278] sm:$0x3f]  ;;  %v7070_v38 = vrot.slane %v6991_v24, 6 }
 0x548   : > { %v7071_v3 = vrot.slane %v6992_v55, 6 }
 0x54a   : > { %v7072_v6 = vsel %vm628_vm0, %v7070_v38, %v7071_v3  ;;  %v7526_v3 = vld [vmem:[#allocation2 + $0x170] sm:$0xfc] }
 0x54b   : > { %v7594_v59 = vrot.slane %v7526_v3, 2 }
 0x54e   : > { %17682 = vmatmul.mubr.msk.bf16.gmra.mrb[48].mxu0 %vm172_vm1, %v7057_v7  ;;  %v6993_v7 = vld [vmem:[#allocation2 + $0x288] sm:$0xc0] }
 0x54f   : > { %17685 = vmatprep.mubr.msk.bf16.mxu0 %vm172_vm1, %v7060_v21  ;;  %v6994_v21 = vld [vmem:[#allocation2 + $0x290] sm:$0x3f]  ;;  %v7073_v34 = vrot.slane %v6993_v7, 6  ;;  %v7528_v7 = vld [vmem:[#allocation2 + $0x188] sm:$0xfc] }
 0x550   : > { %v7074_v13 = vrot.slane %v6994_v21, 6  ;;  %v7529_v21 = vld [vmem:[#allocation2 + $0x190] sm:$0x3]  ;;  %v7597_v49 = vrot.slane %v7528_v7, 2 }
 0x551   : > { %v7598_v56 = vrot.slane %v7529_v21, 2 }
 0x552   : > { %v7075_v31 = vsel %vm628_vm0, %v7073_v34, %v7074_v13  ;;  %v7530_v13 = vld [vmem:[#allocation2 + $0x1a0] sm:$0xfc] }
 0x553   : > { %v7599_v34 = vsel %vm7584_vm6, %v7597_v49, %v7598_v56  ;;  %v7538_v49 = vld [vmem:[#allocation2 + $0x200] sm:$0xfc]  ;;  %v7539_v56 = vld [vmem:[#allocation2 + $0x208] sm:$0x3] }
 0x556   : > { %17686 = vmatmul.mubr.msk.bf16.gmra.mrb[52].mxu0 %vm172_vm1, %v7063_v52  ;;  %v7524_v52 = vld [vmem:[#allocation2 + $0x158] sm:$0xfc] }
 0x557   : > { %17689 = vmatprep.mubr.msk.bf16.mxu0 %vm172_vm1, %v7066_v40  ;;  %v7525_v40 = vld [vmem:[#allocation2 + $0x160] sm:$0x3]  ;;  %v7591_v24 = vrot.slane %v7524_v52, 2 }
 0x558   : > { %v7592_v55 = vrot.slane %v7525_v40, 2  ;;  %v7603_v40 = vrot.slane %v7532_v58, 2 }
 0x55a   : > { %v7593_v38 = vsel %vm7584_vm6, %v7591_v24, %v7592_v55  ;;  %v7605_v24 = vsel %vm7584_vm6, %v7603_v40, %v7604_v62  ;;  %v7534_v55 = vld [vmem:[#allocation2 + $0x1d0] sm:$0xfc]  ;;  %v7543_v62 = vld [vmem:[#allocation2 + $0x238] sm:$0x3] }
 0x55b   : > { %v7606_v3 = vrot.slane %v7534_v55, 2  ;;  %v7542_v40 = vld [vmem:[#allocation2 + $0x230] sm:$0xfc] }
 0x55c   : > { %v7618_v55 = vrot.slane %v7542_v40, 2 }
 0x55e   : > { %17690 = vmatmul.mubr.msk.bf16.gmra.mrb[56].mxu0 %vm172_vm1, %v7069_v47  ;;  %v7527_v47 = vld [vmem:[#allocation2 + $0x178] sm:$0x3] }
 0x55f   : > { %17693 = vmatprep.mubr.msk.bf16.mxu0 %vm172_vm1, %v7072_v6  ;;  %v7595_v6 = vrot.slane %v7527_v47, 2 }
 0x561   : > { %v7596_v19 = vsel %vm7584_vm6, %v7594_v59, %v7595_v6 }
 0x566   : > { %17694 = vmatmul.mubr.msk.bf16.gmra.mrb[60].mxu0 %vm172_vm1, %v7075_v31  ;;  %v7600_v31 = vrot.slane %v7530_v13, 2  ;;  %v7612_v13 = vrot.slane %v7538_v49, 2 }
 0x567   : > { %17699 = vmatprep.mubr.msk.bf16.mxu0 %vm172_vm1, %v7587_v45  ;;  %v7531_v45 = vld [vmem:[#allocation2 + $0x1a8] sm:$0x3] }
 0x568   : > { %v7601_v52 = vrot.slane %v7531_v45, 2  ;;  %v7613_v45 = vrot.slane %v7539_v56, 2 }
 0x56a   : > { %v7602_v61 = vsel %vm7584_vm6, %v7600_v31, %v7601_v52  ;;  %v7614_v31 = vsel %vm7584_vm6, %v7612_v13, %v7613_v45 }
 0x56e   : > { %17700 = vmatmul.mubr.msk.bf16.vlgmr.msra.gmra.mrb[32].mxu0 %vm172_vm1, %v7590_v46  ;;  %v7535_v46 = vld [vmem:[#allocation2 + $0x1d8] sm:$0x3] }
 0x56f   : > { %17732 = vmatpush3.bf16.msra.mxu0 %v8042_v43  ;;  %17703 = vmatprep.mubr.msk.bf16.mxu0 %vm172_vm1, %v7593_v38  ;;  %v7536_v43 = vld [vmem:[#allocation2 + $0x1e8] sm:$0xfc]  ;;  %v7537_v38 = vld [vmem:[#allocation2 + $0x1f0] sm:$0x3]  ;;  %v7607_v47 = vrot.slane %v7535_v46, 2  ;;  %v7619_v46 = vrot.slane %v7543_v62, 2 }
 0x570   : > { %19852 = vmatprep.subr.msk.bf16.mxu0 %vm628_vm0, %v21996_v29  ;;  %v7609_v59 = vrot.slane %v7536_v43, 2  ;;  %v7610_v6 = vrot.slane %v7537_v38, 2 }
 0x571   : > { %v7608_v7 = vsel %vm7584_vm6, %v7606_v3, %v7607_v47  ;;  %v7620_v3 = vsel %vm7584_vm6, %v7618_v55, %v7619_v46 }
 0x572   : > { %v7611_v21 = vsel %vm7584_vm6, %v7609_v59, %v7610_v6  ;;  %v7546_v59 = vld [vmem:[#allocation2 + $0x260] sm:$0xfc]  ;;  %v7547_v6 = vld [vmem:[#allocation2 + $0x268] sm:$0x3] }
 0x573   : > { %v7624_v49 = vrot.slane %v7546_v59, 2  ;;  %v7625_v56 = vrot.slane %v7547_v6, 2 }
 0x575   : > { %v7626_v13 = vsel %vm7584_vm6, %v7624_v49, %v7625_v56  ;;  %v8304_v49 = vsel %vm628_vm0, %v21996_v29, 0 }
 0x576   : > { %17704 = vmatmul.mubr.msk.bf16.gmra.mrb[36].mxu0 %vm172_vm1, %v7596_v19  ;;  %v7540_v19 = vld [vmem:[#allocation2 + $0x218] sm:$0xfc] }
 0x577   : > { %17707 = vmatprep.mubr.msk.bf16.mxu0 %vm172_vm1, %v7599_v34  ;;  %v7541_v34 = vld [vmem:[#allocation2 + $0x220] sm:$0x3]  ;;  %v7615_v58 = vrot.slane %v7540_v19, 2 }
 0x578   : > { %v7616_v48 = vrot.slane %v7541_v34, 2 }
 0x57a   : > { %v7617_v52 = vsel %vm7584_vm6, %v7615_v58, %v7616_v48  ;;  %v7550_v58 = vld [vmem:[#allocation2 + $0x290] sm:$0xfc]  ;;  %v7551_v48 = vld [vmem:[#allocation2 + $0x298] sm:$0x3] }
 0x57b   : > { %v7630_v40 = vrot.slane %v7550_v58, 2  ;;  %v7631_v62 = vrot.slane %v7551_v48, 2  ;;  %v7887_v58 = vld [vmem:[#allocation2 + $0x1e0] sm:$0xc0]  ;;  %v7888_v48 = vld [vmem:[#allocation2 + $0x1e8] sm:$0x3f] }
 0x57d   : > { %v7632_v55 = vsel %vm7584_vm6, %v7630_v40, %v7631_v62  ;;  %v7956_v40 = vrot.slane %v7888_v48, 6 }
 0x57e   : > { %17708 = vmatmul.mubr.msk.bf16.gmra.mrb[40].mxu0 %vm172_vm1, %v7602_v61  ;;  %v7544_v61 = vld [vmem:[#allocation2 + $0x248] sm:$0xfc] }
 0x57f   : > { %17711 = vmatprep.mubr.msk.bf16.mxu0 %vm172_vm1, %v7605_v24  ;;  %v7545_v24 = vld [vmem:[#allocation2 + $0x250] sm:$0x3]  ;;  %v7621_v43 = vrot.slane %v7544_v61, 2 }
 0x580   : > { %v7622_v38 = vrot.slane %v7545_v24, 2 }
 0x582   : > { %v7623_v47 = vsel %vm7584_vm6, %v7621_v43, %v7622_v38  ;;  %v7881_v43 = vld [vmem:[#allocation2 + $0x198] sm:$0xc0]  ;;  %v7882_v38 = vld [vmem:[#allocation2 + $0x1a0] sm:$0x3f] }
 0x583   : > { %v7946_v59 = vrot.slane %v7881_v43, 6  ;;  %v7947_v6 = vrot.slane %v7882_v38, 6  ;;  %v7892_v43 = vld [vmem:[#allocation2 + $0x218] sm:$0x3f] }
 0x585   : > { %v7948_v56 = vsel %vm628_vm0, %v7946_v59, %v7947_v6  ;;  %v7962_v59 = vrot.slane %v7892_v43, 6 }
 0x586   : > { %17712 = vmatmul.mubr.msk.bf16.gmra.mrb[44].mxu0 %vm172_vm1, %v7608_v7  ;;  %v7548_v7 = vld [vmem:[#allocation2 + $0x278] sm:$0xfc] }
 0x587   : > { %17715 = vmatprep.mubr.msk.bf16.mxu0 %vm172_vm1, %v7611_v21  ;;  %v7549_v21 = vld [vmem:[#allocation2 + $0x280] sm:$0x3]  ;;  %v7627_v19 = vrot.slane %v7548_v7, 2 }
 0x588   : > { %v7628_v34 = vrot.slane %v7549_v21, 2 }
 0x58a   : > { %v7629_v45 = vsel %vm7584_vm6, %v7627_v19, %v7628_v34  ;;  %v22036_v19 = vld [vmem:[%s23262_s1 + $0x2e] sm:$0x3] }
 0x58e   : > { %17716 = vmatmul.mubr.msk.bf16.gmra.mrb[48].mxu0 %vm172_vm1, %v7614_v31  ;;  %v7879_v31 = vld [vmem:[#allocation2 + $0x180] sm:$0xc0] }
 0x58f   : > { %17719 = vmatprep.mubr.msk.bf16.mxu0 %vm172_vm1, %v7617_v52  ;;  %v7880_v52 = vld [vmem:[#allocation2 + $0x188] sm:$0x3f]  ;;  %v7943_v61 = vrot.slane %v7879_v31, 6 }
 0x590   : > { %v7944_v24 = vrot.slane %v7880_v52, 6  ;;  %v7955_v52 = vrot.slane %v7887_v58, 6 }
 0x592   : > { %v7945_v46 = vsel %vm628_vm0, %v7943_v61, %v7944_v24  ;;  %v7957_v61 = vsel %vm628_vm0, %v7955_v52, %v7956_v40  ;;  %v7889_v24 = vld [vmem:[#allocation2 + $0x1f8] sm:$0xc0]  ;;  %v7898_v40 = vld [vmem:[#allocation2 + $0x260] sm:$0x3f] }
 0x593   : > { %v7958_v38 = vrot.slane %v7889_v24, 6  ;;  %v7897_v52 = vld [vmem:[#allocation2 + $0x258] sm:$0xc0] }
 0x594   : > { %v7970_v24 = vrot.slane %v7897_v52, 6 }
 0x596   : > { %17720 = vmatmul.mubr.msk.bf16.gmra.mrb[52].mxu0 %vm172_vm1, %v7620_v3  ;;  %v7883_v3 = vld [vmem:[#allocation2 + $0x1b0] sm:$0xc0] }
 0x597   : > { %17723 = vmatprep.mubr.msk.bf16.mxu0 %vm172_vm1, %v7623_v47  ;;  %v7884_v47 = vld [vmem:[#allocation2 + $0x1b8] sm:$0x3f]  ;;  %v7949_v7 = vrot.slane %v7883_v3, 6 }
 0x598   : > { %v7950_v21 = vrot.slane %v7884_v47, 6 }
 0x59a   : > { %v7951_v34 = vsel %vm628_vm0, %v7949_v7, %v7950_v21  ;;  %v7893_v21 = vld [vmem:[#allocation2 + $0x228] sm:$0xc0] }
 0x59e   : > { %17724 = vmatmul.mubr.msk.bf16.gmra.mrb[56].mxu0 %vm172_vm1, %v7626_v13  ;;  %v7885_v13 = vld [vmem:[#allocation2 + $0x1c8] sm:$0xc0] }
 0x59f   : > { %17727 = vmatprep.mubr.msk.bf16.mxu0 %vm172_vm1, %v7629_v45  ;;  %v7886_v45 = vld [vmem:[#allocation2 + $0x1d0] sm:$0x3f]  ;;  %v7952_v29 = vrot.slane %v7885_v13, 6  ;;  %v7964_v13 = vrot.slane %v7893_v21, 6 }
 0x5a0   : > { %v7953_v31 = vrot.slane %v7886_v45, 6 }
 0x5a2   : > { %v7954_v62 = vsel %vm628_vm0, %v7952_v29, %v7953_v31 }
 0x5a6   : > { %17728 = vmatmul.mubr.msk.bf16.gmra.mrb[60].mxu0 %vm172_vm1, %v7632_v55  ;;  %v7890_v55 = vld [vmem:[#allocation2 + $0x200] sm:$0x3f] }
 0x5a7   : > { %17733 = vmatprep.mubr.msk.bf16.mxu0 %vm172_vm1, %v7945_v46  ;;  %v7891_v46 = vld [vmem:[#allocation2 + $0x210] sm:$0xc0]  ;;  %v7959_v3 = vrot.slane %v7890_v55, 6  ;;  %v7971_v55 = vrot.slane %v7898_v40, 6 }
 0x5a8   : > { %v7961_v47 = vrot.slane %v7891_v46, 6 }
 0x5a9   : > { %v7960_v6 = vsel %vm628_vm0, %v7958_v38, %v7959_v3  ;;  %v7972_v38 = vsel %vm628_vm0, %v7970_v24, %v7971_v55 }
 0x5aa   : > { %v7963_v7 = vsel %vm628_vm0, %v7961_v47, %v7962_v59  ;;  %v7901_v47 = vld [vmem:[#allocation2 + $0x288] sm:$0xc0]  ;;  %v7902_v59 = vld [vmem:[#allocation2 + $0x290] sm:$0x3f] }
 0x5ab   : > { %v7976_v21 = vrot.slane %v7901_v47, 6 }
 0x5ae   : > { %17734 = vmatmul.mubr.msk.bf16.vlgmr.msra.gmra.mrb[32].mxu0 %vm172_vm1, %v7948_v56  ;;  %v7895_v56 = vld [vmem:[#allocation2 + $0x240] sm:$0xc0] }
 0x5af   : > { %17766 = vmatpush3.bf16.msra.mxu0 %v8304_v49  ;;  %17737 = vmatprep.mubr.msk.bf16.mxu0 %vm172_vm1, %v7951_v34  ;;  %v7894_v49 = vld [vmem:[#allocation2 + $0x230] sm:$0x3f]  ;;  %v7896_v34 = vld [vmem:[#allocation2 + $0x248] sm:$0x3f]  ;;  %v7967_v58 = vrot.slane %v7895_v56, 6 }
 0x5b0   : > { %19853 = vmatprep.subr.msk.bf16.mxu0 %vm628_vm0, %v22036_v19  ;;  %v7965_v45 = vrot.slane %v7894_v49, 6  ;;  %v7968_v48 = vrot.slane %v7896_v34, 6  ;;  %v7977_v49 = vrot.slane %v7902_v59, 6  ;;  %v8662_v59 = vsel %vm628_vm0, %v22036_v19, 0  ;;  %v8504_v19 = vld [vmem:[#allocation2 + $0x1c0] sm:$0x3] }
 0x5b2   : > { %v7966_v29 = vsel %vm628_vm0, %v7964_v13, %v7965_v45  ;;  %v7969_v31 = vsel %vm628_vm0, %v7967_v58, %v7968_v48  ;;  %v7978_v13 = vsel %vm628_vm0, %v7976_v21, %v7977_v49  ;;  %v7905_v58 = vld [vmem:[#allocation2 + $0x2b8] sm:$0xc0]  ;;  %v7906_v48 = vld [vmem:[#allocation2 + $0x2c0] sm:$0x3f] }
 0x5b3   : > { %v7982_v52 = vrot.slane %v7905_v58, 6  ;;  %v7983_v40 = vrot.slane %v7906_v48, 6  ;;  %v8505_v48 = vld [vmem:[#allocation2 + $0x1d0] sm:$0xfc] }
 0x5b5   : > { %v7984_v24 = vsel %vm628_vm0, %v7982_v52, %v7983_v40  ;;  %v8508_v52 = vld [vmem:[#allocation2 + $0x1f0] sm:$0x3]  ;;  %v8572_v40 = vrot.slane %v8505_v48, 2  ;;  %v8519_v48 = vld [vmem:[#allocation2 + $0x278] sm:$0xfc] }
 0x5b6   : > { %17738 = vmatmul.mubr.msk.bf16.gmra.mrb[36].mxu0 %vm172_vm1, %v7954_v62  ;;  %v7899_v62 = vld [vmem:[#allocation2 + $0x270] sm:$0xc0] }
 0x5b7   : > { %17741 = vmatprep.mubr.msk.bf16.mxu0 %vm172_vm1, %v7957_v61  ;;  %v7900_v61 = vld [vmem:[#allocation2 + $0x278] sm:$0x3f]  ;;  %v7973_v46 = vrot.slane %v7899_v62, 6 }
 0x5b8   : > { %v7974_v43 = vrot.slane %v7900_v61, 6 }
 0x5ba   : > { %v7975_v3 = vsel %vm628_vm0, %v7973_v46, %v7974_v43  ;;  %v7909_v46 = vld [vmem:[#allocation2 + $0x2e8] sm:$0xc0]  ;;  %v7910_v43 = vld [vmem:[#allocation2 + $0x2f0] sm:$0x3f] }
 0x5be   : > { %17742 = vmatmul.mubr.msk.bf16.gmra.mrb[40].mxu0 %vm172_vm1, %v7960_v6  ;;  %v7903_v6 = vld [vmem:[#allocation2 + $0x2a0] sm:$0xc0] }
 0x5bf   : > { %17745 = vmatprep.mubr.msk.bf16.mxu0 %vm172_vm1, %v7963_v7  ;;  %v7904_v7 = vld [vmem:[#allocation2 + $0x2a8] sm:$0x3f]  ;;  %v7979_v56 = vrot.slane %v7903_v6, 6  ;;  %v15885_v6 = vld [vmem:[%s23262_s1 + $0x30] sm:$0x3] }
 0x5c0   : > { %v7980_v34 = vrot.slane %v7904_v7, 6 }
 0x5c2   : > { %v7981_v45 = vsel %vm628_vm0, %v7979_v56, %v7980_v34  ;;  %v8570_v56 = vrot.slane %v8504_v19, 2  ;;  %v9021_v34 = vsel %vm628_vm0, %v15885_v6, 0 }
 0x5c6   : > { %17746 = vmatmul.mubr.msk.bf16.gmra.mrb[44].mxu0 %vm172_vm1, %v7966_v29  ;;  %v7907_v29 = vld [vmem:[#allocation2 + $0x2d0] sm:$0xc0] }
 0x5c7   : > { %17749 = vmatprep.mubr.msk.bf16.mxu0 %vm172_vm1, %v7969_v31  ;;  %v7908_v31 = vld [vmem:[#allocation2 + $0x2d8] sm:$0x3f]  ;;  %v7985_v62 = vrot.slane %v7907_v29, 6 }
 0x5c8   : > { %v7986_v61 = vrot.slane %v7908_v31, 6  ;;  %v8506_v29 = vld [vmem:[#allocation2 + $0x1d8] sm:$0x3]  ;;  %v8507_v31 = vld [vmem:[#allocation2 + $0x1e8] sm:$0xfc] }
 0x5ca   : > { %v7987_v55 = vsel %vm628_vm0, %v7985_v62, %v7986_v61  ;;  %v8573_v62 = vrot.slane %v8506_v29, 2  ;;  %v8575_v61 = vrot.slane %v8507_v31, 2  ;;  %v8520_v29 = vld [vmem:[#allocation2 + $0x280] sm:$0x3] }
 0x5ce   : > { %17750 = vmatmul.mubr.msk.bf16.gmra.mrb[48].mxu0 %vm172_vm1, %v7972_v38  ;;  %v7988_v38 = vrot.slane %v7909_v46, 6 }
 0x5cf   : > { %17753 = vmatprep.mubr.msk.bf16.mxu0 %vm172_vm1, %v7975_v3  ;;  %v7989_v3 = vrot.slane %v7910_v43, 6  ;;  %v8509_v43 = vld [vmem:[#allocation2 + $0x200] sm:$0xfc] }
 0x5d1   : > { %v7990_v47 = vsel %vm628_vm0, %v7988_v38, %v7989_v3  ;;  %v8510_v38 = vld [vmem:[#allocation2 + $0x208] sm:$0x3]  ;;  %v8511_v3 = vld [vmem:[#allocation2 + $0x218] sm:$0xfc] }
 0x5d6   : > { %17754 = vmatmul.mubr.msk.bf16.gmra.mrb[52].mxu0 %vm172_vm1, %v7978_v13 }
 0x5d7   : > { %17757 = vmatprep.mubr.msk.bf16.mxu0 %vm172_vm1, %v7981_v45  ;;  %v22122_v45 = vld [vmem:[%s23262_s1 + $0x32] sm:$0x3] }
 0x5de   : > { %17758 = vmatmul.mubr.msk.bf16.gmra.mrb[56].mxu0 %vm172_vm1, %v7984_v24  ;;  %v8576_v24 = vrot.slane %v8508_v52, 2 }
 0x5df   : > { %17761 = vmatprep.mubr.msk.bf16.mxu0 %vm172_vm1, %v7987_v55  ;;  %v8574_v55 = vsel %vm7584_vm6, %v8572_v40, %v8573_v62  ;;  %v8593_v40 = vrot.slane %v8519_v48, 2  ;;  %v8594_v62 = vrot.slane %v8520_v29, 2 }
 0x5e0   : > { %v8577_v46 = vsel %vm7584_vm6, %v8575_v61, %v8576_v24 }
 0x5e1   : > { %v8595_v24 = vsel %vm7584_vm6, %v8593_v40, %v8594_v62 }
 0x5e6   : > { %17762 = vmatmul.mubr.msk.bf16.gmra.mrb[60].mxu0 %vm172_vm1, %v7990_v47  ;;  %v8512_v47 = vld [vmem:[#allocation2 + $0x220] sm:$0x3] }
 0x5e7   : > { %17767 = vmatprep.mubr.msk.bf16.mxu0 %vm172_vm1, %v21742_v39  ;;  %v22099_v39 = vld [vmem:[#allocation2 + $0x2a8] sm:$0xff] }
 0x5ee   : > { %17768 = vmatmul.mubr.msk.bf16.vlgmr.msra.gmra.mrb[32].mxu0 %vm172_vm1, %v21748_v10  ;;  %v22103_v10 = vld [vmem:[#allocation2 + $0x2c0] sm:$0xff] }
 0x5ef   : > { %17800 = vmatpush3.bf16.msra.mxu0 %v8662_v59  ;;  %17771 = vmatprep.mubr.msk.bf16.mxu0 %vm172_vm1, %v21776_v25  ;;  %v22107_v25 = vld [vmem:[#allocation2 + $0x2d8] sm:$0xff]  ;;  %v8578_v59 = vrot.slane %v8509_v43, 2  ;;  %v8523_v43 = vld [vmem:[#allocation2 + $0x2a8] sm:$0xfc] }
 0x5f0   : > { %19854 = vmatprep.subr.msk.bf16.mxu0 %vm628_vm0, %v15885_v6  ;;  %v8579_v6 = vrot.slane %v8510_v38, 2  ;;  %v8524_v38 = vld [vmem:[#allocation2 + $0x2b0] sm:$0x3] }
 0x5f6   : > { %17772 = vmatmul.mubr.msk.bf16.gmra.mrb[36].mxu0 %vm172_vm1, %v21782_v28  ;;  %v8499_v28 = vld [vmem:[#allocation2 + $0x188] sm:$0xfc] }
 0x5f7   : > { %17775 = vmatprep.mubr.msk.bf16.mxu0 %vm172_vm1, %v21810_v17  ;;  %v8500_v17 = vld [vmem:[#allocation2 + $0x190] sm:$0x3] }
 0x5fe   : > { %17776 = vmatmul.mubr.msk.bf16.gmra.mrb[40].mxu0 %vm172_vm1, %v21816_v1  ;;  %v8563_v1 = vrot.slane %v8499_v28, 2  ;;  %v8581_v28 = vrot.slane %v8511_v3, 2 }
 0x5ff   : > { %17779 = vmatprep.mubr.msk.bf16.mxu0 %vm172_vm1, %v21844_v36  ;;  %v8564_v36 = vrot.slane %v8500_v17, 2  ;;  %v8582_v17 = vrot.slane %v8512_v47, 2 }
 0x606   : > { %17780 = vmatmul.mubr.msk.bf16.gmra.mrb[44].mxu0 %vm172_vm1, %v21850_v11  ;;  %v22111_v11 = vld [vmem:[#allocation2 + $0x2f0] sm:$0xff] }
 0x607   : > { %17783 = vmatprep.mubr.msk.bf16.mxu0 %vm172_vm1, %v21878_v37  ;;  %v8565_v37 = vsel %vm7584_vm6, %v8563_v1, %v8564_v36  ;;  %v8580_v1 = vsel %vm7584_vm6, %v8578_v59, %v8579_v6  ;;  %v8583_v36 = vsel %vm7584_vm6, %v8581_v28, %v8582_v17  ;;  %v8599_v59 = vrot.slane %v8523_v43, 2 }
 0x608   : > { %v8600_v6 = vrot.slane %v8524_v38, 2 }
 0x60a   : > { %v8601_v17 = vsel %vm7584_vm6, %v8599_v59, %v8600_v6  ;;  %v9283_v59 = vsel %vm628_vm0, %v22122_v45, 0 }
 0x60e   : > { %17784 = vmatmul.mubr.msk.bf16.gmra.mrb[48].mxu0 %vm172_vm1, %v21884_v20  ;;  %v8501_v20 = vld [vmem:[#allocation2 + $0x1a0] sm:$0xfc] }
 0x60f   : > { %17787 = vmatprep.mubr.msk.bf16.mxu0 %vm172_vm1, %v21912_v26  ;;  %v8502_v26 = vld [vmem:[#allocation2 + $0x1a8] sm:$0x3]  ;;  %v8566_v7 = vrot.slane %v8501_v20, 2  ;;  %v8514_v20 = vld [vmem:[#allocation2 + $0x238] sm:$0x3] }
 0x610   : > { %v8567_v21 = vrot.slane %v8502_v26, 2  ;;  %v8515_v26 = vld [vmem:[#allocation2 + $0x248] sm:$0xfc] }
 0x612   : > { %v8568_v13 = vsel %vm7584_vm6, %v8566_v7, %v8567_v21  ;;  %v8585_v7 = vrot.slane %v8514_v20, 2  ;;  %v8587_v21 = vrot.slane %v8515_v26, 2  ;;  %v8528_v20 = vld [vmem:[#allocation2 + $0x2e0] sm:$0x3] }
 0x616   : > { %17788 = vmatmul.mubr.msk.bf16.gmra.mrb[52].mxu0 %vm172_vm1, %v21922_v22  ;;  %v8503_v22 = vld [vmem:[#allocation2 + $0x1b8] sm:$0xfc] }
 0x617   : > { %17791 = vmatprep.mubr.msk.bf16.mxu0 %vm172_vm1, %v22099_v39  ;;  %v8569_v49 = vrot.slane %v8503_v22, 2  ;;  %v8516_v22 = vld [vmem:[#allocation2 + $0x250] sm:$0x3] }
 0x619   : > { %v8571_v58 = vsel %vm7584_vm6, %v8569_v49, %v8570_v56  ;;  %v8588_v49 = vrot.slane %v8516_v22, 2 }
 0x61e   : > { %17792 = vmatmul.mubr.msk.bf16.gmra.mrb[56].mxu0 %vm172_vm1, %v22103_v10 }
 0x61f   : > { %17795 = vmatprep.mubr.msk.bf16.mxu0 %vm172_vm1, %v22107_v25 }
 0x626   : > { %17796 = vmatmul.mubr.msk.bf16.gmra.mrb[60].mxu0 %vm172_vm1, %v22111_v11 }
 0x627   : > { %17801 = vmatprep.mubr.msk.bf16.mxu0 %vm172_vm1, %v8565_v37  ;;  %v8513_v37 = vld [vmem:[#allocation2 + $0x230] sm:$0xfc] }
 0x628   : > { %v8584_v19 = vrot.slane %v8513_v37, 2  ;;  %v8527_v37 = vld [vmem:[#allocation2 + $0x2d8] sm:$0xfc] }
 0x62a   : > { %v8586_v56 = vsel %vm7584_vm6, %v8584_v19, %v8585_v7  ;;  %v8605_v19 = vrot.slane %v8527_v37, 2  ;;  %v8606_v7 = vrot.slane %v8528_v20, 2  ;;  %v8866_v37 = vld [vmem:[#allocation2 + $0x240] sm:$0xc0]  ;;  %v8867_v20 = vld [vmem:[#allocation2 + $0x248] sm:$0x3f] }
 0x62e   : > { %17802 = vmatmul.mubr.msk.bf16.vlgmr.msra.gmra.mrb[32].mxu0 %vm172_vm1, %v8568_v13  ;;  %v8517_v13 = vld [vmem:[#allocation2 + $0x260] sm:$0xfc] }
 0x62f   : > { %17834 = vmatpush3.bf16.msra.mxu0 %v9021_v34  ;;  %17805 = vmatprep.mubr.msk.bf16.mxu0 %vm172_vm1, %v8571_v58  ;;  %v8589_v34 = vsel %vm7584_vm6, %v8587_v21, %v8588_v49  ;;  %v8518_v58 = vld [vmem:[#allocation2 + $0x268] sm:$0x3]  ;;  %v8590_v31 = vrot.slane %v8517_v13, 2  ;;  %v8607_v49 = vsel %vm7584_vm6, %v8605_v19, %v8606_v7  ;;  %v8858_v13 = vld [vmem:[#allocation2 + $0x1e0] sm:$0xc0]  ;;  %v8935_v19 = vrot.slane %v8867_v20, 6 }
 0x630   : > { %19855 = vmatprep.subr.msk.bf16.mxu0 %vm628_vm0, %v22122_v45  ;;  %v8591_v52 = vrot.slane %v8518_v58, 2  ;;  %v8859_v58 = vld [vmem:[#allocation2 + $0x1e8] sm:$0x3f] }
 0x632   : > { %v8592_v61 = vsel %vm7584_vm6, %v8590_v31, %v8591_v52  ;;  %v8922_v31 = vrot.slane %v8858_v13, 6  ;;  %v8923_v52 = vrot.slane %v8859_v58, 6  ;;  %v8871_v13 = vld [vmem:[#allocation2 + $0x278] sm:$0x3f] }
 0x634   : > { %v8924_v62 = vsel %vm628_vm0, %v8922_v31, %v8923_v52  ;;  %v8941_v31 = vrot.slane %v8871_v13, 6 }
 0x636   : > { %17806 = vmatmul.mubr.msk.bf16.gmra.mrb[36].mxu0 %vm172_vm1, %v8574_v55  ;;  %v8521_v55 = vld [vmem:[#allocation2 + $0x290] sm:$0xfc] }
 0x637   : > { %17809 = vmatprep.mubr.msk.bf16.mxu0 %vm172_vm1, %v8577_v46  ;;  %v8522_v46 = vld [vmem:[#allocation2 + $0x298] sm:$0x3]  ;;  %v8596_v3 = vrot.slane %v8521_v55, 2  ;;  %v8862_v55 = vld [vmem:[#allocation2 + $0x210] sm:$0xc0] }
 0x638   : > { %v8597_v47 = vrot.slane %v8522_v46, 2  ;;  %v8863_v46 = vld [vmem:[#allocation2 + $0x218] sm:$0x3f] }
 0x63a   : > { %v8598_v28 = vsel %vm7584_vm6, %v8596_v3, %v8597_v47  ;;  %v8928_v3 = vrot.slane %v8862_v55, 6  ;;  %v8929_v47 = vrot.slane %v8863_v46, 6  ;;  %v8875_v55 = vld [vmem:[#allocation2 + $0x2a8] sm:$0x3f] }
 0x63e   : > { %17810 = vmatmul.mubr.msk.bf16.gmra.mrb[40].mxu0 %vm172_vm1, %v8580_v1  ;;  %v8525_v1 = vld [vmem:[#allocation2 + $0x2c0] sm:$0xfc] }
 0x63f   : > { %17813 = vmatprep.mubr.msk.bf16.mxu0 %vm172_vm1, %v8583_v36  ;;  %v8526_v36 = vld [vmem:[#allocation2 + $0x2c8] sm:$0x3]  ;;  %v8602_v26 = vrot.slane %v8525_v1, 2  ;;  %v8864_v1 = vld [vmem:[#allocation2 + $0x228] sm:$0xc0] }
 0x640   : > { %v8603_v22 = vrot.slane %v8526_v36, 2  ;;  %v8865_v36 = vld [vmem:[#allocation2 + $0x230] sm:$0x3f]  ;;  %v8931_v45 = vrot.slane %v8864_v1, 6  ;;  %v8878_v1 = vld [vmem:[#allocation2 + $0x2d0] sm:$0xc0] }
 0x642   : > { %v8604_v21 = vsel %vm7584_vm6, %v8602_v26, %v8603_v22  ;;  %v8932_v26 = vrot.slane %v8865_v36, 6  ;;  %v8934_v22 = vrot.slane %v8866_v37, 6  ;;  %v8879_v36 = vld [vmem:[#allocation2 + $0x2d8] sm:$0x3f] }
 0x644   : > { %v8933_v7 = vsel %vm628_vm0, %v8931_v45, %v8932_v26  ;;  %v8952_v45 = vrot.slane %v8878_v1, 6  ;;  %v8953_v26 = vrot.slane %v8879_v36, 6  ;;  %v9216_v36 = vld [vmem:[#allocation2 + $0x1e8] sm:$0xff] }
 0x646   : > { %17814 = vmatmul.mubr.msk.bf16.gmra.mrb[44].mxu0 %vm172_vm1, %v8586_v56  ;;  %v8529_v56 = vld [vmem:[#allocation2 + $0x2f0] sm:$0xfc] }
 0x647   : > { %17817 = vmatprep.mubr.msk.bf16.mxu0 %vm172_vm1, %v8589_v34  ;;  %v8530_v34 = vld [vmem:[#allocation2 + $0x2f8] sm:$0x3]  ;;  %v8608_v48 = vrot.slane %v8529_v56, 2  ;;  %v8869_v56 = vld [vmem:[#allocation2 + $0x260] sm:$0x3f] }
 0x648   : > { %v8609_v29 = vrot.slane %v8530_v34, 2  ;;  %v8870_v34 = vld [vmem:[#allocation2 + $0x270] sm:$0xc0] }
 0x64a   : > { %v8610_v40 = vsel %vm7584_vm6, %v8608_v48, %v8609_v29  ;;  %v8938_v48 = vrot.slane %v8869_v56, 6  ;;  %v8940_v29 = vrot.slane %v8870_v34, 6  ;;  %v8881_v56 = vld [vmem:[#allocation2 + $0x2f0] sm:$0x3f] }
 0x64e   : > { %17818 = vmatmul.mubr.msk.bf16.gmra.mrb[48].mxu0 %vm172_vm1, %v8592_v61  ;;  %v8860_v61 = vld [vmem:[#allocation2 + $0x1f8] sm:$0xc0] }
 0x64f   : > { %17821 = vmatprep.mubr.msk.bf16.mxu0 %vm172_vm1, %v8595_v24  ;;  %v8861_v24 = vld [vmem:[#allocation2 + $0x200] sm:$0x3f]  ;;  %v8925_v43 = vrot.slane %v8860_v61, 6  ;;  %v8873_v61 = vld [vmem:[#allocation2 + $0x290] sm:$0x3f] }
 0x650   : > { %v8926_v38 = vrot.slane %v8861_v24, 6  ;;  %v8874_v24 = vld [vmem:[#allocation2 + $0x2a0] sm:$0xc0] }
 0x652   : > { %v8927_v6 = vsel %vm628_vm0, %v8925_v43, %v8926_v38  ;;  %v8944_v43 = vrot.slane %v8873_v61, 6  ;;  %v8946_v38 = vrot.slane %v8874_v24, 6  ;;  %v8887_v61 = vld [vmem:[#allocation2 + $0x338] sm:$0x3f] }
 0x656   : > { %17822 = vmatmul.mubr.msk.bf16.gmra.mrb[52].mxu0 %vm172_vm1, %v8598_v28  ;;  %v22163_v28 = vld [vmem:[%s23262_s1 + $0x34] sm:$0x3] }
 0x657   : > { %17825 = vmatprep.mubr.msk.bf16.mxu0 %vm172_vm1, %v8601_v17  ;;  %v8930_v17 = vsel %vm628_vm0, %v8928_v3, %v8929_v47  ;;  %v8947_v3 = vrot.slane %v8875_v55, 6 }
 0x65e   : > { %17826 = vmatmul.mubr.msk.bf16.gmra.mrb[56].mxu0 %vm172_vm1, %v8604_v21  ;;  %v8936_v21 = vsel %vm628_vm0, %v8934_v22, %v8935_v19  ;;  %v8882_v19 = vld [vmem:[#allocation2 + $0x300] sm:$0xc0] }
 0x65f   : > { %17829 = vmatprep.mubr.msk.bf16.mxu0 %vm172_vm1, %v8607_v49  ;;  %v8868_v49 = vld [vmem:[#allocation2 + $0x258] sm:$0xc0]  ;;  %v8958_v34 = vrot.slane %v8882_v19, 6 }
 0x660   : > { %v8937_v58 = vrot.slane %v8868_v49, 6  ;;  %v8880_v49 = vld [vmem:[#allocation2 + $0x2e8] sm:$0xc0] }
 0x662   : > { %v8939_v52 = vsel %vm628_vm0, %v8937_v58, %v8938_v48  ;;  %v8955_v58 = vrot.slane %v8880_v49, 6  ;;  %v8956_v48 = vrot.slane %v8881_v56, 6  ;;  %v9217_v49 = vld [vmem:[#allocation2 + $0x200] sm:$0xff]  ;;  %v9218_v56 = vld [vmem:[#allocation2 + $0x218] sm:$0xff] }
 0x666   : > { %17830 = vmatmul.mubr.msk.bf16.gmra.mrb[60].mxu0 %vm172_vm1, %v8610_v40  ;;  %v8942_v40 = vsel %vm628_vm0, %v8940_v29, %v8941_v31  ;;  %v8884_v31 = vld [vmem:[#allocation2 + $0x318] sm:$0xc0] }
 0x667   : > { %17835 = vmatprep.mubr.msk.bf16.mxu0 %vm172_vm1, %v8924_v62  ;;  %v8872_v62 = vld [vmem:[#allocation2 + $0x288] sm:$0xc0]  ;;  %v8961_v24 = vrot.slane %v8884_v31, 6 }
 0x668   : > { %v8943_v46 = vrot.slane %v8872_v62, 6  ;;  %v8886_v62 = vld [vmem:[#allocation2 + $0x330] sm:$0xc0]  ;;  %v9228_v31 = vld [vmem:[#allocation2 + $0x308] sm:$0xff] }
 0x66a   : > { %v8945_v47 = vsel %vm628_vm0, %v8943_v46, %v8944_v43  ;;  %v8964_v46 = vrot.slane %v8886_v62, 6  ;;  %v8965_v43 = vrot.slane %v8887_v61, 6  ;;  %v9478_v62 = vld [vmem:[#allocation2 + $0x1e8] sm:$0xfc] }
 0x66b   : > { %v9542_v61 = vrot.slane %v9478_v62, 2  ;;  %v9493_v62 = vld [vmem:[#allocation2 + $0x298] sm:$0x3] }
 0x66e   : > { %17836 = vmatmul.mubr.msk.bf16.vlgmr.msra.gmra.mrb[32].mxu0 %vm172_vm1, %v8927_v6  ;;  %v8876_v6 = vld [vmem:[#allocation2 + $0x2b8] sm:$0xc0] }
 0x66f   : > { %17868 = vmatpush3.bf16.msra.mxu0 %v9283_v59  ;;  %17839 = vmatprep.mubr.msk.bf16.mxu0 %vm172_vm1, %v8930_v17  ;;  %v8948_v59 = vsel %vm628_vm0, %v8946_v38, %v8947_v3  ;;  %v8877_v17 = vld [vmem:[#allocation2 + $0x2c0] sm:$0x3f]  ;;  %v8949_v37 = vrot.slane %v8876_v6, 6  ;;  %v8966_v3 = vsel %vm628_vm0, %v8964_v46, %v8965_v43  ;;  %v9481_v46 = vld [vmem:[#allocation2 + $0x208] sm:$0x3] }
 0x670   : > { %19856 = vmatprep.subr.msk.bf16.mxu0 %vm628_vm0, %v22163_v28  ;;  %v8950_v20 = vrot.slane %v8877_v17, 6  ;;  %v9483_v43 = vld [vmem:[#allocation2 + $0x220] sm:$0x3] }
 0x672   : > { %v8951_v22 = vsel %vm628_vm0, %v8949_v37, %v8950_v20  ;;  %v15939_v37 = vld [vmem:[%s23262_s1 + $0x38] sm:$0x3]  ;;  %v10088_v20 = vld [vmem:[#allocation2 + $0xc8] sm:$0xff] }
 0x673   : > { %19857 = vmatprep.subr.msk.bf16.mxu1 %vm628_vm0, %v15939_v37  ;;  %17937 = vmatprep.mubr.msk.bf16.mxu1 %vm172_vm1, %v10088_v20  ;;  %v9487_v20 = vld [vmem:[#allocation2 + $0x250] sm:$0x3] }
 0x676   : > { %17840 = vmatmul.mubr.msk.bf16.gmra.mrb[36].mxu0 %vm172_vm1, %v8933_v7  ;;  %v8883_v7 = vld [vmem:[#allocation2 + $0x308] sm:$0x3f] }
 0x677   : > { %17843 = vmatprep.mubr.msk.bf16.mxu0 %vm172_vm1, %v8936_v21  ;;  %v8954_v21 = vsel %vm628_vm0, %v8952_v45, %v8953_v26  ;;  %v8959_v13 = vrot.slane %v8883_v7, 6  ;;  %v15938_v45 = vld [vmem:[%s23262_s1 + $0x36] sm:$0x3]  ;;  %v10155_v26 = vsel %vm628_vm0, %v15939_v37, 0  ;;  %v10090_v7 = vld [vmem:[#allocation2 + $0xf8] sm:$0xff] }
 0x678   : > { %17936 = vmatpush3.bf16.msra.mxu1 %v10155_v26  ;;  %v10367_v19 = vsel %vm628_vm0, %v15938_v45, 0  ;;  %v9486_v37 = vld [vmem:[#allocation2 + $0x248] sm:$0xfc] }
 0x679   : > { %v8960_v29 = vsel %vm628_vm0, %v8958_v34, %v8959_v13  ;;  %19858 = vmatprep.subr.msk.bf16.mxu1 %vm628_vm0, %v15938_v45  ;;  %v10091_v34 = vld [vmem:[#allocation2 + $0x110] sm:$0xff] }
 0x67a   : > { %v9219_v13 = vld [vmem:[#allocation2 + $0x230] sm:$0xff] }
 0x67e   : > { %17844 = vmatmul.mubr.msk.bf16.gmra.mrb[40].mxu0 %vm172_vm1, %v8939_v52  ;;  %v8885_v52 = vld [vmem:[#allocation2 + $0x320] sm:$0x3f] }
 0x67f   : > { %17847 = vmatprep.mubr.msk.bf16.mxu0 %vm172_vm1, %v8942_v40  ;;  %v8957_v40 = vsel %vm628_vm0, %v8955_v58, %v8956_v48  ;;  %v8962_v55 = vrot.slane %v8885_v52, 6  ;;  %v9220_v58 = vld [vmem:[#allocation2 + $0x248] sm:$0xff]  ;;  %v9222_v48 = vld [vmem:[#allocation2 + $0x278] sm:$0xff]  ;;  %v9229_v52 = vld [vmem:[#allocation2 + $0x320] sm:$0xff] }
 0x681   : > { %v8963_v38 = vsel %vm628_vm0, %v8961_v24, %v8962_v55  ;;  %v9480_v55 = vld [vmem:[#allocation2 + $0x200] sm:$0xfc] }
 0x686   : > { %17848 = vmatmul.mubr.msk.bf16.gmra.mrb[44].mxu0 %vm172_vm1, %v8945_v47  ;;  %v8888_v47 = vld [vmem:[#allocation2 + $0x348] sm:$0xc0] }
 0x687   : > { %17851 = vmatprep.mubr.msk.bf16.mxu0 %vm172_vm1, %v8948_v59  ;;  %v8889_v59 = vld [vmem:[#allocation2 + $0x350] sm:$0x3f]  ;;  %v8967_v6 = vrot.slane %v8888_v47, 6 }
 0x688   : > { %v8968_v17 = vrot.slane %v8889_v59, 6  ;;  %v9549_v59 = vrot.slane %v9483_v43, 2  ;;  %v9496_v43 = vld [vmem:[#allocation2 + $0x2c0] sm:$0xfc] }
 0x68a   : > { %v8969_v1 = vsel %vm628_vm0, %v8967_v6, %v8968_v17 }
 0x68e   : > { %17852 = vmatmul.mubr.msk.bf16.gmra.mrb[48].mxu0 %vm172_vm1, %v8951_v22  ;;  %v10089_v22 = vld [vmem:[#allocation2 + $0xe0] sm:$0xff] }
 0x68f   : > { %17855 = vmatprep.mubr.msk.bf16.mxu0 %vm172_vm1, %v8954_v21  ;;  %17938 = vmatmul.mubr.msk.bf16.vlgmr.msra.gmra.mrb[64].mxu1 %vm172_vm1, %v10089_v22  ;;  %v9641_v21 = vsel %vm628_vm0, %v22163_v28, 0  ;;  %v9221_v28 = vld [vmem:[#allocation2 + $0x260] sm:$0xff]  ;;  %v9554_v22 = vrot.slane %v9486_v37, 2  ;;  %v9502_v37 = vld [vmem:[#allocation2 + $0x308] sm:$0xfc] }
 0x690   : > { %17970 = vmatpush3.bf16.msra.mxu1 %v10367_v19  ;;  %17941 = vmatprep.mubr.msk.bf16.mxu1 %vm172_vm1, %v10090_v7  ;;  %v9555_v19 = vrot.slane %v9487_v20, 2  ;;  %v9503_v20 = vld [vmem:[#allocation2 + $0x310] sm:$0x3] }
 0x696   : > { %17856 = vmatmul.mubr.msk.bf16.gmra.mrb[52].mxu0 %vm172_vm1, %v8957_v40  ;;  %v9230_v40 = vld [vmem:[#allocation2 + $0x338] sm:$0xff] }
 0x697   : > { %17859 = vmatprep.mubr.msk.bf16.mxu0 %vm172_vm1, %v8960_v29  ;;  %17942 = vmatmul.mubr.msk.bf16.gmra.mrb[68].mxu1 %vm172_vm1, %v10091_v34  ;;  %v9223_v29 = vld [vmem:[#allocation2 + $0x290] sm:$0xff]  ;;  %v9490_v34 = vld [vmem:[#allocation2 + $0x278] sm:$0xfc] }
 0x69e   : > { %17860 = vmatmul.mubr.msk.bf16.gmra.mrb[56].mxu0 %vm172_vm1, %v8963_v38  ;;  %v9545_v38 = vrot.slane %v9480_v55, 2 }
 0x69f   : > { %17863 = vmatprep.mubr.msk.bf16.mxu0 %vm172_vm1, %v8966_v3  ;;  %v9546_v3 = vrot.slane %v9481_v46, 2 }
 0x6a1   : > { %v9547_v6 = vsel %vm7584_vm6, %v9545_v38, %v9546_v3  ;;  %v9497_v38 = vld [vmem:[#allocation2 + $0x2c8] sm:$0x3]  ;;  %v9498_v3 = vld [vmem:[#allocation2 + $0x2d8] sm:$0xfc] }
 0x6a6   : > { %17864 = vmatmul.mubr.msk.bf16.gmra.mrb[60].mxu0 %vm172_vm1, %v8969_v1  ;;  %v9484_v1 = vld [vmem:[#allocation2 + $0x230] sm:$0xfc] }
 0x6a7   : > { %17869 = vmatprep.mubr.msk.bf16.mxu0 %vm172_vm1, %v9216_v36  ;;  %v9485_v36 = vld [vmem:[#allocation2 + $0x238] sm:$0x3]  ;;  %v9551_v45 = vrot.slane %v9484_v1, 2 }
 0x6a8   : > { %v9552_v26 = vrot.slane %v9485_v36, 2 }
 0x6aa   : > { %v9553_v7 = vsel %vm7584_vm6, %v9551_v45, %v9552_v26  ;;  %v9500_v26 = vld [vmem:[#allocation2 + $0x2f0] sm:$0xfc] }
 0x6ae   : > { %17870 = vmatmul.mubr.msk.bf16.vlgmr.msra.gmra.mrb[32].mxu0 %vm172_vm1, %v9217_v49  ;;  %v9488_v49 = vld [vmem:[#allocation2 + $0x260] sm:$0xfc] }
 0x6af   : > { %17902 = vmatpush3.bf16.msra.mxu0 %v9641_v21  ;;  %17873 = vmatprep.mubr.msk.bf16.mxu0 %vm172_vm1, %v9218_v56  ;;  %v9556_v21 = vsel %vm7584_vm6, %v9554_v22, %v9555_v19  ;;  %v9489_v56 = vld [vmem:[#allocation2 + $0x268] sm:$0x3]  ;;  %v9501_v22 = vld [vmem:[#allocation2 + $0x2f8] sm:$0x3]  ;;  %v9578_v19 = vrot.slane %v9502_v37, 2 }
 0x6b6   : > { %17874 = vmatmul.mubr.msk.bf16.gmra.mrb[36].mxu0 %vm172_vm1, %v9219_v13  ;;  %v9491_v13 = vld [vmem:[#allocation2 + $0x280] sm:$0x3] }
 0x6b7   : > { %17877 = vmatprep.mubr.msk.bf16.mxu0 %vm172_vm1, %v9220_v58  ;;  %v9557_v58 = vrot.slane %v9488_v49, 2  ;;  %v9576_v49 = vrot.slane %v9501_v22, 2 }
 0x6be   : > { %17878 = vmatmul.mubr.msk.bf16.gmra.mrb[40].mxu0 %vm172_vm1, %v9221_v28  ;;  %v9558_v28 = vrot.slane %v9489_v56, 2 }
 0x6bf   : > { %17881 = vmatprep.mubr.msk.bf16.mxu0 %vm172_vm1, %v9222_v48  ;;  %v9560_v48 = vrot.slane %v9490_v34, 2  ;;  %v9504_v34 = vld [vmem:[#allocation2 + $0x320] sm:$0xfc] }
 0x6c6   : > { %17882 = vmatmul.mubr.msk.bf16.gmra.mrb[44].mxu0 %vm172_vm1, %v9223_v29  ;;  %v9561_v29 = vrot.slane %v9491_v13, 2  ;;  %v9505_v13 = vld [vmem:[#allocation2 + $0x328] sm:$0x3] }
 0x6c7   : > { %17885 = vmatprep.mubr.msk.bf16.mxu0 %vm172_vm1, %v22099_v39  ;;  %v9479_v39 = vld [vmem:[#allocation2 + $0x1f0] sm:$0x3] }
 0x6c8   : > { %v9543_v24 = vrot.slane %v9479_v39, 2  ;;  %v9494_v39 = vld [vmem:[#allocation2 + $0x2a8] sm:$0xfc] }
 0x6ce   : > { %17886 = vmatmul.mubr.msk.bf16.gmra.mrb[48].mxu0 %vm172_vm1, %v22103_v10  ;;  %v9231_v10 = vld [vmem:[#allocation2 + $0x350] sm:$0xff] }
 0x6cf   : > { %17889 = vmatprep.mubr.msk.bf16.mxu0 %vm172_vm1, %v22107_v25  ;;  %v9544_v25 = vsel %vm7584_vm6, %v9542_v61, %v9543_v24  ;;  %v9495_v61 = vld [vmem:[#allocation2 + $0x2b0] sm:$0x3] }
 0x6d0   : > { %v9567_v55 = vrot.slane %v9495_v61, 2  ;;  %v9508_v61 = vld [vmem:[#allocation2 + $0x350] sm:$0xfc] }
 0x6d6   : > { %17890 = vmatmul.mubr.msk.bf16.gmra.mrb[52].mxu0 %vm172_vm1, %v22111_v11  ;;  %v9482_v11 = vld [vmem:[#allocation2 + $0x218] sm:$0xfc] }
 0x6d7   : > { %17893 = vmatprep.mubr.msk.bf16.mxu0 %vm172_vm1, %v9228_v31  ;;  %v9548_v47 = vrot.slane %v9482_v11, 2  ;;  %v9559_v31 = vsel %vm7584_vm6, %v9557_v58, %v9558_v28  ;;  %v9506_v28 = vld [vmem:[#allocation2 + $0x338] sm:$0xfc] }
 0x6d9   : > { %v9550_v17 = vsel %vm7584_vm6, %v9548_v47, %v9549_v59  ;;  %v9499_v47 = vld [vmem:[#allocation2 + $0x2e0] sm:$0x3]  ;;  %v9569_v59 = vrot.slane %v9496_v43, 2  ;;  %v10094_v43 = vld [vmem:[#allocation2 + $0x158] sm:$0xff] }
 0x6da   : > { %v9573_v1 = vrot.slane %v9499_v47, 2  ;;  %v22278_v47 = vld [vmem:[%s23263_s2 + $0x2] ss:$0 sm:$0xff] }
 0x6de   : > { %17894 = vmatmul.mubr.msk.bf16.gmra.mrb[56].mxu0 %vm172_vm1, %v9229_v52  ;;  %v9562_v52 = vsel %vm7584_vm6, %v9560_v48, %v9561_v29  ;;  %v9507_v48 = vld [vmem:[#allocation2 + $0x340] sm:$0x3]  ;;  %v9581_v29 = vrot.slane %v9504_v34, 2 }
 0x6df   : > { %17897 = vmatprep.mubr.msk.bf16.mxu0 %vm172_vm1, %v9230_v40  ;;  %v9492_v40 = vld [vmem:[#allocation2 + $0x290] sm:$0xfc] }
 0x6e0   : > { %v9563_v24 = vrot.slane %v9492_v40, 2  ;;  %v9585_v40 = vrot.slane %v9507_v48, 2 }
 0x6e6   : > { %17898 = vmatmul.mubr.msk.bf16.gmra.mrb[60].mxu0 %vm172_vm1, %v9231_v10  ;;  %v9564_v10 = vrot.slane %v9493_v62, 2 }
 0x6e7   : > { %17903 = vmatprep.mubr.msk.bf16.mxu0 %vm172_vm1, %v9544_v25  ;;  %v9566_v25 = vrot.slane %v9494_v39, 2 }
 0x6e8   : > { %v9565_v46 = vsel %vm7584_vm6, %v9563_v24, %v9564_v10  ;;  %v9509_v24 = vld [vmem:[#allocation2 + $0x358] sm:$0x3]  ;;  %v9587_v10 = vrot.slane %v9508_v61, 2 }
 0x6e9   : > { %v9568_v11 = vsel %vm7584_vm6, %v9566_v25, %v9567_v55  ;;  %v9588_v25 = vrot.slane %v9509_v24, 2 }
 0x6eb   : > { %v9589_v55 = vsel %vm7584_vm6, %v9587_v10, %v9588_v25 }
 0x6ee   : > { %17904 = vmatmul.mubr.msk.bf16.vlgmr.msra.gmra.mrb[32].mxu0 %vm172_vm1, %v9547_v6  ;;  %v9570_v6 = vrot.slane %v9497_v38, 2  ;;  %v10095_v38 = vld [vmem:[#allocation2 + $0x170] sm:$0xff] }
 0x6ef   : > { %17907 = vmatprep.mubr.msk.bf16.mxu0 %vm172_vm1, %v9550_v17  ;;  %v9572_v17 = vrot.slane %v9498_v3, 2  ;;  %v22271_v3 = vld [vmem:[%s23262_s1 + $0x3a] sm:$0x3] }
 0x6f0   : > { %v9571_v36 = vsel %vm7584_vm6, %v9569_v59, %v9570_v6  ;;  %19859 = vmatprep.subr.msk.bf16.mxu1 %vm628_vm0, %v22271_v3 }
 0x6f1   : > { %v9574_v45 = vsel %vm7584_vm6, %v9572_v17, %v9573_v1 }
 0x6f6   : > { %17908 = vmatmul.mubr.msk.bf16.gmra.mrb[36].mxu0 %vm172_vm1, %v9553_v7  ;;  %v9579_v7 = vrot.slane %v9503_v20, 2 }
 0x6f7   : > { %17911 = vmatprep.mubr.msk.bf16.mxu0 %vm172_vm1, %v9556_v21  ;;  %v9575_v21 = vrot.slane %v9500_v26, 2 }
 0x6f8   : > { %v9580_v56 = vsel %vm7584_vm6, %v9578_v19, %v9579_v7 }
 0x6f9   : > { %v9577_v58 = vsel %vm7584_vm6, %v9575_v21, %v9576_v49 }
 0x6fe   : > { %17912 = vmatmul.mubr.msk.bf16.gmra.mrb[40].mxu0 %vm172_vm1, %v9559_v31  ;;  %v9582_v31 = vrot.slane %v9505_v13, 2 }
 0x6ff   : > { %17915 = vmatprep.mubr.msk.bf16.mxu0 %vm172_vm1, %v9562_v52  ;;  %v9584_v52 = vrot.slane %v9506_v28, 2 }
 0x700   : > { %v9583_v62 = vsel %vm7584_vm6, %v9581_v29, %v9582_v31 }
 0x701   : > { %v9586_v39 = vsel %vm7584_vm6, %v9584_v52, %v9585_v40 }
 0x706   : > { %17916 = vmatmul.mubr.msk.bf16.gmra.mrb[44].mxu0 %vm172_vm1, %v9565_v46  ;;  %v10092_v46 = vld [vmem:[#allocation2 + $0x128] sm:$0xff] }
 0x707   : > { %17919 = vmatprep.mubr.msk.bf16.mxu0 %vm172_vm1, %v9568_v11  ;;  %17945 = vmatprep.mubr.msk.bf16.mxu1 %vm172_vm1, %v10092_v46  ;;  %v10093_v11 = vld [vmem:[#allocation2 + $0x140] sm:$0xff] }
 0x708   : > { %17946 = vmatmul.mubr.msk.bf16.gmra.mrb[72].mxu1 %vm172_vm1, %v10093_v11 }
 0x709   : > { %17949 = vmatprep.mubr.msk.bf16.mxu1 %vm172_vm1, %v10094_v43 }
 0x70e   : > { %17920 = vmatmul.mubr.msk.bf16.gmra.mrb[48].mxu0 %vm172_vm1, %v9571_v36 }
 0x70f   : > { %17923 = vmatprep.mubr.msk.bf16.mxu0 %vm172_vm1, %v9574_v45 }
 0x710   : > { %17950 = vmatmul.mubr.msk.bf16.gmra.mrb[76].mxu1 %vm172_vm1, %v10095_v38 }
 0x716   : > { %17924 = vmatmul.mubr.msk.bf16.gmra.mrb[52].mxu0 %vm172_vm1, %v9577_v58 }
 0x717   : > { %17927 = vmatprep.mubr.msk.bf16.mxu0 %vm172_vm1, %v9580_v56 }
 0x71e   : > { %17928 = vmatmul.mubr.msk.bf16.gmra.mrb[56].mxu0 %vm172_vm1, %v9583_v62 }
 0x71f   : > { %17931 = vmatprep.mubr.msk.bf16.mxu0 %vm172_vm1, %v9586_v39 }
 0x726   : > { %17932 = vmatmul.mubr.msk.bf16.gmra.mrb[60].mxu0 %vm172_vm1, %v9589_v55 }
 0x7c1   : > { %v17905_v59 = vpop.f32.mrb[32].mxu0 }
 0x7c2   : > { %v9846_v6 = vadd.f32 %v17905_v59, %v22278_v47  ;;  %v9677_v17 = vpop.f32.mrb[33].mxu0 }
 0x7c3   : > { %v9844_v1 = vadd.f32 %v22278_v47, %v9677_v17  ;;  %v17906_v36 = vpop.f32.mrb[34].mxu0 }
 0x7c4   : > { %v9878_v37 = vmax.f32 %v9846_v6, 0.0  ;;  %v9847_v20 = vadd.f32 %v17906_v36, %v22278_v47  ;;  %v9680_v45 = vpop.f32.mrb[35].mxu0 }
 0x7c5   : > { %v9876_v26 = vmax.f32 %v9844_v1, 0.0  ;;  %v9845_v22 = vadd.f32 %v22278_v47, %v9680_v45 }
 0x7c6   : > { %v22285_v19 = vadd.f32 %v9878_v37, %v21700_v15  ;;  %v9879_v7 = vmax.f32 %v9847_v20, 0.0 }
 0x7c7   : > { %v22288_v21 = vadd.f32 %v9876_v26, %v21705_v44  ;;  %v9877_v49 = vmax.f32 %v9845_v22, 0.0 }
 0x7c8   : > { %v22291_v56 = vadd.f32 %v9879_v7, %v21710_v41  ;;  %v9941_v34 = vpack.c.bf16 %v9879_v7, %v9878_v37 }
 0x7c9   : > { %v22294_v13 = vadd.f32 %v9877_v49, %v21712_v33  ;;  %v9940_v58 = vpack.c.bf16 %v9877_v49, %v9876_v26  ;;  %v17909_v28 = vpop.f32.mrb[36].mxu0 }
 0x7ca   : > { %9957 = vst.msk [vmem:[#allocation2 + $0x1a0] sm:$0xff] %vm172_vm1, %v9941_v34  ;;  %v9850_v48 = vadd.f32 %v17909_v28, %v22278_v47  ;;  %v9693_v15 = vpop.f32.mrb[37].mxu0 }
 0x7cb   : > { %9956 = vst.msk [vmem:[#allocation2 + $0x188] sm:$0xff] %vm172_vm1, %v9940_v58  ;;  %v9848_v44 = vadd.f32 %v22278_v47, %v9693_v15  ;;  %v17910_v29 = vpop.f32.mrb[38].mxu0 }
 0x7cc   : > { %v9882_v31 = vmax.f32 %v9850_v48, 0.0  ;;  %v9851_v41 = vadd.f32 %v17910_v29, %v22278_v47  ;;  %v9696_v52 = vpop.f32.mrb[39].mxu0 }
 0x7cd   : > { %v9880_v40 = vmax.f32 %v9848_v44, 0.0  ;;  %v9849_v33 = vadd.f32 %v22278_v47, %v9696_v52 }
 0x7ce   : > { %v22303_v62 = vadd.f32 %v9882_v31, %v21726_v57  ;;  %v9883_v39 = vmax.f32 %v9851_v41, 0.0 }
 0x7cf   : > { %v22306_v61 = vadd.f32 %v9880_v40, %v21731_v4  ;;  %v9881_v24 = vmax.f32 %v9849_v33, 0.0 }
 0x7d0   : > { %v22309_v10 = vadd.f32 %v9883_v39, %v21736_v51  ;;  %v9943_v25 = vpack.c.bf16 %v9883_v39, %v9882_v31 }
 0x7d1   : > { %v22312_v55 = vadd.f32 %v9881_v24, %v21738_v16  ;;  %v9942_v46 = vpack.c.bf16 %v9881_v24, %v9880_v40  ;;  %v17913_v11 = vpop.f32.mrb[40].mxu0  ;;  %v22322_v51 = vld [vmem:[#allocation2 + $0x1a0] sm:$0xff] }
 0x7d2   : > { %9959 = vst.msk [vmem:[#allocation2 + $0x1d0] sm:$0xff] %vm172_vm1, %v9943_v25  ;;  %v9854_v43 = vadd.f32 %v17913_v11, %v22278_v47  ;;  %v9709_v57 = vpop.f32.mrb[41].mxu0  ;;  %v22316_v38 = vld [vmem:[#allocation2 + $0x188] sm:$0xff] }
 0x7d3   : > { %9958 = vst.msk [vmem:[#allocation2 + $0x1b8] sm:$0xff] %vm172_vm1, %v9942_v46  ;;  %v9852_v4 = vadd.f32 %v22278_v47, %v9709_v57  ;;  %v17914_v59 = vpop.f32.mrb[42].mxu0  ;;  %17953 = vmatprep.mubr.msk.bf16.mxu1 %vm172_vm1, %v22316_v38 }
 0x7d4   : > { %v9886_v16 = vmax.f32 %v9854_v43, 0.0  ;;  %v9855_v6 = vadd.f32 %v17914_v59, %v22278_v47  ;;  %v9712_v17 = vpop.f32.mrb[43].mxu0  ;;  %17954 = vmatmul.mubr.msk.bf16.gmra.mrb[80].mxu1 %vm172_vm1, %v22322_v51 }
 0x7d5   : > { %v9884_v1 = vmax.f32 %v9852_v4, 0.0  ;;  %v9853_v36 = vadd.f32 %v22278_v47, %v9712_v17 }
 0x7d6   : > { %v22329_v37 = vadd.f32 %v9886_v16, %v21760_v0  ;;  %v9887_v20 = vmax.f32 %v9855_v6, 0.0 }
 0x7d7   : > { %v22332_v45 = vadd.f32 %v9884_v1, %v21765_v30  ;;  %v9885_v26 = vmax.f32 %v9853_v36, 0.0 }
 0x7d8   : > { %v22335_v22 = vadd.f32 %v9887_v20, %v21770_v60  ;;  %v9945_v7 = vpack.c.bf16 %v9887_v20, %v9886_v16  ;;  %v9974_v16 = vld [vmem:[#allocation2 + $0xc8] sm:$0xf] }
 0x7d9   : > { %v22338_v49 = vadd.f32 %v9885_v26, %v21772_v50  ;;  %v9944_v34 = vpack.c.bf16 %v9885_v26, %v9884_v1  ;;  %v17917_v58 = vpop.f32.mrb[44].mxu0  ;;  %v22348_v60 = vld [vmem:[#allocation2 + $0x1d0] sm:$0xff] }
 0x7da   : > { %9961 = vst.msk [vmem:[#allocation2 + $0x200] sm:$0xff] %vm172_vm1, %v9945_v7  ;;  %v9858_v28 = vadd.f32 %v17917_v58, %v22278_v47  ;;  %v9725_v0 = vpop.f32.mrb[45].mxu0  ;;  %v22342_v48 = vld [vmem:[#allocation2 + $0x1b8] sm:$0xff]  ;;  %v10039_v58 = vrot.slane %v9974_v16, 4 }
 0x7db   : > { %9960 = vst.msk [vmem:[#allocation2 + $0x1e8] sm:$0xff] %vm172_vm1, %v9944_v34  ;;  %v9856_v30 = vadd.f32 %v22278_v47, %v9725_v0  ;;  %v17918_v15 = vpop.f32.mrb[46].mxu0  ;;  %17957 = vmatprep.mubr.msk.bf16.mxu1 %vm172_vm1, %v22342_v48 }
 0x7dc   : > { %v9890_v50 = vmax.f32 %v9858_v28, 0.0  ;;  %v9859_v44 = vadd.f32 %v17918_v15, %v22278_v47  ;;  %v9728_v29 = vpop.f32.mrb[47].mxu0  ;;  %17958 = vmatmul.mubr.msk.bf16.gmra.mrb[84].mxu1 %vm172_vm1, %v22348_v60 }
 0x7dd   : > { %v9888_v31 = vmax.f32 %v9856_v30, 0.0  ;;  %v9857_v41 = vadd.f32 %v22278_v47, %v9728_v29 }
 0x7de   : > { %v22355_v52 = vadd.f32 %v9890_v50, %v21794_v32  ;;  %v9891_v40 = vmax.f32 %v9859_v44, 0.0 }
 0x7df   : > { %v22358_v33 = vadd.f32 %v9888_v31, %v21799_v12  ;;  %v9889_v39 = vmax.f32 %v9857_v41, 0.0 }
 0x7e0   : > { %v22361_v24 = vadd.f32 %v9891_v40, %v21804_v27  ;;  %v9947_v25 = vpack.c.bf16 %v9891_v40, %v9890_v50  ;;  %v9975_v40 = vld [vmem:[#allocation2 + $0xd8] sm:$0xf0] }
 0x7e1   : > { %v22364_v46 = vadd.f32 %v9889_v39, %v21806_v5  ;;  %v9946_v11 = vpack.c.bf16 %v9889_v39, %v9888_v31  ;;  %v17921_v43 = vpop.f32.mrb[48].mxu0  ;;  %v22374_v27 = vld [vmem:[#allocation2 + $0x200] sm:$0xff]  ;;  %v10041_v16 = vrot.slane %v9975_v40, 4 }
 0x7e2   : > { %9963 = vst.msk [vmem:[#allocation2 + $0x230] sm:$0xff] %vm172_vm1, %v9947_v25  ;;  %v9862_v57 = vadd.f32 %v17921_v43, %v22278_v47  ;;  %v9741_v32 = vpop.f32.mrb[49].mxu0  ;;  %v22368_v4 = vld [vmem:[#allocation2 + $0x1e8] sm:$0xff]  ;;  %v9973_v5 = vld [vmem:[#allocation2 + $0xc0] sm:$0xf0] }
 0x7e3   : > { %9962 = vst.msk [vmem:[#allocation2 + $0x218] sm:$0xff] %vm172_vm1, %v9946_v11  ;;  %v9860_v12 = vadd.f32 %v22278_v47, %v9741_v32  ;;  %v17922_v59 = vpop.f32.mrb[50].mxu0  ;;  %17961 = vmatprep.mubr.msk.bf16.mxu1 %vm172_vm1, %v22368_v4  ;;  %v10038_v34 = vrot.slane %v9973_v5, 4  ;;  %v9976_v39 = vld [vmem:[#allocation2 + $0xe0] sm:$0xf] }
 0x7e4   : > { %v9894_v6 = vmax.f32 %v9862_v57, 0.0  ;;  %v9863_v17 = vadd.f32 %v17922_v59, %v22278_v47  ;;  %v9744_v1 = vpop.f32.mrb[51].mxu0  ;;  %17962 = vmatmul.mubr.msk.bf16.gmra.mrb[88].mxu1 %vm172_vm1, %v22374_v27  ;;  %v9977_v11 = vld [vmem:[#allocation2 + $0xf0] sm:$0xf0]  ;;  %v9978_v43 = vld [vmem:[#allocation2 + $0xf8] sm:$0xf] }
 0x7e5   : > { %v9892_v36 = vmax.f32 %v9860_v12, 0.0  ;;  %v9861_v20 = vadd.f32 %v22278_v47, %v9744_v1 }
 0x7e6   : > { %v22381_v26 = vadd.f32 %v9894_v6, %v21828_v8  ;;  %v9895_v7 = vmax.f32 %v9863_v17, 0.0 }
 0x7e7   : > { %v22384_v28 = vadd.f32 %v9892_v36, %v21833_v9  ;;  %v9893_v0 = vmax.f32 %v9861_v20, 0.0  ;;  %v10040_v9 = vsel %vm10037_vm7, %v10038_v34, %v10039_v58  ;;  %v10045_v20 = vrot.slane %v9978_v43, 4  ;;  %v9982_v43 = vld [vmem:[#allocation2 + $0x128] sm:$0xf] }
 0x7e8   : > { %v22387_v30 = vadd.f32 %v9895_v7, %v21838_v2  ;;  %v9949_v15 = vpack.c.bf16 %v9895_v7, %v9894_v6  ;;  %v10042_v6 = vrot.slane %v9976_v39, 4  ;;  %v9980_v39 = vld [vmem:[#allocation2 + $0x110] sm:$0xf] }
 0x7e9   : > { %v22390_v50 = vadd.f32 %v9893_v0, %v21840_v18  ;;  %v9948_v44 = vpack.c.bf16 %v9893_v0, %v9892_v36  ;;  %v17925_v29 = vpop.f32.mrb[52].mxu0  ;;  %v22401_v25 = vld [vmem:[#allocation2 + $0x230] sm:$0xff]  ;;  %v10044_v36 = vrot.slane %v9977_v11, 4 }
 0x7ea   : > { %9965 = vst.msk [vmem:[#allocation2 + $0x260] sm:$0xff] %vm172_vm1, %v9949_v15  ;;  %v9866_v8 = vadd.f32 %v17925_v29, %v22278_v47  ;;  %v9757_v31 = vpop.f32.mrb[53].mxu0  ;;  %v22394_v41 = vld [vmem:[#allocation2 + $0x218] sm:$0xff]  ;;  %v23340_v15 = vld [vmem:[#allocation4_spill] sm:$0xff] }
 0x7eb   : > { %9964 = vst.msk [vmem:[#allocation2 + $0x248] sm:$0xff] %vm172_vm1, %v9948_v44  ;;  %v9864_v2 = vadd.f32 %v22278_v47, %v9757_v31  ;;  %v17926_v18 = vpop.f32.mrb[54].mxu0  ;;  %17965 = vmatprep.mubr.msk.bf16.mxu1 %vm172_vm1, %v22394_v41  ;;  %v10043_v31 = vsel %vm10037_vm7, %v10041_v16, %v10042_v6  ;;  %v10048_v6 = vrot.slane %v9980_v39, 4 }
 0x7ec   : > { %v9898_v57 = vmax.f32 %v9866_v8, 0.0  ;;  %v9867_v32 = vadd.f32 %v17926_v18, %v22278_v47  ;;  %v9760_v12 = vpop.f32.mrb[55].mxu0  ;;  %17966 = vmatmul.mubr.msk.bf16.gmra.mrb[92].mxu1 %vm172_vm1, %v22401_v25 }
 0x7ed   : > { %v9896_v59 = vmax.f32 %v9864_v2, 0.0  ;;  %v9865_v5 = vadd.f32 %v22278_v47, %v9760_v12  ;;  %17971 = vmatprep.mubr.msk.bf16.mxu1 %vm172_vm1, %v10040_v9  ;;  %v9981_v2 = vld [vmem:[#allocation2 + $0x120] sm:$0xf0] }
 0x7ee   : > { %v22409_v17 = vadd.f32 %v9898_v57, %v21862_v53  ;;  %v9899_v1 = vmax.f32 %v9867_v32, 0.0  ;;  %v9979_v53 = vld [vmem:[#allocation2 + $0x108] sm:$0xf0] }
 0x7ef   : > { %v22412_v7 = vadd.f32 %v9896_v59, %v21867_v63  ;;  %v9897_v34 = vmax.f32 %v9865_v5, 0.0  ;;  %v10693_v63 = vsel %vm628_vm0, %v22271_v3, 0  ;;  %v10047_v16 = vrot.slane %v9979_v53, 4 }
 0x7f0   : > { %v22415_v58 = vadd.f32 %v9899_v1, %v21872_v35  ;;  %v9951_v0 = vpack.c.bf16 %v9899_v1, %v9898_v57  ;;  %v10046_v35 = vsel %vm10037_vm7, %v10044_v36, %v10045_v20  ;;  %v22431_v57 = vld [vmem:[%s23262_s1 + $0x3c] sm:$0x3]  ;;  %v23341_v1 = vld [vmem:[#allocation5_spill] sm:$0xff] }
 0x7f1   : > { %v22418_v44 = vadd.f32 %v9897_v34, %v23340_v15  ;;  %v9950_v29 = vpack.c.bf16 %v9897_v34, %v9896_v59  ;;  %v17929_v8 = vpop.f32.mrb[56].mxu0  ;;  %v10050_v34 = vrot.slane %v9981_v2, 4  ;;  %v23342_v15 = vld [vmem:[#allocation6_spill] sm:$0xff] }
 0x7f2   : > { %9967 = vst.msk [vmem:[#allocation2 + $0x290] sm:$0xff] %vm172_vm1, %v9951_v0  ;;  %v9870_v9 = vadd.f32 %v17929_v8, %v22278_v47  ;;  %v9773_v40 = vpop.f32.mrb[57].mxu0  ;;  %v10051_v0 = vrot.slane %v9982_v43, 4 }
 0x7f3   : > { %9966 = vst.msk [vmem:[#allocation2 + $0x278] sm:$0xff] %vm172_vm1, %v9950_v29  ;;  %v9868_v18 = vadd.f32 %v22278_v47, %v9773_v40  ;;  %v17930_v11 = vpop.f32.mrb[58].mxu0 }
 0x7f4   : > { %v9902_v32 = vmax.f32 %v9870_v9, 0.0  ;;  %v9871_v12 = vadd.f32 %v17930_v11, %v22278_v47  ;;  %v9776_v59 = vpop.f32.mrb[59].mxu0  ;;  %17972 = vmatmul.mubr.msk.bf16.vlgmr.msra.gmra.mrb[64].mxu1 %vm172_vm1, %v10043_v31  ;;  %v23343_v31 = vld [vmem:[#allocation7_spill] sm:$0xff]  ;;  %v10052_v43 = vsel %vm10037_vm7, %v10050_v34, %v10051_v0 }
 0x7f5   : > { %v9900_v3 = vmax.f32 %v9868_v18, 0.0  ;;  %v9869_v5 = vadd.f32 %v22278_v47, %v9776_v59  ;;  %18004 = vmatpush3.bf16.msra.mxu1 %v10693_v63  ;;  %17975 = vmatprep.mubr.msk.bf16.mxu1 %vm172_vm1, %v10046_v35  ;;  %v23344_v63 = vld [vmem:[#allocation8_spill] sm:$0xff]  ;;  %v10049_v18 = vsel %vm10037_vm7, %v10047_v16, %v10048_v6  ;;  %v9984_v59 = vld [vmem:[#allocation2 + $0x140] sm:$0xf] }
 0x7f6   : > { %v22438_v36 = vadd.f32 %v9902_v32, %v23341_v1  ;;  %v9903_v20 = vmax.f32 %v9871_v12, 0.0  ;;  %19860 = vmatprep.subr.msk.bf16.mxu1 %vm628_vm0, %v22431_v57  ;;  %v9983_v12 = vld [vmem:[#allocation2 + $0x138] sm:$0xf0]  ;;  %v9985_v1 = vld [vmem:[#allocation2 + $0x150] sm:$0xf0]  ;;  %v10054_v0 = vrot.slane %v9984_v59, 4 }
 0x7f7   : > { %v22443_v29 = vadd.f32 %v9900_v3, %v23342_v15  ;;  %v9901_v8 = vmax.f32 %v9869_v5, 0.0  ;;  %v10053_v34 = vrot.slane %v9983_v12, 4  ;;  %v9987_v59 = vld [vmem:[#allocation2 + $0x168] sm:$0xf0] }
 0x7f8   : > { %v22446_v9 = vadd.f32 %v9903_v20, %v23343_v31  ;;  %v9953_v40 = vpack.c.bf16 %v9903_v20, %v9902_v32  ;;  %v9986_v20 = vld [vmem:[#allocation2 + $0x158] sm:$0xf] }
 0x7f9   : > { %v22449_v53 = vadd.f32 %v9901_v8, %v23344_v63  ;;  %v9952_v35 = vpack.c.bf16 %v9901_v8, %v9900_v3  ;;  %v17933_v39 = vpop.f32.mrb[60].mxu0  ;;  %v10056_v63 = vrot.slane %v9985_v1, 4  ;;  %v10055_v12 = vsel %vm10037_vm7, %v10053_v34, %v10054_v0  ;;  %v9994_v34 = vld [vmem:[#allocation2 + $0x1b8] sm:$0xf] }
 0x7fa   : > { %9969 = vst.msk [vmem:[#allocation2 + $0x2c0] sm:$0xff] %vm172_vm1, %v9953_v40  ;;  %v9874_v2 = vadd.f32 %v17933_v39, %v22278_v47  ;;  %v9789_v11 = vpop.f32.mrb[61].mxu0 }
 0x7fb   : > { %9968 = vst.msk [vmem:[#allocation2 + $0x2a8] sm:$0xff] %vm172_vm1, %v9952_v35  ;;  %v9872_v32 = vadd.f32 %v22278_v47, %v9789_v11  ;;  %v17934_v5 = vpop.f32.mrb[62].mxu0  ;;  %v10057_v35 = vrot.slane %v9986_v20, 4 }
 0x7fc   : > { %v9906_v3 = vmax.f32 %v9874_v2, 0.0  ;;  %v9875_v15 = vadd.f32 %v17934_v5, %v22278_v47  ;;  %v9792_v16 = vpop.f32.mrb[63].mxu0  ;;  %17976 = vmatmul.mubr.msk.bf16.gmra.mrb[68].mxu1 %vm172_vm1, %v10049_v18  ;;  %v9989_v5 = vld [vmem:[#allocation2 + $0x180] sm:$0xf0] }
 0x7fd   : > { %v9904_v6 = vmax.f32 %v9872_v32, 0.0  ;;  %v9873_v8 = vadd.f32 %v22278_v47, %v9792_v16  ;;  %17979 = vmatprep.mubr.msk.bf16.mxu1 %vm172_vm1, %v10052_v43  ;;  %v9988_v32 = vld [vmem:[#allocation2 + $0x170] sm:$0xf]  ;;  %v10062_v1 = vrot.slane %v9989_v5, 4  ;;  %v9991_v16 = vld [vmem:[#allocation2 + $0x198] sm:$0xf0] }
 0x7fe   : > { %v22462_v31 = vadd.f32 %v9906_v3, %v21935_v23  ;;  %v9907_v40 = vmax.f32 %v9875_v15, 0.0  ;;  %v10058_v23 = vsel %vm10037_vm7, %v10056_v63, %v10057_v35  ;;  %v10065_v0 = vrot.slane %v9991_v16, 4  ;;  %v10002_v16 = vld [vmem:[#allocation2 + $0x218] sm:$0xf] }
 0x7ff   : > { %v22465_v39 = vadd.f32 %v9904_v6, %v21937_v54  ;;  %v9905_v2 = vmax.f32 %v9873_v8, 0.0  ;;  %v10060_v54 = vrot.slane %v9988_v32, 4  ;;  %v9993_v8 = vld [vmem:[#allocation2 + $0x1b0] sm:$0xf0]  ;;  %v10069_v35 = vrot.slane %v9994_v34, 4 }
 0x800   : > { %v22468_v11 = vadd.f32 %v9907_v40, %v21942_v14  ;;  %v9955_v18 = vpack.c.bf16 %v9907_v40, %v9906_v3  ;;  %v10059_v14 = vrot.slane %v9987_v59, 4  ;;  %v10068_v63 = vrot.slane %v9993_v8, 4  ;;  %v9998_v59 = vld [vmem:[#allocation2 + $0x1e8] sm:$0xf] }
 0x801   : > { %v22471_v47 = vadd.f32 %v9905_v2, %v21944_v42  ;;  %v9954_v43 = vpack.c.bf16 %v9905_v2, %v9904_v6  ;;  %v9990_v42 = vld [vmem:[#allocation2 + $0x188] sm:$0xf]  ;;  %v9992_v6 = vld [vmem:[#allocation2 + $0x1a0] sm:$0xf]  ;;  %v10075_v5 = vrot.slane %v9998_v59, 4 }
 0x802   : > { %9971 = vst.msk [vmem:[#allocation2 + $0x2f0] sm:$0xff] %vm172_vm1, %v9955_v18  ;;  %v10063_v20 = vrot.slane %v9990_v42, 4  ;;  %v10061_v3 = vsel %vm10037_vm7, %v10059_v14, %v10060_v54  ;;  %v10066_v40 = vrot.slane %v9992_v6, 4  ;;  %v10070_v18 = vsel %vm10037_vm7, %v10068_v63, %v10069_v35  ;;  %v10530_v63 = vld [vmem:[#allocation2 + $0xc8] sm:$0xf0] }
 0x803   : > { %9970 = vst.msk [vmem:[#allocation2 + $0x2d8] sm:$0xff] %vm172_vm1, %v9954_v43  ;;  %v9995_v43 = vld [vmem:[#allocation2 + $0x1c8] sm:$0xf0]  ;;  %v10531_v35 = vld [vmem:[#allocation2 + $0xd0] sm:$0xf] }
 0x804   : > { %17980 = vmatmul.mubr.msk.bf16.gmra.mrb[72].mxu1 %vm172_vm1, %v10055_v12  ;;  %v10064_v15 = vsel %vm10037_vm7, %v10062_v1, %v10063_v20  ;;  %v10067_v2 = vsel %vm10037_vm7, %v10065_v0, %v10066_v40  ;;  %v9996_v12 = vld [vmem:[#allocation2 + $0x1d0] sm:$0xf]  ;;  %v10071_v32 = vrot.slane %v9995_v43, 4  ;;  %v9999_v20 = vld [vmem:[#allocation2 + $0x1f8] sm:$0xf0]  ;;  %v10081_v0 = vrot.slane %v10002_v16, 4 }
 0x805   : > { %17983 = vmatprep.mubr.msk.bf16.mxu1 %vm172_vm1, %v10058_v23  ;;  %v9997_v23 = vld [vmem:[#allocation2 + $0x1e0] sm:$0xf0]  ;;  %v10072_v14 = vrot.slane %v9996_v12, 4  ;;  %v10077_v6 = vrot.slane %v9999_v20, 4  ;;  %v10004_v43 = vld [vmem:[#allocation2 + $0x230] sm:$0xf] }
 0x806   : > { %v10074_v54 = vrot.slane %v9997_v23, 4  ;;  %v10594_v12 = vrot.slane %v10530_v63, 4  ;;  %v10595_v23 = vrot.slane %v10531_v35, 4  ;;  %v10535_v20 = vld [vmem:[#allocation2 + $0x100] sm:$0xf] }
 0x807   : > { %v10073_v42 = vsel %vm10037_vm7, %v10071_v32, %v10072_v14  ;;  %v10084_v32 = vrot.slane %v10004_v43, 4  ;;  %v10537_v63 = vld [vmem:[#allocation2 + $0x118] sm:$0xf]  ;;  %v10538_v35 = vld [vmem:[#allocation2 + $0x128] sm:$0xf0] }
 0x808   : > { %v10076_v1 = vsel %vm10037_vm7, %v10074_v54, %v10075_v5  ;;  %v10596_v14 = vsel %vm10037_vm7, %v10594_v12, %v10595_v23  ;;  %v10532_v54 = vld [vmem:[#allocation2 + $0xe0] sm:$0xf0]  ;;  %v10533_v5 = vld [vmem:[#allocation2 + $0xe8] sm:$0xf]  ;;  %v10604_v12 = vrot.slane %v10537_v63, 4  ;;  %v10606_v23 = vrot.slane %v10538_v35, 4 }
 0x809   : > { %v10546_v63 = vld [vmem:[#allocation2 + $0x188] sm:$0xf0]  ;;  %v10547_v35 = vld [vmem:[#allocation2 + $0x190] sm:$0xf] }
 0x80c   : > { %17984 = vmatmul.mubr.msk.bf16.gmra.mrb[76].mxu1 %vm172_vm1, %v10061_v3  ;;  %v10000_v3 = vld [vmem:[#allocation2 + $0x200] sm:$0xf] }
 0x80d   : > { %17987 = vmatprep.mubr.msk.bf16.mxu1 %vm172_vm1, %v10064_v15  ;;  %v10001_v15 = vld [vmem:[#allocation2 + $0x210] sm:$0xf0]  ;;  %v10078_v8 = vrot.slane %v10000_v3, 4  ;;  %v10597_v3 = vrot.slane %v10532_v54, 4  ;;  %v10541_v54 = vld [vmem:[#allocation2 + $0x148] sm:$0xf] }
 0x80e   : > { %v10080_v34 = vrot.slane %v10001_v15, 4  ;;  %v10598_v15 = vrot.slane %v10533_v5, 4  ;;  %v10542_v5 = vld [vmem:[#allocation2 + $0x158] sm:$0xf0] }
 0x80f   : > { %v10079_v40 = vsel %vm10037_vm7, %v10077_v6, %v10078_v8  ;;  %v10601_v6 = vrot.slane %v10535_v20, 4  ;;  %v10610_v20 = vrot.slane %v10541_v54, 4 }
 0x810   : > { %v10599_v8 = vsel %vm10037_vm7, %v10597_v3, %v10598_v15  ;;  %v10612_v3 = vrot.slane %v10542_v5, 4 }
 0x814   : > { %17988 = vmatmul.mubr.msk.bf16.gmra.mrb[80].mxu1 %vm172_vm1, %v10067_v2  ;;  %v10082_v2 = vsel %vm10037_vm7, %v10080_v34, %v10081_v0  ;;  %v11051_v34 = vsel %vm628_vm0, %v22431_v57, 0 }
 0x815   : > { %17991 = vmatprep.mubr.msk.bf16.mxu1 %vm172_vm1, %v10070_v18  ;;  %v10003_v18 = vld [vmem:[#allocation2 + $0x228] sm:$0xf0] }
 0x816   : > { %v10083_v59 = vrot.slane %v10003_v18, 4  ;;  %v22506_v18 = vld [vmem:[%s23262_s1 + $0x3e] sm:$0x3] }
 0x81c   : > { %17992 = vmatmul.mubr.msk.bf16.gmra.mrb[84].mxu1 %vm172_vm1, %v10073_v42  ;;  %v10085_v42 = vsel %vm10037_vm7, %v10083_v59, %v10084_v32 }
 0x81d   : > { %17995 = vmatprep.mubr.msk.bf16.mxu1 %vm172_vm1, %v10076_v1  ;;  %v10534_v1 = vld [vmem:[#allocation2 + $0xf8] sm:$0xf0] }
 0x81e   : > { %v10600_v16 = vrot.slane %v10534_v1, 4 }
 0x820   : > { %v10602_v0 = vsel %vm10037_vm7, %v10600_v16, %v10601_v6 }
 0x824   : > { %17996 = vmatmul.mubr.msk.bf16.gmra.mrb[88].mxu1 %vm172_vm1, %v10079_v40  ;;  %v10536_v40 = vld [vmem:[#allocation2 + $0x110] sm:$0xf0] }
 0x825   : > { %17999 = vmatprep.mubr.msk.bf16.mxu1 %vm172_vm1, %v10082_v2  ;;  %v10539_v2 = vld [vmem:[#allocation2 + $0x130] sm:$0xf]  ;;  %v10603_v43 = vrot.slane %v10536_v40, 4 }
 0x826   : > { %v10607_v57 = vrot.slane %v10539_v2, 4  ;;  %v10618_v2 = vrot.slane %v10546_v63, 4 }
 0x827   : > { %v10605_v59 = vsel %vm10037_vm7, %v10603_v43, %v10604_v12  ;;  %v10619_v43 = vrot.slane %v10547_v35, 4 }
 0x828   : > { %v10608_v32 = vsel %vm10037_vm7, %v10606_v23, %v10607_v57  ;;  %v10548_v57 = vld [vmem:[#allocation2 + $0x1a0] sm:$0xf0] }
 0x829   : > { %v10620_v23 = vsel %vm10037_vm7, %v10618_v2, %v10619_v43  ;;  %v10621_v54 = vrot.slane %v10548_v57, 4  ;;  %v10556_v43 = vld [vmem:[#allocation2 + $0x200] sm:$0xf0]  ;;  %v10559_v57 = vld [vmem:[#allocation2 + $0x220] sm:$0xf] }
 0x82c   : > { %18000 = vmatmul.mubr.msk.bf16.gmra.mrb[92].mxu1 %vm172_vm1, %v10085_v42  ;;  %v10543_v42 = vld [vmem:[#allocation2 + $0x160] sm:$0xf] }
 0x82d   : > { %18005 = vmatprep.mubr.msk.bf16.mxu1 %vm172_vm1, %v10596_v14  ;;  %v10540_v14 = vld [vmem:[#allocation2 + $0x140] sm:$0xf0]  ;;  %v10613_v15 = vrot.slane %v10543_v42, 4 }
 0x82e   : > { %v10609_v1 = vrot.slane %v10540_v14, 4  ;;  %v10551_v14 = vld [vmem:[#allocation2 + $0x1c0] sm:$0xf] }
 0x82f   : > { %v10614_v6 = vsel %vm10037_vm7, %v10612_v3, %v10613_v15  ;;  %v10552_v15 = vld [vmem:[#allocation2 + $0x1d0] sm:$0xf0] }
 0x830   : > { %v10611_v16 = vsel %vm10037_vm7, %v10609_v1, %v10610_v20  ;;  %v10625_v1 = vrot.slane %v10551_v14, 4 }
 0x834   : > { %18006 = vmatmul.mubr.msk.bf16.vlgmr.msra.gmra.mrb[64].mxu1 %vm172_vm1, %v10599_v8  ;;  %v10544_v8 = vld [vmem:[#allocation2 + $0x170] sm:$0xf0] }
 0x835   : > { %18038 = vmatpush3.bf16.msra.mxu1 %v11051_v34  ;;  %18009 = vmatprep.mubr.msk.bf16.mxu1 %vm172_vm1, %v10602_v0  ;;  %v10545_v34 = vld [vmem:[#allocation2 + $0x178] sm:$0xf]  ;;  %v10615_v0 = vrot.slane %v10544_v8, 4  ;;  %v10555_v8 = vld [vmem:[#allocation2 + $0x1f0] sm:$0xf] }
 0x836   : > { %19861 = vmatprep.subr.msk.bf16.mxu1 %vm628_vm0, %v22506_v18  ;;  %v10616_v40 = vrot.slane %v10545_v34, 4  ;;  %v10627_v34 = vrot.slane %v10552_v15, 4  ;;  %v10631_v63 = vrot.slane %v10555_v8, 4  ;;  %v10889_v15 = vld [vmem:[#allocation2 + $0x188] sm:$0xf] }
 0x838   : > { %v10617_v12 = vsel %vm10037_vm7, %v10615_v0, %v10616_v40 }
 0x83c   : > { %18010 = vmatmul.mubr.msk.bf16.gmra.mrb[68].mxu1 %vm172_vm1, %v10605_v59  ;;  %v10549_v59 = vld [vmem:[#allocation2 + $0x1a8] sm:$0xf] }
 0x83d   : > { %18013 = vmatprep.mubr.msk.bf16.mxu1 %vm172_vm1, %v10608_v32  ;;  %v10550_v32 = vld [vmem:[#allocation2 + $0x1b8] sm:$0xf0]  ;;  %v10622_v5 = vrot.slane %v10549_v59, 4  ;;  %v10633_v59 = vrot.slane %v10556_v43, 4  ;;  %v10893_v43 = vld [vmem:[#allocation2 + $0x1b8] sm:$0xf] }
 0x83e   : > { %v10624_v42 = vrot.slane %v10550_v32, 4 }
 0x83f   : > { %v10623_v20 = vsel %vm10037_vm7, %v10621_v54, %v10622_v5  ;;  %v10637_v54 = vrot.slane %v10559_v57, 4 }
 0x840   : > { %v10626_v3 = vsel %vm10037_vm7, %v10624_v42, %v10625_v1  ;;  %v10560_v1 = vld [vmem:[#allocation2 + $0x230] sm:$0xf0] }
 0x844   : > { %18014 = vmatmul.mubr.msk.bf16.gmra.mrb[72].mxu1 %vm172_vm1, %v10611_v16  ;;  %v10553_v16 = vld [vmem:[#allocation2 + $0x1d8] sm:$0xf] }
 0x845   : > { %18017 = vmatprep.mubr.msk.bf16.mxu1 %vm172_vm1, %v10614_v6  ;;  %v10554_v6 = vld [vmem:[#allocation2 + $0x1e8] sm:$0xf0]  ;;  %v10628_v0 = vrot.slane %v10553_v16, 4  ;;  %v10639_v16 = vrot.slane %v10560_v1, 4  ;;  %v10895_v1 = vld [vmem:[#allocation2 + $0x1d0] sm:$0xf] }
 0x846   : > { %v10630_v40 = vrot.slane %v10554_v6, 4 }
 0x847   : > { %v10629_v35 = vsel %vm10037_vm7, %v10627_v34, %v10628_v0  ;;  %v10953_v34 = vrot.slane %v10889_v15, 4  ;;  %v10962_v15 = vrot.slane %v10895_v1, 4 }
 0x848   : > { %v10632_v2 = vsel %vm10037_vm7, %v10630_v40, %v10631_v63  ;;  %v10890_v63 = vld [vmem:[#allocation2 + $0x198] sm:$0xf0] }
 0x84c   : > { %18018 = vmatmul.mubr.msk.bf16.gmra.mrb[76].mxu1 %vm172_vm1, %v10617_v12  ;;  %v10557_v12 = vld [vmem:[#allocation2 + $0x208] sm:$0xf] }
 0x84d   : > { %18021 = vmatprep.mubr.msk.bf16.mxu1 %vm172_vm1, %v10620_v23  ;;  %v10558_v23 = vld [vmem:[#allocation2 + $0x218] sm:$0xf0]  ;;  %v10634_v32 = vrot.slane %v10557_v12, 4  ;;  %v10955_v12 = vrot.slane %v10890_v63, 4  ;;  %v10900_v63 = vld [vmem:[#allocation2 + $0x210] sm:$0xf0] }
 0x84e   : > { %v10636_v14 = vrot.slane %v10558_v23, 4 }
 0x84f   : > { %v10635_v5 = vsel %vm10037_vm7, %v10633_v59, %v10634_v32  ;;  %v10959_v59 = vrot.slane %v10893_v43, 4  ;;  %v11313_v32 = vsel %vm628_vm0, %v22506_v18, 0 }
 0x850   : > { %v10638_v42 = vsel %vm10037_vm7, %v10636_v14, %v10637_v54  ;;  %v22546_v54 = vld [vmem:[%s23262_s1 + $0x40] sm:$0x3] }
 0x854   : > { %18022 = vmatmul.mubr.msk.bf16.gmra.mrb[80].mxu1 %vm172_vm1, %v10623_v20  ;;  %v10561_v20 = vld [vmem:[#allocation2 + $0x238] sm:$0xf] }
 0x855   : > { %18025 = vmatprep.mubr.msk.bf16.mxu1 %vm172_vm1, %v10626_v3  ;;  %v10888_v3 = vld [vmem:[#allocation2 + $0x180] sm:$0xf0]  ;;  %v10640_v6 = vrot.slane %v10561_v20, 4 }
 0x856   : > { %v10952_v8 = vrot.slane %v10888_v3, 4  ;;  %v10896_v20 = vld [vmem:[#allocation2 + $0x1e0] sm:$0xf0]  ;;  %v10897_v3 = vld [vmem:[#allocation2 + $0x1e8] sm:$0xf] }
 0x857   : > { %v10641_v0 = vsel %vm10037_vm7, %v10639_v16, %v10640_v6  ;;  %v10964_v16 = vrot.slane %v10896_v20, 4  ;;  %v10965_v6 = vrot.slane %v10897_v3, 4 }
 0x858   : > { %v10954_v40 = vsel %vm10037_vm7, %v10952_v8, %v10953_v34 }
 0x859   : > { %v10966_v34 = vsel %vm10037_vm7, %v10964_v16, %v10965_v6  ;;  %v10906_v6 = vld [vmem:[#allocation2 + $0x258] sm:$0xf0] }
 0x85c   : > { %18026 = vmatmul.mubr.msk.bf16.gmra.mrb[84].mxu1 %vm172_vm1, %v10629_v35  ;;  %v10891_v35 = vld [vmem:[#allocation2 + $0x1a0] sm:$0xf] }
 0x85d   : > { %18029 = vmatprep.mubr.msk.bf16.mxu1 %vm172_vm1, %v10632_v2  ;;  %v10892_v2 = vld [vmem:[#allocation2 + $0x1b0] sm:$0xf0]  ;;  %v10956_v23 = vrot.slane %v10891_v35, 4  ;;  %v10901_v35 = vld [vmem:[#allocation2 + $0x218] sm:$0xf] }
 0x85e   : > { %v10958_v57 = vrot.slane %v10892_v2, 4 }
 0x85f   : > { %v10957_v14 = vsel %vm10037_vm7, %v10955_v12, %v10956_v23  ;;  %v10970_v12 = vrot.slane %v10900_v63, 4  ;;  %v10971_v23 = vrot.slane %v10901_v35, 4 }
 0x864   : > { %18030 = vmatmul.mubr.msk.bf16.gmra.mrb[88].mxu1 %vm172_vm1, %v10635_v5  ;;  %v10960_v5 = vsel %vm10037_vm7, %v10958_v57, %v10959_v59  ;;  %v10972_v59 = vsel %vm10037_vm7, %v10970_v12, %v10971_v23  ;;  %v10910_v23 = vld [vmem:[#allocation2 + $0x288] sm:$0xf0] }
 0x865   : > { %18033 = vmatprep.mubr.msk.bf16.mxu1 %vm172_vm1, %v10638_v42  ;;  %v10894_v42 = vld [vmem:[#allocation2 + $0x1c8] sm:$0xf0] }
 0x866   : > { %v10961_v18 = vrot.slane %v10894_v42, 4  ;;  %v10905_v42 = vld [vmem:[#allocation2 + $0x248] sm:$0xf] }
 0x868   : > { %v10963_v8 = vsel %vm10037_vm7, %v10961_v18, %v10962_v15  ;;  %v10977_v18 = vrot.slane %v10905_v42, 4 }
 0x86c   : > { %18034 = vmatmul.mubr.msk.bf16.gmra.mrb[92].mxu1 %vm172_vm1, %v10641_v0  ;;  %v10898_v0 = vld [vmem:[#allocation2 + $0x1f8] sm:$0xf0] }
 0x86d   : > { %18039 = vmatprep.mubr.msk.bf16.mxu1 %vm172_vm1, %v10954_v40  ;;  %v10899_v40 = vld [vmem:[#allocation2 + $0x200] sm:$0xf]  ;;  %v10967_v2 = vrot.slane %v10898_v0, 4  ;;  %v10909_v0 = vld [vmem:[#allocation2 + $0x278] sm:$0xf] }
 0x86e   : > { %v10968_v43 = vrot.slane %v10899_v40, 4  ;;  %v10979_v40 = vrot.slane %v10906_v6, 4  ;;  %v10917_v6 = vld [vmem:[#allocation2 + $0x2d8] sm:$0xf] }
 0x870   : > { %v10969_v57 = vsel %vm10037_vm7, %v10967_v2, %v10968_v43  ;;  %v10983_v2 = vrot.slane %v10909_v0, 4 }
 0x874   : > { %18040 = vmatmul.mubr.msk.bf16.vlgmr.msra.gmra.mrb[64].mxu1 %vm172_vm1, %v10957_v14  ;;  %v10903_v14 = vld [vmem:[#allocation2 + $0x230] sm:$0xf] }
 0x875   : > { %18072 = vmatpush3.bf16.msra.mxu1 %v11313_v32  ;;  %18043 = vmatprep.mubr.msk.bf16.mxu1 %vm172_vm1, %v10960_v5  ;;  %v10902_v32 = vld [vmem:[#allocation2 + $0x228] sm:$0xf0]  ;;  %v10904_v5 = vld [vmem:[#allocation2 + $0x240] sm:$0xf0]  ;;  %v10974_v20 = vrot.slane %v10903_v14, 4  ;;  %v10985_v14 = vrot.slane %v10910_v23, 4 }
 0x876   : > { %19862 = vmatprep.subr.msk.bf16.mxu1 %vm628_vm0, %v22546_v54  ;;  %v10973_v1 = vrot.slane %v10902_v32, 4  ;;  %v10976_v3 = vrot.slane %v10904_v5, 4  ;;  %v10913_v32 = vld [vmem:[#allocation2 + $0x2a8] sm:$0xf] }
 0x878   : > { %v10975_v15 = vsel %vm10037_vm7, %v10973_v1, %v10974_v20  ;;  %v10978_v16 = vsel %vm10037_vm7, %v10976_v3, %v10977_v18  ;;  %v10989_v1 = vrot.slane %v10913_v32, 4  ;;  %v10914_v18 = vld [vmem:[#allocation2 + $0x2b8] sm:$0xf0]  ;;  %v16040_v32 = vld [vmem:[%s23262_s1 + $0x42] sm:$0x3] }
 0x87c   : > { %18044 = vmatmul.mubr.msk.bf16.gmra.mrb[68].mxu1 %vm172_vm1, %v10963_v8  ;;  %v10907_v8 = vld [vmem:[#allocation2 + $0x260] sm:$0xf] }
 0x87d   : > { %18047 = vmatprep.mubr.msk.bf16.mxu1 %vm172_vm1, %v10966_v34  ;;  %v10908_v34 = vld [vmem:[#allocation2 + $0x270] sm:$0xf0]  ;;  %v10980_v63 = vrot.slane %v10907_v8, 4  ;;  %v10991_v8 = vrot.slane %v10914_v18, 4  ;;  %v11510_v18 = vld [vmem:[#allocation2 + $0x1a0] sm:$0xf0] }
 0x87e   : > { %v10982_v35 = vrot.slane %v10908_v34, 4 }
 0x87f   : > { %v10981_v43 = vsel %vm10037_vm7, %v10979_v40, %v10980_v63  ;;  %v10995_v40 = vrot.slane %v10917_v6, 4  ;;  %v11513_v6 = vld [vmem:[#allocation2 + $0x1c0] sm:$0xf] }
 0x880   : > { %v10984_v12 = vsel %vm10037_vm7, %v10982_v35, %v10983_v2  ;;  %v10918_v2 = vld [vmem:[#allocation2 + $0x2e8] sm:$0xf0] }
 0x884   : > { %18048 = vmatmul.mubr.msk.bf16.gmra.mrb[72].mxu1 %vm172_vm1, %v10969_v57  ;;  %v10911_v57 = vld [vmem:[#allocation2 + $0x290] sm:$0xf] }
 0x885   : > { %18051 = vmatprep.mubr.msk.bf16.mxu1 %vm172_vm1, %v10972_v59  ;;  %v10912_v59 = vld [vmem:[#allocation2 + $0x2a0] sm:$0xf0]  ;;  %v10986_v5 = vrot.slane %v10911_v57, 4 }
 0x886   : > { %v10988_v42 = vrot.slane %v10912_v59, 4  ;;  %v11671_v59 = vsel %vm628_vm0, %v22546_v54, 0  ;;  %v22630_v54 = vld [vmem:[#allocation2 + $0x2d8] sm:$0xff] }
 0x887   : > { %v10987_v20 = vsel %vm10037_vm7, %v10985_v14, %v10986_v5  ;;  %v11508_v14 = vld [vmem:[#allocation2 + $0x188] sm:$0xf0]  ;;  %v11509_v5 = vld [vmem:[#allocation2 + $0x190] sm:$0xf] }
 0x888   : > { %v10990_v3 = vsel %vm10037_vm7, %v10988_v42, %v10989_v1  ;;  %v11572_v42 = vrot.slane %v11508_v14, 4  ;;  %v11573_v1 = vrot.slane %v11509_v5, 4 }
 0x88c   : > { %18052 = vmatmul.mubr.msk.bf16.gmra.mrb[76].mxu1 %vm172_vm1, %v10975_v15  ;;  %v10915_v15 = vld [vmem:[#allocation2 + $0x2c0] sm:$0xf] }
 0x88d   : > { %18055 = vmatprep.mubr.msk.bf16.mxu1 %vm172_vm1, %v10978_v16  ;;  %v10916_v16 = vld [vmem:[#allocation2 + $0x2d0] sm:$0xf0]  ;;  %v10992_v34 = vrot.slane %v10915_v15, 4  ;;  %v11511_v15 = vld [vmem:[#allocation2 + $0x1a8] sm:$0xf] }
 0x88e   : > { %v10994_v0 = vrot.slane %v10916_v16, 4  ;;  %v11512_v16 = vld [vmem:[#allocation2 + $0x1b8] sm:$0xf0] }
 0x88f   : > { %v10993_v63 = vsel %vm10037_vm7, %v10991_v8, %v10992_v34  ;;  %v11575_v8 = vrot.slane %v11510_v18, 4  ;;  %v11576_v34 = vrot.slane %v11511_v15, 4  ;;  %v11520_v18 = vld [vmem:[#allocation2 + $0x218] sm:$0xf0]  ;;  %v11521_v15 = vld [vmem:[#allocation2 + $0x220] sm:$0xf] }
 0x890   : > { %v10996_v35 = vsel %vm10037_vm7, %v10994_v0, %v10995_v40  ;;  %v11578_v0 = vrot.slane %v11512_v16, 4  ;;  %v11579_v40 = vrot.slane %v11513_v6, 4 }
 0x894   : > { %18056 = vmatmul.mubr.msk.bf16.gmra.mrb[80].mxu1 %vm172_vm1, %v10981_v43  ;;  %v10919_v43 = vld [vmem:[#allocation2 + $0x2f0] sm:$0xf] }
 0x895   : > { %18059 = vmatprep.mubr.msk.bf16.mxu1 %vm172_vm1, %v10984_v12  ;;  %v10997_v12 = vrot.slane %v10918_v2, 4  ;;  %v10998_v23 = vrot.slane %v10919_v43, 4  ;;  %v22645_v2 = vld [vmem:[%s23262_s1 + $0x44] sm:$0x3]  ;;  %v11580_v43 = vsel %vm10037_vm7, %v11578_v0, %v11579_v40 }
 0x897   : > { %v10999_v57 = vsel %vm10037_vm7, %v10997_v12, %v10998_v23  ;;  %v11514_v12 = vld [vmem:[#allocation2 + $0x1d0] sm:$0xf0]  ;;  %v11515_v23 = vld [vmem:[#allocation2 + $0x1d8] sm:$0xf] }
 0x89c   : > { %18060 = vmatmul.mubr.msk.bf16.gmra.mrb[84].mxu1 %vm172_vm1, %v10987_v20  ;;  %v22634_v20 = vld [vmem:[#allocation2 + $0x2f0] sm:$0xff] }
 0x89d   : > { %18063 = vmatprep.mubr.msk.bf16.mxu1 %vm172_vm1, %v10990_v3  ;;  %v11574_v3 = vsel %vm10037_vm7, %v11572_v42, %v11573_v1  ;;  %v11518_v1 = vld [vmem:[#allocation2 + $0x200] sm:$0xf0] }
 0x89e   : > { %v11587_v16 = vrot.slane %v11518_v1, 4  ;;  %v11529_v1 = vld [vmem:[#allocation2 + $0x280] sm:$0xf] }
 0x8a4   : > { %18064 = vmatmul.mubr.msk.bf16.gmra.mrb[88].mxu1 %vm172_vm1, %v10993_v63  ;;  %v12030_v63 = vsel %vm628_vm0, %v16040_v32, 0 }
 0x8a5   : > { %18067 = vmatprep.mubr.msk.bf16.mxu1 %vm172_vm1, %v10996_v35  ;;  %v11577_v35 = vsel %vm10037_vm7, %v11575_v8, %v11576_v34  ;;  %v11590_v8 = vrot.slane %v11520_v18, 4  ;;  %v11591_v34 = vrot.slane %v11521_v15, 4 }
 0x8a7   : > { %v11592_v40 = vsel %vm10037_vm7, %v11590_v8, %v11591_v34  ;;  %v11530_v8 = vld [vmem:[#allocation2 + $0x290] sm:$0xf0]  ;;  %v11531_v34 = vld [vmem:[#allocation2 + $0x298] sm:$0xf] }
 0x8ac   : > { %18068 = vmatmul.mubr.msk.bf16.gmra.mrb[92].mxu1 %vm172_vm1, %v10999_v57  ;;  %v11516_v57 = vld [vmem:[#allocation2 + $0x1e8] sm:$0xf0] }
 0x8ad   : > { %18073 = vmatprep.mubr.msk.bf16.mxu1 %vm172_vm1, %v22316_v38  ;;  %v22601_v38 = vld [vmem:[#allocation2 + $0x248] sm:$0xff] }
 0x8b4   : > { %18074 = vmatmul.mubr.msk.bf16.vlgmr.msra.gmra.mrb[64].mxu1 %vm172_vm1, %v22322_v51  ;;  %v22605_v51 = vld [vmem:[#allocation2 + $0x260] sm:$0xff] }
 0x8b5   : > { %18106 = vmatpush3.bf16.msra.mxu1 %v11671_v59  ;;  %18077 = vmatprep.mubr.msk.bf16.mxu1 %vm172_vm1, %v22342_v48  ;;  %v22609_v48 = vld [vmem:[#allocation2 + $0x278] sm:$0xff]  ;;  %v11517_v59 = vld [vmem:[#allocation2 + $0x1f0] sm:$0xf] }
 0x8b6   : > { %19863 = vmatprep.subr.msk.bf16.mxu1 %vm628_vm0, %v16040_v32  ;;  %v11581_v32 = vrot.slane %v11514_v12, 4  ;;  %v11585_v14 = vrot.slane %v11517_v59, 4  ;;  %v11525_v12 = vld [vmem:[#allocation2 + $0x250] sm:$0xf] }
 0x8bc   : > { %18078 = vmatmul.mubr.msk.bf16.gmra.mrb[68].mxu1 %vm172_vm1, %v22348_v60  ;;  %v16094_v60 = vld [vmem:[%s23262_s1 + $0x4a] sm:$0x3] }
 0x8bd   : > { %18081 = vmatprep.mubr.msk.bf16.mxu1 %vm172_vm1, %v22368_v4  ;;  %19866 = vmatprep.subr.msk.bf16.mxu0 %vm628_vm0, %v16094_v60  ;;  %v13066_v4 = vsel %vm628_vm0, %v16094_v60, 0  ;;  %v11582_v60 = vrot.slane %v11515_v23, 4 }
 0x8be   : > { %18242 = vmatpush3.bf16.msra.mxu0 %v13066_v4  ;;  %v11584_v4 = vrot.slane %v11516_v57, 4 }
 0x8bf   : > { %v11583_v5 = vsel %vm10037_vm7, %v11581_v32, %v11582_v60  ;;  %v11597_v32 = vrot.slane %v11525_v12, 4  ;;  %v11533_v12 = vld [vmem:[#allocation2 + $0x2b0] sm:$0xf] }
 0x8c0   : > { %v11586_v42 = vsel %vm10037_vm7, %v11584_v4, %v11585_v14  ;;  %v11526_v14 = vld [vmem:[#allocation2 + $0x260] sm:$0xf0] }
 0x8c4   : > { %18082 = vmatmul.mubr.msk.bf16.gmra.mrb[72].mxu1 %vm172_vm1, %v22374_v27  ;;  %v22618_v27 = vld [vmem:[#allocation2 + $0x290] sm:$0xff] }
 0x8c5   : > { %18085 = vmatprep.mubr.msk.bf16.mxu1 %vm172_vm1, %v22394_v41  ;;  %v22622_v41 = vld [vmem:[#allocation2 + $0x2a8] sm:$0xff] }
 0x8cc   : > { %18086 = vmatmul.mubr.msk.bf16.gmra.mrb[76].mxu1 %vm172_vm1, %v22401_v25  ;;  %v22626_v25 = vld [vmem:[#allocation2 + $0x2c0] sm:$0xff] }
 0x8cd   : > { %18089 = vmatprep.mubr.msk.bf16.mxu1 %vm172_vm1, %v22601_v38 }
 0x8d4   : > { %18090 = vmatmul.mubr.msk.bf16.gmra.mrb[80].mxu1 %vm172_vm1, %v22605_v51 }
 0x8d5   : > { %18093 = vmatprep.mubr.msk.bf16.mxu1 %vm172_vm1, %v22609_v48 }
 0x8dc   : > { %18094 = vmatmul.mubr.msk.bf16.gmra.mrb[84].mxu1 %vm172_vm1, %v22618_v27 }
 0x8dd   : > { %18097 = vmatprep.mubr.msk.bf16.mxu1 %vm172_vm1, %v22622_v41 }
 0x8e4   : > { %18098 = vmatmul.mubr.msk.bf16.gmra.mrb[88].mxu1 %vm172_vm1, %v22626_v25 }
 0x8e5   : > { %18101 = vmatprep.mubr.msk.bf16.mxu1 %vm172_vm1, %v22630_v54 }
 0x8ec   : > { %18102 = vmatmul.mubr.msk.bf16.gmra.mrb[92].mxu1 %vm172_vm1, %v22634_v20 }
 0x8ed   : > { %18107 = vmatprep.mubr.msk.bf16.mxu1 %vm172_vm1, %v11574_v3  ;;  %v11519_v3 = vld [vmem:[#allocation2 + $0x208] sm:$0xf] }
 0x8ee   : > { %v11588_v6 = vrot.slane %v11519_v3, 4  ;;  %v11599_v3 = vrot.slane %v11526_v14, 4  ;;  %v11535_v14 = vld [vmem:[#allocation2 + $0x2c8] sm:$0xf] }
 0x8f0   : > { %v11589_v0 = vsel %vm10037_vm7, %v11587_v16, %v11588_v6  ;;  %v11603_v16 = vrot.slane %v11529_v1, 4  ;;  %v13001_v1 = vld [vmem:[#allocation2 + $0x38] sm:$0xff] }
 0x8f4   : > { %18108 = vmatmul.mubr.msk.bf16.vlgmr.msra.gmra.mrb[64].mxu1 %vm172_vm1, %v11577_v35  ;;  %v11523_v35 = vld [vmem:[#allocation2 + $0x238] sm:$0xf] }
 0x8f5   : > { %18140 = vmatpush3.bf16.msra.mxu1 %v12030_v63  ;;  %18111 = vmatprep.mubr.msk.bf16.mxu1 %vm172_vm1, %v11580_v43  ;;  %v11522_v63 = vld [vmem:[#allocation2 + $0x230] sm:$0xf0]  ;;  %v11524_v43 = vld [vmem:[#allocation2 + $0x248] sm:$0xf0]  ;;  %v11594_v57 = vrot.slane %v11523_v35, 4  ;;  %v13000_v35 = vld [vmem:[#allocation2 + $0x20] sm:$0xff] }
 0x8f6   : > { %19864 = vmatprep.subr.msk.bf16.mxu1 %vm628_vm0, %v22645_v2  ;;  %v11593_v23 = vrot.slane %v11522_v63, 4  ;;  %v11596_v59 = vrot.slane %v11524_v43, 4  ;;  %v16093_v63 = vld [vmem:[%s23262_s1 + $0x48] sm:$0x3]  ;;  %v11532_v43 = vld [vmem:[#allocation2 + $0x2a8] sm:$0xf0] }
 0x8f7   : > { %19867 = vmatprep.subr.msk.bf16.mxu0 %vm628_vm0, %v16093_v63 }
 0x8f8   : > { %v11595_v60 = vsel %vm10037_vm7, %v11593_v23, %v11594_v57  ;;  %v11598_v4 = vsel %vm10037_vm7, %v11596_v59, %v11597_v32  ;;  %v13278_v23 = vsel %vm628_vm0, %v16093_v63, 0  ;;  %v11605_v57 = vrot.slane %v11530_v8, 4 }
 0x8f9   : > { %v11606_v59 = vrot.slane %v11531_v34, 4  ;;  %v11608_v32 = vrot.slane %v11532_v43, 4  ;;  %v13003_v43 = vld [vmem:[#allocation2 + $0x68] sm:$0xff] }
 0x8fc   : > { %18112 = vmatmul.mubr.msk.bf16.gmra.mrb[68].mxu1 %vm172_vm1, %v11583_v5  ;;  %v11527_v5 = vld [vmem:[#allocation2 + $0x268] sm:$0xf] }
 0x8fd   : > { %18115 = vmatprep.mubr.msk.bf16.mxu1 %vm172_vm1, %v11586_v42  ;;  %v11528_v42 = vld [vmem:[#allocation2 + $0x278] sm:$0xf0]  ;;  %v11600_v18 = vrot.slane %v11527_v5, 4 }
 0x8fe   : > { %v11602_v15 = vrot.slane %v11528_v42, 4  ;;  %v11534_v42 = vld [vmem:[#allocation2 + $0x2c0] sm:$0xf0] }
 0x8ff   : > { %v11601_v6 = vsel %vm10037_vm7, %v11599_v3, %v11600_v18  ;;  %v13002_v3 = vld [vmem:[#allocation2 + $0x50] sm:$0xff]  ;;  %v11536_v18 = vld [vmem:[#allocation2 + $0x2d8] sm:$0xf0] }
 0x900   : > { %v11614_v8 = vrot.slane %v11536_v18, 4  ;;  %v11872_v18 = vld [vmem:[#allocation2 + $0x278] sm:$0xf] }
 0x904   : > { %18116 = vmatmul.mubr.msk.bf16.gmra.mrb[72].mxu1 %vm172_vm1, %v11589_v0  ;;  %v11604_v0 = vsel %vm10037_vm7, %v11602_v15, %v11603_v16  ;;  %v11537_v15 = vld [vmem:[#allocation2 + $0x2e0] sm:$0xf]  ;;  %v11611_v16 = vrot.slane %v11534_v42, 4  ;;  %v11869_v42 = vld [vmem:[#allocation2 + $0x258] sm:$0xf0] }
 0x905   : > { %18119 = vmatprep.mubr.msk.bf16.mxu1 %vm172_vm1, %v11592_v40  ;;  %v12999_v40 = vld [vmem:[#allocation2 + $0x8] sm:$0xff]  ;;  %v11615_v34 = vrot.slane %v11537_v15, 4  ;;  %v13005_v15 = vld [vmem:[#allocation2 + $0x98] sm:$0xff] }
 0x906   : > { %18243 = vmatprep.mubr.msk.bf16.mxu0 %vm172_vm1, %v12999_v40  ;;  %v11539_v40 = vld [vmem:[#allocation2 + $0x2f8] sm:$0xf] }
 0x907   : > { %18244 = vmatmul.mubr.msk.bf16.vlgmr.msra.gmra.mrb[64].mxu0 %vm172_vm1, %v13000_v35  ;;  %v11616_v63 = vsel %vm10037_vm7, %v11614_v8, %v11615_v34  ;;  %v11538_v35 = vld [vmem:[#allocation2 + $0x2f0] sm:$0xf0] }
 0x908   : > { %18276 = vmatpush3.bf16.msra.mxu0 %v13278_v23  ;;  %18247 = vmatprep.mubr.msk.bf16.mxu0 %vm172_vm1, %v13001_v1  ;;  %v11867_v23 = vld [vmem:[#allocation2 + $0x240] sm:$0xf0]  ;;  %v11870_v1 = vld [vmem:[#allocation2 + $0x260] sm:$0xf] }
 0x909   : > { %v11935_v8 = vrot.slane %v11870_v1, 4 }
 0x90c   : > { %18120 = vmatmul.mubr.msk.bf16.gmra.mrb[76].mxu1 %vm172_vm1, %v11595_v60  ;;  %v11609_v60 = vrot.slane %v11533_v12, 4  ;;  %v13004_v12 = vld [vmem:[#allocation2 + $0x80] sm:$0xff] }
 0x90d   : > { %18123 = vmatprep.mubr.msk.bf16.mxu1 %vm172_vm1, %v11598_v4  ;;  %v11607_v4 = vsel %vm10037_vm7, %v11605_v57, %v11606_v59  ;;  %v11868_v57 = vld [vmem:[#allocation2 + $0x248] sm:$0xf]  ;;  %v11617_v59 = vrot.slane %v11538_v35, 4  ;;  %v22699_v35 = vld [vmem:[%s23262_s1 + $0x46] sm:$0x3] }
 0x90e   : > { %v11610_v5 = vsel %vm10037_vm7, %v11608_v32, %v11609_v60  ;;  %v11618_v32 = vrot.slane %v11539_v40, 4  ;;  %v11931_v60 = vrot.slane %v11867_v23, 4  ;;  %v12292_v40 = vsel %vm628_vm0, %v22645_v2, 0  ;;  %v11874_v23 = vld [vmem:[#allocation2 + $0x290] sm:$0xf]  ;;  %v13008_v2 = vld [vmem:[#allocation2 + $0xe0] sm:$0xff] }
 0x90f   : > { %18248 = vmatmul.mubr.msk.bf16.gmra.mrb[68].mxu0 %vm172_vm1, %v13002_v3  ;;  %v11871_v3 = vld [vmem:[#allocation2 + $0x270] sm:$0xf0] }
 0x910   : > { %18251 = vmatprep.mubr.msk.bf16.mxu0 %vm172_vm1, %v13003_v43  ;;  %v11937_v34 = vrot.slane %v11871_v3, 4  ;;  %v11877_v3 = vld [vmem:[#allocation2 + $0x2b8] sm:$0xf0] }
 0x914   : > { %18124 = vmatmul.mubr.msk.bf16.gmra.mrb[80].mxu1 %vm172_vm1, %v11601_v6  ;;  %v11612_v6 = vrot.slane %v11535_v14, 4  ;;  %v11619_v14 = vsel %vm10037_vm7, %v11617_v59, %v11618_v32  ;;  %v11876_v59 = vld [vmem:[#allocation2 + $0x2a8] sm:$0xf] }
 0x915   : > { %18127 = vmatprep.mubr.msk.bf16.mxu1 %vm172_vm1, %v11604_v0  ;;  %v13007_v32 = vld [vmem:[#allocation2 + $0xc8] sm:$0xff] }
 0x916   : > { %v11613_v0 = vsel %vm10037_vm7, %v11611_v16, %v11612_v6  ;;  %v13006_v16 = vld [vmem:[#allocation2 + $0xb0] sm:$0xff]  ;;  %v11934_v6 = vrot.slane %v11869_v42, 4 }
 0x917   : > { %18252 = vmatmul.mubr.msk.bf16.gmra.mrb[72].mxu0 %vm172_vm1, %v13004_v12  ;;  %v11873_v12 = vld [vmem:[#allocation2 + $0x288] sm:$0xf0] }
 0x918   : > { %18255 = vmatprep.mubr.msk.bf16.mxu0 %vm172_vm1, %v13005_v15  ;;  %v11879_v15 = vld [vmem:[#allocation2 + $0x2d0] sm:$0xf0] }
 0x91c   : > { %18128 = vmatmul.mubr.msk.bf16.gmra.mrb[84].mxu1 %vm172_vm1, %v11607_v4  ;;  %v11932_v4 = vrot.slane %v11868_v57, 4  ;;  %v11875_v57 = vld [vmem:[#allocation2 + $0x2a0] sm:$0xf0] }
 0x91d   : > { %18131 = vmatprep.mubr.msk.bf16.mxu1 %vm172_vm1, %v11610_v5 }
 0x91e   : > { %v11933_v5 = vsel %vm10037_vm7, %v11931_v60, %v11932_v4  ;;  %v11940_v60 = vrot.slane %v11873_v12, 4  ;;  %v11941_v4 = vrot.slane %v11874_v23, 4  ;;  %v11883_v12 = vld [vmem:[#allocation2 + $0x300] sm:$0xf0]  ;;  %v11884_v23 = vld [vmem:[#allocation2 + $0x308] sm:$0xf] }
 0x91f   : > { %18256 = vmatmul.mubr.msk.bf16.gmra.mrb[76].mxu0 %vm172_vm1, %v13006_v16  ;;  %v11880_v16 = vld [vmem:[#allocation2 + $0x2d8] sm:$0xf] }
 0x920   : > { %18259 = vmatprep.mubr.msk.bf16.mxu0 %vm172_vm1, %v13007_v32  ;;  %v11942_v42 = vsel %vm10037_vm7, %v11940_v60, %v11941_v4  ;;  %v11882_v32 = vld [vmem:[#allocation2 + $0x2f0] sm:$0xf]  ;;  %v13012_v60 = vld [vmem:[#allocation2 + $0x140] sm:$0xff]  ;;  %v11955_v4 = vrot.slane %v11883_v12, 4 }
 0x924   : > { %18132 = vmatmul.mubr.msk.bf16.gmra.mrb[88].mxu1 %vm172_vm1, %v11613_v0  ;;  %v11938_v0 = vrot.slane %v11872_v18, 4  ;;  %v11878_v18 = vld [vmem:[#allocation2 + $0x2c0] sm:$0xf] }
 0x925   : > { %18135 = vmatprep.mubr.msk.bf16.mxu1 %vm172_vm1, %v11616_v63  ;;  %v11936_v63 = vsel %vm10037_vm7, %v11934_v6, %v11935_v8  ;;  %v13009_v6 = vld [vmem:[#allocation2 + $0xf8] sm:$0xff]  ;;  %v13010_v8 = vld [vmem:[#allocation2 + $0x110] sm:$0xff] }
 0x926   : > { %v11939_v43 = vsel %vm10037_vm7, %v11937_v34, %v11938_v0  ;;  %v11946_v34 = vrot.slane %v11877_v3, 4  ;;  %v11947_v0 = vrot.slane %v11878_v18, 4  ;;  %v11885_v3 = vld [vmem:[#allocation2 + $0x318] sm:$0xf0]  ;;  %v11886_v18 = vld [vmem:[#allocation2 + $0x320] sm:$0xf] }
 0x927   : > { %18260 = vmatmul.mubr.msk.bf16.gmra.mrb[80].mxu0 %vm172_vm1, %v13008_v2  ;;  %v13011_v2 = vld [vmem:[#allocation2 + $0x128] sm:$0xff] }
 0x928   : > { %18263 = vmatprep.mubr.msk.bf16.mxu0 %vm172_vm1, %v13009_v6  ;;  %v11888_v6 = vld [vmem:[#allocation2 + $0x338] sm:$0xf] }
 0x92c   : > { %18136 = vmatmul.mubr.msk.bf16.gmra.mrb[92].mxu1 %vm172_vm1, %v11619_v14  ;;  %v11943_v14 = vrot.slane %v11875_v57, 4 }
 0x92d   : > { %18141 = vmatprep.mubr.msk.bf16.mxu1 %vm172_vm1, %v11933_v5  ;;  %v11944_v5 = vrot.slane %v11876_v59, 4  ;;  %v11881_v59 = vld [vmem:[#allocation2 + $0x2e8] sm:$0xf0] }
 0x92f   : > { %v11945_v1 = vsel %vm10037_vm7, %v11943_v14, %v11944_v5  ;;  %18264 = vmatmul.mubr.msk.bf16.gmra.mrb[84].mxu0 %vm172_vm1, %v13010_v8  ;;  %v11956_v14 = vrot.slane %v11884_v23, 4  ;;  %v11952_v5 = vrot.slane %v11881_v59, 4  ;;  %v13013_v8 = vld [vmem:[#allocation2 + $0x158] sm:$0xff]  ;;  %v11890_v59 = vld [vmem:[#allocation2 + $0x350] sm:$0xf] }
 0x930   : > { %18267 = vmatprep.mubr.msk.bf16.mxu0 %vm172_vm1, %v13011_v2  ;;  %v11892_v2 = vld [vmem:[#allocation2 + $0x368] sm:$0xf] }
 0x934   : > { %18142 = vmatmul.mubr.msk.bf16.vlgmr.msra.gmra.mrb[64].mxu1 %vm172_vm1, %v11936_v63  ;;  %v11950_v63 = vrot.slane %v11880_v16, 4  ;;  %v11887_v16 = vld [vmem:[#allocation2 + $0x330] sm:$0xf0] }
 0x935   : > { %18174 = vmatpush3.bf16.msra.mxu1 %v12292_v40  ;;  %18145 = vmatprep.mubr.msk.bf16.mxu1 %vm172_vm1, %v11939_v43  ;;  %v11949_v40 = vrot.slane %v11879_v15, 4  ;;  %v11948_v43 = vsel %vm10037_vm7, %v11946_v34, %v11947_v0  ;;  %v13014_v34 = vld [vmem:[#allocation2 + $0x170] sm:$0xff]  ;;  %v11958_v0 = vrot.slane %v11885_v3, 4 }
 0x936   : > { %19865 = vmatprep.subr.msk.bf16.mxu1 %vm628_vm0, %v22699_v35 }
 0x937   : > { %v11951_v57 = vsel %vm10037_vm7, %v11949_v40, %v11950_v63  ;;  %18268 = vmatmul.mubr.msk.bf16.gmra.mrb[88].mxu0 %vm172_vm1, %v13012_v60  ;;  %v11959_v40 = vrot.slane %v11886_v18, 4  ;;  %v11961_v63 = vrot.slane %v11887_v16, 4  ;;  %v12981_v60 = vld [vmem:[#allocation2] sm:$0xff]  ;;  %v11968_v18 = vrot.slane %v11892_v2, 4  ;;  %v11897_v2 = vld [vmem:[#allocation2 + $0x3a8] sm:$0xf0] }
 0x938   : > { %18271 = vmatprep.mubr.msk.bf16.mxu0 %vm172_vm1, %v13013_v8  ;;  %v11894_v8 = vld [vmem:[#allocation2 + $0x380] sm:$0xf] }
 0x939   : > { %v11960_v12 = vsel %vm10037_vm7, %v11958_v0, %v11959_v40  ;;  %v11896_v0 = vld [vmem:[#allocation2 + $0x398] sm:$0xf]  ;;  %v12983_v40 = vld [vmem:[#allocation2 + $0x30] sm:$0xff] }
 0x93c   : > { %18146 = vmatmul.mubr.msk.bf16.gmra.mrb[68].mxu1 %vm172_vm1, %v11942_v42  ;;  %v11953_v42 = vrot.slane %v11882_v32, 4  ;;  %v11891_v32 = vld [vmem:[#allocation2 + $0x360] sm:$0xf0] }
 0x93d   : > { %18149 = vmatprep.mubr.msk.bf16.mxu1 %vm172_vm1, %v11945_v1  ;;  %v11957_v1 = vsel %vm10037_vm7, %v11955_v4, %v11956_v14  ;;  %v16127_v4 = vld [vmem:[%s23262_s1 + $0x4c] sm:$0x3]  ;;  %v12982_v14 = vld [vmem:[#allocation2 + $0x18] sm:$0xff]  ;;  %v11967_v3 = vrot.slane %v11891_v32, 4 }
 0x93e   : > { %v11954_v15 = vsel %vm10037_vm7, %v11952_v5, %v11953_v42  ;;  %v11965_v42 = vrot.slane %v11890_v59, 4  ;;  %19868 = vmatprep.subr.msk.bf16.mxu0 %vm628_vm0, %v16127_v4 }
 0x93f   : > { %18272 = vmatmul.mubr.msk.bf16.gmra.mrb[92].mxu0 %vm172_vm1, %v13014_v34  ;;  %v11969_v16 = vsel %vm10037_vm7, %v11967_v3, %v11968_v18  ;;  %v11895_v34 = vld [vmem:[#allocation2 + $0x390] sm:$0xf0]  ;;  %v12988_v18 = vld [vmem:[#allocation2 + $0xa8] sm:$0xff] }
 0x940   : > { %18277 = vmatprep.mubr.msk.bf16.mxu0 %vm172_vm1, %v12981_v60  ;;  %v11898_v60 = vld [vmem:[#allocation2 + $0x3b0] sm:$0xf] }
 0x941   : > { %v12987_v3 = vld [vmem:[#allocation2 + $0x90] sm:$0xff] }
 0x944   : > { %18150 = vmatmul.mubr.msk.bf16.gmra.mrb[72].mxu1 %vm172_vm1, %v11948_v43  ;;  %v11962_v43 = vrot.slane %v11888_v6, 4  ;;  %v11893_v6 = vld [vmem:[#allocation2 + $0x378] sm:$0xf0] }
 0x945   : > { %18153 = vmatprep.mubr.msk.bf16.mxu1 %vm172_vm1, %v11951_v57  ;;  %v11889_v57 = vld [vmem:[#allocation2 + $0x348] sm:$0xf0] }
 0x946   : > { %v11963_v23 = vsel %vm10037_vm7, %v11961_v63, %v11962_v43  ;;  %v11964_v5 = vrot.slane %v11889_v57, 4  ;;  %v12984_v63 = vld [vmem:[#allocation2 + $0x48] sm:$0xff]  ;;  %v11970_v43 = vrot.slane %v11893_v6, 4  ;;  %v11974_v57 = vrot.slane %v11896_v0, 4  ;;  %v13441_v0 = vld [vmem:[#allocation2 + $0x10] sm:$0xff] }
 0x947   : > { %18278 = vmatmul.mubr.msk.bf16.vlgmr.msra.gmra.mrb[64].mxu0 %vm172_vm1, %v12982_v14  ;;  %v12986_v14 = vld [vmem:[#allocation2 + $0x78] sm:$0xff]  ;;  %v12650_v6 = vsel %vm628_vm0, %v22699_v35, 0  ;;  %v12993_v35 = vld [vmem:[#allocation2 + $0x120] sm:$0xff] }
 0x948   : > { %18281 = vmatprep.mubr.msk.bf16.mxu0 %vm172_vm1, %v12983_v40  ;;  %v12235_v40 = vld [vmem:[#allocation2 + $0x338] sm:$0xff] }
 0x94c   : > { %18154 = vmatmul.mubr.msk.bf16.gmra.mrb[76].mxu1 %vm172_vm1, %v11954_v15  ;;  %v11966_v15 = vsel %vm10037_vm7, %v11964_v5, %v11965_v42  ;;  %v11976_v5 = vrot.slane %v11897_v2, 4  ;;  %v11977_v42 = vrot.slane %v11898_v60, 4  ;;  %v12239_v2 = vld [vmem:[#allocation2 + $0x398] sm:$0xff]  ;;  %v13446_v60 = vld [vmem:[#allocation2 + $0x88] sm:$0xff] }
 0x94d   : > { %18157 = vmatprep.mubr.msk.bf16.mxu1 %vm172_vm1, %v11957_v1  ;;  %v13508_v1 = vsel %vm628_vm0, %v16127_v4, 0  ;;  %v12985_v4 = vld [vmem:[#allocation2 + $0x60] sm:$0xff] }
 0x94e   : > { %18310 = vmatpush3.bf16.msra.mxu0 %v13508_v1  ;;  %v11978_v1 = vsel %vm10037_vm7, %v11976_v5, %v11977_v42  ;;  %v13447_v5 = vld [vmem:[#allocation2 + $0xa0] sm:$0xff] }
 0x94f   : > { %18282 = vmatmul.mubr.msk.bf16.gmra.mrb[68].mxu0 %vm172_vm1, %v12984_v63 }
 0x950   : > { %18285 = vmatprep.mubr.msk.bf16.mxu0 %vm172_vm1, %v12985_v4  ;;  %v12487_v4 = vld [vmem:[#allocation2 + $0x248] sm:$0xf0] }
 0x951   : > { %v12551_v42 = vrot.slane %v12487_v4, 4  ;;  %v12497_v4 = vld [vmem:[#allocation2 + $0x2c0] sm:$0xf0] }
 0x954   : > { %18158 = vmatmul.mubr.msk.bf16.gmra.mrb[80].mxu1 %vm172_vm1, %v11960_v12  ;;  %v11971_v12 = vrot.slane %v11894_v8, 4  ;;  %v12991_v8 = vld [vmem:[#allocation2 + $0xf0] sm:$0xff] }
 0x955   : > { %18161 = vmatprep.mubr.msk.bf16.mxu1 %vm172_vm1, %v11963_v23  ;;  %v11973_v23 = vrot.slane %v11895_v34, 4  ;;  %v12992_v34 = vld [vmem:[#allocation2 + $0x108] sm:$0xff] }
 0x956   : > { %v11972_v59 = vsel %vm10037_vm7, %v11970_v43, %v11971_v12  ;;  %v13443_v43 = vld [vmem:[#allocation2 + $0x40] sm:$0xff]  ;;  %v12236_v12 = vld [vmem:[#allocation2 + $0x350] sm:$0xff] }
 0x957   : > { %v11975_v32 = vsel %vm10037_vm7, %v11973_v23, %v11974_v57  ;;  %18286 = vmatmul.mubr.msk.bf16.gmra.mrb[72].mxu0 %vm172_vm1, %v12986_v14  ;;  %v12237_v23 = vld [vmem:[#allocation2 + $0x368] sm:$0xff]  ;;  %v13444_v57 = vld [vmem:[#allocation2 + $0x58] sm:$0xff]  ;;  %v12488_v14 = vld [vmem:[#allocation2 + $0x250] sm:$0xf] }
 0x958   : > { %18289 = vmatprep.mubr.msk.bf16.mxu0 %vm172_vm1, %v12987_v3  ;;  %v12240_v3 = vld [vmem:[#allocation2 + $0x3b0] sm:$0xff] }
 0x95c   : > { %18162 = vmatmul.mubr.msk.bf16.gmra.mrb[84].mxu1 %vm172_vm1, %v11966_v15  ;;  %v12989_v15 = vld [vmem:[#allocation2 + $0xc0] sm:$0xff] }
 0x95d   : > { %18165 = vmatprep.mubr.msk.bf16.mxu1 %vm172_vm1, %v11969_v16  ;;  %v16144_v16 = vld [vmem:[%s23262_s1 + $0x4e] sm:$0x3] }
 0x95e   : > { %19869 = vmatprep.subr.msk.bf16.mxu0 %vm628_vm0, %v16144_v16  ;;  %v13770_v63 = vsel %vm628_vm0, %v16144_v16, 0  ;;  %v12490_v16 = vld [vmem:[#allocation2 + $0x268] sm:$0xf] }
 0x95f   : > { %18290 = vmatmul.mubr.msk.bf16.gmra.mrb[76].mxu0 %vm172_vm1, %v12988_v18 }
 0x960   : > { %18293 = vmatprep.mubr.msk.bf16.mxu0 %vm172_vm1, %v12989_v15  ;;  %v12489_v15 = vld [vmem:[#allocation2 + $0x260] sm:$0xf0] }
 0x964   : > { %18166 = vmatmul.mubr.msk.bf16.gmra.mrb[88].mxu1 %vm172_vm1, %v11972_v59  ;;  %v13445_v59 = vld [vmem:[#allocation2 + $0x70] sm:$0xff] }
 0x965   : > { %18169 = vmatprep.mubr.msk.bf16.mxu1 %vm172_vm1, %v11975_v32  ;;  %v12238_v32 = vld [vmem:[#allocation2 + $0x380] sm:$0xff] }
 0x96c   : > { %18170 = vmatmul.mubr.msk.bf16.gmra.mrb[92].mxu1 %vm172_vm1, %v11978_v1  ;;  %v12552_v1 = vrot.slane %v12488_v14, 4  ;;  %v12498_v14 = vld [vmem:[#allocation2 + $0x2c8] sm:$0xf] }
 0x96d   : > { %18175 = vmatprep.mubr.msk.bf16.mxu1 %vm172_vm1, %v22601_v38  ;;  %v12990_v38 = vld [vmem:[#allocation2 + $0xd8] sm:$0xff] }
 0x96e   : > { %18294 = vmatmul.mubr.msk.bf16.gmra.mrb[80].mxu0 %vm172_vm1, %v12990_v38  ;;  %v12553_v18 = vsel %vm10037_vm7, %v12551_v42, %v12552_v1  ;;  %v12491_v38 = vld [vmem:[#allocation2 + $0x278] sm:$0xf0]  ;;  %v12500_v1 = vld [vmem:[#allocation2 + $0x2e0] sm:$0xf] }
 0x96f   : > { %18297 = vmatprep.mubr.msk.bf16.mxu0 %vm172_vm1, %v12991_v8  ;;  %v12492_v8 = vld [vmem:[#allocation2 + $0x280] sm:$0xf]  ;;  %v12499_v42 = vld [vmem:[#allocation2 + $0x2d8] sm:$0xf0] }
 0x974   : > { %18176 = vmatmul.mubr.msk.bf16.vlgmr.msra.gmra.mrb[64].mxu1 %vm172_vm1, %v22605_v51  ;;  %v12994_v51 = vld [vmem:[#allocation2 + $0x138] sm:$0xff] }
 0x975   : > { %18208 = vmatpush3.bf16.msra.mxu1 %v12650_v6  ;;  %18179 = vmatprep.mubr.msk.bf16.mxu1 %vm172_vm1, %v22609_v48  ;;  %v12995_v48 = vld [vmem:[#allocation2 + $0x150] sm:$0xff]  ;;  %v13448_v6 = vld [vmem:[#allocation2 + $0xb8] sm:$0xff] }
 0x976   : > { %18298 = vmatmul.mubr.msk.bf16.gmra.mrb[84].mxu0 %vm172_vm1, %v12992_v34  ;;  %v13449_v34 = vld [vmem:[#allocation2 + $0xd0] sm:$0xff] }
 0x977   : > { %18301 = vmatprep.mubr.msk.bf16.mxu0 %vm172_vm1, %v12993_v35  ;;  %v12554_v35 = vrot.slane %v12489_v15, 4  ;;  %v12567_v15 = vrot.slane %v12498_v14, 4 }
 0x97c   : > { %18180 = vmatmul.mubr.msk.bf16.gmra.mrb[68].mxu1 %vm172_vm1, %v22618_v27  ;;  %v12233_v27 = vld [vmem:[#allocation2 + $0x308] sm:$0xff] }
 0x97d   : > { %18183 = vmatprep.mubr.msk.bf16.mxu1 %vm172_vm1, %v22622_v41  ;;  %v12996_v41 = vld [vmem:[#allocation2 + $0x168] sm:$0xff] }
 0x97e   : > { %18302 = vmatmul.mubr.msk.bf16.gmra.mrb[88].mxu0 %vm172_vm1, %v12994_v51  ;;  %v12555_v51 = vrot.slane %v12490_v16, 4  ;;  %v12569_v16 = vrot.slane %v12499_v42, 4 }
 0x97f   : > { %18305 = vmatprep.mubr.msk.bf16.mxu0 %vm172_vm1, %v12995_v48  ;;  %v12557_v48 = vrot.slane %v12491_v38, 4 }
 0x984   : > { %18184 = vmatmul.mubr.msk.bf16.gmra.mrb[72].mxu1 %vm172_vm1, %v22626_v25  ;;  %v12234_v25 = vld [vmem:[#allocation2 + $0x320] sm:$0xff] }
 0x985   : > { %18187 = vmatprep.mubr.msk.bf16.mxu1 %vm172_vm1, %v22630_v54  ;;  %v13442_v54 = vld [vmem:[#allocation2 + $0x28] sm:$0xff] }
 0x986   : > { %18306 = vmatmul.mubr.msk.bf16.gmra.mrb[92].mxu0 %vm172_vm1, %v12996_v41  ;;  %v12556_v41 = vsel %vm10037_vm7, %v12554_v35, %v12555_v51  ;;  %v12501_v51 = vld [vmem:[#allocation2 + $0x2f0] sm:$0xf0] }
 0x987   : > { %18311 = vmatprep.mubr.msk.bf16.mxu0 %vm172_vm1, %v13441_v0 }
 0x98c   : > { %18188 = vmatmul.mubr.msk.bf16.gmra.mrb[76].mxu1 %vm172_vm1, %v22634_v20  ;;  %v22791_v20 = vld [vmem:[%s23262_s1 + $0x50] sm:$0x3] }
 0x98d   : > { %18191 = vmatprep.mubr.msk.bf16.mxu1 %vm172_vm1, %v12233_v27  ;;  %v12558_v27 = vrot.slane %v12492_v8, 4  ;;  %v12503_v8 = vld [vmem:[#allocation2 + $0x308] sm:$0xf0] }
 0x98e   : > { %18312 = vmatmul.mubr.msk.bf16.vlgmr.msra.gmra.mrb[64].mxu0 %vm172_vm1, %v13442_v54  ;;  %v13450_v54 = vld [vmem:[#allocation2 + $0xe8] sm:$0xff] }
 0x98f   : > { %18344 = vmatpush3.bf16.msra.mxu0 %v13770_v63  ;;  %18315 = vmatprep.mubr.msk.bf16.mxu0 %vm172_vm1, %v13443_v43  ;;  %v12559_v0 = vsel %vm10037_vm7, %v12557_v48, %v12558_v27  ;;  %v12495_v63 = vld [vmem:[#allocation2 + $0x2a8] sm:$0xf0]  ;;  %v12496_v43 = vld [vmem:[#allocation2 + $0x2b0] sm:$0xf]  ;;  %v12502_v48 = vld [vmem:[#allocation2 + $0x2f8] sm:$0xf] }
 0x990   : > { %19870 = vmatprep.subr.msk.bf16.mxu0 %vm628_vm0, %v22791_v20  ;;  %v13454_v27 = vld [vmem:[#allocation2 + $0x148] sm:$0xff] }
 0x994   : > { %18192 = vmatmul.mubr.msk.bf16.gmra.mrb[80].mxu1 %vm172_vm1, %v12234_v25  ;;  %v12493_v25 = vld [vmem:[#allocation2 + $0x290] sm:$0xf0] }
 0x995   : > { %18195 = vmatprep.mubr.msk.bf16.mxu1 %vm172_vm1, %v12235_v40  ;;  %v12494_v40 = vld [vmem:[#allocation2 + $0x298] sm:$0xf] }
 0x996   : > { %18316 = vmatmul.mubr.msk.bf16.gmra.mrb[68].mxu0 %vm172_vm1, %v13444_v57  ;;  %v12561_v57 = vrot.slane %v12494_v40, 4  ;;  %v12572_v40 = vrot.slane %v12501_v51, 4 }
 0x997   : > { %18319 = vmatprep.mubr.msk.bf16.mxu0 %vm172_vm1, %v13445_v59  ;;  %v12563_v59 = vrot.slane %v12495_v63, 4 }
 0x99c   : > { %18196 = vmatmul.mubr.msk.bf16.gmra.mrb[84].mxu1 %vm172_vm1, %v12236_v12  ;;  %v13451_v12 = vld [vmem:[#allocation2 + $0x100] sm:$0xff] }
 0x99d   : > { %18199 = vmatprep.mubr.msk.bf16.mxu1 %vm172_vm1, %v12237_v23  ;;  %v12560_v23 = vrot.slane %v12493_v25, 4 }
 0x99e   : > { %18320 = vmatmul.mubr.msk.bf16.gmra.mrb[72].mxu0 %vm172_vm1, %v13446_v60 }
 0x99f   : > { %18323 = vmatprep.mubr.msk.bf16.mxu0 %vm172_vm1, %v13447_v5  ;;  %v13452_v5 = vld [vmem:[#allocation2 + $0x118] sm:$0xff] }
 0x9a4   : > { %18200 = vmatmul.mubr.msk.bf16.gmra.mrb[88].mxu1 %vm172_vm1, %v12238_v32  ;;  %v12564_v32 = vrot.slane %v12496_v43, 4  ;;  %v12505_v43 = vld [vmem:[#allocation2 + $0x320] sm:$0xf0] }
 0x9a5   : > { %18203 = vmatprep.mubr.msk.bf16.mxu1 %vm172_vm1, %v12239_v2  ;;  %v12562_v2 = vsel %vm10037_vm7, %v12560_v23, %v12561_v57  ;;  %v12507_v57 = vld [vmem:[#allocation2 + $0x338] sm:$0xf0] }
 0x9a6   : > { %18324 = vmatmul.mubr.msk.bf16.gmra.mrb[76].mxu0 %vm172_vm1, %v13448_v6  ;;  %v12565_v60 = vsel %vm10037_vm7, %v12563_v59, %v12564_v32  ;;  %v12570_v6 = vrot.slane %v12500_v1, 4  ;;  %v12508_v59 = vld [vmem:[#allocation2 + $0x340] sm:$0xf]  ;;  %v13456_v32 = vld [vmem:[#allocation2 + $0x178] sm:$0xff]  ;;  %v12581_v14 = vrot.slane %v12507_v57, 4 }
 0x9a7   : > { %18327 = vmatprep.mubr.msk.bf16.mxu0 %vm172_vm1, %v13449_v34  ;;  %v12504_v34 = vld [vmem:[#allocation2 + $0x310] sm:$0xf] }
 0x9a8   : > { %v12571_v35 = vsel %vm10037_vm7, %v12569_v16, %v12570_v6  ;;  %v12576_v25 = vrot.slane %v12504_v34, 4  ;;  %v12512_v16 = vld [vmem:[#allocation2 + $0x370] sm:$0xf]  ;;  %v13704_v6 = vld [vmem:[#allocation2 + $0x198] sm:$0xff]  ;;  %v14032_v34 = vsel %vm628_vm0, %v22791_v20, 0 }
 0x9ac   : > { %18204 = vmatmul.mubr.msk.bf16.gmra.mrb[92].mxu1 %vm172_vm1, %v12240_v3  ;;  %v13453_v3 = vld [vmem:[#allocation2 + $0x130] sm:$0xff] }
 0x9ad   : > { %18209 = vmatprep.mubr.msk.bf16.mxu1 %vm172_vm1, %v12553_v18  ;;  %v12566_v18 = vrot.slane %v12497_v4, 4  ;;  %v13703_v4 = vld [vmem:[#allocation2 + $0x180] sm:$0xff] }
 0x9ae   : > { %18328 = vmatmul.mubr.msk.bf16.gmra.mrb[80].mxu0 %vm172_vm1, %v13450_v54  ;;  %v12573_v54 = vrot.slane %v12502_v48, 4  ;;  %v12588_v48 = vrot.slane %v12512_v16, 4  ;;  %v13713_v16 = vld [vmem:[#allocation2 + $0x270] sm:$0xff] }
 0x9af   : > { %18331 = vmatprep.mubr.msk.bf16.mxu0 %vm172_vm1, %v13451_v12  ;;  %v12568_v38 = vsel %vm10037_vm7, %v12566_v18, %v12567_v15  ;;  %v12506_v12 = vld [vmem:[#allocation2 + $0x328] sm:$0xf]  ;;  %v12510_v18 = vld [vmem:[#allocation2 + $0x358] sm:$0xf]  ;;  %v12511_v15 = vld [vmem:[#allocation2 + $0x368] sm:$0xf0] }
 0x9b0   : > { %v12574_v23 = vsel %vm10037_vm7, %v12572_v40, %v12573_v54  ;;  %v12587_v51 = vrot.slane %v12511_v15, 4  ;;  %v12515_v40 = vld [vmem:[#allocation2 + $0x398] sm:$0xf0]  ;;  %v12516_v54 = vld [vmem:[#allocation2 + $0x3a0] sm:$0xf] }
 0x9b1   : > { %v12594_v57 = vrot.slane %v12516_v54, 4  ;;  %v13712_v15 = vld [vmem:[#allocation2 + $0x258] sm:$0xff] }
 0x9b4   : > { %18210 = vmatmul.mubr.msk.bf16.vlgmr.msra.gmra.mrb[64].mxu1 %vm172_vm1, %v12556_v41  ;;  %v13455_v41 = vld [vmem:[#allocation2 + $0x160] sm:$0xff] }
 0x9b5   : > { %18213 = vmatprep.mubr.msk.bf16.mxu1 %vm172_vm1, %v12559_v0  ;;  %v12575_v0 = vrot.slane %v12503_v8, 4  ;;  %v12585_v8 = vrot.slane %v12510_v18, 4  ;;  %v13711_v18 = vld [vmem:[#allocation2 + $0x240] sm:$0xff] }
 0x9b6   : > { %18332 = vmatmul.mubr.msk.bf16.gmra.mrb[84].mxu0 %vm172_vm1, %v13452_v5  ;;  %v12582_v5 = vrot.slane %v12508_v59, 4 }
 0x9b7   : > { %18335 = vmatprep.mubr.msk.bf16.mxu0 %vm172_vm1, %v13453_v3  ;;  %v12577_v63 = vsel %vm10037_vm7, %v12575_v0, %v12576_v25  ;;  %v12509_v3 = vld [vmem:[#allocation2 + $0x350] sm:$0xf0]  ;;  %v12513_v0 = vld [vmem:[#allocation2 + $0x380] sm:$0xf0]  ;;  %v12514_v25 = vld [vmem:[#allocation2 + $0x388] sm:$0xf] }
 0x9b8   : > { %v12583_v1 = vsel %vm10037_vm7, %v12581_v14, %v12582_v5  ;;  %v12590_v20 = vrot.slane %v12513_v0, 4 }
 0x9bc   : > { %18214 = vmatmul.mubr.msk.bf16.gmra.mrb[68].mxu1 %vm172_vm1, %v12562_v2  ;;  %v12578_v2 = vrot.slane %v12505_v43, 4  ;;  %v12591_v43 = vrot.slane %v12514_v25, 4 }
 0x9bd   : > { %18217 = vmatprep.mubr.msk.bf16.mxu1 %vm172_vm1, %v12565_v60  ;;  %v12579_v60 = vrot.slane %v12506_v12, 4  ;;  %v13707_v12 = vld [vmem:[#allocation2 + $0x1e0] sm:$0xff] }
 0x9be   : > { %18336 = vmatmul.mubr.msk.bf16.gmra.mrb[88].mxu0 %vm172_vm1, %v13454_v27  ;;  %v12592_v59 = vsel %vm10037_vm7, %v12590_v20, %v12591_v43 }
 0x9bf   : > { %18339 = vmatprep.mubr.msk.bf16.mxu0 %vm172_vm1, %v13455_v41  ;;  %v12580_v42 = vsel %vm10037_vm7, %v12578_v2, %v12579_v60  ;;  %v12589_v41 = vsel %vm10037_vm7, %v12587_v51, %v12588_v48  ;;  %v12517_v2 = vld [vmem:[#allocation2 + $0x3b0] sm:$0xf0]  ;;  %v12518_v60 = vld [vmem:[#allocation2 + $0x3b8] sm:$0xf]  ;;  %v16178_v51 = vld [vmem:[%s23262_s1 + $0x52] sm:$0x3] }
 0x9c0   : > { %v12596_v14 = vrot.slane %v12517_v2, 4  ;;  %v12597_v5 = vrot.slane %v12518_v60, 4  ;;  %v22872_v48 = vld [vmem:[%s23263_s2 + $0x3] ss:$0 sm:$0xff] }
 0x9c4   : > { %18218 = vmatmul.mubr.msk.bf16.gmra.mrb[72].mxu1 %vm172_vm1, %v12568_v38  ;;  %v12584_v38 = vrot.slane %v12509_v3, 4  ;;  %v13710_v3 = vld [vmem:[#allocation2 + $0x228] sm:$0xff] }
 0x9c5   : > { %18221 = vmatprep.mubr.msk.bf16.mxu1 %vm172_vm1, %v12571_v35  ;;  %v13705_v35 = vld [vmem:[#allocation2 + $0x1b0] sm:$0xff] }
 0x9c6   : > { %18340 = vmatmul.mubr.msk.bf16.gmra.mrb[92].mxu0 %vm172_vm1, %v13456_v32  ;;  %v12586_v27 = vsel %vm10037_vm7, %v12584_v38, %v12585_v8  ;;  %v13715_v38 = vld [vmem:[#allocation2 + $0x2a0] sm:$0xff]  ;;  %v13716_v8 = vld [vmem:[#allocation2 + $0x2b8] sm:$0xff] }
 0x9c7   : > { %18345 = vmatprep.mubr.msk.bf16.mxu0 %vm172_vm1, %v13703_v4  ;;  %v13708_v4 = vld [vmem:[#allocation2 + $0x1f8] sm:$0xff] }
 0x9cc   : > { %18222 = vmatmul.mubr.msk.bf16.gmra.mrb[76].mxu1 %vm172_vm1, %v12574_v23  ;;  %v12593_v23 = vrot.slane %v12515_v40, 4 }
 0x9cd   : > { %18225 = vmatprep.mubr.msk.bf16.mxu1 %vm172_vm1, %v12577_v63  ;;  %v13706_v63 = vld [vmem:[#allocation2 + $0x1c8] sm:$0xff] }
 0x9ce   : > { %18346 = vmatmul.mubr.msk.bf16.vlgmr.msra.gmra.mrb[64].mxu0 %vm172_vm1, %v13704_v6  ;;  %v12595_v32 = vsel %vm10037_vm7, %v12593_v23, %v12594_v57  ;;  %v13714_v6 = vld [vmem:[#allocation2 + $0x288] sm:$0xff] }
 0x9cf   : > { %18378 = vmatpush3.bf16.msra.mxu0 %v14032_v34  ;;  %18349 = vmatprep.mubr.msk.bf16.mxu0 %vm172_vm1, %v13705_v35  ;;  %v13717_v34 = vld [vmem:[#allocation2 + $0x2d0] sm:$0xff]  ;;  %v13718_v35 = vld [vmem:[#allocation2 + $0x2e8] sm:$0xff] }
 0x9d0   : > { %19871 = vmatprep.subr.msk.bf16.mxu0 %vm628_vm0, %v16178_v51 }
 0x9d4   : > { %18226 = vmatmul.mubr.msk.bf16.gmra.mrb[80].mxu1 %vm172_vm1, %v12580_v42  ;;  %v13709_v42 = vld [vmem:[#allocation2 + $0x210] sm:$0xff] }
 0x9d5   : > { %18229 = vmatprep.mubr.msk.bf16.mxu1 %vm172_vm1, %v12583_v1  ;;  %v12598_v1 = vsel %vm10037_vm7, %v12596_v14, %v12597_v5 }
 0x9d6   : > { %18350 = vmatmul.mubr.msk.bf16.gmra.mrb[68].mxu0 %vm172_vm1, %v13706_v63 }
 0x9d7   : > { %18353 = vmatprep.mubr.msk.bf16.mxu0 %vm172_vm1, %v13707_v12 }
 0x9dc   : > { %18230 = vmatmul.mubr.msk.bf16.gmra.mrb[84].mxu1 %vm172_vm1, %v12586_v27 }
 0x9dd   : > { %18233 = vmatprep.mubr.msk.bf16.mxu1 %vm172_vm1, %v12589_v41 }
 0x9de   : > { %18354 = vmatmul.mubr.msk.bf16.gmra.mrb[72].mxu0 %vm172_vm1, %v13708_v4 }
 0x9df   : > { %18357 = vmatprep.mubr.msk.bf16.mxu0 %vm172_vm1, %v13709_v42 }
 0x9e4   : > { %18234 = vmatmul.mubr.msk.bf16.gmra.mrb[88].mxu1 %vm172_vm1, %v12592_v59 }
 0x9e5   : > { %18237 = vmatprep.mubr.msk.bf16.mxu1 %vm172_vm1, %v12595_v32 }
 0x9e6   : > { %18358 = vmatmul.mubr.msk.bf16.gmra.mrb[76].mxu0 %vm172_vm1, %v13710_v3 }
 0x9e7   : > { %18361 = vmatprep.mubr.msk.bf16.mxu0 %vm172_vm1, %v13711_v18 }
 0x9ec   : > { %18238 = vmatmul.mubr.msk.bf16.gmra.mrb[92].mxu1 %vm172_vm1, %v12598_v1 }
 0x9ee   : > { %18362 = vmatmul.mubr.msk.bf16.gmra.mrb[80].mxu0 %vm172_vm1, %v13712_v15 }
 0x9ef   : > { %18365 = vmatprep.mubr.msk.bf16.mxu0 %vm172_vm1, %v13713_v16 }
 0x9f6   : > { %18366 = vmatmul.mubr.msk.bf16.gmra.mrb[84].mxu0 %vm172_vm1, %v13714_v6 }
 0x9f7   : > { %18369 = vmatprep.mubr.msk.bf16.mxu0 %vm172_vm1, %v13715_v38 }
 0x9fe   : > { %18370 = vmatmul.mubr.msk.bf16.gmra.mrb[88].mxu0 %vm172_vm1, %v13716_v8 }
 0x9ff   : > { %18373 = vmatprep.mubr.msk.bf16.mxu0 %vm172_vm1, %v13717_v34 }
 0xa06   : > { %18374 = vmatmul.mubr.msk.bf16.gmra.mrb[92].mxu0 %vm172_vm1, %v13718_v35 }
 0xa87   : > { %v18211_v27 = vpop.f32.mrb[64].mxu1 }
 0xa88   : > { %v12855_v41 = vadd.f32 %v18211_v27, %v22872_v48  ;;  %v12686_v0 = vpop.f32.mrb[65].mxu1 }
 0xa89   : > { %v12853_v25 = vadd.f32 %v22872_v48, %v12686_v0  ;;  %v18212_v40 = vpop.f32.mrb[66].mxu1 }
 0xa8a   : > { %v12887_v54 = vmax.f32 %v12855_v41, 0.0  ;;  %v12856_v63 = vadd.f32 %v18212_v40, %v22872_v48  ;;  %v12689_v20 = vpop.f32.mrb[67].mxu1 }
 0xa8b   : > { %v12885_v43 = vmax.f32 %v12853_v25, 0.0  ;;  %v12854_v12 = vadd.f32 %v22872_v48, %v12689_v20 }
 0xa8c   : > { %v22879_v23 = vadd.f32 %v12887_v54, %v22285_v19  ;;  %v12888_v57 = vmax.f32 %v12856_v63, 0.0 }
 0xa8d   : > { %v22882_v59 = vadd.f32 %v12885_v43, %v22288_v21  ;;  %v12886_v32 = vmax.f32 %v12854_v12, 0.0 }
 0xa8e   : > { %v22885_v2 = vadd.f32 %v12888_v57, %v22291_v56  ;;  %v12950_v60 = vpack.c.bf16 %v12888_v57, %v12887_v54  ;;  %v14294_v54 = vsel %vm628_vm0, %v16178_v51, 0 }
 0xa8f   : > { %v22888_v4 = vadd.f32 %v12886_v32, %v22294_v13  ;;  %v12949_v14 = vpack.c.bf16 %v12886_v32, %v12885_v43  ;;  %v18215_v5 = vpop.f32.mrb[68].mxu1 }
 0xa90   : > { %12966 = vst.msk [vmem:[#allocation2 + $0x1a0] sm:$0xff] %vm172_vm1, %v12950_v60  ;;  %v12859_v42 = vadd.f32 %v18215_v5, %v22872_v48  ;;  %v12702_v19 = vpop.f32.mrb[69].mxu1 }
 0xa91   : > { %12965 = vst.msk [vmem:[#allocation2 + $0x188] sm:$0xff] %vm172_vm1, %v12949_v14  ;;  %v12857_v21 = vadd.f32 %v22872_v48, %v12702_v19  ;;  %v18216_v1 = vpop.f32.mrb[70].mxu1 }
 0xa92   : > { %v12891_v3 = vmax.f32 %v12859_v42, 0.0  ;;  %v12860_v56 = vadd.f32 %v18216_v1, %v22872_v48  ;;  %v12705_v18 = vpop.f32.mrb[71].mxu1 }
 0xa93   : > { %v12889_v15 = vmax.f32 %v12857_v21, 0.0  ;;  %v12858_v13 = vadd.f32 %v22872_v48, %v12705_v18 }
 0xa94   : > { %v22897_v16 = vadd.f32 %v12891_v3, %v22303_v62  ;;  %v12892_v6 = vmax.f32 %v12860_v56, 0.0 }
 0xa95   : > { %v22900_v38 = vadd.f32 %v12889_v15, %v22306_v61  ;;  %v12890_v8 = vmax.f32 %v12858_v13, 0.0 }
 0xa96   : > { %v22903_v34 = vadd.f32 %v12892_v6, %v22309_v10  ;;  %v12952_v35 = vpack.c.bf16 %v12892_v6, %v12891_v3 }
 0xa97   : > { %v22906_v27 = vadd.f32 %v12890_v8, %v22312_v55  ;;  %v12951_v41 = vpack.c.bf16 %v12890_v8, %v12889_v15  ;;  %v18219_v0 = vpop.f32.mrb[72].mxu1  ;;  %v13966_v63 = vld [vmem:[#allocation2 + $0x1a0] sm:$0xff]  ;;  %v22917_v55 = vld [vmem:[%s23262_s1 + $0x54] sm:$0x3] }
 0xa98   : > { %12968 = vst.msk [vmem:[#allocation2 + $0x1d0] sm:$0xff] %vm172_vm1, %v12952_v35  ;;  %v12863_v25 = vadd.f32 %v18219_v0, %v22872_v48  ;;  %v12718_v62 = vpop.f32.mrb[73].mxu1  ;;  %v13965_v40 = vld [vmem:[#allocation2 + $0x188] sm:$0xff] }
 0xa99   : > { %12967 = vst.msk [vmem:[#allocation2 + $0x1b8] sm:$0xff] %vm172_vm1, %v12951_v41  ;;  %v12861_v61 = vadd.f32 %v22872_v48, %v12718_v62  ;;  %v18220_v10 = vpop.f32.mrb[74].mxu1  ;;  %18379 = vmatprep.mubr.msk.bf16.mxu0 %vm172_vm1, %v13965_v40 }
 0xa9a   : > { %v12895_v20 = vmax.f32 %v12863_v25, 0.0  ;;  %v12864_v43 = vadd.f32 %v18220_v10, %v22872_v48  ;;  %v12721_v12 = vpop.f32.mrb[75].mxu1  ;;  %18380 = vmatmul.mubr.msk.bf16.vlgmr.msra.gmra.mrb[64].mxu0 %vm172_vm1, %v13966_v63 }
 0xa9b   : > { %v12893_v51 = vmax.f32 %v12861_v61, 0.0  ;;  %v12862_v57 = vadd.f32 %v22872_v48, %v12721_v12  ;;  %18412 = vmatpush3.bf16.msra.mxu0 %v14294_v54 }
 0xa9c   : > { %v22923_v32 = vadd.f32 %v12895_v20, %v22329_v37  ;;  %v12896_v60 = vmax.f32 %v12864_v43, 0.0  ;;  %19872 = vmatprep.subr.msk.bf16.mxu0 %vm628_vm0, %v22917_v55 }
 0xa9d   : > { %v22928_v14 = vadd.f32 %v12893_v51, %v22332_v45  ;;  %v12894_v5 = vmax.f32 %v12862_v57, 0.0 }
 0xa9e   : > { %v22931_v42 = vadd.f32 %v12896_v60, %v22335_v22  ;;  %v12954_v19 = vpack.c.bf16 %v12896_v60, %v12895_v20 }
 0xa9f   : > { %v22934_v21 = vadd.f32 %v12894_v5, %v22338_v49  ;;  %v12953_v1 = vpack.c.bf16 %v12894_v5, %v12893_v51  ;;  %v18223_v3 = vpop.f32.mrb[76].mxu1  ;;  %v13968_v22 = vld [vmem:[#allocation2 + $0x1d0] sm:$0xff] }
 0xaa0   : > { %12970 = vst.msk [vmem:[#allocation2 + $0x200] sm:$0xff] %vm172_vm1, %v12954_v19  ;;  %v12867_v37 = vadd.f32 %v18223_v3, %v22872_v48  ;;  %v12734_v56 = vpop.f32.mrb[77].mxu1  ;;  %v13967_v18 = vld [vmem:[#allocation2 + $0x1b8] sm:$0xff] }
 0xaa1   : > { %12969 = vst.msk [vmem:[#allocation2 + $0x1e8] sm:$0xff] %vm172_vm1, %v12953_v1  ;;  %v12865_v45 = vadd.f32 %v22872_v48, %v12734_v56  ;;  %v18224_v15 = vpop.f32.mrb[78].mxu1  ;;  %18383 = vmatprep.mubr.msk.bf16.mxu0 %vm172_vm1, %v13967_v18 }
 0xaa2   : > { %v12899_v13 = vmax.f32 %v12867_v37, 0.0  ;;  %v12868_v49 = vadd.f32 %v18224_v15, %v22872_v48  ;;  %v12737_v6 = vpop.f32.mrb[79].mxu1  ;;  %18384 = vmatmul.mubr.msk.bf16.gmra.mrb[68].mxu0 %vm172_vm1, %v13968_v22 }
 0xaa3   : > { %v12897_v8 = vmax.f32 %v12865_v45, 0.0  ;;  %v12866_v35 = vadd.f32 %v22872_v48, %v12737_v6 }
 0xaa4   : > { %v22945_v41 = vadd.f32 %v12899_v13, %v22355_v52  ;;  %v12900_v0 = vmax.f32 %v12868_v49, 0.0 }
 0xaa5   : > { %v22948_v25 = vadd.f32 %v12897_v8, %v22358_v33  ;;  %v12898_v62 = vmax.f32 %v12866_v35, 0.0 }
 0xaa6   : > { %v22951_v40 = vadd.f32 %v12900_v0, %v22361_v24  ;;  %v12956_v54 = vpack.c.bf16 %v12900_v0, %v12899_v13 }
 0xaa7   : > { %v22954_v61 = vadd.f32 %v12898_v62, %v22364_v46  ;;  %v12955_v10 = vpack.c.bf16 %v12898_v62, %v12897_v8  ;;  %v18227_v63 = vpop.f32.mrb[80].mxu1  ;;  %v13970_v24 = vld [vmem:[#allocation2 + $0x200] sm:$0xff] }
 0xaa8   : > { %12972 = vst.msk [vmem:[#allocation2 + $0x230] sm:$0xff] %vm172_vm1, %v12956_v54  ;;  %v12871_v20 = vadd.f32 %v18227_v63, %v22872_v48  ;;  %v12750_v52 = vpop.f32.mrb[81].mxu1  ;;  %v13969_v43 = vld [vmem:[#allocation2 + $0x1e8] sm:$0xff] }
 0xaa9   : > { %12971 = vst.msk [vmem:[#allocation2 + $0x218] sm:$0xff] %vm172_vm1, %v12955_v10  ;;  %v12869_v33 = vadd.f32 %v22872_v48, %v12750_v52  ;;  %v18228_v12 = vpop.f32.mrb[82].mxu1  ;;  %18387 = vmatprep.mubr.msk.bf16.mxu0 %vm172_vm1, %v13969_v43 }
 0xaaa   : > { %v12903_v51 = vmax.f32 %v12871_v20, 0.0  ;;  %v12872_v46 = vadd.f32 %v18228_v12, %v22872_v48  ;;  %v12753_v57 = vpop.f32.mrb[83].mxu1  ;;  %18388 = vmatmul.mubr.msk.bf16.gmra.mrb[72].mxu0 %vm172_vm1, %v13970_v24 }
 0xaab   : > { %v12901_v60 = vmax.f32 %v12869_v33, 0.0  ;;  %v12870_v5 = vadd.f32 %v22872_v48, %v12753_v57 }
 0xaac   : > { %v22965_v19 = vadd.f32 %v12903_v51, %v22381_v26  ;;  %v12904_v1 = vmax.f32 %v12872_v46, 0.0 }
 0xaad   : > { %v22968_v3 = vadd.f32 %v12901_v60, %v22384_v28  ;;  %v12902_v37 = vmax.f32 %v12870_v5, 0.0 }
 0xaae   : > { %v22971_v56 = vadd.f32 %v12904_v1, %v22387_v30  ;;  %v12958_v18 = vpack.c.bf16 %v12904_v1, %v12903_v51 }
 0xaaf   : > { %v22974_v45 = vadd.f32 %v12902_v37, %v22390_v50  ;;  %v12957_v15 = vpack.c.bf16 %v12902_v37, %v12901_v60  ;;  %v18231_v22 = vpop.f32.mrb[84].mxu1  ;;  %v13972_v30 = vld [vmem:[#allocation2 + $0x230] sm:$0xff] }
 0xab0   : > { %12974 = vst.msk [vmem:[#allocation2 + $0x260] sm:$0xff] %vm172_vm1, %v12958_v18  ;;  %v12875_v13 = vadd.f32 %v18231_v22, %v22872_v48  ;;  %v12766_v26 = vpop.f32.mrb[85].mxu1  ;;  %v13971_v49 = vld [vmem:[#allocation2 + $0x218] sm:$0xff] }
 0xab1   : > { %12973 = vst.msk [vmem:[#allocation2 + $0x248] sm:$0xff] %vm172_vm1, %v12957_v15  ;;  %v12873_v28 = vadd.f32 %v22872_v48, %v12766_v26  ;;  %v18232_v6 = vpop.f32.mrb[86].mxu1  ;;  %18391 = vmatprep.mubr.msk.bf16.mxu0 %vm172_vm1, %v13971_v49 }
 0xab2   : > { %v12907_v8 = vmax.f32 %v12875_v13, 0.0  ;;  %v12876_v50 = vadd.f32 %v18232_v6, %v22872_v48  ;;  %v12769_v35 = vpop.f32.mrb[87].mxu1  ;;  %18392 = vmatmul.mubr.msk.bf16.gmra.mrb[76].mxu0 %vm172_vm1, %v13972_v30 }
 0xab3   : > { %v12905_v0 = vmax.f32 %v12873_v28, 0.0  ;;  %v12874_v62 = vadd.f32 %v22872_v48, %v12769_v35 }
 0xab4   : > { %v22985_v54 = vadd.f32 %v12907_v8, %v22409_v17  ;;  %v12908_v10 = vmax.f32 %v12876_v50, 0.0 }
 0xab5   : > { %v22988_v63 = vadd.f32 %v12905_v0, %v22412_v7  ;;  %v12906_v20 = vmax.f32 %v12874_v62, 0.0 }
 0xab6   : > { %v22991_v52 = vadd.f32 %v12908_v10, %v22415_v58  ;;  %v12960_v43 = vpack.c.bf16 %v12908_v10, %v12907_v8 }
 0xab7   : > { %v22994_v33 = vadd.f32 %v12906_v20, %v22418_v44  ;;  %v12959_v12 = vpack.c.bf16 %v12906_v20, %v12905_v0  ;;  %v18235_v24 = vpop.f32.mrb[88].mxu1  ;;  %v13974_v58 = vld [vmem:[#allocation2 + $0x260] sm:$0xff] }
 0xab8   : > { %12976 = vst.msk [vmem:[#allocation2 + $0x290] sm:$0xff] %vm172_vm1, %v12960_v43  ;;  %v12879_v51 = vadd.f32 %v18235_v24, %v22872_v48  ;;  %v12782_v17 = vpop.f32.mrb[89].mxu1  ;;  %v13973_v46 = vld [vmem:[#allocation2 + $0x248] sm:$0xff] }
 0xab9   : > { %12975 = vst.msk [vmem:[#allocation2 + $0x278] sm:$0xff] %vm172_vm1, %v12959_v12  ;;  %v12877_v7 = vadd.f32 %v22872_v48, %v12782_v17  ;;  %v18236_v57 = vpop.f32.mrb[90].mxu1  ;;  %18395 = vmatprep.mubr.msk.bf16.mxu0 %vm172_vm1, %v13973_v46 }
 0xaba   : > { %v12911_v60 = vmax.f32 %v12879_v51, 0.0  ;;  %v12880_v44 = vadd.f32 %v18236_v57, %v22872_v48  ;;  %v12785_v5 = vpop.f32.mrb[91].mxu1  ;;  %18396 = vmatmul.mubr.msk.bf16.gmra.mrb[80].mxu0 %vm172_vm1, %v13974_v58 }
 0xabb   : > { %v12909_v1 = vmax.f32 %v12877_v7, 0.0  ;;  %v12878_v37 = vadd.f32 %v22872_v48, %v12785_v5  ;;  %v16212_v5 = vld [vmem:[%s23262_s1 + $0x56] sm:$0x3] }
 0xabc   : > { %v23005_v18 = vadd.f32 %v12911_v60, %v22438_v36  ;;  %v12912_v15 = vmax.f32 %v12880_v44, 0.0  ;;  %v14229_v44 = vld [vmem:[#allocation2 + $0x1c0] sm:$0xff] }
 0xabd   : > { %v23008_v22 = vadd.f32 %v12909_v1, %v22443_v29  ;;  %v12910_v13 = vmax.f32 %v12878_v37, 0.0  ;;  %v14231_v37 = vld [vmem:[#allocation2 + $0x1f0] sm:$0xff] }
 0xabe   : > { %v23011_v26 = vadd.f32 %v12912_v15, %v22446_v9  ;;  %v12962_v49 = vpack.c.bf16 %v12912_v15, %v12911_v60  ;;  %v14556_v60 = vsel %vm628_vm0, %v22917_v55, 0  ;;  %v14232_v15 = vld [vmem:[#allocation2 + $0x208] sm:$0xff]  ;;  %v14233_v55 = vld [vmem:[#allocation2 + $0x220] sm:$0xff] }
 0xabf   : > { %v23014_v28 = vadd.f32 %v12910_v13, %v22449_v53  ;;  %v12961_v6 = vpack.c.bf16 %v12910_v13, %v12909_v1  ;;  %v18239_v30 = vpop.f32.mrb[92].mxu1  ;;  %v13976_v9 = vld [vmem:[#allocation2 + $0x290] sm:$0xff]  ;;  %v14230_v1 = vld [vmem:[#allocation2 + $0x1d8] sm:$0xff] }
 0xac0   : > { %12978 = vst.msk [vmem:[#allocation2 + $0x2c0] sm:$0xff] %vm172_vm1, %v12962_v49  ;;  %v12883_v8 = vadd.f32 %v18239_v30, %v22872_v48  ;;  %v12798_v36 = vpop.f32.mrb[93].mxu1  ;;  %v13975_v50 = vld [vmem:[#allocation2 + $0x278] sm:$0xff]  ;;  %v14235_v49 = vld [vmem:[#allocation2 + $0x250] sm:$0xff]  ;;  %v14237_v30 = vld [vmem:[#allocation2 + $0x280] sm:$0xff] }
 0xac1   : > { %12977 = vst.msk [vmem:[#allocation2 + $0x2a8] sm:$0xff] %vm172_vm1, %v12961_v6  ;;  %v12881_v29 = vadd.f32 %v22872_v48, %v12798_v36  ;;  %v18240_v35 = vpop.f32.mrb[94].mxu1  ;;  %18399 = vmatprep.mubr.msk.bf16.mxu0 %vm172_vm1, %v13975_v50  ;;  %v14234_v13 = vld [vmem:[#allocation2 + $0x238] sm:$0xff]  ;;  %v14236_v6 = vld [vmem:[#allocation2 + $0x268] sm:$0xff]  ;;  %v14239_v36 = vld [vmem:[#allocation2 + $0x2b0] sm:$0xff] }
 0xac2   : > { %v12915_v0 = vmax.f32 %v12883_v8, 0.0  ;;  %v12884_v53 = vadd.f32 %v18240_v35, %v22872_v48  ;;  %v12801_v62 = vpop.f32.mrb[95].mxu1  ;;  %18400 = vmatmul.mubr.msk.bf16.gmra.mrb[84].mxu0 %vm172_vm1, %v13976_v9  ;;  %v14238_v8 = vld [vmem:[#allocation2 + $0x298] sm:$0xff]  ;;  %v14240_v50 = vld [vmem:[#allocation2 + $0x2c8] sm:$0xff]  ;;  %v14489_v9 = vld [vmem:[#allocation2 + $0x300] sm:$0xff] }
 0xac3   : > { %v12913_v10 = vmax.f32 %v12881_v29, 0.0  ;;  %v12882_v20 = vadd.f32 %v22872_v48, %v12801_v62  ;;  %v14227_v48 = vld [vmem:[#allocation2 + $0x190] sm:$0xff]  ;;  %v14241_v29 = vld [vmem:[#allocation2 + $0x2e0] sm:$0xff]  ;;  %v14242_v35 = vld [vmem:[#allocation2 + $0x2f8] sm:$0xff] }
 0xac4   : > { %v23025_v43 = vadd.f32 %v12915_v0, %v22462_v31  ;;  %v12916_v12 = vmax.f32 %v12884_v53, 0.0  ;;  %v14818_v53 = vsel %vm628_vm0, %v16212_v5, 0  ;;  %v14491_v62 = vld [vmem:[#allocation2 + $0x330] sm:$0xff] }
 0xac5   : > { %v23028_v24 = vadd.f32 %v12913_v10, %v22465_v39  ;;  %v12914_v51 = vmax.f32 %v12882_v20, 0.0  ;;  %v14492_v20 = vld [vmem:[#allocation2 + $0x348] sm:$0xff] }
 0xac6   : > { %v23031_v17 = vadd.f32 %v12916_v12, %v22468_v11  ;;  %v12964_v46 = vpack.c.bf16 %v12916_v12, %v12915_v0  ;;  %v14490_v0 = vld [vmem:[#allocation2 + $0x318] sm:$0xff]  ;;  %v14493_v12 = vld [vmem:[#allocation2 + $0x360] sm:$0xff] }
 0xac7   : > { %v23034_v7 = vadd.f32 %v12914_v51, %v22471_v47  ;;  %v12963_v57 = vpack.c.bf16 %v12914_v51, %v12913_v10  ;;  %v13978_v31 = vld [vmem:[#allocation2 + $0x2c0] sm:$0xff]  ;;  %v14228_v47 = vld [vmem:[#allocation2 + $0x1a8] sm:$0xff]  ;;  %v16229_v10 = vld [vmem:[%s23262_s1 + $0x58] sm:$0x3] }
 0xac8   : > { %12980 = vst.msk [vmem:[#allocation2 + $0x2f0] sm:$0xff] %vm172_vm1, %v12964_v46  ;;  %v13977_v58 = vld [vmem:[#allocation2 + $0x2a8] sm:$0xff]  ;;  %v14494_v51 = vld [vmem:[#allocation2 + $0x378] sm:$0xff]  ;;  %v14495_v46 = vld [vmem:[#allocation2 + $0x390] sm:$0xff] }
 0xac9   : > { %12979 = vst.msk [vmem:[#allocation2 + $0x2d8] sm:$0xff] %vm172_vm1, %v12963_v57  ;;  %18403 = vmatprep.mubr.msk.bf16.mxu0 %vm172_vm1, %v13977_v58  ;;  %v14496_v57 = vld [vmem:[#allocation2 + $0x3a8] sm:$0xff]  ;;  %v14497_v58 = vld [vmem:[#allocation2 + $0x3c0] sm:$0xff] }
 0xaca   : > { %18404 = vmatmul.mubr.msk.bf16.gmra.mrb[88].mxu0 %vm172_vm1, %v13978_v31  ;;  %v14498_v31 = vld [vmem:[#allocation2 + $0x3d8] sm:$0xff] }
 0xacf   : > { %v13980_v11 = vld [vmem:[#allocation2 + $0x2f0] sm:$0xff] }
 0xad0   : > { %v13979_v39 = vld [vmem:[#allocation2 + $0x2d8] sm:$0xff] }
 0xad1   : > { %18407 = vmatprep.mubr.msk.bf16.mxu0 %vm172_vm1, %v13979_v39  ;;  %v14499_v39 = vld [vmem:[#allocation2 + $0x3f0] sm:$0xff] }
 0xad2   : > { %18408 = vmatmul.mubr.msk.bf16.gmra.mrb[92].mxu0 %vm172_vm1, %v13980_v11  ;;  %v14501_v11 = vld [vmem:[#allocation2 + $0x420] sm:$0xff] }
 0xad3   : > { %18413 = vmatprep.mubr.msk.bf16.mxu0 %vm172_vm1, %v14227_v48  ;;  %v14500_v48 = vld [vmem:[#allocation2 + $0x408] sm:$0xff] }
 0xada   : > { %18414 = vmatmul.mubr.msk.bf16.vlgmr.msra.gmra.mrb[64].mxu0 %vm172_vm1, %v14228_v47  ;;  %v14502_v47 = vld [vmem:[#allocation2 + $0x438] sm:$0xff] }
 0xadb   : > { %18446 = vmatpush3.bf16.msra.mxu0 %v14556_v60  ;;  %18417 = vmatprep.mubr.msk.bf16.mxu0 %vm172_vm1, %v14229_v44  ;;  %v14503_v60 = vld [vmem:[#allocation2 + $0x450] sm:$0xff]  ;;  %v14504_v44 = vld [vmem:[#allocation2 + $0x468] sm:$0xff] }
 0xadc   : > { %19873 = vmatprep.subr.msk.bf16.mxu0 %vm628_vm0, %v16212_v5  ;;  %v14751_v5 = vld [vmem:[#allocation2 + $0x308] sm:$0xff] }
 0xae2   : > { %18418 = vmatmul.mubr.msk.bf16.gmra.mrb[68].mxu0 %vm172_vm1, %v14230_v1  ;;  %v14752_v1 = vld [vmem:[#allocation2 + $0x320] sm:$0xff] }
 0xae3   : > { %18421 = vmatprep.mubr.msk.bf16.mxu0 %vm172_vm1, %v14231_v37  ;;  %v15080_v37 = vsel %vm628_vm0, %v16229_v10, 0 }
 0xaea   : > { %18422 = vmatmul.mubr.msk.bf16.gmra.mrb[72].mxu0 %vm172_vm1, %v14232_v15  ;;  %v14753_v15 = vld [vmem:[#allocation2 + $0x338] sm:$0xff] }
 0xaeb   : > { %18425 = vmatprep.mubr.msk.bf16.mxu0 %vm172_vm1, %v14233_v55  ;;  %v14754_v55 = vld [vmem:[#allocation2 + $0x350] sm:$0xff] }
 0xaf2   : > { %18426 = vmatmul.mubr.msk.bf16.gmra.mrb[76].mxu0 %vm172_vm1, %v14234_v13  ;;  %v14755_v13 = vld [vmem:[#allocation2 + $0x368] sm:$0xff] }
 0xaf3   : > { %18429 = vmatprep.mubr.msk.bf16.mxu0 %vm172_vm1, %v14235_v49  ;;  %v14756_v49 = vld [vmem:[#allocation2 + $0x380] sm:$0xff] }
 0xafa   : > { %18430 = vmatmul.mubr.msk.bf16.gmra.mrb[80].mxu0 %vm172_vm1, %v14236_v6  ;;  %v14757_v6 = vld [vmem:[#allocation2 + $0x398] sm:$0xff] }
 0xafb   : > { %18433 = vmatprep.mubr.msk.bf16.mxu0 %vm172_vm1, %v14237_v30  ;;  %v14758_v30 = vld [vmem:[#allocation2 + $0x3b0] sm:$0xff] }
 0xb02   : > { %18434 = vmatmul.mubr.msk.bf16.gmra.mrb[84].mxu0 %vm172_vm1, %v14238_v8  ;;  %v14759_v8 = vld [vmem:[#allocation2 + $0x3c8] sm:$0xff] }
 0xb03   : > { %18437 = vmatprep.mubr.msk.bf16.mxu0 %vm172_vm1, %v14239_v36  ;;  %v14760_v36 = vld [vmem:[#allocation2 + $0x3e0] sm:$0xff] }
 0xb0a   : > { %18438 = vmatmul.mubr.msk.bf16.gmra.mrb[88].mxu0 %vm172_vm1, %v14240_v50  ;;  %v14761_v50 = vld [vmem:[#allocation2 + $0x3f8] sm:$0xff] }
 0xb0b   : > { %18441 = vmatprep.mubr.msk.bf16.mxu0 %vm172_vm1, %v14241_v29  ;;  %v14762_v29 = vld [vmem:[#allocation2 + $0x410] sm:$0xff] }
 0xb12   : > { %18442 = vmatmul.mubr.msk.bf16.gmra.mrb[92].mxu0 %vm172_vm1, %v14242_v35  ;;  %v14763_v35 = vld [vmem:[#allocation2 + $0x428] sm:$0xff] }
 0xb13   : > { %18447 = vmatprep.mubr.msk.bf16.mxu0 %vm172_vm1, %v14489_v9  ;;  %v14764_v9 = vld [vmem:[#allocation2 + $0x440] sm:$0xff] }
 0xb1a   : > { %18448 = vmatmul.mubr.msk.bf16.vlgmr.msra.gmra.mrb[64].mxu0 %vm172_vm1, %v14490_v0  ;;  %v14765_v0 = vld [vmem:[#allocation2 + $0x458] sm:$0xff] }
 0xb1b   : > { %18480 = vmatpush3.bf16.msra.mxu0 %v14818_v53  ;;  %18451 = vmatprep.mubr.msk.bf16.mxu0 %vm172_vm1, %v14491_v62  ;;  %v14766_v53 = vld [vmem:[#allocation2 + $0x470] sm:$0xff] }
 0xb1c   : > { %19874 = vmatprep.subr.msk.bf16.mxu0 %vm628_vm0, %v16229_v10  ;;  %v15013_v62 = vld [vmem:[#allocation2 + $0x310] sm:$0xff]  ;;  %v15014_v10 = vld [vmem:[#allocation2 + $0x328] sm:$0xff] }
 0xb22   : > { %18452 = vmatmul.mubr.msk.bf16.gmra.mrb[68].mxu0 %vm172_vm1, %v14492_v20  ;;  %v15015_v20 = vld [vmem:[#allocation2 + $0x340] sm:$0xff] }
 0xb23   : > { %18455 = vmatprep.mubr.msk.bf16.mxu0 %vm172_vm1, %v14493_v12  ;;  %v15016_v12 = vld [vmem:[#allocation2 + $0x358] sm:$0xff] }
 0xb2a   : > { %18456 = vmatmul.mubr.msk.bf16.gmra.mrb[72].mxu0 %vm172_vm1, %v14494_v51  ;;  %v15017_v51 = vld [vmem:[#allocation2 + $0x370] sm:$0xff] }
 0xb2b   : > { %18459 = vmatprep.mubr.msk.bf16.mxu0 %vm172_vm1, %v14495_v46  ;;  %v15018_v46 = vld [vmem:[#allocation2 + $0x388] sm:$0xff] }
 0xb32   : > { %18460 = vmatmul.mubr.msk.bf16.gmra.mrb[76].mxu0 %vm172_vm1, %v14496_v57  ;;  %v15019_v57 = vld [vmem:[#allocation2 + $0x3a0] sm:$0xff] }
 0xb33   : > { %18463 = vmatprep.mubr.msk.bf16.mxu0 %vm172_vm1, %v14497_v58  ;;  %v15020_v58 = vld [vmem:[#allocation2 + $0x3b8] sm:$0xff] }
 0xb3a   : > { %18464 = vmatmul.mubr.msk.bf16.gmra.mrb[80].mxu0 %vm172_vm1, %v14498_v31  ;;  %v15021_v31 = vld [vmem:[#allocation2 + $0x3d0] sm:$0xff] }
 0xb3b   : > { %18467 = vmatprep.mubr.msk.bf16.mxu0 %vm172_vm1, %v14499_v39  ;;  %v15022_v39 = vld [vmem:[#allocation2 + $0x3e8] sm:$0xff] }
 0xb42   : > { %18468 = vmatmul.mubr.msk.bf16.gmra.mrb[84].mxu0 %vm172_vm1, %v14500_v48  ;;  %v15023_v48 = vld [vmem:[#allocation2 + $0x400] sm:$0xff] }
 0xb43   : > { %18471 = vmatprep.mubr.msk.bf16.mxu0 %vm172_vm1, %v14501_v11  ;;  %v15024_v11 = vld [vmem:[#allocation2 + $0x418] sm:$0xff] }
 0xb4a   : > { %18472 = vmatmul.mubr.msk.bf16.gmra.mrb[88].mxu0 %vm172_vm1, %v14502_v47  ;;  %v15025_v47 = vld [vmem:[#allocation2 + $0x430] sm:$0xff] }
 0xb4b   : > { %18475 = vmatprep.mubr.msk.bf16.mxu0 %vm172_vm1, %v14503_v60  ;;  %v15026_v60 = vld [vmem:[#allocation2 + $0x448] sm:$0xff] }
 0xb52   : > { %18476 = vmatmul.mubr.msk.bf16.gmra.mrb[92].mxu0 %vm172_vm1, %v14504_v44  ;;  %v15027_v44 = vld [vmem:[#allocation2 + $0x460] sm:$0xff] }
 0xb53   : > { %18481 = vmatprep.mubr.msk.bf16.mxu0 %vm172_vm1, %v14751_v5  ;;  %v15028_v5 = vld [vmem:[#allocation2 + $0x478] sm:$0xff] }
 0xb5a   : > { %18482 = vmatmul.mubr.msk.bf16.vlgmr.msra.gmra.mrb[64].mxu0 %vm172_vm1, %v14752_v1  ;;  %v23121_v1 = vld [vmem:[%s23263_s2 + $0x4] ss:$0 sm:$0xff] }
 0xb5b   : > { %18514 = vmatpush3.bf16.msra.mxu0 %v15080_v37  ;;  %18485 = vmatprep.mubr.msk.bf16.mxu0 %vm172_vm1, %v14753_v15 }
 0xb62   : > { %18486 = vmatmul.mubr.msk.bf16.gmra.mrb[68].mxu0 %vm172_vm1, %v14754_v55 }
 0xb63   : > { %18489 = vmatprep.mubr.msk.bf16.mxu0 %vm172_vm1, %v14755_v13 }
 0xb6a   : > { %18490 = vmatmul.mubr.msk.bf16.gmra.mrb[72].mxu0 %vm172_vm1, %v14756_v49 }
 0xb6b   : > { %18493 = vmatprep.mubr.msk.bf16.mxu0 %vm172_vm1, %v14757_v6 }
 0xb72   : > { %18494 = vmatmul.mubr.msk.bf16.gmra.mrb[76].mxu0 %vm172_vm1, %v14758_v30 }
 0xb73   : > { %18497 = vmatprep.mubr.msk.bf16.mxu0 %vm172_vm1, %v14759_v8 }
 0xb7a   : > { %18498 = vmatmul.mubr.msk.bf16.gmra.mrb[80].mxu0 %vm172_vm1, %v14760_v36 }
 0xb7b   : > { %18501 = vmatprep.mubr.msk.bf16.mxu0 %vm172_vm1, %v14761_v50 }
 0xb82   : > { %18502 = vmatmul.mubr.msk.bf16.gmra.mrb[84].mxu0 %vm172_vm1, %v14762_v29 }
 0xb83   : > { %18505 = vmatprep.mubr.msk.bf16.mxu0 %vm172_vm1, %v14763_v35 }
 0xb8a   : > { %18506 = vmatmul.mubr.msk.bf16.gmra.mrb[88].mxu0 %vm172_vm1, %v14764_v9 }
 0xb8b   : > { %18509 = vmatprep.mubr.msk.bf16.mxu0 %vm172_vm1, %v14765_v0 }
 0xb92   : > { %18510 = vmatmul.mubr.msk.bf16.gmra.mrb[92].mxu0 %vm172_vm1, %v14766_v53 }
 0xb93   : > { %18515 = vmatprep.mubr.msk.bf16.mxu0 %vm172_vm1, %v15013_v62 }
 0xb9a   : > { %18516 = vmatmul.mubr.msk.bf16.vlgmr.msra.gmra.mrb[64].mxu0 %vm172_vm1, %v15014_v10 }
 0xb9b   : > { %18519 = vmatprep.mubr.msk.bf16.mxu0 %vm172_vm1, %v15015_v20 }
 0xba2   : > { %18520 = vmatmul.mubr.msk.bf16.gmra.mrb[68].mxu0 %vm172_vm1, %v15016_v12 }
 0xba3   : > { %18523 = vmatprep.mubr.msk.bf16.mxu0 %vm172_vm1, %v15017_v51 }
 0xbaa   : > { %18524 = vmatmul.mubr.msk.bf16.gmra.mrb[72].mxu0 %vm172_vm1, %v15018_v46 }
 0xbab   : > { %18527 = vmatprep.mubr.msk.bf16.mxu0 %vm172_vm1, %v15019_v57 }
 0xbb2   : > { %18528 = vmatmul.mubr.msk.bf16.gmra.mrb[76].mxu0 %vm172_vm1, %v15020_v58 }
 0xbb3   : > { %18531 = vmatprep.mubr.msk.bf16.mxu0 %vm172_vm1, %v15021_v31 }
 0xbba   : > { %18532 = vmatmul.mubr.msk.bf16.gmra.mrb[80].mxu0 %vm172_vm1, %v15022_v39 }
 0xbbb   : > { %18535 = vmatprep.mubr.msk.bf16.mxu0 %vm172_vm1, %v15023_v48 }
 0xbc2   : > { %18536 = vmatmul.mubr.msk.bf16.gmra.mrb[84].mxu0 %vm172_vm1, %v15024_v11 }
 0xbc3   : > { %18539 = vmatprep.mubr.msk.bf16.mxu0 %vm172_vm1, %v15025_v47 }
 0xbca   : > { %18540 = vmatmul.mubr.msk.bf16.gmra.mrb[88].mxu0 %vm172_vm1, %v15026_v60 }
 0xbcb   : > { %18543 = vmatprep.mubr.msk.bf16.mxu0 %vm172_vm1, %v15027_v44 }
 0xbd2   : > { %18544 = vmatmul.mubr.msk.bf16.gmra.mrb[92].mxu0 %vm172_vm1, %v15028_v5 }
 0xc6d   : > { %v18517_v37 = vpop.f32.mrb[64].mxu0 }
 0xc6e   : > { %v15285_v15 = vadd.f32 %v18517_v37, %v23121_v1  ;;  %v15116_v55 = vpop.f32.mrb[65].mxu0 }
 0xc6f   : > { %v15283_v13 = vadd.f32 %v23121_v1, %v15116_v55  ;;  %v18518_v49 = vpop.f32.mrb[66].mxu0 }
 0xc70   : > { %v15317_v6 = vmax.f32 %v15285_v15, 0.0  ;;  %v15286_v30 = vadd.f32 %v18518_v49, %v23121_v1  ;;  %v15119_v8 = vpop.f32.mrb[67].mxu0 }
 0xc71   : > { %v15315_v36 = vmax.f32 %v15283_v13, 0.0  ;;  %v15284_v50 = vadd.f32 %v23121_v1, %v15119_v8 }
 0xc72   : > { %v15349_v29 = vadd.f32 %v15317_v6, %v22879_v23  ;;  %v15318_v35 = vmax.f32 %v15286_v30, 0.0 }
 0xc73   : > { %v15347_v9 = vadd.f32 %v15315_v36, %v22882_v59  ;;  %v15316_v0 = vmax.f32 %v15284_v50, 0.0 }
 0xc74   : > { %15381 = vst.msk [vmem:[%s23131_s28 + $0x10] sm:$0xff] %vm172_vm1, %v15349_v29  ;;  %v15350_v53 = vadd.f32 %v15318_v35, %v22885_v2 }
 0xc75   : > { %15379 = vst.msk [vmem:[%s23131_s28] sm:$0xff] %vm172_vm1, %v15347_v9  ;;  %v15348_v62 = vadd.f32 %v15316_v0, %v22888_v4  ;;  %v18521_v10 = vpop.f32.mrb[68].mxu0 }
 0xc76   : > { %15382 = vst.msk [vmem:[%s23131_s28 + $0x18] sm:$0xff] %vm172_vm1, %v15350_v53  ;;  %v15289_v20 = vadd.f32 %v18521_v10, %v23121_v1  ;;  %v15132_v23 = vpop.f32.mrb[69].mxu0 }
 0xc77   : > { %15380 = vst.msk [vmem:[%s23131_s28 + $0x8] sm:$0xff] %vm172_vm1, %v15348_v62  ;;  %v15287_v59 = vadd.f32 %v23121_v1, %v15132_v23  ;;  %v18522_v12 = vpop.f32.mrb[70].mxu0 }
 0xc78   : > { %v15321_v51 = vmax.f32 %v15289_v20, 0.0  ;;  %v15290_v2 = vadd.f32 %v18522_v12, %v23121_v1  ;;  %v15135_v46 = vpop.f32.mrb[71].mxu0 }
 0xc79   : > { %v15319_v4 = vmax.f32 %v15287_v59, 0.0  ;;  %v15288_v57 = vadd.f32 %v23121_v1, %v15135_v46 }
 0xc7a   : > { %v15353_v58 = vadd.f32 %v15321_v51, %v22897_v16  ;;  %v15322_v31 = vmax.f32 %v15290_v2, 0.0 }
 0xc7b   : > { %v15351_v39 = vadd.f32 %v15319_v4, %v22900_v38  ;;  %v15320_v48 = vmax.f32 %v15288_v57, 0.0 }
 0xc7c   : > { %15385 = vst.msk [vmem:[%s23131_s28 + $0x30] sm:$0xff] %vm172_vm1, %v15353_v58  ;;  %v15354_v11 = vadd.f32 %v15322_v31, %v22903_v34 }
 0xc7d   : > { %15383 = vst.msk [vmem:[%s23131_s28 + $0x20] sm:$0xff] %vm172_vm1, %v15351_v39  ;;  %v15352_v47 = vadd.f32 %v15320_v48, %v22906_v27  ;;  %v18525_v60 = vpop.f32.mrb[72].mxu0 }
 0xc7e   : > { %15386 = vst.msk [vmem:[%s23131_s28 + $0x38] sm:$0xff] %vm172_vm1, %v15354_v11  ;;  %v15293_v44 = vadd.f32 %v18525_v60, %v23121_v1  ;;  %v15148_v16 = vpop.f32.mrb[73].mxu0 }
 0xc7f   : > { %15384 = vst.msk [vmem:[%s23131_s28 + $0x28] sm:$0xff] %vm172_vm1, %v15352_v47  ;;  %v15291_v38 = vadd.f32 %v23121_v1, %v15148_v16  ;;  %v18526_v5 = vpop.f32.mrb[74].mxu0 }
 0xc80   : > { %v15325_v37 = vmax.f32 %v15293_v44, 0.0  ;;  %v15294_v34 = vadd.f32 %v18526_v5, %v23121_v1  ;;  %v15151_v15 = vpop.f32.mrb[75].mxu0 }
 0xc81   : > { %v15323_v27 = vmax.f32 %v15291_v38, 0.0  ;;  %v15292_v55 = vadd.f32 %v23121_v1, %v15151_v15 }
 0xc82   : > { %v15357_v13 = vadd.f32 %v15325_v37, %v22923_v32  ;;  %v15326_v49 = vmax.f32 %v15294_v34, 0.0 }
 0xc83   : > { %v15355_v6 = vadd.f32 %v15323_v27, %v22928_v14  ;;  %v15324_v30 = vmax.f32 %v15292_v55, 0.0 }
 0xc84   : > { %15389 = vst.msk [vmem:[%s23131_s28 + $0x50] sm:$0xff] %vm172_vm1, %v15357_v13  ;;  %v15358_v8 = vadd.f32 %v15326_v49, %v22931_v42 }
 0xc85   : > { %15387 = vst.msk [vmem:[%s23131_s28 + $0x40] sm:$0xff] %vm172_vm1, %v15355_v6  ;;  %v15356_v36 = vadd.f32 %v15324_v30, %v22934_v21  ;;  %v18529_v50 = vpop.f32.mrb[76].mxu0 }
 0xc86   : > { %15390 = vst.msk [vmem:[%s23131_s28 + $0x58] sm:$0xff] %vm172_vm1, %v15358_v8  ;;  %v15297_v29 = vadd.f32 %v18529_v50, %v23121_v1  ;;  %v15164_v32 = vpop.f32.mrb[77].mxu0 }
 0xc87   : > { %15388 = vst.msk [vmem:[%s23131_s28 + $0x48] sm:$0xff] %vm172_vm1, %v15356_v36  ;;  %v15295_v14 = vadd.f32 %v23121_v1, %v15164_v32  ;;  %v18530_v35 = vpop.f32.mrb[78].mxu0 }
 0xc88   : > { %v15329_v9 = vmax.f32 %v15297_v29, 0.0  ;;  %v15298_v42 = vadd.f32 %v18530_v35, %v23121_v1  ;;  %v15167_v0 = vpop.f32.mrb[79].mxu0 }
 0xc89   : > { %v15327_v21 = vmax.f32 %v15295_v14, 0.0  ;;  %v15296_v53 = vadd.f32 %v23121_v1, %v15167_v0 }
 0xc8a   : > { %v15361_v62 = vadd.f32 %v15329_v9, %v22945_v41  ;;  %v15330_v10 = vmax.f32 %v15298_v42, 0.0 }
 0xc8b   : > { %v15359_v20 = vadd.f32 %v15327_v21, %v22948_v25  ;;  %v15328_v23 = vmax.f32 %v15296_v53, 0.0 }
 0xc8c   : > { %15393 = vst.msk [vmem:[%s23131_s28 + $0x70] sm:$0xff] %vm172_vm1, %v15361_v62  ;;  %v15362_v59 = vadd.f32 %v15330_v10, %v22951_v40 }
 0xc8d   : > { %15391 = vst.msk [vmem:[%s23131_s28 + $0x60] sm:$0xff] %vm172_vm1, %v15359_v20  ;;  %v15360_v12 = vadd.f32 %v15328_v23, %v22954_v61  ;;  %v18533_v51 = vpop.f32.mrb[80].mxu0 }
 0xc8e   : > { %15394 = vst.msk [vmem:[%s23131_s28 + $0x78] sm:$0xff] %vm172_vm1, %v15362_v59  ;;  %v15301_v2 = vadd.f32 %v18533_v51, %v23121_v1  ;;  %v15180_v41 = vpop.f32.mrb[81].mxu0 }
 0xc8f   : > { %15392 = vst.msk [vmem:[%s23131_s28 + $0x68] sm:$0xff] %vm172_vm1, %v15360_v12  ;;  %v15299_v25 = vadd.f32 %v23121_v1, %v15180_v41  ;;  %v18534_v46 = vpop.f32.mrb[82].mxu0 }
 0xc90   : > { %v15333_v4 = vmax.f32 %v15301_v2, 0.0  ;;  %v15302_v40 = vadd.f32 %v18534_v46, %v23121_v1  ;;  %v15183_v57 = vpop.f32.mrb[83].mxu0 }
 0xc91   : > { %v15331_v61 = vmax.f32 %v15299_v25, 0.0  ;;  %v15300_v58 = vadd.f32 %v23121_v1, %v15183_v57 }
 0xc92   : > { %v15365_v31 = vadd.f32 %v15333_v4, %v22965_v19  ;;  %v15334_v39 = vmax.f32 %v15302_v40, 0.0 }
 0xc93   : > { %v15363_v48 = vadd.f32 %v15331_v61, %v22968_v3  ;;  %v15332_v11 = vmax.f32 %v15300_v58, 0.0 }
 0xc94   : > { %15397 = vst.msk [vmem:[%s23131_s28 + $0x90] sm:$0xff] %vm172_vm1, %v15365_v31  ;;  %v15366_v47 = vadd.f32 %v15334_v39, %v22971_v56 }
 0xc95   : > { %15395 = vst.msk [vmem:[%s23131_s28 + $0x80] sm:$0xff] %vm172_vm1, %v15363_v48  ;;  %v15364_v60 = vadd.f32 %v15332_v11, %v22974_v45  ;;  %v18537_v44 = vpop.f32.mrb[84].mxu0 }
 0xc96   : > { %15398 = vst.msk [vmem:[%s23131_s28 + $0x98] sm:$0xff] %vm172_vm1, %v15366_v47  ;;  %v15305_v16 = vadd.f32 %v18537_v44, %v23121_v1  ;;  %v15196_v19 = vpop.f32.mrb[85].mxu0 }
 0xc97   : > { %15396 = vst.msk [vmem:[%s23131_s28 + $0x88] sm:$0xff] %vm172_vm1, %v15364_v60  ;;  %v15303_v3 = vadd.f32 %v23121_v1, %v15196_v19  ;;  %v18538_v38 = vpop.f32.mrb[86].mxu0 }
 0xc98   : > { %v15337_v5 = vmax.f32 %v15305_v16, 0.0  ;;  %v15306_v56 = vadd.f32 %v18538_v38, %v23121_v1  ;;  %v15199_v37 = vpop.f32.mrb[87].mxu0 }
 0xc99   : > { %v15335_v45 = vmax.f32 %v15303_v3, 0.0  ;;  %v15304_v34 = vadd.f32 %v23121_v1, %v15199_v37 }
 0xc9a   : > { %v15369_v15 = vadd.f32 %v15337_v5, %v22985_v54  ;;  %v15338_v27 = vmax.f32 %v15306_v56, 0.0 }
 0xc9b   : > { %v15367_v55 = vadd.f32 %v15335_v45, %v22988_v63  ;;  %v15336_v13 = vmax.f32 %v15304_v34, 0.0 }
 0xc9c   : > { %15401 = vst.msk [vmem:[%s23131_s28 + $0xb0] sm:$0xff] %vm172_vm1, %v15369_v15  ;;  %v15370_v49 = vadd.f32 %v15338_v27, %v22991_v52 }
 0xc9d   : > { %15399 = vst.msk [vmem:[%s23131_s28 + $0xa0] sm:$0xff] %vm172_vm1, %v15367_v55  ;;  %v15368_v6 = vadd.f32 %v15336_v13, %v22994_v33  ;;  %v18541_v30 = vpop.f32.mrb[88].mxu0 }
 0xc9e   : > { %15402 = vst.msk [vmem:[%s23131_s28 + $0xb8] sm:$0xff] %vm172_vm1, %v15370_v49  ;;  %v15309_v8 = vadd.f32 %v18541_v30, %v23121_v1  ;;  %v15212_v54 = vpop.f32.mrb[89].mxu0 }
 0xc9f   : > { %15400 = vst.msk [vmem:[%s23131_s28 + $0xa8] sm:$0xff] %vm172_vm1, %v15368_v6  ;;  %v15307_v63 = vadd.f32 %v23121_v1, %v15212_v54  ;;  %v18542_v36 = vpop.f32.mrb[90].mxu0 }
 0xca0   : > { %v15341_v50 = vmax.f32 %v15309_v8, 0.0  ;;  %v15310_v52 = vadd.f32 %v18542_v36, %v23121_v1  ;;  %v15215_v29 = vpop.f32.mrb[91].mxu0 }
 0xca1   : > { %v15339_v33 = vmax.f32 %v15307_v63, 0.0  ;;  %v15308_v32 = vadd.f32 %v23121_v1, %v15215_v29 }
 0xca2   : > { %v15373_v14 = vadd.f32 %v15341_v50, %v23005_v18  ;;  %v15342_v35 = vmax.f32 %v15310_v52, 0.0 }
 0xca3   : > { %v15371_v9 = vadd.f32 %v15339_v33, %v23008_v22  ;;  %v15340_v42 = vmax.f32 %v15308_v32, 0.0 }
 0xca4   : > { %15405 = vst.msk [vmem:[%s23131_s28 + $0xd0] sm:$0xff] %vm172_vm1, %v15373_v14  ;;  %v15374_v0 = vadd.f32 %v15342_v35, %v23011_v26 }
 0xca5   : > { %15403 = vst.msk [vmem:[%s23131_s28 + $0xc0] sm:$0xff] %vm172_vm1, %v15371_v9  ;;  %v15372_v21 = vadd.f32 %v15340_v42, %v23014_v28  ;;  %v18545_v53 = vpop.f32.mrb[92].mxu0 }
 0xca6   : > { %15406 = vst.msk [vmem:[%s23131_s28 + $0xd8] sm:$0xff] %vm172_vm1, %v15374_v0  ;;  %v15313_v62 = vadd.f32 %v18545_v53, %v23121_v1  ;;  %v15228_v18 = vpop.f32.mrb[93].mxu0 }
 0xca7   : > { %15404 = vst.msk [vmem:[%s23131_s28 + $0xc8] sm:$0xff] %vm172_vm1, %v15372_v21  ;;  %v15311_v22 = vadd.f32 %v23121_v1, %v15228_v18  ;;  %v18546_v10 = vpop.f32.mrb[94].mxu0 }
 0xca8   : > { %v15345_v26 = vmax.f32 %v15313_v62, 0.0  ;;  %v15314_v20 = vadd.f32 %v18546_v10, %v23121_v1  ;;  %v15231_v23 = vpop.f32.mrb[95].mxu0 }
 0xca9   : > { %v15343_v28 = vmax.f32 %v15311_v22, 0.0  ;;  %v15312_v59 = vadd.f32 %v23121_v1, %v15231_v23 }
 0xcaa   : > { %v15377_v12 = vadd.f32 %v15345_v26, %v23025_v43  ;;  %v15346_v51 = vmax.f32 %v15314_v20, 0.0 }
 0xcab   : > { %v15375_v2 = vadd.f32 %v15343_v28, %v23028_v24  ;;  %v15344_v41 = vmax.f32 %v15312_v59, 0.0 }
 0xcac   : > { %15409 = vst.msk [vmem:[%s23131_s28 + $0xf0] sm:$0xff] %vm172_vm1, %v15377_v12  ;;  %v15378_v25 = vadd.f32 %v15346_v51, %v23031_v17 }
 0xcad   : > { %15407 = vst.msk [vmem:[%s23131_s28 + $0xe0] sm:$0xff] %vm172_vm1, %v15375_v2  ;;  %v15376_v46 = vadd.f32 %v15344_v41, %v23034_v7 }
 0xcae   : > { %15410 = vst.msk [vmem:[%s23131_s28 + $0xf8] sm:$0xff] %vm172_vm1, %v15378_v25 }
 0xcaf   : > { %15408 = vst.msk [vmem:[%s23131_s28 + $0xe8] sm:$0xff] %vm172_vm1, %v15376_v46 }
 0xcb0 PF: > { %s13_s12 = sadd.s32 1, %s19934_s12  }
 0xcb1   : > { %p10_p4 = scmp.ge.s32.totalorder %s13_s12, 4  }
 0xcb3   :  { %12 = sbr.rel (!%p10_p4) target bundleno = 1 (0x1), region = 120 }

</bundles_post_ra>
